<compile_context>
chip_gen: v6e
topology: v6e:2x2x1
jax: 0.10.0
libtpu: 0.0.40
codegen_flags: <defaults>
</compile_context>

<pallas_src>
import functools

import jax
import jax.numpy as jnp
from jax.experimental import pallas as pl
from jax.experimental.pallas import tpu as pltpu

_KP = 40  # tap rows: [0]=1x1, [1:10]=3x3, [10:35]=5x5, [35:40]=zero pad (sublane multiple of 8)


def fuse_unit_kernel(f1_ref, f2_ref, wl_ref, wr_ref, bproj_ref, wfuse_ref, bfuse_ref,
                     o_ref, tbuf_ref, *, H, W, C):
    HW = H * W

    f1 = f1_ref[...]                                    # (C, HW)  bf16
    f2 = f2_ref[...]                                    # (C, HW)  bf16

    # --- merged 1x1-conv matmuls (bf16 operands, f32 accumulation) -------------------
    # rows [0:C]  of L/R: proj1 partials (F1 / F2 halves of the concat weight)
    # rows [C:2C] of L/R: proj2(F1) / proj3(F2)
    L = jnp.dot(wl_ref[...], f1, preferred_element_type=jnp.float32)    # (2C, HW)
    R = jnp.dot(wr_ref[...], f2, preferred_element_type=jnp.float32)    # (2C, HW)

    fcat = L[:C, :] + R[:C, :] + bproj_ref[0:C, :]
    f1p = L[C:, :] + bproj_ref[C:2 * C, :]
    f2p = R[C:, :] + bproj_ref[2 * C:3 * C, :]

    # --- all fuse-conv channel contractions in one lane-dense matmul -----------------
    taps = jnp.dot(wfuse_ref[...], fcat.astype(jnp.bfloat16),
                   preferred_element_type=jnp.float32)                  # (Kp, HW)

    g1 = jax.nn.sigmoid(taps[0:1, :] + bfuse_ref[0])                    # 1x1 gate, (1, HW)

    # Relayout tap maps to (Kp, H, W): tap index on the leading axis, W on lanes.
    for h in range(H):
        tbuf_ref[:, h, :] = taps[:, h * W:(h + 1) * W]
    t3d = tbuf_ref[...]                                                 # (Kp, H, W)

    # One reflection pad with p=2; the p=1 (3x3) pad is its inner window.
    tp_ = jnp.concatenate([t3d[:, 2:3, :], t3d[:, 1:2, :], t3d,
                           t3d[:, H - 2:H - 1, :], t3d[:, H - 3:H - 2, :]], axis=1)
    tp_ = jnp.concatenate([tp_[:, :, 2:3], tp_[:, :, 1:2], tp_,
                           tp_[:, :, W - 2:W - 1], tp_[:, :, W - 3:W - 2]], axis=2)
    # tp_: (Kp, H + 4, W + 4)

    # fuse3x: taps rows 1..9, window offset (1+i, 1+j) inside the p=2 pad.
    acc3 = tp_[1, 1:1 + H, 1:1 + W]
    for t in range(1, 9):
        i, j = t // 3, t % 3
        acc3 = acc3 + tp_[1 + t, 1 + i:1 + i + H, 1 + j:1 + j + W]

    # fuse5x: taps rows 10..34, window offset (i, j).
    acc5 = tp_[10, 0:H, 0:W]
    for t in range(1, 25):
        i, j = t // 5, t % 5
        acc5 = acc5 + tp_[10 + t, i:i + H, j:j + W]

    # Stacked sigmoid for the 3x3 / 5x5 gates, then flatten back to a (1, HW) lane row.
    g35 = jax.nn.sigmoid(jnp.concatenate(
        [(acc3 + bfuse_ref[1]).reshape(1, H, W),
         (acc5 + bfuse_ref[2]).reshape(1, H, W)], axis=0))              # (2, H, W)
    s35 = g35[0] + g35[1]                                               # (H, W)
    s35_flat = jnp.concatenate([s35[h:h + 1, :] for h in range(H)], axis=1)  # (1, HW)

    # --- gating + blend ----------------------------------------------------------------
    fusion = (g1 + s35_flat) * (1.0 / 3.0)                              # (1, HW)
    w_a = jnp.clip(fusion, 0.0, 1.0)
    w_b = jnp.clip(1.0 - fusion, 0.0, 1.0)
    o_ref[...] = (w_a * f1p + w_b * f2p).astype(o_ref.dtype)            # (C, HW), lane-dense


def fuse_unit_forward(F1, F2, params):
    """F1, F2: (B, C, H, W) NCHW like the PyTorch module.  Returns (B, C, H, W)."""
    B, C, H, W = F1.shape
    HW = H * W

    # NCHW is already channels-first; flattening H*W onto the lane axis is a free reshape.
    x1 = F1.reshape(B, C, HW).astype(jnp.bfloat16)
    x2 = F2.reshape(B, C, HW).astype(jnp.bfloat16)

    w1 = params["proj1_w"][:, :, 0, 0]                       # (C, 2C)  (out, in)
    w2 = params["proj2_w"][:, :, 0, 0]                       # (C, C)
    w3 = params["proj3_w"][:, :, 0, 0]                       # (C, C)
    wl = jnp.concatenate([w1[:, :C], w2], axis=0).astype(jnp.bfloat16)   # (2C, C): acts on F1
    wr = jnp.concatenate([w1[:, C:], w3], axis=0).astype(jnp.bfloat16)   # (2C, C): acts on F2

    bproj = jnp.concatenate(
        [params["proj1_b"], params["proj2_b"], params["proj3_b"]],
        axis=0).astype(jnp.float32).reshape(3 * C, 1)                    # (3C, 1)

    wfuse = jnp.zeros((_KP, C), jnp.float32)
    wfuse = wfuse.at[0].set(params["fuse1x_w"][0, :, 0, 0])
    wfuse = wfuse.at[1:10].set(params["fuse3x_w"][0].reshape(C, 9).T)
    wfuse = wfuse.at[10:35].set(params["fuse5x_w"][0].reshape(C, 25).T)
    wfuse = wfuse.astype(jnp.bfloat16)                                   # (Kp, C)

    bfuse = jnp.concatenate(
        [params["fuse1x_b"], params["fuse3x_b"], params["fuse5x_b"]]).astype(jnp.float32)

    matmul_flops = 2 * (2 * C) * C * HW * 2 + 2 * _KP * C * HW
    flops = int(B * (matmul_flops + 60 * HW + 6 * C * HW))
    bytes_accessed = int(B * HW * C * (2 + 2 + 4) + 2 * 2 * (2 * C) * C + 2 * _KP * C
                         + 4 * (3 * C + 3))

    out = pl.pallas_call(
        functools.partial(fuse_unit_kernel, H=H, W=W, C=C),
        out_shape=jax.ShapeDtypeStruct((B, C, HW), F1.dtype),
        grid_spec=pltpu.PrefetchScalarGridSpec(
            num_scalar_prefetch=0,
            grid=(B,),
            in_specs=[
                pl.BlockSpec((None, C, HW), lambda b: (b, 0, 0)),     # F1  (C, HW) bf16
                pl.BlockSpec((None, C, HW), lambda b: (b, 0, 0)),     # F2  (C, HW) bf16
                pl.BlockSpec((2 * C, C), lambda b: (0, 0)),           # merged proj weights (F1 side)
                pl.BlockSpec((2 * C, C), lambda b: (0, 0)),           # merged proj weights (F2 side)
                pl.BlockSpec((3 * C, 1), lambda b: (0, 0)),           # proj biases (f32)
                pl.BlockSpec((_KP, C), lambda b: (0, 0)),             # fused fuse-conv weights
                pl.BlockSpec(memory_space=pltpu.MemorySpace.SMEM),    # fuse biases (3 scalars)
            ],
            out_specs=pl.BlockSpec((None, C, HW), lambda b: (b, 0, 0)),
            scratch_shapes=[pltpu.VMEM((_KP, H, W), jnp.float32)],    # tap-map relayout buffer
        ),
        compiler_params=pltpu.CompilerParams(
            dimension_semantics=("parallel",),
            vmem_limit_bytes=32 * 1024 * 1024),
        cost_estimate=pl.CostEstimate(flops=flops, transcendentals=3 * B * HW,
                                      bytes_accessed=bytes_accessed),
    )(x1, x2, wl, wr, bproj, wfuse, bfuse)

    return out.reshape(B, C, H, W)


def fuse_unit_reference(F1, F2, params):
    """Pure-JAX reference mirroring the PyTorch FuseUnit.forward exactly (f32)."""
    HIGH = jax.lax.Precision.HIGHEST

    def conv1x1(x, w, b):
        return jnp.einsum("bchw,oc->bohw", x, w[:, :, 0, 0], precision=HIGH) \
            + b[None, :, None, None]

    def conv_reflect(x, w, b, pad):
        if pad:
            x = jnp.pad(x, ((0, 0), (0, 0), (pad, pad), (pad, pad)), mode="reflect")
        y = jax.lax.conv_general_dilated(
            x, w, window_strides=(1, 1), padding="VALID",
            dimension_numbers=("NCHW", "OIHW", "NCHW"), precision=HIGH)
        return y + b[None, :, None, None]

    Fcat = conv1x1(jnp.concatenate([F1, F2], axis=1), params["proj1_w"], params["proj1_b"])
    F1p = conv1x1(F1, params["proj2_w"], params["proj2_b"])
    F2p = conv1x1(F2, params["proj3_w"], params["proj3_b"])

    fusion1 = jax.nn.sigmoid(conv_reflect(Fcat, params["fuse1x_w"], params["fuse1x_b"], 0))
    fusion3 = jax.nn.sigmoid(conv_reflect(Fcat, params["fuse3x_w"], params["fuse3x_b"], 1))
    fusion5 = jax.nn.sigmoid(conv_reflect(Fcat, params["fuse5x_w"], params["fuse5x_b"], 2))
    fusion = (fusion1 + fusion3 + fusion5) / 3.0
    return (jnp.clip(fusion, 0.0, 1.0) * F1p
            + jnp.clip(1.0 - fusion, 0.0, 1.0) * F2p)


if __name__ == "__main__":
    B, C, H, W = 2, 16, 16, 16

    key = jax.random.PRNGKey(0)
    keys = jax.random.split(key, 14)

    F1 = jax.random.normal(keys[0], (B, C, H, W), dtype=jnp.float32)
    F2 = jax.random.normal(keys[1], (B, C, H, W), dtype=jnp.float32)

    def mk(k, shape, scale=0.1):
        return jax.random.normal(k, shape, dtype=jnp.float32) * scale

    params = {
        "proj1_w": mk(keys[2], (C, 2 * C, 1, 1)), "proj1_b": mk(keys[3], (C,)),
        "proj2_w": mk(keys[4], (C, C, 1, 1)),     "proj2_b": mk(keys[5], (C,)),
        "proj3_w": mk(keys[6], (C, C, 1, 1)),     "proj3_b": mk(keys[7], (C,)),
        "fuse1x_w": mk(keys[8], (1, C, 1, 1)),    "fuse1x_b": mk(keys[9], (1,)),
        "fuse3x_w": mk(keys[10], (1, C, 3, 3)),   "fuse3x_b": mk(keys[11], (1,)),
        "fuse5x_w": mk(keys[12], (1, C, 5, 5)),   "fuse5x_b": mk(keys[13], (1,)),
    }

    out = jax.block_until_ready(fuse_unit_forward(F1, F2, params))
    ref = jax.block_until_ready(fuse_unit_reference(F1, F2, params))

    assert out.shape == (B, C, H, W)
    err = jnp.max(jnp.abs(out - ref))
    # bf16 MXU operands loosen the tolerance vs. the pure-f32 reference.
    assert jnp.allclose(out, ref, atol=3e-2, rtol=3e-2), f"max abs err = {err}"

    print("KERNEL_OK")
</pallas_src>

<mosaic_0001>
module attributes {stable_mosaic.version = 11 : i64} {
  func.func @fuse_unit_kernel(%arg0: i32, %arg1: memref<1x16x256xbf16, #tpu.memory_space<vmem>>, %arg2: memref<1x16x256xbf16, #tpu.memory_space<vmem>>, %arg3: memref<32x16xbf16, #tpu.memory_space<vmem>>, %arg4: memref<32x16xbf16, #tpu.memory_space<vmem>>, %arg5: memref<48x1xf32, #tpu.memory_space<vmem>>, %arg6: memref<40x16xbf16, #tpu.memory_space<vmem>>, %arg7: memref<3xf32, #tpu.memory_space<smem>>, %arg8: memref<1x16x256xf32, #tpu.memory_space<vmem>>, %arg9: memref<40x16x16xf32, #tpu.memory_space<vmem>>) attributes {dimension_semantics = [#tpu.dimension_semantics<parallel>], iteration_bounds = array<i64: 2>, scalar_prefetch = 0 : i64, scratch_operands = 1 : i64, tpu.core_type = #tpu.core_type<tc>, window_params = [{transform_indices = @transform_0, window_bounds = array<i64: 1, 16, 256>}, {transform_indices = @transform_1, window_bounds = array<i64: 1, 16, 256>}, {pipeline_mode = #tpu.pipeline_mode<synchronous>, transform_indices = @transform_2, window_bounds = array<i64: 32, 16>}, {pipeline_mode = #tpu.pipeline_mode<synchronous>, transform_indices = @transform_3, window_bounds = array<i64: 32, 16>}, {pipeline_mode = #tpu.pipeline_mode<synchronous>, transform_indices = @transform_4, window_bounds = array<i64: 48, 1>}, {pipeline_mode = #tpu.pipeline_mode<synchronous>, transform_indices = @transform_5, window_bounds = array<i64: 40, 16>}, {transform_indices = @transform_6, window_bounds = array<i64: 3>}, {transform_indices = @transform_7, window_bounds = array<i64: 1, 16, 256>}]} {
    %c0 = arith.constant 0 : index
    %c0_0 = arith.constant 0 : index
    %c0_1 = arith.constant 0 : index
    %0 = vector.load %arg1[%c0, %c0_0, %c0_1] : memref<1x16x256xbf16, #tpu.memory_space<vmem>>, vector<1x16x256xbf16>
    %1 = vector.shape_cast %0 : vector<1x16x256xbf16> to vector<16x256xbf16>
    %c0_2 = arith.constant 0 : index
    %c0_3 = arith.constant 0 : index
    %c0_4 = arith.constant 0 : index
    %2 = vector.load %arg2[%c0_2, %c0_3, %c0_4] : memref<1x16x256xbf16, #tpu.memory_space<vmem>>, vector<1x16x256xbf16>
    %3 = vector.shape_cast %2 : vector<1x16x256xbf16> to vector<16x256xbf16>
    %c0_5 = arith.constant 0 : index
    %c0_6 = arith.constant 0 : index
    %4 = vector.load %arg3[%c0_5, %c0_6] : memref<32x16xbf16, #tpu.memory_space<vmem>>, vector<32x16xbf16>
    %cst = arith.constant dense<0.000000e+00> : vector<32x256xf32>
    %5 = tpu.matmul %4, %1, %cst {dimension_numbers = #tpu.dot_dimension_numbers<[1], [0], [0], [1], [0, 0, 1, 1], [], []>} : vector<32x16xbf16>, vector<16x256xbf16>, vector<32x256xf32> -> vector<32x256xf32>
    %c0_7 = arith.constant 0 : index
    %c0_8 = arith.constant 0 : index
    %6 = vector.load %arg4[%c0_7, %c0_8] : memref<32x16xbf16, #tpu.memory_space<vmem>>, vector<32x16xbf16>
    %cst_9 = arith.constant dense<0.000000e+00> : vector<32x256xf32>
    %7 = tpu.matmul %6, %3, %cst_9 {dimension_numbers = #tpu.dot_dimension_numbers<[1], [0], [0], [1], [0, 0, 1, 1], [], []>} : vector<32x16xbf16>, vector<16x256xbf16>, vector<32x256xf32> -> vector<32x256xf32>
    %8 = vector.extract_strided_slice %5 {offsets = [0, 0], sizes = [16, 256], strides = [1, 1]} : vector<32x256xf32> to vector<16x256xf32>
    %9 = vector.extract_strided_slice %7 {offsets = [0, 0], sizes = [16, 256], strides = [1, 1]} : vector<32x256xf32> to vector<16x256xf32>
    %10 = arith.addf %8, %9 : vector<16x256xf32>
    %c0_10 = arith.constant 0 : index
    %c0_11 = arith.constant 0 : index
    %11 = vector.load %arg5[%c0_10, %c0_11] : memref<48x1xf32, #tpu.memory_space<vmem>>, vector<16x1xf32>
    %12 = vector.broadcast %11 : vector<16x1xf32> to vector<16x256xf32>
    %13 = arith.addf %10, %12 : vector<16x256xf32>
    %14 = vector.extract_strided_slice %5 {offsets = [16, 0], sizes = [16, 256], strides = [1, 1]} : vector<32x256xf32> to vector<16x256xf32>
    %c16 = arith.constant 16 : index
    %c0_12 = arith.constant 0 : index
    %15 = vector.load %arg5[%c16, %c0_12] : memref<48x1xf32, #tpu.memory_space<vmem>>, vector<16x1xf32>
    %16 = vector.broadcast %15 : vector<16x1xf32> to vector<16x256xf32>
    %17 = arith.addf %14, %16 : vector<16x256xf32>
    %18 = vector.extract_strided_slice %7 {offsets = [16, 0], sizes = [16, 256], strides = [1, 1]} : vector<32x256xf32> to vector<16x256xf32>
    %c32 = arith.constant 32 : index
    %c0_13 = arith.constant 0 : index
    %19 = vector.load %arg5[%c32, %c0_13] : memref<48x1xf32, #tpu.memory_space<vmem>>, vector<16x1xf32>
    %20 = vector.broadcast %19 : vector<16x1xf32> to vector<16x256xf32>
    %21 = arith.addf %18, %20 : vector<16x256xf32>
    %c0_14 = arith.constant 0 : index
    %c0_15 = arith.constant 0 : index
    %22 = vector.load %arg6[%c0_14, %c0_15] : memref<40x16xbf16, #tpu.memory_space<vmem>>, vector<40x16xbf16>
    %23 = arith.truncf %13 : vector<16x256xf32> to vector<16x256xbf16>
    %cst_16 = arith.constant dense<0.000000e+00> : vector<40x256xf32>
    %24 = tpu.matmul %22, %23, %cst_16 {dimension_numbers = #tpu.dot_dimension_numbers<[1], [0], [0], [1], [0, 0, 1, 1], [], []>} : vector<40x16xbf16>, vector<16x256xbf16>, vector<40x256xf32> -> vector<40x256xf32>
    %25 = vector.extract_strided_slice %24 {offsets = [0, 0], sizes = [1, 256], strides = [1, 1]} : vector<40x256xf32> to vector<1x256xf32>
    %c0_17 = arith.constant 0 : index
    %26 = memref.load %arg7[%c0_17] : memref<3xf32, #tpu.memory_space<smem>>
    %27 = vector.broadcast %26 : f32 to vector<1x256xf32>
    %28 = arith.addf %25, %27 : vector<1x256xf32>
    %29 = arith.negf %28 : vector<1x256xf32>
    %30 = math.exp %29 : vector<1x256xf32>
    %cst_18 = arith.constant 1.000000e+00 : f32
    %31 = vector.broadcast %cst_18 : f32 to vector<1x256xf32>
    %32 = arith.addf %31, %30 : vector<1x256xf32>
    %33 = arith.divf %31, %32 : vector<1x256xf32>
    %34 = vector.extract_strided_slice %24 {offsets = [0, 0], sizes = [40, 16], strides = [1, 1]} : vector<40x256xf32> to vector<40x16xf32>
    %c0_19 = arith.constant 0 : index
    %c0_20 = arith.constant 0 : index
    %c0_21 = arith.constant 0 : index
    %35 = vector.load %arg9[%c0_19, %c0_20, %c0_21] : memref<40x16x16xf32, #tpu.memory_space<vmem>>, vector<40x1x16xf32>
    %36 = vector.shape_cast %35 : vector<40x1x16xf32> to vector<40x16xf32>
    %37 = vector.shape_cast %34 : vector<40x16xf32> to vector<40x1x16xf32>
    tpu.vector_store %arg9[%c0_19, %c0_20, %c0_21], %37 {strides = array<i32>} : memref<40x16x16xf32, #tpu.memory_space<vmem>>, vector<40x1x16xf32>,
    %38 = vector.extract_strided_slice %24 {offsets = [0, 16], sizes = [40, 16], strides = [1, 1]} : vector<40x256xf32> to vector<40x16xf32>
    %c0_22 = arith.constant 0 : index
    %c1 = arith.constant 1 : index
    %c0_23 = arith.constant 0 : index
    %39 = vector.load %arg9[%c0_22, %c1, %c0_23] : memref<40x16x16xf32, #tpu.memory_space<vmem>>, vector<40x1x16xf32>
    %40 = vector.shape_cast %39 : vector<40x1x16xf32> to vector<40x16xf32>
    %41 = vector.shape_cast %38 : vector<40x16xf32> to vector<40x1x16xf32>
    tpu.vector_store %arg9[%c0_22, %c1, %c0_23], %41 {strides = array<i32>} : memref<40x16x16xf32, #tpu.memory_space<vmem>>, vector<40x1x16xf32>,
    %42 = vector.extract_strided_slice %24 {offsets = [0, 32], sizes = [40, 16], strides = [1, 1]} : vector<40x256xf32> to vector<40x16xf32>
    %c0_24 = arith.constant 0 : index
    %c2 = arith.constant 2 : index
    %c0_25 = arith.constant 0 : index
    %43 = vector.load %arg9[%c0_24, %c2, %c0_25] : memref<40x16x16xf32, #tpu.memory_space<vmem>>, vector<40x1x16xf32>
    %44 = vector.shape_cast %43 : vector<40x1x16xf32> to vector<40x16xf32>
    %45 = vector.shape_cast %42 : vector<40x16xf32> to vector<40x1x16xf32>
    tpu.vector_store %arg9[%c0_24, %c2, %c0_25], %45 {strides = array<i32>} : memref<40x16x16xf32, #tpu.memory_space<vmem>>, vector<40x1x16xf32>,
    %46 = vector.extract_strided_slice %24 {offsets = [0, 48], sizes = [40, 16], strides = [1, 1]} : vector<40x256xf32> to vector<40x16xf32>
    %c0_26 = arith.constant 0 : index
    %c3 = arith.constant 3 : index
    %c0_27 = arith.constant 0 : index
    %47 = vector.load %arg9[%c0_26, %c3, %c0_27] : memref<40x16x16xf32, #tpu.memory_space<vmem>>, vector<40x1x16xf32>
    %48 = vector.shape_cast %47 : vector<40x1x16xf32> to vector<40x16xf32>
    %49 = vector.shape_cast %46 : vector<40x16xf32> to vector<40x1x16xf32>
    tpu.vector_store %arg9[%c0_26, %c3, %c0_27], %49 {strides = array<i32>} : memref<40x16x16xf32, #tpu.memory_space<vmem>>, vector<40x1x16xf32>,
    %50 = vector.extract_strided_slice %24 {offsets = [0, 64], sizes = [40, 16], strides = [1, 1]} : vector<40x256xf32> to vector<40x16xf32>
    %c0_28 = arith.constant 0 : index
    %c4 = arith.constant 4 : index
    %c0_29 = arith.constant 0 : index
    %51 = vector.load %arg9[%c0_28, %c4, %c0_29] : memref<40x16x16xf32, #tpu.memory_space<vmem>>, vector<40x1x16xf32>
    %52 = vector.shape_cast %51 : vector<40x1x16xf32> to vector<40x16xf32>
    %53 = vector.shape_cast %50 : vector<40x16xf32> to vector<40x1x16xf32>
    tpu.vector_store %arg9[%c0_28, %c4, %c0_29], %53 {strides = array<i32>} : memref<40x16x16xf32, #tpu.memory_space<vmem>>, vector<40x1x16xf32>,
    %54 = vector.extract_strided_slice %24 {offsets = [0, 80], sizes = [40, 16], strides = [1, 1]} : vector<40x256xf32> to vector<40x16xf32>
    %c0_30 = arith.constant 0 : index
    %c5 = arith.constant 5 : index
    %c0_31 = arith.constant 0 : index
    %55 = vector.load %arg9[%c0_30, %c5, %c0_31] : memref<40x16x16xf32, #tpu.memory_space<vmem>>, vector<40x1x16xf32>
    %56 = vector.shape_cast %55 : vector<40x1x16xf32> to vector<40x16xf32>
    %57 = vector.shape_cast %54 : vector<40x16xf32> to vector<40x1x16xf32>
    tpu.vector_store %arg9[%c0_30, %c5, %c0_31], %57 {strides = array<i32>} : memref<40x16x16xf32, #tpu.memory_space<vmem>>, vector<40x1x16xf32>,
    %58 = vector.extract_strided_slice %24 {offsets = [0, 96], sizes = [40, 16], strides = [1, 1]} : vector<40x256xf32> to vector<40x16xf32>
    %c0_32 = arith.constant 0 : index
    %c6 = arith.constant 6 : index
    %c0_33 = arith.constant 0 : index
    %59 = vector.load %arg9[%c0_32, %c6, %c0_33] : memref<40x16x16xf32, #tpu.memory_space<vmem>>, vector<40x1x16xf32>
    %60 = vector.shape_cast %59 : vector<40x1x16xf32> to vector<40x16xf32>
    %61 = vector.shape_cast %58 : vector<40x16xf32> to vector<40x1x16xf32>
    tpu.vector_store %arg9[%c0_32, %c6, %c0_33], %61 {strides = array<i32>} : memref<40x16x16xf32, #tpu.memory_space<vmem>>, vector<40x1x16xf32>,
    %62 = vector.extract_strided_slice %24 {offsets = [0, 112], sizes = [40, 16], strides = [1, 1]} : vector<40x256xf32> to vector<40x16xf32>
    %c0_34 = arith.constant 0 : index
    %c7 = arith.constant 7 : index
    %c0_35 = arith.constant 0 : index
    %63 = vector.load %arg9[%c0_34, %c7, %c0_35] : memref<40x16x16xf32, #tpu.memory_space<vmem>>, vector<40x1x16xf32>
    %64 = vector.shape_cast %63 : vector<40x1x16xf32> to vector<40x16xf32>
    %65 = vector.shape_cast %62 : vector<40x16xf32> to vector<40x1x16xf32>
    tpu.vector_store %arg9[%c0_34, %c7, %c0_35], %65 {strides = array<i32>} : memref<40x16x16xf32, #tpu.memory_space<vmem>>, vector<40x1x16xf32>,
    %66 = vector.extract_strided_slice %24 {offsets = [0, 128], sizes = [40, 16], strides = [1, 1]} : vector<40x256xf32> to vector<40x16xf32>
    %c0_36 = arith.constant 0 : index
    %c8 = arith.constant 8 : index
    %c0_37 = arith.constant 0 : index
    %67 = vector.load %arg9[%c0_36, %c8, %c0_37] : memref<40x16x16xf32, #tpu.memory_space<vmem>>, vector<40x1x16xf32>
    %68 = vector.shape_cast %67 : vector<40x1x16xf32> to vector<40x16xf32>
    %69 = vector.shape_cast %66 : vector<40x16xf32> to vector<40x1x16xf32>
    tpu.vector_store %arg9[%c0_36, %c8, %c0_37], %69 {strides = array<i32>} : memref<40x16x16xf32, #tpu.memory_space<vmem>>, vector<40x1x16xf32>,
    %70 = vector.extract_strided_slice %24 {offsets = [0, 144], sizes = [40, 16], strides = [1, 1]} : vector<40x256xf32> to vector<40x16xf32>
    %c0_38 = arith.constant 0 : index
    %c9 = arith.constant 9 : index
    %c0_39 = arith.constant 0 : index
    %71 = vector.load %arg9[%c0_38, %c9, %c0_39] : memref<40x16x16xf32, #tpu.memory_space<vmem>>, vector<40x1x16xf32>
    %72 = vector.shape_cast %71 : vector<40x1x16xf32> to vector<40x16xf32>
    %73 = vector.shape_cast %70 : vector<40x16xf32> to vector<40x1x16xf32>
    tpu.vector_store %arg9[%c0_38, %c9, %c0_39], %73 {strides = array<i32>} : memref<40x16x16xf32, #tpu.memory_space<vmem>>, vector<40x1x16xf32>,
    %74 = vector.extract_strided_slice %24 {offsets = [0, 160], sizes = [40, 16], strides = [1, 1]} : vector<40x256xf32> to vector<40x16xf32>
    %c0_40 = arith.constant 0 : index
    %c10 = arith.constant 10 : index
    %c0_41 = arith.constant 0 : index
    %75 = vector.load %arg9[%c0_40, %c10, %c0_41] : memref<40x16x16xf32, #tpu.memory_space<vmem>>, vector<40x1x16xf32>
    %76 = vector.shape_cast %75 : vector<40x1x16xf32> to vector<40x16xf32>
    %77 = vector.shape_cast %74 : vector<40x16xf32> to vector<40x1x16xf32>
    tpu.vector_store %arg9[%c0_40, %c10, %c0_41], %77 {strides = array<i32>} : memref<40x16x16xf32, #tpu.memory_space<vmem>>, vector<40x1x16xf32>,
    %78 = vector.extract_strided_slice %24 {offsets = [0, 176], sizes = [40, 16], strides = [1, 1]} : vector<40x256xf32> to vector<40x16xf32>
    %c0_42 = arith.constant 0 : index
    %c11 = arith.constant 11 : index
    %c0_43 = arith.constant 0 : index
    %79 = vector.load %arg9[%c0_42, %c11, %c0_43] : memref<40x16x16xf32, #tpu.memory_space<vmem>>, vector<40x1x16xf32>
    %80 = vector.shape_cast %79 : vector<40x1x16xf32> to vector<40x16xf32>
    %81 = vector.shape_cast %78 : vector<40x16xf32> to vector<40x1x16xf32>
    tpu.vector_store %arg9[%c0_42, %c11, %c0_43], %81 {strides = array<i32>} : memref<40x16x16xf32, #tpu.memory_space<vmem>>, vector<40x1x16xf32>,
    %82 = vector.extract_strided_slice %24 {offsets = [0, 192], sizes = [40, 16], strides = [1, 1]} : vector<40x256xf32> to vector<40x16xf32>
    %c0_44 = arith.constant 0 : index
    %c12 = arith.constant 12 : index
    %c0_45 = arith.constant 0 : index
    %83 = vector.load %arg9[%c0_44, %c12, %c0_45] : memref<40x16x16xf32, #tpu.memory_space<vmem>>, vector<40x1x16xf32>
    %84 = vector.shape_cast %83 : vector<40x1x16xf32> to vector<40x16xf32>
    %85 = vector.shape_cast %82 : vector<40x16xf32> to vector<40x1x16xf32>
    tpu.vector_store %arg9[%c0_44, %c12, %c0_45], %85 {strides = array<i32>} : memref<40x16x16xf32, #tpu.memory_space<vmem>>, vector<40x1x16xf32>,
    %86 = vector.extract_strided_slice %24 {offsets = [0, 208], sizes = [40, 16], strides = [1, 1]} : vector<40x256xf32> to vector<40x16xf32>
    %c0_46 = arith.constant 0 : index
    %c13 = arith.constant 13 : index
    %c0_47 = arith.constant 0 : index
    %87 = vector.load %arg9[%c0_46, %c13, %c0_47] : memref<40x16x16xf32, #tpu.memory_space<vmem>>, vector<40x1x16xf32>
    %88 = vector.shape_cast %87 : vector<40x1x16xf32> to vector<40x16xf32>
    %89 = vector.shape_cast %86 : vector<40x16xf32> to vector<40x1x16xf32>
    tpu.vector_store %arg9[%c0_46, %c13, %c0_47], %89 {strides = array<i32>} : memref<40x16x16xf32, #tpu.memory_space<vmem>>, vector<40x1x16xf32>,
    %90 = vector.extract_strided_slice %24 {offsets = [0, 224], sizes = [40, 16], strides = [1, 1]} : vector<40x256xf32> to vector<40x16xf32>
    %c0_48 = arith.constant 0 : index
    %c14 = arith.constant 14 : index
    %c0_49 = arith.constant 0 : index
    %91 = vector.load %arg9[%c0_48, %c14, %c0_49] : memref<40x16x16xf32, #tpu.memory_space<vmem>>, vector<40x1x16xf32>
    %92 = vector.shape_cast %91 : vector<40x1x16xf32> to vector<40x16xf32>
    %93 = vector.shape_cast %90 : vector<40x16xf32> to vector<40x1x16xf32>
    tpu.vector_store %arg9[%c0_48, %c14, %c0_49], %93 {strides = array<i32>} : memref<40x16x16xf32, #tpu.memory_space<vmem>>, vector<40x1x16xf32>,
    %94 = vector.extract_strided_slice %24 {offsets = [0, 240], sizes = [40, 16], strides = [1, 1]} : vector<40x256xf32> to vector<40x16xf32>
    %c0_50 = arith.constant 0 : index
    %c15 = arith.constant 15 : index
    %c0_51 = arith.constant 0 : index
    %95 = vector.load %arg9[%c0_50, %c15, %c0_51] : memref<40x16x16xf32, #tpu.memory_space<vmem>>, vector<40x1x16xf32>
    %96 = vector.shape_cast %95 : vector<40x1x16xf32> to vector<40x16xf32>
    %97 = vector.shape_cast %94 : vector<40x16xf32> to vector<40x1x16xf32>
    tpu.vector_store %arg9[%c0_50, %c15, %c0_51], %97 {strides = array<i32>} : memref<40x16x16xf32, #tpu.memory_space<vmem>>, vector<40x1x16xf32>,
    %c0_52 = arith.constant 0 : index
    %c0_53 = arith.constant 0 : index
    %c0_54 = arith.constant 0 : index
    %98 = vector.load %arg9[%c0_52, %c0_53, %c0_54] : memref<40x16x16xf32, #tpu.memory_space<vmem>>, vector<40x16x16xf32>
    %99 = vector.extract_strided_slice %98 {offsets = [0, 2, 0], sizes = [40, 1, 16], strides = [1, 1, 1]} : vector<40x16x16xf32> to vector<40x1x16xf32>
    %100 = vector.extract_strided_slice %98 {offsets = [0, 1, 0], sizes = [40, 1, 16], strides = [1, 1, 1]} : vector<40x16x16xf32> to vector<40x1x16xf32>
    %101 = vector.extract_strided_slice %98 {offsets = [0, 14, 0], sizes = [40, 1, 16], strides = [1, 1, 1]} : vector<40x16x16xf32> to vector<40x1x16xf32>
    %102 = vector.extract_strided_slice %98 {offsets = [0, 13, 0], sizes = [40, 1, 16], strides = [1, 1, 1]} : vector<40x16x16xf32> to vector<40x1x16xf32>
    %103 = tpu.concatenate %99, %100, %98, %101, %102 in 1 : vector<40x1x16xf32>, vector<40x1x16xf32>, vector<40x16x16xf32>, vector<40x1x16xf32>, vector<40x1x16xf32> -> vector<40x20x16xf32>
    %104 = vector.extract_strided_slice %103 {offsets = [0, 0, 2], sizes = [40, 20, 1], strides = [1, 1, 1]} : vector<40x20x16xf32> to vector<40x20x1xf32>
    %105 = vector.extract_strided_slice %103 {offsets = [0, 0, 1], sizes = [40, 20, 1], strides = [1, 1, 1]} : vector<40x20x16xf32> to vector<40x20x1xf32>
    %106 = vector.extract_strided_slice %103 {offsets = [0, 0, 14], sizes = [40, 20, 1], strides = [1, 1, 1]} : vector<40x20x16xf32> to vector<40x20x1xf32>
    %107 = vector.extract_strided_slice %103 {offsets = [0, 0, 13], sizes = [40, 20, 1], strides = [1, 1, 1]} : vector<40x20x16xf32> to vector<40x20x1xf32>
    %108 = tpu.concatenate %104, %105, %103, %106, %107 in 2 : vector<40x20x1xf32>, vector<40x20x1xf32>, vector<40x20x16xf32>, vector<40x20x1xf32>, vector<40x20x1xf32> -> vector<40x20x20xf32>
    %109 = vector.extract_strided_slice %108 {offsets = [1, 1, 1], sizes = [1, 16, 16], strides = [1, 1, 1]} : vector<40x20x20xf32> to vector<1x16x16xf32>
    %110 = vector.shape_cast %109 : vector<1x16x16xf32> to vector<16x16xf32>
    %111 = vector.extract_strided_slice %108 {offsets = [2, 1, 2], sizes = [1, 16, 16], strides = [1, 1, 1]} : vector<40x20x20xf32> to vector<1x16x16xf32>
    %112 = vector.shape_cast %111 : vector<1x16x16xf32> to vector<16x16xf32>
    %113 = arith.addf %110, %112 : vector<16x16xf32>
    %114 = vector.extract_strided_slice %108 {offsets = [3, 1, 3], sizes = [1, 16, 16], strides = [1, 1, 1]} : vector<40x20x20xf32> to vector<1x16x16xf32>
    %115 = vector.shape_cast %114 : vector<1x16x16xf32> to vector<16x16xf32>
    %116 = arith.addf %113, %115 : vector<16x16xf32>
    %117 = vector.extract_strided_slice %108 {offsets = [4, 2, 1], sizes = [1, 16, 16], strides = [1, 1, 1]} : vector<40x20x20xf32> to vector<1x16x16xf32>
    %118 = vector.shape_cast %117 : vector<1x16x16xf32> to vector<16x16xf32>
    %119 = arith.addf %116, %118 : vector<16x16xf32>
    %120 = vector.extract_strided_slice %108 {offsets = [5, 2, 2], sizes = [1, 16, 16], strides = [1, 1, 1]} : vector<40x20x20xf32> to vector<1x16x16xf32>
    %121 = vector.shape_cast %120 : vector<1x16x16xf32> to vector<16x16xf32>
    %122 = arith.addf %119, %121 : vector<16x16xf32>
    %123 = vector.extract_strided_slice %108 {offsets = [6, 2, 3], sizes = [1, 16, 16], strides = [1, 1, 1]} : vector<40x20x20xf32> to vector<1x16x16xf32>
    %124 = vector.shape_cast %123 : vector<1x16x16xf32> to vector<16x16xf32>
    %125 = arith.addf %122, %124 : vector<16x16xf32>
    %126 = vector.extract_strided_slice %108 {offsets = [7, 3, 1], sizes = [1, 16, 16], strides = [1, 1, 1]} : vector<40x20x20xf32> to vector<1x16x16xf32>
    %127 = vector.shape_cast %126 : vector<1x16x16xf32> to vector<16x16xf32>
    %128 = arith.addf %125, %127 : vector<16x16xf32>
    %129 = vector.extract_strided_slice %108 {offsets = [8, 3, 2], sizes = [1, 16, 16], strides = [1, 1, 1]} : vector<40x20x20xf32> to vector<1x16x16xf32>
    %130 = vector.shape_cast %129 : vector<1x16x16xf32> to vector<16x16xf32>
    %131 = arith.addf %128, %130 : vector<16x16xf32>
    %132 = vector.extract_strided_slice %108 {offsets = [9, 3, 3], sizes = [1, 16, 16], strides = [1, 1, 1]} : vector<40x20x20xf32> to vector<1x16x16xf32>
    %133 = vector.shape_cast %132 : vector<1x16x16xf32> to vector<16x16xf32>
    %134 = arith.addf %131, %133 : vector<16x16xf32>
    %135 = vector.extract_strided_slice %108 {offsets = [10, 0, 0], sizes = [1, 16, 16], strides = [1, 1, 1]} : vector<40x20x20xf32> to vector<1x16x16xf32>
    %136 = vector.shape_cast %135 : vector<1x16x16xf32> to vector<16x16xf32>
    %137 = vector.extract_strided_slice %108 {offsets = [11, 0, 1], sizes = [1, 16, 16], strides = [1, 1, 1]} : vector<40x20x20xf32> to vector<1x16x16xf32>
    %138 = vector.shape_cast %137 : vector<1x16x16xf32> to vector<16x16xf32>
    %139 = arith.addf %136, %138 : vector<16x16xf32>
    %140 = vector.extract_strided_slice %108 {offsets = [12, 0, 2], sizes = [1, 16, 16], strides = [1, 1, 1]} : vector<40x20x20xf32> to vector<1x16x16xf32>
    %141 = vector.shape_cast %140 : vector<1x16x16xf32> to vector<16x16xf32>
    %142 = arith.addf %139, %141 : vector<16x16xf32>
    %143 = vector.extract_strided_slice %108 {offsets = [13, 0, 3], sizes = [1, 16, 16], strides = [1, 1, 1]} : vector<40x20x20xf32> to vector<1x16x16xf32>
    %144 = vector.shape_cast %143 : vector<1x16x16xf32> to vector<16x16xf32>
    %145 = arith.addf %142, %144 : vector<16x16xf32>
    %146 = vector.extract_strided_slice %108 {offsets = [14, 0, 4], sizes = [1, 16, 16], strides = [1, 1, 1]} : vector<40x20x20xf32> to vector<1x16x16xf32>
    %147 = vector.shape_cast %146 : vector<1x16x16xf32> to vector<16x16xf32>
    %148 = arith.addf %145, %147 : vector<16x16xf32>
    %149 = vector.extract_strided_slice %108 {offsets = [15, 1, 0], sizes = [1, 16, 16], strides = [1, 1, 1]} : vector<40x20x20xf32> to vector<1x16x16xf32>
    %150 = vector.shape_cast %149 : vector<1x16x16xf32> to vector<16x16xf32>
    %151 = arith.addf %148, %150 : vector<16x16xf32>
    %152 = vector.extract_strided_slice %108 {offsets = [16, 1, 1], sizes = [1, 16, 16], strides = [1, 1, 1]} : vector<40x20x20xf32> to vector<1x16x16xf32>
    %153 = vector.shape_cast %152 : vector<1x16x16xf32> to vector<16x16xf32>
    %154 = arith.addf %151, %153 : vector<16x16xf32>
    %155 = vector.extract_strided_slice %108 {offsets = [17, 1, 2], sizes = [1, 16, 16], strides = [1, 1, 1]} : vector<40x20x20xf32> to vector<1x16x16xf32>
    %156 = vector.shape_cast %155 : vector<1x16x16xf32> to vector<16x16xf32>
    %157 = arith.addf %154, %156 : vector<16x16xf32>
    %158 = vector.extract_strided_slice %108 {offsets = [18, 1, 3], sizes = [1, 16, 16], strides = [1, 1, 1]} : vector<40x20x20xf32> to vector<1x16x16xf32>
    %159 = vector.shape_cast %158 : vector<1x16x16xf32> to vector<16x16xf32>
    %160 = arith.addf %157, %159 : vector<16x16xf32>
    %161 = vector.extract_strided_slice %108 {offsets = [19, 1, 4], sizes = [1, 16, 16], strides = [1, 1, 1]} : vector<40x20x20xf32> to vector<1x16x16xf32>
    %162 = vector.shape_cast %161 : vector<1x16x16xf32> to vector<16x16xf32>
    %163 = arith.addf %160, %162 : vector<16x16xf32>
    %164 = vector.extract_strided_slice %108 {offsets = [20, 2, 0], sizes = [1, 16, 16], strides = [1, 1, 1]} : vector<40x20x20xf32> to vector<1x16x16xf32>
    %165 = vector.shape_cast %164 : vector<1x16x16xf32> to vector<16x16xf32>
    %166 = arith.addf %163, %165 : vector<16x16xf32>
    %167 = vector.extract_strided_slice %108 {offsets = [21, 2, 1], sizes = [1, 16, 16], strides = [1, 1, 1]} : vector<40x20x20xf32> to vector<1x16x16xf32>
    %168 = vector.shape_cast %167 : vector<1x16x16xf32> to vector<16x16xf32>
    %169 = arith.addf %166, %168 : vector<16x16xf32>
    %170 = vector.extract_strided_slice %108 {offsets = [22, 2, 2], sizes = [1, 16, 16], strides = [1, 1, 1]} : vector<40x20x20xf32> to vector<1x16x16xf32>
    %171 = vector.shape_cast %170 : vector<1x16x16xf32> to vector<16x16xf32>
    %172 = arith.addf %169, %171 : vector<16x16xf32>
    %173 = vector.extract_strided_slice %108 {offsets = [23, 2, 3], sizes = [1, 16, 16], strides = [1, 1, 1]} : vector<40x20x20xf32> to vector<1x16x16xf32>
    %174 = vector.shape_cast %173 : vector<1x16x16xf32> to vector<16x16xf32>
    %175 = arith.addf %172, %174 : vector<16x16xf32>
    %176 = vector.extract_strided_slice %108 {offsets = [24, 2, 4], sizes = [1, 16, 16], strides = [1, 1, 1]} : vector<40x20x20xf32> to vector<1x16x16xf32>
    %177 = vector.shape_cast %176 : vector<1x16x16xf32> to vector<16x16xf32>
    %178 = arith.addf %175, %177 : vector<16x16xf32>
    %179 = vector.extract_strided_slice %108 {offsets = [25, 3, 0], sizes = [1, 16, 16], strides = [1, 1, 1]} : vector<40x20x20xf32> to vector<1x16x16xf32>
    %180 = vector.shape_cast %179 : vector<1x16x16xf32> to vector<16x16xf32>
    %181 = arith.addf %178, %180 : vector<16x16xf32>
    %182 = vector.extract_strided_slice %108 {offsets = [26, 3, 1], sizes = [1, 16, 16], strides = [1, 1, 1]} : vector<40x20x20xf32> to vector<1x16x16xf32>
    %183 = vector.shape_cast %182 : vector<1x16x16xf32> to vector<16x16xf32>
    %184 = arith.addf %181, %183 : vector<16x16xf32>
    %185 = vector.extract_strided_slice %108 {offsets = [27, 3, 2], sizes = [1, 16, 16], strides = [1, 1, 1]} : vector<40x20x20xf32> to vector<1x16x16xf32>
    %186 = vector.shape_cast %185 : vector<1x16x16xf32> to vector<16x16xf32>
    %187 = arith.addf %184, %186 : vector<16x16xf32>
    %188 = vector.extract_strided_slice %108 {offsets = [28, 3, 3], sizes = [1, 16, 16], strides = [1, 1, 1]} : vector<40x20x20xf32> to vector<1x16x16xf32>
    %189 = vector.shape_cast %188 : vector<1x16x16xf32> to vector<16x16xf32>
    %190 = arith.addf %187, %189 : vector<16x16xf32>
    %191 = vector.extract_strided_slice %108 {offsets = [29, 3, 4], sizes = [1, 16, 16], strides = [1, 1, 1]} : vector<40x20x20xf32> to vector<1x16x16xf32>
    %192 = vector.shape_cast %191 : vector<1x16x16xf32> to vector<16x16xf32>
    %193 = arith.addf %190, %192 : vector<16x16xf32>
    %194 = vector.extract_strided_slice %108 {offsets = [30, 4, 0], sizes = [1, 16, 16], strides = [1, 1, 1]} : vector<40x20x20xf32> to vector<1x16x16xf32>
    %195 = vector.shape_cast %194 : vector<1x16x16xf32> to vector<16x16xf32>
    %196 = arith.addf %193, %195 : vector<16x16xf32>
    %197 = vector.extract_strided_slice %108 {offsets = [31, 4, 1], sizes = [1, 16, 16], strides = [1, 1, 1]} : vector<40x20x20xf32> to vector<1x16x16xf32>
    %198 = vector.shape_cast %197 : vector<1x16x16xf32> to vector<16x16xf32>
    %199 = arith.addf %196, %198 : vector<16x16xf32>
    %200 = vector.extract_strided_slice %108 {offsets = [32, 4, 2], sizes = [1, 16, 16], strides = [1, 1, 1]} : vector<40x20x20xf32> to vector<1x16x16xf32>
    %201 = vector.shape_cast %200 : vector<1x16x16xf32> to vector<16x16xf32>
    %202 = arith.addf %199, %201 : vector<16x16xf32>
    %203 = vector.extract_strided_slice %108 {offsets = [33, 4, 3], sizes = [1, 16, 16], strides = [1, 1, 1]} : vector<40x20x20xf32> to vector<1x16x16xf32>
    %204 = vector.shape_cast %203 : vector<1x16x16xf32> to vector<16x16xf32>
    %205 = arith.addf %202, %204 : vector<16x16xf32>
    %206 = vector.extract_strided_slice %108 {offsets = [34, 4, 4], sizes = [1, 16, 16], strides = [1, 1, 1]} : vector<40x20x20xf32> to vector<1x16x16xf32>
    %207 = vector.shape_cast %206 : vector<1x16x16xf32> to vector<16x16xf32>
    %208 = arith.addf %205, %207 : vector<16x16xf32>
    %c1_55 = arith.constant 1 : index
    %209 = memref.load %arg7[%c1_55] : memref<3xf32, #tpu.memory_space<smem>>
    %210 = vector.broadcast %209 : f32 to vector<16x16xf32>
    %211 = arith.addf %134, %210 : vector<16x16xf32>
    %212 = vector.shape_cast %211 : vector<16x16xf32> to vector<1x16x16xf32>
    %c2_56 = arith.constant 2 : index
    %213 = memref.load %arg7[%c2_56] : memref<3xf32, #tpu.memory_space<smem>>
    %214 = vector.broadcast %213 : f32 to vector<16x16xf32>
    %215 = arith.addf %208, %214 : vector<16x16xf32>
    %216 = vector.shape_cast %215 : vector<16x16xf32> to vector<1x16x16xf32>
    %217 = tpu.concatenate %212, %216 in 0 : vector<1x16x16xf32>, vector<1x16x16xf32> -> vector<2x16x16xf32>
    %218 = arith.negf %217 : vector<2x16x16xf32>
    %219 = math.exp %218 : vector<2x16x16xf32>
    %cst_57 = arith.constant 1.000000e+00 : f32
    %220 = vector.broadcast %cst_57 : f32 to vector<2x16x16xf32>
    %221 = arith.addf %220, %219 : vector<2x16x16xf32>
    %222 = arith.divf %220, %221 : vector<2x16x16xf32>
    %223 = vector.extract_strided_slice %222 {offsets = [0, 0, 0], sizes = [1, 16, 16], strides = [1, 1, 1]} : vector<2x16x16xf32> to vector<1x16x16xf32>
    %224 = vector.shape_cast %223 : vector<1x16x16xf32> to vector<16x16xf32>
    %225 = vector.extract_strided_slice %222 {offsets = [1, 0, 0], sizes = [1, 16, 16], strides = [1, 1, 1]} : vector<2x16x16xf32> to vector<1x16x16xf32>
    %226 = vector.shape_cast %225 : vector<1x16x16xf32> to vector<16x16xf32>
    %227 = arith.addf %224, %226 : vector<16x16xf32>
    %228 = vector.extract_strided_slice %227 {offsets = [0, 0], sizes = [1, 16], strides = [1, 1]} : vector<16x16xf32> to vector<1x16xf32>
    %229 = vector.extract_strided_slice %227 {offsets = [1, 0], sizes = [1, 16], strides = [1, 1]} : vector<16x16xf32> to vector<1x16xf32>
    %230 = vector.extract_strided_slice %227 {offsets = [2, 0], sizes = [1, 16], strides = [1, 1]} : vector<16x16xf32> to vector<1x16xf32>
    %231 = vector.extract_strided_slice %227 {offsets = [3, 0], sizes = [1, 16], strides = [1, 1]} : vector<16x16xf32> to vector<1x16xf32>
    %232 = vector.extract_strided_slice %227 {offsets = [4, 0], sizes = [1, 16], strides = [1, 1]} : vector<16x16xf32> to vector<1x16xf32>
    %233 = vector.extract_strided_slice %227 {offsets = [5, 0], sizes = [1, 16], strides = [1, 1]} : vector<16x16xf32> to vector<1x16xf32>
    %234 = vector.extract_strided_slice %227 {offsets = [6, 0], sizes = [1, 16], strides = [1, 1]} : vector<16x16xf32> to vector<1x16xf32>
    %235 = vector.extract_strided_slice %227 {offsets = [7, 0], sizes = [1, 16], strides = [1, 1]} : vector<16x16xf32> to vector<1x16xf32>
    %236 = vector.extract_strided_slice %227 {offsets = [8, 0], sizes = [1, 16], strides = [1, 1]} : vector<16x16xf32> to vector<1x16xf32>
    %237 = vector.extract_strided_slice %227 {offsets = [9, 0], sizes = [1, 16], strides = [1, 1]} : vector<16x16xf32> to vector<1x16xf32>
    %238 = vector.extract_strided_slice %227 {offsets = [10, 0], sizes = [1, 16], strides = [1, 1]} : vector<16x16xf32> to vector<1x16xf32>
    %239 = vector.extract_strided_slice %227 {offsets = [11, 0], sizes = [1, 16], strides = [1, 1]} : vector<16x16xf32> to vector<1x16xf32>
    %240 = vector.extract_strided_slice %227 {offsets = [12, 0], sizes = [1, 16], strides = [1, 1]} : vector<16x16xf32> to vector<1x16xf32>
    %241 = vector.extract_strided_slice %227 {offsets = [13, 0], sizes = [1, 16], strides = [1, 1]} : vector<16x16xf32> to vector<1x16xf32>
    %242 = vector.extract_strided_slice %227 {offsets = [14, 0], sizes = [1, 16], strides = [1, 1]} : vector<16x16xf32> to vector<1x16xf32>
    %243 = vector.extract_strided_slice %227 {offsets = [15, 0], sizes = [1, 16], strides = [1, 1]} : vector<16x16xf32> to vector<1x16xf32>
    %244 = tpu.concatenate %228, %229, %230, %231, %232, %233, %234, %235, %236, %237, %238, %239, %240, %241, %242, %243 in 1 : vector<1x16xf32>, vector<1x16xf32>, vector<1x16xf32>, vector<1x16xf32>, vector<1x16xf32>, vector<1x16xf32>, vector<1x16xf32>, vector<1x16xf32>, vector<1x16xf32>, vector<1x16xf32>, vector<1x16xf32>, vector<1x16xf32>, vector<1x16xf32>, vector<1x16xf32>, vector<1x16xf32>, vector<1x16xf32> -> vector<1x256xf32>
    %245 = arith.addf %33, %244 : vector<1x256xf32>
    %cst_58 = arith.constant 0.333333343 : f32
    %246 = vector.broadcast %cst_58 : f32 to vector<1x256xf32>
    %247 = arith.mulf %245, %246 : vector<1x256xf32>
    %cst_59 = arith.constant 0.000000e+00 : f32
    %cst_60 = arith.constant 1.000000e+00 : f32
    %248 = vector.broadcast %cst_59 : f32 to vector<1x256xf32>
    %249 = arith.maximumf %248, %247 : vector<1x256xf32>
    %250 = vector.broadcast %cst_60 : f32 to vector<1x256xf32>
    %251 = arith.minimumf %250, %249 : vector<1x256xf32>
    %cst_61 = arith.constant 1.000000e+00 : f32
    %252 = vector.broadcast %cst_61 : f32 to vector<1x256xf32>
    %253 = arith.subf %252, %247 : vector<1x256xf32>
    %cst_62 = arith.constant 0.000000e+00 : f32
    %cst_63 = arith.constant 1.000000e+00 : f32
    %254 = vector.broadcast %cst_62 : f32 to vector<1x256xf32>
    %255 = arith.maximumf %254, %253 : vector<1x256xf32>
    %256 = vector.broadcast %cst_63 : f32 to vector<1x256xf32>
    %257 = arith.minimumf %256, %255 : vector<1x256xf32>
    %258 = vector.broadcast %251 : vector<1x256xf32> to vector<16x256xf32>
    %259 = arith.mulf %258, %17 : vector<16x256xf32>
    %260 = vector.broadcast %257 : vector<1x256xf32> to vector<16x256xf32>
    %261 = arith.mulf %260, %21 : vector<16x256xf32>
    %262 = arith.addf %259, %261 : vector<16x256xf32>
    %c0_64 = arith.constant 0 : index
    %c0_65 = arith.constant 0 : index
    %c0_66 = arith.constant 0 : index
    %263 = vector.load %arg8[%c0_64, %c0_65, %c0_66] : memref<1x16x256xf32, #tpu.memory_space<vmem>>, vector<1x16x256xf32>
    %264 = vector.shape_cast %263 : vector<1x16x256xf32> to vector<16x256xf32>
    %265 = vector.shape_cast %262 : vector<16x256xf32> to vector<1x16x256xf32>
    tpu.vector_store %arg8[%c0_64, %c0_65, %c0_66], %265 {strides = array<i32>} : memref<1x16x256xf32, #tpu.memory_space<vmem>>, vector<1x16x256xf32>,
    return
  }
  func.func @transform_0(%arg0: i32) -> (i32, i32, i32) {
    %c0_i32 = arith.constant 0 : i32
    %c0_i32_0 = arith.constant 0 : i32
    %c0_i32_1 = arith.constant 0 : i32
    return %arg0, %c0_i32, %c0_i32_0 : i32, i32, i32
  }
  func.func @transform_1(%arg0: i32) -> (i32, i32, i32) {
    %c0_i32 = arith.constant 0 : i32
    %c0_i32_0 = arith.constant 0 : i32
    %c0_i32_1 = arith.constant 0 : i32
    return %arg0, %c0_i32, %c0_i32_0 : i32, i32, i32
  }
  func.func @transform_2(%arg0: i32) -> (i32, i32) {
    %c0_i32 = arith.constant 0 : i32
    %c0_i32_0 = arith.constant 0 : i32
    %c0_i32_1 = arith.constant 0 : i32
    return %c0_i32, %c0_i32_0 : i32, i32
  }
  func.func @transform_3(%arg0: i32) -> (i32, i32) {
    %c0_i32 = arith.constant 0 : i32
    %c0_i32_0 = arith.constant 0 : i32
    %c0_i32_1 = arith.constant 0 : i32
    return %c0_i32, %c0_i32_0 : i32, i32
  }
  func.func @transform_4(%arg0: i32) -> (i32, i32) {
    %c0_i32 = arith.constant 0 : i32
    %c0_i32_0 = arith.constant 0 : i32
    %c0_i32_1 = arith.constant 0 : i32
    return %c0_i32, %c0_i32_0 : i32, i32
  }
  func.func @transform_5(%arg0: i32) -> (i32, i32) {
    %c0_i32 = arith.constant 0 : i32
    %c0_i32_0 = arith.constant 0 : i32
    %c0_i32_1 = arith.constant 0 : i32
    return %c0_i32, %c0_i32_0 : i32, i32
  }
  func.func @transform_6(%arg0: i32) -> i32 {
    %c0_i32 = arith.constant 0 : i32
    %c0_i32_0 = arith.constant 0 : i32
    return %c0_i32 : i32
  }
  func.func @transform_7(%arg0: i32) -> (i32, i32, i32) {
    %c0_i32 = arith.constant 0 : i32
    %c0_i32_0 = arith.constant 0 : i32
    %c0_i32_1 = arith.constant 0 : i32
    return %arg0, %c0_i32, %c0_i32_0 : i32, i32, i32
  }
}

</mosaic_0001>

<bundles_post_ra>
// kernel: tpu_custom_call.1
= control target key start
LH: loop header
LB: loop body
LE: loop exit
PB: predicated region body
PF: predicated region fallthrough
CT: control target
= control target key end

     0   :  { %12 = vsyncpa [#allocation5], 0  ;;  %s12538_s0 = inlined_call_operand.vmem [shape: bf16[2,16,256], index: 0, kind: input, shape index: {}]   ;;  %s12539_s1 = inlined_call_operand.vmem [shape: bf16[2,16,256], index: 1, kind: input, shape index: {}]   ;;  %s12540_s2 = inlined_call_operand.vmem [shape: bf16[32,16], index: 2, kind: input, shape index: {}]   ;;  %s12541_s3 = inlined_call_operand.vmem [shape: bf16[32,16], index: 3, kind: input, shape index: {}]   ;;  %s12542_s4 = inlined_call_operand.vmem [shape: f32[48,1], index: 4, kind: input, shape index: {}]   ;;  %s12543_s5 = inlined_call_operand.vmem [shape: bf16[40,16], index: 5, kind: input, shape index: {}]   ;;  %s12544_s6 = inlined_call_operand.vmem [shape: f32[3], index: 6, kind: input, shape index: {}]   ;;  %s12545_s7 = inlined_call_operand.hbm [shape: f32[2,16,256], index: 7, kind: output, shape index: {}]  }
   0x1   :  { %13 = vsyncpa [#allocation4], 0 }
   0x2   :  { %15 = vsyncpa [#allocation4 + $0x1], 0  ;;  %s7231_s24 = smov 0   ;;  %s7233_s25 = smov 0  }
   0x3   :  { %s7235_s26 = smov 0   ;;  %s7237_s27 = smov 0  }
   0x4 LB: > { %s7252_s28 = sadd.s32 4294967295, %s7162_s27   ;;  %s6914_s29 = sadd.s32 4294967294, %s7162_s27   ;;  %s7162_s27 = sphi %s7237_s27, %s13596_s27   ;;  %s7158_s26 = sphi %s7235_s26, %s13595_s26   ;;  %s7154_s25 = sphi %s7233_s25, %s13594_s25   ;;  %s7150_s24 = sphi %s7231_s24, %s13593_s24  }
   0x5   : > { %s7256_s30 = sadd.s32 1, %s7162_s27   ;;  %s185_s8 = sadd.s32 1, %s7158_s26 }
   0x6   : > { %s182_s9 = ssub.s32 %s7162_s27, %s7256_s30  ;;  %p195_p0 = scmp.ne.s32.totalorder %s7158_s26, %s7154_s25 }
   0x7   : > { %p183_p1 = scmp.eq.s32.totalorder %s182_s9, 0  ;;  %p196_p2 = scmp.eq.s32.totalorder %s7252_s28, 1 }
   0x8   : > { %p201_p3 = scmp.ne.s32.totalorder %s7154_s25, %s7150_s24  ;;  %p202_p4 = scmp.eq.s32.totalorder %s6914_s29, 1 }
   0x9   : > { %s7267_s10 = scalar_select %p183_p1, %s7158_s26, %s185_s8  }
   0xa   : > { %p7269_p5 = por %p196_p2, %p195_p0  ;;  %p7273_p6 = por %p202_p4, %p201_p3 }
   0xb   : > { %p6915_p7 = scmp.ge.s32.totalorder %s7162_s27, 1  ;;  %p209_p8 = scmp.lt.s32.totalorder %s7162_s27, 3 }
   0xc   : > { %p6975_p9 = scmp.eq.s32.totalorder %s7252_s28, 0  ;;  %s234_s16 = sshll.u32 %s12544_s6, 4  ;;  %s235_s16 = int_to_ptr.vmem [resolvable:$true] %s234_s16 }
   0xd   : > { %p7280_p10 = pnand %p6915_p7, %p209_p8  ;;  %s7083_s17 = scalar_lea.vmem %s235_s16, 16 }
   0xe   : > { %p7084_p13 = scmp.ne.s32.totalorder %s235_s16, %s7083_s17  ;;  %p7091_p3 = scmp.lt.s32.totalorder %s235_s16, %s235_s16 }
   0xf   : > { %p6967_p11 = pneg %p7280_p10  ;;  %p7092_p4 = scmp.lt.s32.totalorder %s7083_s17, %s7083_s17 }
  0x11   : > { %p6968_p12 = pnand %p6975_p9, %p6967_p11  ;;  %p7093_p7 = por %p7092_p4, %p7091_p3 }
  0x13   : > { %p7085_p0 = pneg %p6968_p12 }
  0x15   : > { %p7086_p1 = pnand %p7085_p0, %p7084_p13 }
  0x17   : > { %p7087_p2 = pneg %p7086_p1 }
  0x19   : > { %p7094_p8 = pnand %p7093_p7, %p7087_p2 }
  0x1b   : > { %7097 = shalt.err (!%p7094_p8)
}
  0x1c   : > { %s7164_s18 = smov [#allocation3]   ;;  %263 = sbr.rel (%p7280_p10) target bundleno = 2926 (0xb6e), region = 48 }
  0x1d   : > { %6970 = dma.vmem_to_smem (!%p6968_p12), %s235_s16, 16, %s7164_s18, [#allocation5]  }
  0x21   : > { %7141 = dma.done.wait (%p6975_p9), [#allocation5], 16  }
  0x22   : > { %7143 = vsyncadd (%p6975_p9), [#allocation5], 4294967280 }
  0x23   : > { %269 = sfence }
  0x24   : > { %p301_p11 = scmp.lt.s32.totalorder %s7252_s28, 1  ;;  %v7165_v0 = vmov 0   ;;  %v503_v1 = vld [vmem:[%s12542_s4 + $0x10] sm:$0xff]  ;;  %v504_v2 = vld [vmem:[%s12542_s4 + $0x18] sm:$0xff]  ;;  %v487_v3 = vld [vmem:[%s12542_s4] sm:$0xff]  ;;  %vm340_vm0 = vcmask 130048   ;;  %v650_v43 = vlaneseq }
  0x25   : > { %379 = vmatprep.mubr.bf16.mxu1 %v7165_v0  ;;  %7037 = vset.pattern.permute.xlu1 %v7165_v0  ;;  %v488_v4 = vld [vmem:[%s12542_s4 + $0x8] sm:$0xff]  ;;  %v7041_v6 = vld [vmem:[%s12540_s2] sm:$0xff]   ;;  %v7166_v41 = vmov 1966171168   ;;  %vm931_vm1 = vcmask 122880   ;;  %s7168_s29 = smov 96  }
  0x26   : > { %s302_s19 = scalar_select %p301_p11, %s7252_s28, 1  ;;  %7036 = vset.pattern.permute.xlu0 %v7165_v0  ;;  %596 = vmatprep.mubr.bf16.mxu0 %v7165_v0  ;;  %v519_v10 = vld [vmem:[%s12542_s4 + $0x20] sm:$0xff]  ;;  %v7045_v11 = vld [vmem:[%s12540_s2 + $0x8] sm:$0xff]   ;;  %v648_v42 = vunpack.c.l.s4 %v7166_v41  ;;  %v651_v45 = vshrl.u32 %v650_v43, 7  ;;  %vm4382_vm2 = vcmask 1040384   ;;  %vm4066_vm3 = vcmask 1041408  }
  0x27   : > { %507 = vperm.xlu1 %7037, %v503_v1   ;;  %491 = vperm.xlu0 %7036, %v487_v3   ;;  %v7046_v12 = vld [vmem:[%s12541_s3] sm:$0xff]   ;;  %v7047_v13 = vld [vmem:[%s12541_s3 + $0x8] sm:$0xff]   ;;  %s7169_s9 = smov 80   ;;  %s7171_s13 = smov 48   ;;  %vm4480_vm4 = vcmask 1042432   ;;  %vm5737_vm5 = vcmask 7168  }
  0x28   : > { %s6958_s20 = sshll.u32 %s302_s19, 4  ;;  %v520_v14 = vld [vmem:[%s12542_s4 + $0x28] sm:$0xff]  ;;  %v7048_v39 = vld [vmem:[%s12543_s5] sm:$0xff]   ;;  %v649_v44 = vunpack.c.0.s8 %v648_v42  ;;  %v7372_v50 = vsub.s32 0, %v651_v45  ;;  %s7172_s16 = smov 32   ;;  %vm5835_vm6 = vcmask 15360  }
  0x29   : > { %s305_s8 = scalar_lea.vmem %s12538_s0, %s6958_s20  ;;  %s310_s14 = scalar_lea.vmem %s12539_s1, %s6958_s20  ;;  %v7049_v40 = vld [vmem:[%s12543_s5 + $0x8] sm:$0xff]   ;;  %vm6031_vm7 = vcmask 154624   ;;  %vm5933_vm8 = vcmask 146432   ;;  %vm6162_vm9 = vcmask 1046528   ;;  %vm6217_vm10 = vcmask 1045504  }
  0x2a   : > { %v7038_v5 = vld [vmem:[%s305_s8 + $0x4] ss:$8 sps:$4 sm:$0xff]   ;;  %v7040_v7 = vld [vmem:[%s305_s8] ss:$8 sps:$4 sm:$0xff]   ;;  %v7364_v46 = vsub.s32 %v649_v44, %v651_v45  ;;  %12741 = vst [vmem:[#allocation14_spill] sm:$0xff] %v7372_v50  ;;  %s7167_s20 = smov 112  }
  0x2b   : > { %361 = vmatprep.subr.bf16.mxu1 %v7038_v5  ;;  %v7042_v8 = vld [vmem:[%s310_s14] ss:$8 sps:$4 sm:$0xff]   ;;  %v7044_v9 = vld [vmem:[%s310_s14 + $0x4] ss:$8 sps:$4 sm:$0xff]   ;;  %512 = vperm.xlu1 %7037, %v504_v2   ;;  %s7170_s8 = smov 64   ;;  %s7173_s17 = smov 16  }
  0x2c   : > { %362 = vmatpush1.bf16.msra.mxu1 %v7040_v7  ;;  %496 = vperm.xlu0 %7036, %v488_v4   ;;  %s7174_s18 = smov 126   ;;  %s7175_s19 = smov 2   ;;  %vm6464_vm11 = vcmask 1044480   ;;  %vm6541_vm12 = vcmask 1043456   ;;  %vm6743_vm13 = vcmask 261120   ;;  %vm6745_vm14 = vcmask 392192  }
  0x2d   : > { %444 = vmatprep.subr.bf16.mxu1 %v7044_v9  ;;  %s7176_s21 = smov 4   ;;  %s7177_s22 = smov 6   ;;  %vm6747_vm15 = vcmask 523264  }
  0x2e   : > { %s7178_s23 = smov 127   ;;  %s7182_s14 = smov 15  }
  0x2f   : > { %6929 = vmatmul.mubr.msk.bf16.vlgmr.msra.gmra.mxu1 %vm340_vm0, %v7041_v6  ;;  %528 = vperm.xlu1 %7037, %v520_v14   ;;  %s7183_s15 = smov 31  }
  0x30   : > { %445 = vmatpush1.bf16.msra.mxu1 %v7042_v8  ;;  %389 = vmatprep.mubr.bf16.mxu1 %v7165_v0 }
  0x31   : > { %523 = vperm.xlu0 %7036, %v519_v10  }
  0x37   : > { %6930 = vmatmul.mubr.msk.bf16.gmra.mxu1 %vm340_vm0, %v7045_v11 }
  0x38   : > { %462 = vmatprep.mubr.bf16.mxu1 %v7165_v0 }
  0x3f   : > { %6935 = vmatmul.mubr.msk.bf16.vlgmr.msra.gmra.mxu1 %vm340_vm0, %v7046_v12 }
  0x40   : > { %472 = vmatprep.mubr.bf16.mxu1 %v7165_v0 }
  0x47   : > { %6936 = vmatmul.mubr.msk.bf16.gmra.mxu1 %vm340_vm0, %v7047_v13 }
  0xa2   : > { %v492_v24 = vpop.permute.xlu0 %491 }
  0xa7   : > { %v497_v31 = vpop.permute.xlu0 %496 }
  0xef   : > { %v381_v15 = vpop.f32.mrf.mxu1 }
  0xf1   : > { %v383_v16 = vpop.f32.mrf.mxu1 }
  0xf3   : > { %v385_v17 = vpop.f32.mrf.mxu1 }
  0xf5   : > { %v387_v18 = vpop.f32.mrf.mxu1 }
  0xf7   : > { %v7346_v19 = vpop.f32.mrf.mxu1 }
  0xf8   : > { %12736 = vst [vmem:[#allocation9_spill] sm:$0xff] %v7346_v19 }
  0xf9   : > { %v7348_v20 = vpop.f32.mrf.mxu1 }
  0xfa   : > { %12737 = vst [vmem:[#allocation10_spill] sm:$0xff] %v7348_v20 }
  0xfb   : > { %v7350_v21 = vpop.f32.mrf.mxu1 }
  0xfc   : > { %12738 = vst [vmem:[#allocation11_spill] sm:$0xff] %v7350_v21 }
  0xfd   : > { %v7352_v22 = vpop.f32.mrf.mxu1 }
  0xfe   : > { %12739 = vst [vmem:[#allocation12_spill] sm:$0xff] %v7352_v22 }
  0xff   : > { %v464_v23 = vpop.f32.mrf.mxu1 }
 0x100   : > { %v483_v29 = vadd.f32 %v464_v23, %v381_v15 }
 0x101   : > { %v466_v25 = vpop.f32.mrf.mxu1 }
 0x102   : > { %v484_v27 = vadd.f32 %v466_v25, %v383_v16  ;;  %v499_v36 = vadd.f32 %v492_v24, %v483_v29 }
 0x103   : > { %v468_v26 = vpop.f32.mrf.mxu1 }
 0x104   : > { %v485_v28 = vadd.f32 %v468_v26, %v385_v17  ;;  %v500_v34 = vadd.f32 %v492_v24, %v484_v27 }
 0x105   : > { %v470_v30 = vpop.f32.mrf.mxu1 }
 0x106   : > { %v486_v32 = vadd.f32 %v470_v30, %v387_v18  ;;  %v501_v33 = vadd.f32 %v497_v31, %v485_v28 }
 0x108   : > { %v502_v35 = vadd.f32 %v497_v31, %v486_v32  ;;  %v540_v38 = vpack.c.bf16 %v501_v33, %v499_v36 }
 0x10a   : > { %v541_v37 = vpack.c.bf16 %v502_v35, %v500_v34 }
 0x10c   : > { %578 = vmatprep.subr.bf16.mxu0 %v541_v37 }
 0x10d   : > { %579 = vmatpush1.bf16.msra.mxu0 %v540_v38 }
 0x110   : > { %6940 = vmatmul.mubr.msk.bf16.vlgmr.msra.gmra.mxu0 %vm340_vm0, %v7048_v39 }
 0x111   : > { %606 = vmatprep.mubr.bf16.mxu0 %v7165_v0 }
 0x118   : > { %6941 = vmatmul.mubr.msk.bf16.gmra.mxu0 %vm340_vm0, %v7049_v40 }
 0x119   : > { %616 = vmatprep.mubr.bf16.mxu0 %v7165_v0 }
 0x1d0   : > { %v7366_v47 = vpop.f32.mrf.mxu0 }
 0x1d1   : > { %12740 = vst [vmem:[#allocation13_spill] sm:$0xff] %v7366_v47  ;;  %v646_v48 = vcombine.high %v7366_v47, %v7366_v47  ;;  %v653_v49 = vrot.slane %v7366_v47, %v7364_v46 }
 0x1d2   : > { %v7374_v51 = vpop.f32.mrf.mxu0 }
 0x1d3   : > { %12742 = vst [vmem:[#allocation15_spill] sm:$0xff] %v7374_v51  ;;  %v660_v52 = vrot.slane %v646_v48, %v7364_v46  ;;  %v661_v53 = vcombine.high %v653_v49, %v653_v49  ;;  %v669_v54 = vrot.slane %v653_v49, %v7364_v46  ;;  %v2257_v55 = vcombine.high %v7374_v51, %v7374_v51  ;;  %v7050_v48 = vld [vmem:[%s12543_s5 + $0x10] ss:$0 sps:$4 sm:$0xff]  }
 0x1d4   : > { %v2264_v56 = vrot.slane %v7374_v51, %v7364_v46  ;;  %v602_v57 = vpop.f32.mrf.mxu0  ;;  %6942 = vmatmul.mubr.msk.bf16.gmra.mxu0 %vm340_vm0, %v7050_v48 }
 0x1d5   : > { %v662_v58 = vcombine.high %v660_v52, %v660_v52  ;;  %v7383_v59 = vrot.slane %v660_v52, %v7364_v46  ;;  %v683_v60 = vrot.slane %v661_v53, %v7364_v46  ;;  %v7386_v61 = vcombine.high %v669_v54, %v669_v54 }
 0x1d6   : > { %v7389_v62 = vrot.slane %v669_v54, %v7372_v50  ;;  %v2271_v63 = vrot.slane %v2257_v55, %v7364_v46  ;;  %v2272_v4 = vcombine.high %v2264_v56, %v2264_v56  ;;  %v604_v5 = vpop.f32.mrf.mxu0  ;;  %v7424_v8 = vrot.slane %v2264_v56, %v7364_v46 }
 0x1d7   : > { %v7393_v0 = vrot.slane %v662_v58, %v7364_v46  ;;  %v7397_v1 = vcombine.high %v7383_v59, %v7383_v59  ;;  %v7399_v2 = vcombine.high %v683_v60, %v683_v60  ;;  %933 = vst.msk [vmem:[#allocation2 + $0x10] sm:$0x1] %vm931_vm1, %v683_v60  ;;  %936 = vst.msk [vmem:[#allocation2 + $0x40] sm:$0x1] %vm931_vm1, %v7383_v59 }
 0x1d8   : > { %v7405_v3 = vrot.slane %v683_v60, %v7372_v50  ;;  %934 = vst.msk [vmem:[#allocation2 + $0x20] sm:$0x1] %vm931_vm1, %v7386_v61  ;;  %1132 = vrot.lane.b32.xlu0 %v7389_v62, %s7167_s20  ;;  %v2273_v7 = vcombine.high %v2271_v63, %v2271_v63  ;;  %v7427_v9 = vrot.slane %v2271_v63, %v7364_v46  ;;  %v608_v55 = vpop.f32.mrf.mxu0 }
 0x1d9   : > { %v7413_v6 = vcombine.high %v7393_v0, %v7393_v0  ;;  %935 = vst.msk [vmem:[#allocation2 + $0x30] sm:$0x1] %vm931_vm1, %v7399_v2  ;;  %937 = vst.msk [vmem:[#allocation2 + $0x50] sm:$0x1] %vm931_vm1, %v7393_v0  ;;  %v7430_v10 = vrot.slane %v2272_v4, %v7364_v46  ;;  %v695_v11 = vcombine.high %v602_v57, %v602_v57 }
 0x1da   : > { %938 = vst.msk [vmem:[#allocation2 + $0x60] sm:$0x1] %vm931_vm1, %v7397_v1  ;;  %1134 = vrot.lane.b32.xlu1 %v7405_v3, %s7167_s20  ;;  %v702_v12 = vrot.slane %v602_v57, %v7364_v46  ;;  %v2306_v13 = vcombine.high %v604_v5, %v604_v5  ;;  %v7436_v14 = vrot.slane %v2273_v7, %v7364_v46  ;;  %2546 = vst.msk [vmem:[#allocation2 + $0x48] sm:$0x1] %vm931_vm1, %v7427_v9 }
 0x1db   : > { %939 = vst.msk [vmem:[#allocation2 + $0x70] sm:$0x1] %vm931_vm1, %v7413_v6  ;;  %v7440_v15 = vcombine.high %v7424_v8, %v7424_v8  ;;  %v7444_v16 = vcombine.high %v7427_v9, %v7427_v9  ;;  %v7448_v17 = vcombine.high %v7430_v10, %v7430_v10  ;;  %2543 = vst.msk [vmem:[#allocation2 + $0x18] sm:$0x1] %vm931_vm1, %v7430_v10 }
 0x1dc   : > { %1292 = vrot.lane.b32.xlu0 %v7389_v62, %s7168_s29  ;;  %v709_v18 = vrot.slane %v695_v11, %v7364_v46  ;;  %v7461_v23 = vcombine.high %v7436_v14, %v7436_v14  ;;  %2547 = vst.msk [vmem:[#allocation2 + $0x58] sm:$0x1] %vm931_vm1, %v7436_v14  ;;  %v710_v24 = vcombine.high %v702_v12, %v702_v12 }
 0x1dd   : > { %2544 = vst.msk [vmem:[#allocation2 + $0x28] sm:$0x1] %vm931_vm1, %v7440_v15  ;;  %2545 = vst.msk [vmem:[#allocation2 + $0x38] sm:$0x1] %vm931_vm1, %v7448_v17  ;;  %v7472_v26 = vrot.slane %v702_v12, %v7364_v46  ;;  %v2313_v28 = vrot.slane %v604_v5, %v7364_v46  ;;  %v2320_v29 = vrot.slane %v2306_v13, %v7364_v46 }
 0x1de   : > { %1294 = vrot.lane.b32.xlu1 %v7405_v3, %s7168_s29  ;;  %2548 = vst.msk [vmem:[#allocation2 + $0x68] sm:$0x1] %vm931_vm1, %v7444_v16  ;;  %v711_v25 = vcombine.high %v709_v18, %v709_v18  ;;  %2549 = vst.msk [vmem:[#allocation2 + $0x78] sm:$0x1] %vm931_vm1, %v7461_v23  ;;  %v7477_v27 = vrot.slane %v709_v18, %v7364_v46  ;;  %v7484_v30 = vrot.slane %v710_v24, %v7364_v46 }
 0x1df   : > { %v7491_v32 = vcombine.high %v7472_v26, %v7472_v26  ;;  %940 = vst.msk [vmem:[#allocation2 + $0x80] sm:$0x1] %vm931_vm1, %v7472_v26  ;;  %v2321_v34 = vcombine.high %v2313_v28, %v2313_v28  ;;  %v2322_v35 = vcombine.high %v2320_v29, %v2320_v29  ;;  %v7520_v38 = vrot.slane %v2313_v28, %v7364_v46 }
 0x1e0   : > { %1452 = vrot.lane.b32.xlu0 %v7389_v62, %s7169_s9  ;;  %v7487_v31 = vrot.slane %v711_v25, %v7364_v46  ;;  %v7499_v33 = vcombine.high %v7477_v27, %v7477_v27  ;;  %944 = vst.msk [vmem:[#allocation2 + $0xc0] sm:$0x1] %vm931_vm1, %v7477_v27  ;;  %v7505_v36 = vcombine.high %v7484_v30, %v7484_v30  ;;  %941 = vst.msk [vmem:[#allocation2 + $0x90] sm:$0x1] %vm931_vm1, %v7484_v30 }
 0x1e1   : > { %942 = vst.msk [vmem:[#allocation2 + $0xa0] sm:$0x1] %vm931_vm1, %v7491_v32  ;;  %v7529_v39 = vrot.slane %v2320_v29, %v7364_v46  ;;  %v7534_v40 = vrot.slane %v2321_v34, %v7364_v46  ;;  %v7537_v41 = vrot.slane %v2322_v35, %v7364_v46  ;;  %v7541_v42 = vcombine.high %v7520_v38, %v7520_v38 }
 0x1e2   : > { %1454 = vrot.lane.b32.xlu1 %v7405_v3, %s7169_s9  ;;  %v7509_v37 = vcombine.high %v7487_v31, %v7487_v31  ;;  %945 = vst.msk [vmem:[#allocation2 + $0xd0] sm:$0x1] %vm931_vm1, %v7487_v31  ;;  %946 = vst.msk [vmem:[#allocation2 + $0xe0] sm:$0x1] %vm931_vm1, %v7499_v33  ;;  %v7585_v49 = vrot.slane %v7386_v61, %v7372_v50  ;;  %v7589_v52 = vrot.slane %v7399_v2, %v7372_v50  ;;  %v610_v61 = vpop.f32.mrf.mxu0 }
 0x1e3   : > { %943 = vst.msk [vmem:[#allocation2 + $0xb0] sm:$0x1] %vm931_vm1, %v7505_v36  ;;  %2550 = vst.msk [vmem:[#allocation2 + $0x88] sm:$0x1] %vm931_vm1, %v7520_v38  ;;  %v7547_v43 = vcombine.high %v7529_v39, %v7529_v39  ;;  %v7553_v44 = vcombine.high %v7534_v40, %v7534_v40  ;;  %v7557_v45 = vcombine.high %v7537_v41, %v7537_v41 }
 0x1e4   : > { %1612 = vrot.lane.b32.xlu0 %v7389_v62, %s7170_s8  ;;  %947 = vst.msk [vmem:[#allocation2 + $0xf0] sm:$0x1] %vm931_vm1, %v7509_v37  ;;  %2554 = vst.msk [vmem:[#allocation2 + $0xc8] sm:$0x1] %vm931_vm1, %v7529_v39  ;;  %v7597_v53 = vrot.slane %v7383_v59, %v7372_v50  ;;  %v7601_v54 = vrot.slane %v7393_v0, %v7372_v50  ;;  %v744_v56 = vcombine.high %v608_v55, %v608_v55  ;;  %v612_v28 = vpop.f32.mrf.mxu0 }
 0x1e5   : > { %12743 = vst [vmem:[#allocation16_spill] sm:$0xff] %v7547_v43  ;;  %12744 = vst [vmem:[#allocation17_spill] sm:$0xff] %v7557_v45  ;;  %v751_v57 = vrot.slane %v608_v55, %v7364_v46  ;;  %v2355_v63 = vcombine.high %v610_v61, %v610_v61  ;;  %v2362_v0 = vrot.slane %v610_v61, %v7364_v46 }
 0x1e6   : > { %1614 = vrot.lane.b32.xlu1 %v7405_v3, %s7170_s8  ;;  %2551 = vst.msk [vmem:[#allocation2 + $0x98] sm:$0x1] %vm931_vm1, %v7534_v40  ;;  %2552 = vst.msk [vmem:[#allocation2 + $0xa8] sm:$0x1] %vm931_vm1, %v7541_v42  ;;  %v758_v58 = vrot.slane %v744_v56, %v7364_v46 }
 0x1e7   : > { %2555 = vst.msk [vmem:[#allocation2 + $0xd8] sm:$0x1] %vm931_vm1, %v7537_v41  ;;  %2556 = vst.msk [vmem:[#allocation2 + $0xe8] sm:$0x1] %vm931_vm1, %v7547_v43  ;;  %v759_v59 = vcombine.high %v751_v57, %v751_v57  ;;  %v7614_v60 = vrot.slane %v751_v57, %v7364_v46  ;;  %v2369_v11 = vrot.slane %v2355_v63, %v7364_v46 }
 0x1e8   : > { %1772 = vrot.lane.b32.xlu0 %v7389_v62, %s7171_s13  ;;  %2553 = vst.msk [vmem:[#allocation2 + $0xb8] sm:$0x1] %vm931_vm1, %v7553_v44  ;;  %2557 = vst.msk [vmem:[#allocation2 + $0xf8] sm:$0x1] %vm931_vm1, %v7557_v45  ;;  %v760_v2 = vcombine.high %v758_v58, %v758_v58  ;;  %v7622_v4 = vrot.slane %v758_v58, %v7364_v46  ;;  %v2370_v12 = vcombine.high %v2362_v0, %v2362_v0 }
 0x1e9   : > { %v7625_v5 = vrot.slane %v759_v59, %v7364_v46  ;;  %v7629_v7 = vcombine.high %v7614_v60, %v7614_v60  ;;  %948 = vst.msk [vmem:[#allocation2 + $0x100] sm:$0x1] %vm931_vm1, %v7614_v60  ;;  %v7635_v13 = vrot.slane %v2362_v0, %v7364_v46  ;;  %v2371_v29 = vcombine.high %v2369_v11, %v2369_v11  ;;  %v614_v59 = vpop.f32.mrf.mxu0 }
 0x1ea   : > { %1774 = vrot.lane.b32.xlu1 %v7405_v3, %s7171_s13  ;;  %v7638_v18 = vrot.slane %v760_v2, %v7364_v46  ;;  %v7642_v24 = vcombine.high %v7622_v4, %v7622_v4  ;;  %952 = vst.msk [vmem:[#allocation2 + $0x140] sm:$0x1] %vm931_vm1, %v7622_v4  ;;  %v7657_v34 = vrot.slane %v2369_v11, %v7364_v46 }
 0x1eb   : > { %12745 = vst [vmem:[#allocation18_spill] sm:$0xff] %v7635_v13  ;;  %v7646_v25 = vcombine.high %v7625_v5, %v7625_v5  ;;  %949 = vst.msk [vmem:[#allocation2 + $0x110] sm:$0x1] %vm931_vm1, %v7625_v5  ;;  %v7674_v48 = vrot.slane %v2370_v12, %v7364_v46  ;;  %v7677_v55 = vrot.slane %v2371_v29, %v7364_v46 }
 0x1ec   : > { %1932 = vrot.lane.b32.xlu0 %v7389_v62, %s7172_s16  ;;  %950 = vst.msk [vmem:[#allocation2 + $0x120] sm:$0x1] %vm931_vm1, %v7629_v7  ;;  %12746 = vst [vmem:[#allocation19_spill] sm:$0xff] %v7657_v34  ;;  %v7665_v35 = vcombine.high %v7638_v18, %v7638_v18  ;;  %v7681_v56 = vcombine.high %v7635_v13, %v7635_v13  ;;  %v7685_v57 = vcombine.high %v7657_v34, %v7657_v34 }
 0x1ed   : > { %2558 = vst.msk [vmem:[#allocation2 + $0x108] sm:$0x1] %vm931_vm1, %v7635_v13  ;;  %951 = vst.msk [vmem:[#allocation2 + $0x130] sm:$0x1] %vm931_vm1, %v7646_v25  ;;  %v793_v58 = vcombine.high %v612_v28, %v612_v28  ;;  %v7695_v61 = vcombine.high %v7674_v48, %v7674_v48  ;;  %v7699_v63 = vcombine.high %v7677_v55, %v7677_v55 }
 0x1ee   : > { %1934 = vrot.lane.b32.xlu1 %v7405_v3, %s7172_s16  ;;  %953 = vst.msk [vmem:[#allocation2 + $0x150] sm:$0x1] %vm931_vm1, %v7638_v18  ;;  %954 = vst.msk [vmem:[#allocation2 + $0x160] sm:$0x1] %vm931_vm1, %v7642_v24  ;;  %v800_v0 = vrot.slane %v612_v28, %v7364_v46  ;;  %v2404_v11 = vcombine.high %v614_v59, %v614_v59  ;;  %v2411_v12 = vrot.slane %v614_v59, %v7364_v46 }
 0x1ef   : > { %12747 = vst [vmem:[#allocation20_spill] sm:$0xff] %v7674_v48  ;;  %12748 = vst [vmem:[#allocation21_spill] sm:$0xff] %v7677_v55  ;;  %v807_v2 = vrot.slane %v793_v58, %v7364_v46  ;;  %v8229_v43 = vrot.slane %v7665_v35, %v7372_v50 }
 0x1f0   : > { %1136 = vrot.lane.b32.xlu0 %v7585_v49, %s7167_s20  ;;  %12749 = vst [vmem:[#allocation22_spill] sm:$0xff] %v7681_v56  ;;  %12750 = vst [vmem:[#allocation23_spill] sm:$0xff] %v7685_v57  ;;  %v808_v29 = vcombine.high %v800_v0, %v800_v0  ;;  %v7719_v20 = vrot.slane %v800_v0, %v7364_v46  ;;  %v2418_v28 = vrot.slane %v2404_v11, %v7364_v46 }
 0x1f1   : > { %2562 = vst.msk [vmem:[#allocation2 + $0x148] sm:$0x1] %vm931_vm1, %v7657_v34  ;;  %955 = vst.msk [vmem:[#allocation2 + $0x170] sm:$0x1] %vm931_vm1, %v7665_v35  ;;  %v809_v22 = vcombine.high %v807_v2, %v807_v2  ;;  %v7722_v21 = vrot.slane %v807_v2, %v7364_v46  ;;  %v2419_v58 = vcombine.high %v2411_v12, %v2411_v12 }
 0x1f2   : > { %1138 = vrot.lane.b32.xlu1 %v7589_v52, %s7167_s20  ;;  %12751 = vst [vmem:[#allocation24_spill] sm:$0xff] %v7695_v61  ;;  %12752 = vst [vmem:[#allocation25_spill] sm:$0xff] %v7699_v63  ;;  %v7728_v19 = vrot.slane %v2411_v12, %v7364_v46  ;;  %v7733_v59 = vrot.slane %v808_v29, %v7364_v46  ;;  %v7740_v2 = vcombine.high %v7719_v20, %v7719_v20 }
 0x1f3   : > { %2559 = vst.msk [vmem:[#allocation2 + $0x118] sm:$0x1] %vm931_vm1, %v7674_v48  ;;  %2560 = vst.msk [vmem:[#allocation2 + $0x128] sm:$0x1] %vm931_vm1, %v7681_v56  ;;  %v7736_v0 = vrot.slane %v809_v22, %v7364_v46  ;;  %v7744_v11 = vcombine.high %v7722_v21, %v7722_v21  ;;  %v2420_v12 = vcombine.high %v2418_v28, %v2418_v28 }
 0x1f4   : > { %1140 = vrot.lane.b32.xlu0 %v7597_v53, %s7167_s20  ;;  %2563 = vst.msk [vmem:[#allocation2 + $0x158] sm:$0x1] %vm931_vm1, %v7677_v55  ;;  %2564 = vst.msk [vmem:[#allocation2 + $0x168] sm:$0x1] %vm931_vm1, %v7685_v57  ;;  %v7751_v29 = vrot.slane %v2418_v28, %v7364_v46  ;;  %v7757_v22 = vcombine.high %v7733_v59, %v7733_v59  ;;  %v7774_v28 = vrot.slane %v2419_v58, %v7364_v46 }
 0x1f5   : > { %2561 = vst.msk [vmem:[#allocation2 + $0x138] sm:$0x1] %vm931_vm1, %v7695_v61  ;;  %2565 = vst.msk [vmem:[#allocation2 + $0x178] sm:$0x1] %vm931_vm1, %v7699_v63  ;;  %v7761_v51 = vcombine.high %v7736_v0, %v7736_v0  ;;  %v7777_v47 = vrot.slane %v2420_v12, %v7364_v46  ;;  %v7789_v63 = vcombine.high %v7728_v19, %v7728_v19 }
 0x1f6   : > { %1142 = vrot.lane.b32.xlu1 %v7601_v54, %s7167_s20  ;;  %12753 = vst [vmem:[#allocation26_spill] sm:$0xff] %v7728_v19  ;;  %956 = vst.msk [vmem:[#allocation2 + $0x180] sm:$0x1] %vm931_vm1, %v7719_v20  ;;  %v7793_v58 = vcombine.high %v7751_v29, %v7751_v29  ;;  %v7797_v12 = vcombine.high %v7774_v28, %v7774_v28  ;;  %v8243_v35 = vrot.slane %v7733_v59, %v7372_v50 }
 0x1f7   : > { %960 = vst.msk [vmem:[#allocation2 + $0x1c0] sm:$0x1] %vm931_vm1, %v7722_v21  ;;  %12754 = vst [vmem:[#allocation27_spill] sm:$0xff] %v7751_v29  ;;  %v7801_v57 = vcombine.high %v7777_v47, %v7777_v47 }
 0x1f8   : > { %1296 = vrot.lane.b32.xlu0 %v7585_v49, %s7168_s29  ;;  %2566 = vst.msk [vmem:[#allocation2 + $0x188] sm:$0x1] %vm931_vm1, %v7728_v19  ;;  %957 = vst.msk [vmem:[#allocation2 + $0x190] sm:$0x1] %vm931_vm1, %v7733_v59 }
 0x1f9   : > { %958 = vst.msk [vmem:[#allocation2 + $0x1a0] sm:$0x1] %vm931_vm1, %v7740_v2  ;;  %961 = vst.msk [vmem:[#allocation2 + $0x1d0] sm:$0x1] %vm931_vm1, %v7736_v0 }
 0x1fa   : > { %1298 = vrot.lane.b32.xlu1 %v7589_v52, %s7168_s29  ;;  %962 = vst.msk [vmem:[#allocation2 + $0x1e0] sm:$0x1] %vm931_vm1, %v7744_v11  ;;  %12755 = vst [vmem:[#allocation28_spill] sm:$0xff] %v7774_v28 }
 0x1fb   : > { %12756 = vst [vmem:[#allocation29_spill] sm:$0xff] %v7777_v47  ;;  %2570 = vst.msk [vmem:[#allocation2 + $0x1c8] sm:$0x1] %vm931_vm1, %v7751_v29  ;;  %v7849_v29 = vrot.slane %v7484_v30, %v7372_v50 }
 0x1fc   : > { %1300 = vrot.lane.b32.xlu0 %v7597_v53, %s7168_s29  ;;  %959 = vst.msk [vmem:[#allocation2 + $0x1b0] sm:$0x1] %vm931_vm1, %v7757_v22  ;;  %963 = vst.msk [vmem:[#allocation2 + $0x1f0] sm:$0x1] %vm931_vm1, %v7761_v51 }
 0x1fd   : > { %12757 = vst [vmem:[#allocation30_spill] sm:$0xff] %v7789_v63  ;;  %12758 = vst [vmem:[#allocation31_spill] sm:$0xff] %v7793_v58 }
 0x1fe   : > { %1302 = vrot.lane.b32.xlu1 %v7601_v54, %s7168_s29  ;;  %12759 = vst [vmem:[#allocation32_spill] sm:$0xff] %v7797_v12  ;;  %12760 = vst [vmem:[#allocation33_spill] sm:$0xff] %v7801_v57 }
 0x1ff   : > { %2567 = vst.msk [vmem:[#allocation2 + $0x198] sm:$0x1] %vm931_vm1, %v7774_v28  ;;  %2571 = vst.msk [vmem:[#allocation2 + $0x1d8] sm:$0x1] %vm931_vm1, %v7777_v47  ;;  %v7845_v47 = vrot.slane %v7472_v26, %v7372_v50  ;;  %v7891_v26 = vpop.permute.xlu0 %523 }
 0x200   : > { %1456 = vrot.lane.b32.xlu0 %v7585_v49, %s7169_s9  ;;  %2568 = vst.msk [vmem:[#allocation2 + $0x1a8] sm:$0x1] %vm931_vm1, %v7789_v63  ;;  %2572 = vst.msk [vmem:[#allocation2 + $0x1e8] sm:$0x1] %vm931_vm1, %v7793_v58  ;;  %v7837_v58 = vrot.slane %v7413_v6, %v7372_v50 }
 0x201   : > { %2569 = vst.msk [vmem:[#allocation2 + $0x1b8] sm:$0x1] %vm931_vm1, %v7797_v12  ;;  %2573 = vst.msk [vmem:[#allocation2 + $0x1f8] sm:$0x1] %vm931_vm1, %v7801_v57  ;;  %v7833_v57 = vrot.slane %v7397_v1, %v7372_v50  ;;  %v7877_v1 = vpop.permute.xlu1 %507 }
 0x202   : > { %1458 = vrot.lane.b32.xlu1 %v7589_v52, %s7169_s9  ;;  %12761 = vst [vmem:[#allocation34_spill] sm:$0xff] %v7877_v1  ;;  %12763 = vst [vmem:[#allocation36_spill] sm:$0xff] %v7891_v26  ;;  %v7906_v26 = vrot.slane %v7491_v32, %v7372_v50 }
 0x204   : > { %1460 = vrot.lane.b32.xlu0 %v7597_v53, %s7169_s9 }
 0x205   : > { %v7885_v6 = vpop.permute.xlu1 %512 }
 0x206   : > { %1462 = vrot.lane.b32.xlu1 %v7601_v54, %s7169_s9  ;;  %12762 = vst [vmem:[#allocation35_spill] sm:$0xff] %v7885_v6  ;;  %v7910_v6 = vrot.slane %v7505_v36, %v7372_v50 }
 0x208   : > { %1616 = vrot.lane.b32.xlu0 %v7585_v49, %s7170_s8 }
 0x209   : > { %v7893_v30 = vpop.permute.xlu1 %528 }
 0x20a   : > { %1618 = vrot.lane.b32.xlu1 %v7589_v52, %s7170_s8  ;;  %12764 = vst [vmem:[#allocation37_spill] sm:$0xff] %v7893_v30 }
 0x20c   : > { %1620 = vrot.lane.b32.xlu0 %v7597_v53, %s7170_s8 }
 0x20e   : > { %1622 = vrot.lane.b32.xlu1 %v7601_v54, %s7170_s8 }
 0x210   : > { %1776 = vrot.lane.b32.xlu0 %v7585_v49, %s7171_s13 }
 0x212   : > { %1778 = vrot.lane.b32.xlu1 %v7589_v52, %s7171_s13 }
 0x214   : > { %1780 = vrot.lane.b32.xlu0 %v7597_v53, %s7171_s13 }
 0x216   : > { %1782 = vrot.lane.b32.xlu1 %v7601_v54, %s7171_s13 }
 0x218   : > { %1936 = vrot.lane.b32.xlu0 %v7585_v49, %s7172_s16 }
 0x21a   : > { %1938 = vrot.lane.b32.xlu1 %v7589_v52, %s7172_s16 }
 0x21c   : > { %1940 = vrot.lane.b32.xlu0 %v7597_v53, %s7172_s16 }
 0x21e   : > { %1942 = vrot.lane.b32.xlu1 %v7601_v54, %s7172_s16 }
 0x220   : > { %1144 = vrot.lane.b32.xlu0 %v7833_v57, %s7167_s20 }
 0x222   : > { %1146 = vrot.lane.b32.xlu1 %v7837_v58, %s7167_s20 }
 0x224   : > { %1148 = vrot.lane.b32.xlu0 %v7845_v47, %s7167_s20 }
 0x226   : > { %1150 = vrot.lane.b32.xlu1 %v7849_v29, %s7167_s20 }
 0x228   : > { %1304 = vrot.lane.b32.xlu0 %v7833_v57, %s7168_s29 }
 0x22a   : > { %1306 = vrot.lane.b32.xlu1 %v7837_v58, %s7168_s29 }
 0x22c   : > { %1308 = vrot.lane.b32.xlu0 %v7845_v47, %s7168_s29 }
 0x22e   : > { %1310 = vrot.lane.b32.xlu1 %v7849_v29, %s7168_s29 }
 0x230   : > { %1464 = vrot.lane.b32.xlu0 %v7833_v57, %s7169_s9 }
 0x232   : > { %1466 = vrot.lane.b32.xlu1 %v7837_v58, %s7169_s9 }
 0x234   : > { %1468 = vrot.lane.b32.xlu0 %v7845_v47, %s7169_s9 }
 0x236   : > { %1470 = vrot.lane.b32.xlu1 %v7849_v29, %s7169_s9 }
 0x238   : > { %1624 = vrot.lane.b32.xlu0 %v7833_v57, %s7170_s8 }
 0x23a   : > { %1626 = vrot.lane.b32.xlu1 %v7837_v58, %s7170_s8 }
 0x23c   : > { %1628 = vrot.lane.b32.xlu0 %v7845_v47, %s7170_s8 }
 0x23e   : > { %1630 = vrot.lane.b32.xlu1 %v7849_v29, %s7170_s8 }
 0x240   : > { %1784 = vrot.lane.b32.xlu0 %v7833_v57, %s7171_s13 }
 0x242   : > { %1786 = vrot.lane.b32.xlu1 %v7837_v58, %s7171_s13 }
 0x244   : > { %1788 = vrot.lane.b32.xlu0 %v7845_v47, %s7171_s13 }
 0x246   : > { %1790 = vrot.lane.b32.xlu1 %v7849_v29, %s7171_s13 }
 0x248   : > { %1944 = vrot.lane.b32.xlu0 %v7833_v57, %s7172_s16 }
 0x24a   : > { %1946 = vrot.lane.b32.xlu1 %v7837_v58, %s7172_s16  ;;  %v1133_v1 = vpop.permute.xlu0 %1132 }
 0x24b   : > { %v7923_v1 = vrot.slane %v7487_v31, %v7372_v50 }
 0x24c   : > { %v1135_v12 = vpop.permute.xlu1 %1134  ;;  %1948 = vrot.lane.b32.xlu0 %v7845_v47, %s7172_s16 }
 0x24d   : > { %1253 = vst.msk [vmem:[#allocation2 + $0x11] sm:$0x1] %vm931_vm1, %v1135_v12  ;;  %v7919_v12 = vrot.slane %v7477_v27, %v7372_v50 }
 0x24e   : > { %1950 = vrot.lane.b32.xlu1 %v7849_v29, %s7172_s16  ;;  %v1293_v30 = vpop.permute.xlu0 %1292 }
 0x250   : > { %v1295_v63 = vpop.permute.xlu1 %1294  ;;  %1152 = vrot.lane.b32.xlu0 %v7906_v26, %s7167_s20 }
 0x251   : > { %1413 = vst.msk [vmem:[#allocation2 + $0x12] sm:$0x1] %vm931_vm1, %v1295_v63 }
 0x252   : > { %1154 = vrot.lane.b32.xlu1 %v7910_v6, %s7167_s20  ;;  %v1453_v32 = vpop.permute.xlu0 %1452 }
 0x254   : > { %v1455_v36 = vpop.permute.xlu1 %1454  ;;  %1156 = vrot.lane.b32.xlu0 %v7919_v12, %s7167_s20 }
 0x255   : > { %1573 = vst.msk [vmem:[#allocation2 + $0x13] sm:$0x1] %vm931_vm1, %v1455_v36 }
 0x256   : > { %1158 = vrot.lane.b32.xlu1 %v7923_v1, %s7167_s20  ;;  %v1613_v63 = vpop.permute.xlu0 %1612 }
 0x258   : > { %v1615_v30 = vpop.permute.xlu1 %1614  ;;  %1312 = vrot.lane.b32.xlu0 %v7906_v26, %s7168_s29 }
 0x259   : > { %1733 = vst.msk [vmem:[#allocation2 + $0x14] sm:$0x1] %vm931_vm1, %v1615_v30 }
 0x25a   : > { %1314 = vrot.lane.b32.xlu1 %v7910_v6, %s7168_s29  ;;  %v1773_v27 = vpop.permute.xlu0 %1772 }
 0x25c   : > { %v1775_v31 = vpop.permute.xlu1 %1774  ;;  %1316 = vrot.lane.b32.xlu0 %v7919_v12, %s7168_s29 }
 0x25d   : > { %1893 = vst.msk [vmem:[#allocation2 + $0x15] sm:$0x1] %vm931_vm1, %v1775_v31 }
 0x25e   : > { %1318 = vrot.lane.b32.xlu1 %v7923_v1, %s7168_s29  ;;  %v1933_v32 = vpop.permute.xlu0 %1932 }
 0x260   : > { %v1935_v36 = vpop.permute.xlu1 %1934  ;;  %1472 = vrot.lane.b32.xlu0 %v7906_v26, %s7169_s9 }
 0x261   : > { %2053 = vst.msk [vmem:[#allocation2 + $0x16] sm:$0x1] %vm931_vm1, %v1935_v36 }
 0x262   : > { %1474 = vrot.lane.b32.xlu1 %v7910_v6, %s7169_s9  ;;  %v1137_v63 = vpop.permute.xlu0 %1136 }
 0x263   : > { %1254 = vst.msk [vmem:[#allocation2 + $0x21] sm:$0x1] %vm931_vm1, %v1137_v63 }
 0x264   : > { %v1139_v30 = vpop.permute.xlu1 %1138  ;;  %1476 = vrot.lane.b32.xlu0 %v7919_v12, %s7169_s9 }
 0x265   : > { %1255 = vst.msk [vmem:[#allocation2 + $0x31] sm:$0x1] %vm931_vm1, %v1139_v30 }
 0x266   : > { %1478 = vrot.lane.b32.xlu1 %v7923_v1, %s7169_s9  ;;  %v1141_v27 = vpop.permute.xlu0 %1140 }
 0x267   : > { %1256 = vst.msk [vmem:[#allocation2 + $0x41] sm:$0x1] %vm931_vm1, %v1141_v27 }
 0x268   : > { %v1143_v31 = vpop.permute.xlu1 %1142  ;;  %1632 = vrot.lane.b32.xlu0 %v7906_v26, %s7170_s8 }
 0x269   : > { %1257 = vst.msk [vmem:[#allocation2 + $0x51] sm:$0x1] %vm931_vm1, %v1143_v31 }
 0x26a   : > { %1634 = vrot.lane.b32.xlu1 %v7910_v6, %s7170_s8  ;;  %v1297_v32 = vpop.permute.xlu0 %1296 }
 0x26b   : > { %1414 = vst.msk [vmem:[#allocation2 + $0x22] sm:$0x1] %vm931_vm1, %v1297_v32 }
 0x26c   : > { %v1299_v36 = vpop.permute.xlu1 %1298  ;;  %1636 = vrot.lane.b32.xlu0 %v7919_v12, %s7170_s8 }
 0x26d   : > { %1415 = vst.msk [vmem:[#allocation2 + $0x32] sm:$0x1] %vm931_vm1, %v1299_v36 }
 0x26e   : > { %1638 = vrot.lane.b32.xlu1 %v7923_v1, %s7170_s8  ;;  %v1301_v63 = vpop.permute.xlu0 %1300 }
 0x26f   : > { %1416 = vst.msk [vmem:[#allocation2 + $0x42] sm:$0x1] %vm931_vm1, %v1301_v63 }
 0x270   : > { %v1303_v30 = vpop.permute.xlu1 %1302  ;;  %1792 = vrot.lane.b32.xlu0 %v7906_v26, %s7171_s13 }
 0x271   : > { %1417 = vst.msk [vmem:[#allocation2 + $0x52] sm:$0x1] %vm931_vm1, %v1303_v30 }
 0x272   : > { %1794 = vrot.lane.b32.xlu1 %v7910_v6, %s7171_s13  ;;  %v1457_v27 = vpop.permute.xlu0 %1456 }
 0x273   : > { %1574 = vst.msk [vmem:[#allocation2 + $0x23] sm:$0x1] %vm931_vm1, %v1457_v27  ;;  %v7989_v27 = vrot.slane %v7499_v33, %v7372_v50  ;;  %v8005_v33 = vrot.slane %v7625_v5, %v7372_v50 }
 0x274   : > { %v1459_v31 = vpop.permute.xlu1 %1458  ;;  %1796 = vrot.lane.b32.xlu0 %v7919_v12, %s7171_s13 }
 0x275   : > { %1575 = vst.msk [vmem:[#allocation2 + $0x33] sm:$0x1] %vm931_vm1, %v1459_v31 }
 0x276   : > { %1798 = vrot.lane.b32.xlu1 %v7923_v1, %s7171_s13  ;;  %v1461_v32 = vpop.permute.xlu0 %1460 }
 0x277   : > { %1576 = vst.msk [vmem:[#allocation2 + $0x43] sm:$0x1] %vm931_vm1, %v1461_v32  ;;  %v7993_v32 = vrot.slane %v7509_v37, %v7372_v50 }
 0x278   : > { %v1463_v36 = vpop.permute.xlu1 %1462  ;;  %1952 = vrot.lane.b32.xlu0 %v7906_v26, %s7172_s16 }
 0x279   : > { %1577 = vst.msk [vmem:[#allocation2 + $0x53] sm:$0x1] %vm931_vm1, %v1463_v36 }
 0x27a   : > { %1954 = vrot.lane.b32.xlu1 %v7910_v6, %s7172_s16  ;;  %v1617_v63 = vpop.permute.xlu0 %1616 }
 0x27b   : > { %1734 = vst.msk [vmem:[#allocation2 + $0x24] sm:$0x1] %vm931_vm1, %v1617_v63  ;;  %v7998_v63 = vrot.slane %v7614_v60, %v7372_v50 }
 0x27c   : > { %v1619_v30 = vpop.permute.xlu1 %1618  ;;  %1956 = vrot.lane.b32.xlu0 %v7919_v12, %s7172_s16 }
 0x27d   : > { %1735 = vst.msk [vmem:[#allocation2 + $0x34] sm:$0x1] %vm931_vm1, %v1619_v30 }
 0x27e   : > { %1958 = vrot.lane.b32.xlu1 %v7923_v1, %s7172_s16  ;;  %v1621_v31 = vpop.permute.xlu0 %1620 }
 0x27f   : > { %1736 = vst.msk [vmem:[#allocation2 + $0x44] sm:$0x1] %vm931_vm1, %v1621_v31 }
 0x280   : > { %v1623_v36 = vpop.permute.xlu1 %1622  ;;  %1160 = vrot.lane.b32.xlu0 %v7989_v27, %s7167_s20 }
 0x281   : > { %1737 = vst.msk [vmem:[#allocation2 + $0x54] sm:$0x1] %vm931_vm1, %v1623_v36 }
 0x282   : > { %1162 = vrot.lane.b32.xlu1 %v7993_v32, %s7167_s20  ;;  %v1777_v37 = vpop.permute.xlu0 %1776 }
 0x283   : > { %1894 = vst.msk [vmem:[#allocation2 + $0x25] sm:$0x1] %vm931_vm1, %v1777_v37 }
 0x284   : > { %v1779_v30 = vpop.permute.xlu1 %1778  ;;  %1164 = vrot.lane.b32.xlu0 %v7998_v63, %s7167_s20 }
 0x285   : > { %1895 = vst.msk [vmem:[#allocation2 + $0x35] sm:$0x1] %vm931_vm1, %v1779_v30 }
 0x286   : > { %1166 = vrot.lane.b32.xlu1 %v8005_v33, %s7167_s20  ;;  %v1781_v60 = vpop.permute.xlu0 %1780 }
 0x287   : > { %1896 = vst.msk [vmem:[#allocation2 + $0x45] sm:$0x1] %vm931_vm1, %v1781_v60 }
 0x288   : > { %v1783_v5 = vpop.permute.xlu1 %1782  ;;  %1320 = vrot.lane.b32.xlu0 %v7989_v27, %s7168_s29 }
 0x289   : > { %1897 = vst.msk [vmem:[#allocation2 + $0x55] sm:$0x1] %vm931_vm1, %v1783_v5 }
 0x28a   : > { %1322 = vrot.lane.b32.xlu1 %v7993_v32, %s7168_s29  ;;  %v1937_v31 = vpop.permute.xlu0 %1936 }
 0x28b   : > { %2054 = vst.msk [vmem:[#allocation2 + $0x26] sm:$0x1] %vm931_vm1, %v1937_v31 }
 0x28c   : > { %v1939_v36 = vpop.permute.xlu1 %1938  ;;  %1324 = vrot.lane.b32.xlu0 %v7998_v63, %s7168_s29 }
 0x28d   : > { %2055 = vst.msk [vmem:[#allocation2 + $0x36] sm:$0x1] %vm931_vm1, %v1939_v36 }
 0x28e   : > { %1326 = vrot.lane.b32.xlu1 %v8005_v33, %s7168_s29  ;;  %v1941_v37 = vpop.permute.xlu0 %1940 }
 0x28f   : > { %2056 = vst.msk [vmem:[#allocation2 + $0x46] sm:$0x1] %vm931_vm1, %v1941_v37 }
 0x290   : > { %v1943_v30 = vpop.permute.xlu1 %1942  ;;  %1480 = vrot.lane.b32.xlu0 %v7989_v27, %s7169_s9 }
 0x291   : > { %2057 = vst.msk [vmem:[#allocation2 + $0x56] sm:$0x1] %vm931_vm1, %v1943_v30 }
 0x292   : > { %1482 = vrot.lane.b32.xlu1 %v7993_v32, %s7169_s9  ;;  %v1145_v60 = vpop.permute.xlu0 %1144 }
 0x293   : > { %1258 = vst.msk [vmem:[#allocation2 + $0x61] sm:$0x1] %vm931_vm1, %v1145_v60 }
 0x294   : > { %v1147_v5 = vpop.permute.xlu1 %1146  ;;  %1484 = vrot.lane.b32.xlu0 %v7998_v63, %s7169_s9 }
 0x295   : > { %1259 = vst.msk [vmem:[#allocation2 + $0x71] sm:$0x1] %vm931_vm1, %v1147_v5 }
 0x296   : > { %1486 = vrot.lane.b32.xlu1 %v8005_v33, %s7169_s9  ;;  %v1149_v31 = vpop.permute.xlu0 %1148 }
 0x297   : > { %1260 = vst.msk [vmem:[#allocation2 + $0x81] sm:$0x1] %vm931_vm1, %v1149_v31 }
 0x298   : > { %v1151_v36 = vpop.permute.xlu1 %1150  ;;  %1640 = vrot.lane.b32.xlu0 %v7989_v27, %s7170_s8 }
 0x299   : > { %1261 = vst.msk [vmem:[#allocation2 + $0x91] sm:$0x1] %vm931_vm1, %v1151_v36 }
 0x29a   : > { %1642 = vrot.lane.b32.xlu1 %v7993_v32, %s7170_s8  ;;  %v1305_v37 = vpop.permute.xlu0 %1304 }
 0x29b   : > { %1418 = vst.msk [vmem:[#allocation2 + $0x62] sm:$0x1] %vm931_vm1, %v1305_v37 }
 0x29c   : > { %v1307_v30 = vpop.permute.xlu1 %1306  ;;  %1644 = vrot.lane.b32.xlu0 %v7998_v63, %s7170_s8 }
 0x29d   : > { %1419 = vst.msk [vmem:[#allocation2 + $0x72] sm:$0x1] %vm931_vm1, %v1307_v30 }
 0x29e   : > { %1646 = vrot.lane.b32.xlu1 %v8005_v33, %s7170_s8  ;;  %v1309_v60 = vpop.permute.xlu0 %1308 }
 0x29f   : > { %1420 = vst.msk [vmem:[#allocation2 + $0x82] sm:$0x1] %vm931_vm1, %v1309_v60 }
 0x2a0   : > { %v1311_v5 = vpop.permute.xlu1 %1310  ;;  %1800 = vrot.lane.b32.xlu0 %v7989_v27, %s7171_s13 }
 0x2a1   : > { %1421 = vst.msk [vmem:[#allocation2 + $0x92] sm:$0x1] %vm931_vm1, %v1311_v5 }
 0x2a2   : > { %1802 = vrot.lane.b32.xlu1 %v7993_v32, %s7171_s13  ;;  %v1465_v31 = vpop.permute.xlu0 %1464 }
 0x2a3   : > { %1578 = vst.msk [vmem:[#allocation2 + $0x63] sm:$0x1] %vm931_vm1, %v1465_v31  ;;  %v618_v31 = vpop.f32.mrf.mxu0 }
 0x2a4   : > { %v1467_v36 = vpop.permute.xlu1 %1466  ;;  %1804 = vrot.lane.b32.xlu0 %v7998_v63, %s7171_s13  ;;  %v849_v28 = vrot.slane %v618_v31, %v7364_v46 }
 0x2a5   : > { %1579 = vst.msk [vmem:[#allocation2 + $0x73] sm:$0x1] %vm931_vm1, %v1467_v36  ;;  %v8077_v36 = vrot.slane %v7629_v7, %v7372_v50  ;;  %v620_v19 = vpop.f32.mrf.mxu0 }
 0x2a6   : > { %1806 = vrot.lane.b32.xlu1 %v8005_v33, %s7171_s13  ;;  %v1469_v37 = vpop.permute.xlu0 %1468  ;;  %v857_v55 = vcombine.high %v849_v28, %v849_v28  ;;  %v8090_v34 = vrot.slane %v849_v28, %v7364_v46 }
 0x2a7   : > { %1580 = vst.msk [vmem:[#allocation2 + $0x83] sm:$0x1] %vm931_vm1, %v1469_v37 }
 0x2a8   : > { %v1471_v30 = vpop.permute.xlu1 %1470  ;;  %1960 = vrot.lane.b32.xlu0 %v7989_v27, %s7172_s16  ;;  %v8107_v28 = vcombine.high %v8090_v34, %v8090_v34  ;;  %964 = vst.msk [vmem:[#allocation2 + $0x200] sm:$0x1] %vm931_vm1, %v8090_v34 }
 0x2a9   : > { %1581 = vst.msk [vmem:[#allocation2 + $0x93] sm:$0x1] %vm931_vm1, %v1471_v30  ;;  %v842_v30 = vcombine.high %v618_v31, %v618_v31  ;;  %v2453_v31 = vcombine.high %v620_v19, %v620_v19 }
 0x2aa   : > { %1962 = vrot.lane.b32.xlu1 %v7993_v32, %s7172_s16  ;;  %v1625_v60 = vpop.permute.xlu0 %1624  ;;  %966 = vst.msk [vmem:[#allocation2 + $0x220] sm:$0x1] %vm931_vm1, %v8107_v28 }
 0x2ab   : > { %1738 = vst.msk [vmem:[#allocation2 + $0x64] sm:$0x1] %vm931_vm1, %v1625_v60  ;;  %v8082_v60 = vrot.slane %v7646_v25, %v7372_v50  ;;  %v856_v7 = vrot.slane %v842_v30, %v7364_v46  ;;  %v8094_v25 = vrot.slane %v7622_v4, %v7372_v50  ;;  %v8103_v30 = vrot.slane %v857_v55, %v7364_v46 }
 0x2ac   : > { %v1627_v5 = vpop.permute.xlu1 %1626  ;;  %1964 = vrot.lane.b32.xlu0 %v7998_v63, %s7172_s16  ;;  %v8113_v4 = vrot.slane %v7638_v18, %v7372_v50 }
 0x2ad   : > { %1739 = vst.msk [vmem:[#allocation2 + $0x74] sm:$0x1] %vm931_vm1, %v1627_v5  ;;  %v858_v56 = vcombine.high %v856_v7, %v856_v7  ;;  %v8100_v48 = vrot.slane %v856_v7, %v7364_v46  ;;  %v2467_v7 = vrot.slane %v2453_v31, %v7364_v46  ;;  %965 = vst.msk [vmem:[#allocation2 + $0x210] sm:$0x1] %vm931_vm1, %v8103_v30 }
 0x2ae   : > { %1966 = vrot.lane.b32.xlu1 %v8005_v33, %s7172_s16  ;;  %v1629_v37 = vpop.permute.xlu0 %1628 }
 0x2af   : > { %1740 = vst.msk [vmem:[#allocation2 + $0x84] sm:$0x1] %vm931_vm1, %v1629_v37  ;;  %v2460_v37 = vrot.slane %v620_v19, %v7364_v46  ;;  %v8124_v45 = vrot.slane %v858_v56, %v7364_v46  ;;  %v8137_v31 = vrot.slane %v2467_v7, %v7364_v46 }
 0x2b0   : > { %v1631_v5 = vpop.permute.xlu1 %1630  ;;  %1168 = vrot.lane.b32.xlu0 %v8077_v36, %s7167_s20 }
 0x2b1   : > { %1741 = vst.msk [vmem:[#allocation2 + $0x94] sm:$0x1] %vm931_vm1, %v1631_v5  ;;  %v622_v5 = vpop.f32.mrf.mxu0  ;;  %v8118_v55 = vrot.slane %v2460_v37, %v7364_v46  ;;  %12765 = vst [vmem:[#allocation38_spill] sm:$0xff] %v8137_v31 }
 0x2b2   : > { %1170 = vrot.lane.b32.xlu1 %v8082_v60, %s7167_s20  ;;  %v1785_v61 = vpop.permute.xlu0 %1784  ;;  %v2468_v5 = vcombine.high %v2460_v37, %v2460_v37 }
 0x2b3   : > { %1898 = vst.msk [vmem:[#allocation2 + $0x65] sm:$0x1] %vm931_vm1, %v1785_v61  ;;  %v623_v13 = vpop.f32.mrf.mxu0  ;;  %2574 = vst.msk [vmem:[#allocation2 + $0x208] sm:$0x1] %vm931_vm1, %v8118_v55 }
 0x2b4   : > { %v1787_v19 = vpop.permute.xlu1 %1786  ;;  %1172 = vrot.lane.b32.xlu0 %v8094_v25, %s7167_s20  ;;  %v2469_v13 = vcombine.high %v2467_v7, %v2467_v7  ;;  %v8145_v18 = vrot.slane %v2468_v5, %v7364_v46  ;;  %v8152_v7 = vcombine.high %v8118_v55, %v8118_v55  ;;  %v12767_v5 = vcombine.high %v8103_v30, %v8103_v30 }
 0x2b5   : > { %1899 = vst.msk [vmem:[#allocation2 + $0x75] sm:$0x1] %vm931_vm1, %v1787_v19 }
 0x2b6   : > { %1174 = vrot.lane.b32.xlu1 %v8113_v4, %s7167_s20  ;;  %v1789_v56 = vpop.permute.xlu0 %1788  ;;  %v8148_v61 = vrot.slane %v2469_v13, %v7364_v46  ;;  %2575 = vst.msk [vmem:[#allocation2 + $0x218] sm:$0x1] %vm931_vm1, %v8145_v18  ;;  %2576 = vst.msk [vmem:[#allocation2 + $0x228] sm:$0x1] %vm931_vm1, %v8152_v7  ;;  %v8465_v37 = vrot.slane %v12767_v5, %v7372_v50 }
 0x2b7   : > { %1900 = vst.msk [vmem:[#allocation2 + $0x85] sm:$0x1] %vm931_vm1, %v1789_v56 }
 0x2b8   : > { %v1791_v19 = vpop.permute.xlu1 %1790  ;;  %12766 = vst [vmem:[#allocation39_spill] sm:$0xff] %v8148_v61  ;;  %1328 = vrot.lane.b32.xlu0 %v8077_v36, %s7168_s29 }
 0x2b9   : > { %1901 = vst.msk [vmem:[#allocation2 + $0x95] sm:$0x1] %vm931_vm1, %v1791_v19 }
 0x2ba   : > { %1330 = vrot.lane.b32.xlu1 %v8082_v60, %s7168_s29  ;;  %v1945_v13 = vpop.permute.xlu0 %1944 }
 0x2bb   : > { %2058 = vst.msk [vmem:[#allocation2 + $0x66] sm:$0x1] %vm931_vm1, %v1945_v13 }
 0x2bc   : > { %v1947_v56 = vpop.permute.xlu1 %1946  ;;  %1332 = vrot.lane.b32.xlu0 %v8094_v25, %s7168_s29 }
 0x2bd   : > { %2059 = vst.msk [vmem:[#allocation2 + $0x76] sm:$0x1] %vm931_vm1, %v1947_v56 }
 0x2be   : > { %1334 = vrot.lane.b32.xlu1 %v8113_v4, %s7168_s29  ;;  %v1949_v19 = vpop.permute.xlu0 %1948 }
 0x2bf   : > { %2060 = vst.msk [vmem:[#allocation2 + $0x86] sm:$0x1] %vm931_vm1, %v1949_v19 }
 0x2c0   : > { %v1951_v46 = vpop.permute.xlu1 %1950  ;;  %1488 = vrot.lane.b32.xlu0 %v8077_v36, %s7169_s9 }
 0x2c1   : > { %2061 = vst.msk [vmem:[#allocation2 + $0x96] sm:$0x1] %vm931_vm1, %v1951_v46 }
 0x2c2   : > { %1490 = vrot.lane.b32.xlu1 %v8082_v60, %s7169_s9  ;;  %v1153_v13 = vpop.permute.xlu0 %1152 }
 0x2c3   : > { %1262 = vst.msk [vmem:[#allocation2 + $0xa1] sm:$0x1] %vm931_vm1, %v1153_v13 }
 0x2c4   : > { %v1155_v56 = vpop.permute.xlu1 %1154  ;;  %1492 = vrot.lane.b32.xlu0 %v8094_v25, %s7169_s9 }
 0x2c5   : > { %1263 = vst.msk [vmem:[#allocation2 + $0xb1] sm:$0x1] %vm931_vm1, %v1155_v56 }
 0x2c6   : > { %1494 = vrot.lane.b32.xlu1 %v8113_v4, %s7169_s9  ;;  %v1157_v19 = vpop.permute.xlu0 %1156 }
 0x2c7   : > { %1264 = vst.msk [vmem:[#allocation2 + $0xc1] sm:$0x1] %vm931_vm1, %v1157_v19 }
 0x2c8   : > { %v1159_v46 = vpop.permute.xlu1 %1158  ;;  %1648 = vrot.lane.b32.xlu0 %v8077_v36, %s7170_s8 }
 0x2c9   : > { %1265 = vst.msk [vmem:[#allocation2 + $0xd1] sm:$0x1] %vm931_vm1, %v1159_v46 }
 0x2ca   : > { %1650 = vrot.lane.b32.xlu1 %v8082_v60, %s7170_s8  ;;  %v1313_v13 = vpop.permute.xlu0 %1312 }
 0x2cb   : > { %1422 = vst.msk [vmem:[#allocation2 + $0xa2] sm:$0x1] %vm931_vm1, %v1313_v13 }
 0x2cc   : > { %v1315_v56 = vpop.permute.xlu1 %1314  ;;  %1652 = vrot.lane.b32.xlu0 %v8094_v25, %s7170_s8 }
 0x2cd   : > { %1423 = vst.msk [vmem:[#allocation2 + $0xb2] sm:$0x1] %vm931_vm1, %v1315_v56 }
 0x2ce   : > { %1654 = vrot.lane.b32.xlu1 %v8113_v4, %s7170_s8  ;;  %v1317_v19 = vpop.permute.xlu0 %1316 }
 0x2cf   : > { %1424 = vst.msk [vmem:[#allocation2 + $0xc2] sm:$0x1] %vm931_vm1, %v1317_v19 }
 0x2d0   : > { %v1319_v46 = vpop.permute.xlu1 %1318  ;;  %1808 = vrot.lane.b32.xlu0 %v8077_v36, %s7171_s13 }
 0x2d1   : > { %1425 = vst.msk [vmem:[#allocation2 + $0xd2] sm:$0x1] %vm931_vm1, %v1319_v46 }
 0x2d2   : > { %1810 = vrot.lane.b32.xlu1 %v8082_v60, %s7171_s13  ;;  %v1473_v13 = vpop.permute.xlu0 %1472 }
 0x2d3   : > { %1582 = vst.msk [vmem:[#allocation2 + $0xa3] sm:$0x1] %vm931_vm1, %v1473_v13 }
 0x2d4   : > { %v1475_v56 = vpop.permute.xlu1 %1474  ;;  %1812 = vrot.lane.b32.xlu0 %v8094_v25, %s7171_s13 }
 0x2d5   : > { %1583 = vst.msk [vmem:[#allocation2 + $0xb3] sm:$0x1] %vm931_vm1, %v1475_v56 }
 0x2d6   : > { %1814 = vrot.lane.b32.xlu1 %v8113_v4, %s7171_s13  ;;  %v1477_v19 = vpop.permute.xlu0 %1476 }
 0x2d7   : > { %1584 = vst.msk [vmem:[#allocation2 + $0xc3] sm:$0x1] %vm931_vm1, %v1477_v19  ;;  %v8225_v19 = vrot.slane %v7642_v24, %v7372_v50  ;;  %v8239_v24 = vrot.slane %v7719_v20, %v7372_v50 }
 0x2d8   : > { %v1479_v46 = vpop.permute.xlu1 %1478  ;;  %1968 = vrot.lane.b32.xlu0 %v8077_v36, %s7172_s16 }
 0x2d9   : > { %1585 = vst.msk [vmem:[#allocation2 + $0xd3] sm:$0x1] %vm931_vm1, %v1479_v46 }
 0x2da   : > { %1970 = vrot.lane.b32.xlu1 %v8082_v60, %s7172_s16  ;;  %v1633_v13 = vpop.permute.xlu0 %1632 }
 0x2db   : > { %1742 = vst.msk [vmem:[#allocation2 + $0xa4] sm:$0x1] %vm931_vm1, %v1633_v13 }
 0x2dc   : > { %v1635_v56 = vpop.permute.xlu1 %1634  ;;  %1972 = vrot.lane.b32.xlu0 %v8094_v25, %s7172_s16 }
 0x2dd   : > { %1743 = vst.msk [vmem:[#allocation2 + $0xb4] sm:$0x1] %vm931_vm1, %v1635_v56 }
 0x2de   : > { %1974 = vrot.lane.b32.xlu1 %v8113_v4, %s7172_s16  ;;  %v1637_v46 = vpop.permute.xlu0 %1636 }
 0x2df   : > { %1744 = vst.msk [vmem:[#allocation2 + $0xc4] sm:$0x1] %vm931_vm1, %v1637_v46 }
 0x2e0   : > { %v1639_v13 = vpop.permute.xlu1 %1638  ;;  %1176 = vrot.lane.b32.xlu0 %v8225_v19, %s7167_s20 }
 0x2e1   : > { %1745 = vst.msk [vmem:[#allocation2 + $0xd4] sm:$0x1] %vm931_vm1, %v1639_v13 }
 0x2e2   : > { %1178 = vrot.lane.b32.xlu1 %v8229_v43, %s7167_s20  ;;  %v1793_v56 = vpop.permute.xlu0 %1792 }
 0x2e3   : > { %1902 = vst.msk [vmem:[#allocation2 + $0xa5] sm:$0x1] %vm931_vm1, %v1793_v56 }
 0x2e4   : > { %v1795_v46 = vpop.permute.xlu1 %1794  ;;  %1180 = vrot.lane.b32.xlu0 %v8239_v24, %s7167_s20 }
 0x2e5   : > { %1903 = vst.msk [vmem:[#allocation2 + $0xb5] sm:$0x1] %vm931_vm1, %v1795_v46 }
 0x2e6   : > { %1182 = vrot.lane.b32.xlu1 %v8243_v35, %s7167_s20  ;;  %v1797_v13 = vpop.permute.xlu0 %1796 }
 0x2e7   : > { %1904 = vst.msk [vmem:[#allocation2 + $0xc5] sm:$0x1] %vm931_vm1, %v1797_v13 }
 0x2e8   : > { %v1799_v20 = vpop.permute.xlu1 %1798  ;;  %1336 = vrot.lane.b32.xlu0 %v8225_v19, %s7168_s29 }
 0x2e9   : > { %1905 = vst.msk [vmem:[#allocation2 + $0xd5] sm:$0x1] %vm931_vm1, %v1799_v20 }
 0x2ea   : > { %1338 = vrot.lane.b32.xlu1 %v8229_v43, %s7168_s29  ;;  %v1953_v59 = vpop.permute.xlu0 %1952 }
 0x2eb   : > { %2062 = vst.msk [vmem:[#allocation2 + $0xa6] sm:$0x1] %vm931_vm1, %v1953_v59 }
 0x2ec   : > { %v1955_v56 = vpop.permute.xlu1 %1954  ;;  %1340 = vrot.lane.b32.xlu0 %v8239_v24, %s7168_s29 }
 0x2ed   : > { %2063 = vst.msk [vmem:[#allocation2 + $0xb6] sm:$0x1] %vm931_vm1, %v1955_v56 }
 0x2ee   : > { %1342 = vrot.lane.b32.xlu1 %v8243_v35, %s7168_s29  ;;  %v1957_v46 = vpop.permute.xlu0 %1956 }
 0x2ef   : > { %2064 = vst.msk [vmem:[#allocation2 + $0xc6] sm:$0x1] %vm931_vm1, %v1957_v46 }
 0x2f0   : > { %v1959_v13 = vpop.permute.xlu1 %1958  ;;  %1496 = vrot.lane.b32.xlu0 %v8225_v19, %s7169_s9 }
 0x2f1   : > { %2065 = vst.msk [vmem:[#allocation2 + $0xd6] sm:$0x1] %vm931_vm1, %v1959_v13 }
 0x2f2   : > { %1498 = vrot.lane.b32.xlu1 %v8229_v43, %s7169_s9  ;;  %v1161_v20 = vpop.permute.xlu0 %1160 }
 0x2f3   : > { %1266 = vst.msk [vmem:[#allocation2 + $0xe1] sm:$0x1] %vm931_vm1, %v1161_v20 }
 0x2f4   : > { %v1163_v59 = vpop.permute.xlu1 %1162  ;;  %1500 = vrot.lane.b32.xlu0 %v8239_v24, %s7169_s9 }
 0x2f5   : > { %1267 = vst.msk [vmem:[#allocation2 + $0xf1] sm:$0x1] %vm931_vm1, %v1163_v59 }
 0x2f6   : > { %1502 = vrot.lane.b32.xlu1 %v8243_v35, %s7169_s9  ;;  %v1165_v56 = vpop.permute.xlu0 %1164 }
 0x2f7   : > { %1268 = vst.msk [vmem:[#allocation2 + $0x101] sm:$0x1] %vm931_vm1, %v1165_v56 }
 0x2f8   : > { %v1167_v46 = vpop.permute.xlu1 %1166  ;;  %1656 = vrot.lane.b32.xlu0 %v8225_v19, %s7170_s8 }
 0x2f9   : > { %1269 = vst.msk [vmem:[#allocation2 + $0x111] sm:$0x1] %vm931_vm1, %v1167_v46 }
 0x2fa   : > { %1658 = vrot.lane.b32.xlu1 %v8229_v43, %s7170_s8  ;;  %v1321_v13 = vpop.permute.xlu0 %1320 }
 0x2fb   : > { %1426 = vst.msk [vmem:[#allocation2 + $0xe2] sm:$0x1] %vm931_vm1, %v1321_v13 }
 0x2fc   : > { %v1323_v20 = vpop.permute.xlu1 %1322  ;;  %1660 = vrot.lane.b32.xlu0 %v8239_v24, %s7170_s8 }
 0x2fd   : > { %1427 = vst.msk [vmem:[#allocation2 + $0xf2] sm:$0x1] %vm931_vm1, %v1323_v20 }
 0x2fe   : > { %1662 = vrot.lane.b32.xlu1 %v8243_v35, %s7170_s8  ;;  %v1325_v59 = vpop.permute.xlu0 %1324 }
 0x2ff   : > { %1428 = vst.msk [vmem:[#allocation2 + $0x102] sm:$0x1] %vm931_vm1, %v1325_v59 }
 0x300   : > { %v1327_v56 = vpop.permute.xlu1 %1326  ;;  %1816 = vrot.lane.b32.xlu0 %v8225_v19, %s7171_s13 }
 0x301   : > { %1429 = vst.msk [vmem:[#allocation2 + $0x112] sm:$0x1] %vm931_vm1, %v1327_v56  ;;  %v8307_v56 = vrot.slane %v7740_v2, %v7372_v50  ;;  %v8321_v2 = vrot.slane %v7722_v21, %v7372_v50 }
 0x302   : > { %1818 = vrot.lane.b32.xlu1 %v8229_v43, %s7171_s13  ;;  %v1481_v46 = vpop.permute.xlu0 %1480 }
 0x303   : > { %1586 = vst.msk [vmem:[#allocation2 + $0xe3] sm:$0x1] %vm931_vm1, %v1481_v46 }
 0x304   : > { %v1483_v13 = vpop.permute.xlu1 %1482  ;;  %1820 = vrot.lane.b32.xlu0 %v8239_v24, %s7171_s13 }
 0x305   : > { %1587 = vst.msk [vmem:[#allocation2 + $0xf3] sm:$0x1] %vm931_vm1, %v1483_v13  ;;  %v8311_v13 = vrot.slane %v7757_v22, %v7372_v50  ;;  %v8325_v22 = vrot.slane %v7736_v0, %v7372_v50 }
 0x306   : > { %1822 = vrot.lane.b32.xlu1 %v8243_v35, %s7171_s13  ;;  %v1485_v20 = vpop.permute.xlu0 %1484 }
 0x307   : > { %1588 = vst.msk [vmem:[#allocation2 + $0x103] sm:$0x1] %vm931_vm1, %v1485_v20 }
 0x308   : > { %v1487_v59 = vpop.permute.xlu1 %1486  ;;  %1976 = vrot.lane.b32.xlu0 %v8225_v19, %s7172_s16 }
 0x309   : > { %1589 = vst.msk [vmem:[#allocation2 + $0x113] sm:$0x1] %vm931_vm1, %v1487_v59 }
 0x30a   : > { %1978 = vrot.lane.b32.xlu1 %v8229_v43, %s7172_s16  ;;  %v1641_v46 = vpop.permute.xlu0 %1640 }
 0x30b   : > { %1746 = vst.msk [vmem:[#allocation2 + $0xe4] sm:$0x1] %vm931_vm1, %v1641_v46 }
 0x30c   : > { %v1643_v20 = vpop.permute.xlu1 %1642  ;;  %1184 = vrot.lane.b32.xlu0 %v8307_v56, %s7167_s20 }
 0x30d   : > { %1747 = vst.msk [vmem:[#allocation2 + $0xf4] sm:$0x1] %vm931_vm1, %v1643_v20 }
 0x30e   : > { %1186 = vrot.lane.b32.xlu1 %v8311_v13, %s7167_s20  ;;  %v1645_v59 = vpop.permute.xlu0 %1644 }
 0x30f   : > { %1748 = vst.msk [vmem:[#allocation2 + $0x104] sm:$0x1] %vm931_vm1, %v1645_v59 }
 0x310   : > { %v1647_v46 = vpop.permute.xlu1 %1646  ;;  %1188 = vrot.lane.b32.xlu0 %v8321_v2, %s7167_s20 }
 0x311   : > { %1749 = vst.msk [vmem:[#allocation2 + $0x114] sm:$0x1] %vm931_vm1, %v1647_v46 }
 0x312   : > { %1190 = vrot.lane.b32.xlu1 %v8325_v22, %s7167_s20  ;;  %v1801_v20 = vpop.permute.xlu0 %1800 }
 0x313   : > { %1906 = vst.msk [vmem:[#allocation2 + $0xe5] sm:$0x1] %vm931_vm1, %v1801_v20 }
 0x314   : > { %v1803_v21 = vpop.permute.xlu1 %1802  ;;  %1344 = vrot.lane.b32.xlu0 %v8307_v56, %s7168_s29 }
 0x315   : > { %1907 = vst.msk [vmem:[#allocation2 + $0xf5] sm:$0x1] %vm931_vm1, %v1803_v21 }
 0x316   : > { %1346 = vrot.lane.b32.xlu1 %v8311_v13, %s7168_s29  ;;  %v1805_v0 = vpop.permute.xlu0 %1804 }
 0x317   : > { %1908 = vst.msk [vmem:[#allocation2 + $0x105] sm:$0x1] %vm931_vm1, %v1805_v0 }
 0x318   : > { %v1807_v59 = vpop.permute.xlu1 %1806  ;;  %1348 = vrot.lane.b32.xlu0 %v8321_v2, %s7168_s29 }
 0x319   : > { %1909 = vst.msk [vmem:[#allocation2 + $0x115] sm:$0x1] %vm931_vm1, %v1807_v59 }
 0x31a   : > { %1350 = vrot.lane.b32.xlu1 %v8325_v22, %s7168_s29  ;;  %v1961_v46 = vpop.permute.xlu0 %1960 }
 0x31b   : > { %2066 = vst.msk [vmem:[#allocation2 + $0xe6] sm:$0x1] %vm931_vm1, %v1961_v46 }
 0x31c   : > { %v1963_v20 = vpop.permute.xlu1 %1962  ;;  %1504 = vrot.lane.b32.xlu0 %v8307_v56, %s7169_s9 }
 0x31d   : > { %2067 = vst.msk [vmem:[#allocation2 + $0xf6] sm:$0x1] %vm931_vm1, %v1963_v20 }
 0x31e   : > { %1506 = vrot.lane.b32.xlu1 %v8311_v13, %s7169_s9  ;;  %v1965_v21 = vpop.permute.xlu0 %1964 }
 0x31f   : > { %2068 = vst.msk [vmem:[#allocation2 + $0x106] sm:$0x1] %vm931_vm1, %v1965_v21 }
 0x320   : > { %v1967_v0 = vpop.permute.xlu1 %1966  ;;  %1508 = vrot.lane.b32.xlu0 %v8321_v2, %s7169_s9 }
 0x321   : > { %2069 = vst.msk [vmem:[#allocation2 + $0x116] sm:$0x1] %vm931_vm1, %v1967_v0 }
 0x322   : > { %1510 = vrot.lane.b32.xlu1 %v8325_v22, %s7169_s9  ;;  %v1169_v59 = vpop.permute.xlu0 %1168 }
 0x323   : > { %1270 = vst.msk [vmem:[#allocation2 + $0x121] sm:$0x1] %vm931_vm1, %v1169_v59 }
 0x324   : > { %v1171_v46 = vpop.permute.xlu1 %1170  ;;  %1664 = vrot.lane.b32.xlu0 %v8307_v56, %s7170_s8 }
 0x325   : > { %1271 = vst.msk [vmem:[#allocation2 + $0x131] sm:$0x1] %vm931_vm1, %v1171_v46 }
 0x326   : > { %1666 = vrot.lane.b32.xlu1 %v8311_v13, %s7170_s8  ;;  %v1173_v20 = vpop.permute.xlu0 %1172 }
 0x327   : > { %1272 = vst.msk [vmem:[#allocation2 + $0x141] sm:$0x1] %vm931_vm1, %v1173_v20 }
 0x328   : > { %v1175_v21 = vpop.permute.xlu1 %1174  ;;  %1668 = vrot.lane.b32.xlu0 %v8321_v2, %s7170_s8 }
 0x329   : > { %1273 = vst.msk [vmem:[#allocation2 + $0x151] sm:$0x1] %vm931_vm1, %v1175_v21  ;;  %v8383_v21 = vrot.slane %v7744_v11, %v7372_v50  ;;  %v8399_v11 = vrot.slane %v8103_v30, %v7372_v50  ;;  %v8479_v30 = vrot.slane %v8124_v45, %v7372_v50 }
 0x32a   : > { %1670 = vrot.lane.b32.xlu1 %v8325_v22, %s7170_s8  ;;  %v1329_v0 = vpop.permute.xlu0 %1328 }
 0x32b   : > { %1430 = vst.msk [vmem:[#allocation2 + $0x122] sm:$0x1] %vm931_vm1, %v1329_v0 }
 0x32c   : > { %v1331_v59 = vpop.permute.xlu1 %1330  ;;  %1824 = vrot.lane.b32.xlu0 %v8307_v56, %s7171_s13 }
 0x32d   : > { %1431 = vst.msk [vmem:[#allocation2 + $0x132] sm:$0x1] %vm931_vm1, %v1331_v59  ;;  %v8387_v59 = vrot.slane %v7761_v51, %v7372_v50 }
 0x32e   : > { %1826 = vrot.lane.b32.xlu1 %v8311_v13, %s7171_s13  ;;  %v1333_v46 = vpop.permute.xlu0 %1332 }
 0x32f   : > { %1432 = vst.msk [vmem:[#allocation2 + $0x142] sm:$0x1] %vm931_vm1, %v1333_v46 }
 0x330   : > { %v1335_v20 = vpop.permute.xlu1 %1334  ;;  %1828 = vrot.lane.b32.xlu0 %v8321_v2, %s7171_s13 }
 0x331   : > { %1433 = vst.msk [vmem:[#allocation2 + $0x152] sm:$0x1] %vm931_vm1, %v1335_v20  ;;  %v8392_v20 = vrot.slane %v8090_v34, %v7372_v50 }
 0x332   : > { %1830 = vrot.lane.b32.xlu1 %v8325_v22, %s7171_s13  ;;  %v1489_v0 = vpop.permute.xlu0 %1488 }
 0x333   : > { %1590 = vst.msk [vmem:[#allocation2 + $0x123] sm:$0x1] %vm931_vm1, %v1489_v0 }
 0x334   : > { %v1491_v46 = vpop.permute.xlu1 %1490  ;;  %1192 = vrot.lane.b32.xlu0 %v8383_v21, %s7167_s20 }
 0x335   : > { %1591 = vst.msk [vmem:[#allocation2 + $0x133] sm:$0x1] %vm931_vm1, %v1491_v46 }
 0x336   : > { %1194 = vrot.lane.b32.xlu1 %v8387_v59, %s7167_s20  ;;  %v1493_v51 = vpop.permute.xlu0 %1492 }
 0x337   : > { %1592 = vst.msk [vmem:[#allocation2 + $0x143] sm:$0x1] %vm931_vm1, %v1493_v51 }
 0x338   : > { %v1495_v0 = vpop.permute.xlu1 %1494  ;;  %1196 = vrot.lane.b32.xlu0 %v8392_v20, %s7167_s20 }
 0x339   : > { %1593 = vst.msk [vmem:[#allocation2 + $0x153] sm:$0x1] %vm931_vm1, %v1495_v0 }
 0x33a   : > { %1198 = vrot.lane.b32.xlu1 %v8399_v11, %s7167_s20  ;;  %v1649_v34 = vpop.permute.xlu0 %1648 }
 0x33b   : > { %1750 = vst.msk [vmem:[#allocation2 + $0x124] sm:$0x1] %vm931_vm1, %v1649_v34 }
 0x33c   : > { %v1651_v46 = vpop.permute.xlu1 %1650  ;;  %1352 = vrot.lane.b32.xlu0 %v8383_v21, %s7168_s29 }
 0x33d   : > { %1751 = vst.msk [vmem:[#allocation2 + $0x134] sm:$0x1] %vm931_vm1, %v1651_v46 }
 0x33e   : > { %1354 = vrot.lane.b32.xlu1 %v8387_v59, %s7168_s29  ;;  %v1653_v51 = vpop.permute.xlu0 %1652 }
 0x33f   : > { %1752 = vst.msk [vmem:[#allocation2 + $0x144] sm:$0x1] %vm931_vm1, %v1653_v51 }
 0x340   : > { %v1655_v0 = vpop.permute.xlu1 %1654  ;;  %1356 = vrot.lane.b32.xlu0 %v8392_v20, %s7168_s29 }
 0x341   : > { %1753 = vst.msk [vmem:[#allocation2 + $0x154] sm:$0x1] %vm931_vm1, %v1655_v0 }
 0x342   : > { %1358 = vrot.lane.b32.xlu1 %v8399_v11, %s7168_s29  ;;  %v1809_v34 = vpop.permute.xlu0 %1808 }
 0x343   : > { %1910 = vst.msk [vmem:[#allocation2 + $0x125] sm:$0x1] %vm931_vm1, %v1809_v34 }
 0x344   : > { %v1811_v46 = vpop.permute.xlu1 %1810  ;;  %1512 = vrot.lane.b32.xlu0 %v8383_v21, %s7169_s9 }
 0x345   : > { %1911 = vst.msk [vmem:[#allocation2 + $0x135] sm:$0x1] %vm931_vm1, %v1811_v46 }
 0x346   : > { %1514 = vrot.lane.b32.xlu1 %v8387_v59, %s7169_s9  ;;  %v1813_v51 = vpop.permute.xlu0 %1812 }
 0x347   : > { %1912 = vst.msk [vmem:[#allocation2 + $0x145] sm:$0x1] %vm931_vm1, %v1813_v51 }
 0x348   : > { %v1815_v0 = vpop.permute.xlu1 %1814  ;;  %1516 = vrot.lane.b32.xlu0 %v8392_v20, %s7169_s9 }
 0x349   : > { %1913 = vst.msk [vmem:[#allocation2 + $0x155] sm:$0x1] %vm931_vm1, %v1815_v0 }
 0x34a   : > { %1518 = vrot.lane.b32.xlu1 %v8399_v11, %s7169_s9  ;;  %v1969_v34 = vpop.permute.xlu0 %1968 }
 0x34b   : > { %2070 = vst.msk [vmem:[#allocation2 + $0x126] sm:$0x1] %vm931_vm1, %v1969_v34 }
 0x34c   : > { %v1971_v46 = vpop.permute.xlu1 %1970  ;;  %1672 = vrot.lane.b32.xlu0 %v8383_v21, %s7170_s8 }
 0x34d   : > { %2071 = vst.msk [vmem:[#allocation2 + $0x136] sm:$0x1] %vm931_vm1, %v1971_v46 }
 0x34e   : > { %1674 = vrot.lane.b32.xlu1 %v8387_v59, %s7170_s8  ;;  %v1973_v51 = vpop.permute.xlu0 %1972 }
 0x34f   : > { %2072 = vst.msk [vmem:[#allocation2 + $0x146] sm:$0x1] %vm931_vm1, %v1973_v51 }
 0x350   : > { %v1975_v0 = vpop.permute.xlu1 %1974  ;;  %1676 = vrot.lane.b32.xlu0 %v8392_v20, %s7170_s8 }
 0x351   : > { %2073 = vst.msk [vmem:[#allocation2 + $0x156] sm:$0x1] %vm931_vm1, %v1975_v0 }
 0x352   : > { %1678 = vrot.lane.b32.xlu1 %v8399_v11, %s7170_s8  ;;  %v1177_v34 = vpop.permute.xlu0 %1176 }
 0x353   : > { %1274 = vst.msk [vmem:[#allocation2 + $0x161] sm:$0x1] %vm931_vm1, %v1177_v34  ;;  %v8459_v34 = vrot.slane %v8107_v28, %v7372_v50  ;;  %v8475_v28 = vrot.slane %v8100_v48, %v7372_v50 }
 0x354   : > { %v1179_v46 = vpop.permute.xlu1 %1178  ;;  %1832 = vrot.lane.b32.xlu0 %v8383_v21, %s7171_s13 }
 0x355   : > { %1275 = vst.msk [vmem:[#allocation2 + $0x171] sm:$0x1] %vm931_vm1, %v1179_v46 }
 0x356   : > { %1834 = vrot.lane.b32.xlu1 %v8387_v59, %s7171_s13  ;;  %v1181_v51 = vpop.permute.xlu0 %1180 }
 0x357   : > { %1276 = vst.msk [vmem:[#allocation2 + $0x181] sm:$0x1] %vm931_vm1, %v1181_v51 }
 0x358   : > { %v1183_v0 = vpop.permute.xlu1 %1182  ;;  %1836 = vrot.lane.b32.xlu0 %v8392_v20, %s7171_s13 }
 0x359   : > { %1277 = vst.msk [vmem:[#allocation2 + $0x191] sm:$0x1] %vm931_vm1, %v1183_v0 }
 0x35a   : > { %1838 = vrot.lane.b32.xlu1 %v8399_v11, %s7171_s13  ;;  %v1337_v46 = vpop.permute.xlu0 %1336 }
 0x35b   : > { %1434 = vst.msk [vmem:[#allocation2 + $0x162] sm:$0x1] %vm931_vm1, %v1337_v46 }
 0x35c   : > { %v1339_v51 = vpop.permute.xlu1 %1338  ;;  %1200 = vrot.lane.b32.xlu0 %v8459_v34, %s7167_s20 }
 0x35d   : > { %1435 = vst.msk [vmem:[#allocation2 + $0x172] sm:$0x1] %vm931_vm1, %v1339_v51 }
 0x35e   : > { %1202 = vrot.lane.b32.xlu1 %v8465_v37, %s7167_s20  ;;  %v1341_v0 = vpop.permute.xlu0 %1340 }
 0x35f   : > { %1436 = vst.msk [vmem:[#allocation2 + $0x182] sm:$0x1] %vm931_vm1, %v1341_v0 }
 0x360   : > { %v1343_v5 = vpop.permute.xlu1 %1342  ;;  %1204 = vrot.lane.b32.xlu0 %v8475_v28, %s7167_s20 }
 0x361   : > { %1437 = vst.msk [vmem:[#allocation2 + $0x192] sm:$0x1] %vm931_vm1, %v1343_v5 }
 0x362   : > { %1206 = vrot.lane.b32.xlu1 %v8479_v30, %s7167_s20  ;;  %v1497_v46 = vpop.permute.xlu0 %1496 }
 0x363   : > { %1594 = vst.msk [vmem:[#allocation2 + $0x163] sm:$0x1] %vm931_vm1, %v1497_v46 }
 0x364   : > { %v1499_v51 = vpop.permute.xlu1 %1498  ;;  %1360 = vrot.lane.b32.xlu0 %v8459_v34, %s7168_s29 }
 0x365   : > { %1595 = vst.msk [vmem:[#allocation2 + $0x173] sm:$0x1] %vm931_vm1, %v1499_v51 }
 0x366   : > { %1362 = vrot.lane.b32.xlu1 %v8465_v37, %s7168_s29  ;;  %v1501_v0 = vpop.permute.xlu0 %1500 }
 0x367   : > { %1596 = vst.msk [vmem:[#allocation2 + $0x183] sm:$0x1] %vm931_vm1, %v1501_v0 }
 0x368   : > { %v1503_v5 = vpop.permute.xlu1 %1502  ;;  %1364 = vrot.lane.b32.xlu0 %v8475_v28, %s7168_s29 }
 0x369   : > { %1597 = vst.msk [vmem:[#allocation2 + $0x193] sm:$0x1] %vm931_vm1, %v1503_v5 }
 0x36a   : > { %1366 = vrot.lane.b32.xlu1 %v8479_v30, %s7168_s29  ;;  %v1657_v46 = vpop.permute.xlu0 %1656 }
 0x36b   : > { %1754 = vst.msk [vmem:[#allocation2 + $0x164] sm:$0x1] %vm931_vm1, %v1657_v46 }
 0x36c   : > { %v1659_v51 = vpop.permute.xlu1 %1658  ;;  %1520 = vrot.lane.b32.xlu0 %v8459_v34, %s7169_s9 }
 0x36d   : > { %1755 = vst.msk [vmem:[#allocation2 + $0x174] sm:$0x1] %vm931_vm1, %v1659_v51 }
 0x36e   : > { %1522 = vrot.lane.b32.xlu1 %v8465_v37, %s7169_s9  ;;  %v1661_v0 = vpop.permute.xlu0 %1660 }
 0x36f   : > { %1756 = vst.msk [vmem:[#allocation2 + $0x184] sm:$0x1] %vm931_vm1, %v1661_v0 }
 0x370   : > { %v1663_v5 = vpop.permute.xlu1 %1662  ;;  %1524 = vrot.lane.b32.xlu0 %v8475_v28, %s7169_s9 }
 0x371   : > { %1757 = vst.msk [vmem:[#allocation2 + $0x194] sm:$0x1] %vm931_vm1, %v1663_v5 }
 0x372   : > { %1526 = vrot.lane.b32.xlu1 %v8479_v30, %s7169_s9  ;;  %v1817_v46 = vpop.permute.xlu0 %1816 }
 0x373   : > { %1914 = vst.msk [vmem:[#allocation2 + $0x165] sm:$0x1] %vm931_vm1, %v1817_v46 }
 0x374   : > { %v1819_v51 = vpop.permute.xlu1 %1818  ;;  %1680 = vrot.lane.b32.xlu0 %v8459_v34, %s7170_s8 }
 0x375   : > { %1915 = vst.msk [vmem:[#allocation2 + $0x175] sm:$0x1] %vm931_vm1, %v1819_v51 }
 0x376   : > { %1682 = vrot.lane.b32.xlu1 %v8465_v37, %s7170_s8  ;;  %v1821_v0 = vpop.permute.xlu0 %1820 }
 0x377   : > { %1916 = vst.msk [vmem:[#allocation2 + $0x185] sm:$0x1] %vm931_vm1, %v1821_v0 }
 0x378   : > { %v1823_v5 = vpop.permute.xlu1 %1822  ;;  %1684 = vrot.lane.b32.xlu0 %v8475_v28, %s7170_s8 }
 0x379   : > { %1917 = vst.msk [vmem:[#allocation2 + $0x195] sm:$0x1] %vm931_vm1, %v1823_v5 }
 0x37a   : > { %1686 = vrot.lane.b32.xlu1 %v8479_v30, %s7170_s8  ;;  %v1977_v46 = vpop.permute.xlu0 %1976 }
 0x37b   : > { %2074 = vst.msk [vmem:[#allocation2 + $0x166] sm:$0x1] %vm931_vm1, %v1977_v46  ;;  %v12768_v46 = vcombine.high %v8100_v48, %v8100_v48 }
 0x37c   : > { %v1979_v51 = vpop.permute.xlu1 %1978  ;;  %1840 = vrot.lane.b32.xlu0 %v8459_v34, %s7171_s13 }
 0x37d   : > { %2075 = vst.msk [vmem:[#allocation2 + $0x176] sm:$0x1] %vm931_vm1, %v1979_v51  ;;  %v8539_v51 = vrot.slane %v12768_v46, %v7372_v50 }
 0x37e   : > { %1842 = vrot.lane.b32.xlu1 %v8465_v37, %s7171_s13  ;;  %v1185_v0 = vpop.permute.xlu0 %1184 }
 0x37f   : > { %1278 = vst.msk [vmem:[#allocation2 + $0x1a1] sm:$0x1] %vm931_vm1, %v1185_v0  ;;  %v12769_v0 = vcombine.high %v8124_v45, %v8124_v45 }
 0x380   : > { %v1187_v5 = vpop.permute.xlu1 %1186  ;;  %1844 = vrot.lane.b32.xlu0 %v8475_v28, %s7171_s13 }
 0x381   : > { %1279 = vst.msk [vmem:[#allocation2 + $0x1b1] sm:$0x1] %vm931_vm1, %v1187_v5  ;;  %v8545_v31 = vrot.slane %v12769_v0, %v7372_v50 }
 0x382   : > { %1846 = vrot.lane.b32.xlu1 %v8479_v30, %s7171_s13  ;;  %v1189_v61 = vpop.permute.xlu0 %1188 }
 0x383   : > { %1280 = vst.msk [vmem:[#allocation2 + $0x1c1] sm:$0x1] %vm931_vm1, %v1189_v61 }
 0x384   : > { %v1191_v5 = vpop.permute.xlu1 %1190  ;;  %1208 = vrot.lane.b32.xlu0 %v8539_v51, %s7167_s20 }
 0x385   : > { %1281 = vst.msk [vmem:[#allocation2 + $0x1d1] sm:$0x1] %vm931_vm1, %v1191_v5 }
 0x386   : > { %1210 = vrot.lane.b32.xlu1 %v8545_v31, %s7167_s20  ;;  %v1345_v48 = vpop.permute.xlu0 %1344 }
 0x387   : > { %1438 = vst.msk [vmem:[#allocation2 + $0x1a2] sm:$0x1] %vm931_vm1, %v1345_v48 }
 0x388   : > { %v1347_v46 = vpop.permute.xlu1 %1346  ;;  %1368 = vrot.lane.b32.xlu0 %v8539_v51, %s7168_s29 }
 0x389   : > { %1439 = vst.msk [vmem:[#allocation2 + $0x1b2] sm:$0x1] %vm931_vm1, %v1347_v46 }
 0x38a   : > { %1370 = vrot.lane.b32.xlu1 %v8545_v31, %s7168_s29  ;;  %v1349_v45 = vpop.permute.xlu0 %1348 }
 0x38b   : > { %1440 = vst.msk [vmem:[#allocation2 + $0x1c2] sm:$0x1] %vm931_vm1, %v1349_v45 }
 0x38c   : > { %v1351_v61 = vpop.permute.xlu1 %1350  ;;  %1528 = vrot.lane.b32.xlu0 %v8539_v51, %s7169_s9 }
 0x38d   : > { %1441 = vst.msk [vmem:[#allocation2 + $0x1d2] sm:$0x1] %vm931_vm1, %v1351_v61 }
 0x38e   : > { %1530 = vrot.lane.b32.xlu1 %v8545_v31, %s7169_s9  ;;  %v1505_v0 = vpop.permute.xlu0 %1504 }
 0x38f   : > { %1598 = vst.msk [vmem:[#allocation2 + $0x1a3] sm:$0x1] %vm931_vm1, %v1505_v0 }
 0x390   : > { %v1507_v5 = vpop.permute.xlu1 %1506  ;;  %1688 = vrot.lane.b32.xlu0 %v8539_v51, %s7170_s8 }
 0x391   : > { %1599 = vst.msk [vmem:[#allocation2 + $0x1b3] sm:$0x1] %vm931_vm1, %v1507_v5 }
 0x392   : > { %1690 = vrot.lane.b32.xlu1 %v8545_v31, %s7170_s8  ;;  %v1509_v48 = vpop.permute.xlu0 %1508 }
 0x393   : > { %1600 = vst.msk [vmem:[#allocation2 + $0x1c3] sm:$0x1] %vm931_vm1, %v1509_v48 }
 0x394   : > { %v1511_v46 = vpop.permute.xlu1 %1510  ;;  %1848 = vrot.lane.b32.xlu0 %v8539_v51, %s7171_s13 }
 0x395   : > { %1601 = vst.msk [vmem:[#allocation2 + $0x1d3] sm:$0x1] %vm931_vm1, %v1511_v46 }
 0x396   : > { %1850 = vrot.lane.b32.xlu1 %v8545_v31, %s7171_s13  ;;  %v1665_v45 = vpop.permute.xlu0 %1664 }
 0x397   : > { %1758 = vst.msk [vmem:[#allocation2 + $0x1a4] sm:$0x1] %vm931_vm1, %v1665_v45 }
 0x398   : > { %v1667_v61 = vpop.permute.xlu1 %1666  ;;  %1980 = vrot.lane.b32.xlu0 %v8239_v24, %s7172_s16 }
 0x399   : > { %1759 = vst.msk [vmem:[#allocation2 + $0x1b4] sm:$0x1] %vm931_vm1, %v1667_v61 }
 0x39a   : > { %1982 = vrot.lane.b32.xlu1 %v8243_v35, %s7172_s16  ;;  %v1669_v0 = vpop.permute.xlu0 %1668 }
 0x39b   : > { %1760 = vst.msk [vmem:[#allocation2 + $0x1c4] sm:$0x1] %vm931_vm1, %v1669_v0 }
 0x39c   : > { %v1671_v5 = vpop.permute.xlu1 %1670  ;;  %1984 = vrot.lane.b32.xlu0 %v8307_v56, %s7172_s16 }
 0x39d   : > { %1761 = vst.msk [vmem:[#allocation2 + $0x1d4] sm:$0x1] %vm931_vm1, %v1671_v5 }
 0x39e   : > { %1986 = vrot.lane.b32.xlu1 %v8311_v13, %s7172_s16  ;;  %v1825_v48 = vpop.permute.xlu0 %1824 }
 0x39f   : > { %1918 = vst.msk [vmem:[#allocation2 + $0x1a5] sm:$0x1] %vm931_vm1, %v1825_v48 }
 0x3a0   : > { %v1827_v46 = vpop.permute.xlu1 %1826  ;;  %1988 = vrot.lane.b32.xlu0 %v8321_v2, %s7172_s16 }
 0x3a1   : > { %1919 = vst.msk [vmem:[#allocation2 + $0x1b5] sm:$0x1] %vm931_vm1, %v1827_v46 }
 0x3a2   : > { %1990 = vrot.lane.b32.xlu1 %v8325_v22, %s7172_s16  ;;  %v1829_v45 = vpop.permute.xlu0 %1828 }
 0x3a3   : > { %1920 = vst.msk [vmem:[#allocation2 + $0x1c5] sm:$0x1] %vm931_vm1, %v1829_v45 }
 0x3a4   : > { %v1831_v61 = vpop.permute.xlu1 %1830  ;;  %1992 = vrot.lane.b32.xlu0 %v8383_v21, %s7172_s16 }
 0x3a5   : > { %1921 = vst.msk [vmem:[#allocation2 + $0x1d5] sm:$0x1] %vm931_vm1, %v1831_v61 }
 0x3a6   : > { %1994 = vrot.lane.b32.xlu1 %v8387_v59, %s7172_s16  ;;  %v1193_v0 = vpop.permute.xlu0 %1192 }
 0x3a7   : > { %1282 = vst.msk [vmem:[#allocation2 + $0x1e1] sm:$0x1] %vm931_vm1, %v1193_v0 }
 0x3a8   : > { %v1195_v5 = vpop.permute.xlu1 %1194  ;;  %1996 = vrot.lane.b32.xlu0 %v8392_v20, %s7172_s16 }
 0x3a9   : > { %1283 = vst.msk [vmem:[#allocation2 + $0x1f1] sm:$0x1] %vm931_vm1, %v1195_v5 }
 0x3aa   : > { %1998 = vrot.lane.b32.xlu1 %v8399_v11, %s7172_s16  ;;  %v1197_v48 = vpop.permute.xlu0 %1196 }
 0x3ab   : > { %1284 = vst.msk [vmem:[#allocation2 + $0x201] sm:$0x1] %vm931_vm1, %v1197_v48 }
 0x3ac   : > { %v1199_v46 = vpop.permute.xlu1 %1198  ;;  %2000 = vrot.lane.b32.xlu0 %v8459_v34, %s7172_s16 }
 0x3ad   : > { %1285 = vst.msk [vmem:[#allocation2 + $0x211] sm:$0x1] %vm931_vm1, %v1199_v46 }
 0x3ae   : > { %2002 = vrot.lane.b32.xlu1 %v8465_v37, %s7172_s16  ;;  %v1353_v45 = vpop.permute.xlu0 %1352 }
 0x3af   : > { %1442 = vst.msk [vmem:[#allocation2 + $0x1e2] sm:$0x1] %vm931_vm1, %v1353_v45 }
 0x3b0   : > { %v1355_v61 = vpop.permute.xlu1 %1354  ;;  %2004 = vrot.lane.b32.xlu0 %v8475_v28, %s7172_s16 }
 0x3b1   : > { %1443 = vst.msk [vmem:[#allocation2 + $0x1f2] sm:$0x1] %vm931_vm1, %v1355_v61 }
 0x3b2   : > { %2006 = vrot.lane.b32.xlu1 %v8479_v30, %s7172_s16  ;;  %v1357_v0 = vpop.permute.xlu0 %1356 }
 0x3b3   : > { %1444 = vst.msk [vmem:[#allocation2 + $0x202] sm:$0x1] %vm931_vm1, %v1357_v0 }
 0x3b4   : > { %v1359_v5 = vpop.permute.xlu1 %1358  ;;  %2008 = vrot.lane.b32.xlu0 %v8539_v51, %s7172_s16 }
 0x3b5   : > { %1445 = vst.msk [vmem:[#allocation2 + $0x212] sm:$0x1] %vm931_vm1, %v1359_v5 }
 0x3b6   : > { %2010 = vrot.lane.b32.xlu1 %v8545_v31, %s7172_s16  ;;  %v1513_v48 = vpop.permute.xlu0 %1512 }
 0x3b7   : > { %1602 = vst.msk [vmem:[#allocation2 + $0x1e3] sm:$0x1] %vm931_vm1, %v1513_v48 }
 0x3b8   : > { %v1515_v46 = vpop.permute.xlu1 %1514  ;;  %2092 = vrot.lane.b32.xlu0 %v7389_v62, %s7173_s17 }
 0x3b9   : > { %1603 = vst.msk [vmem:[#allocation2 + $0x1f3] sm:$0x1] %vm931_vm1, %v1515_v46 }
 0x3ba   : > { %2094 = vrot.lane.b32.xlu1 %v7405_v3, %s7173_s17  ;;  %v1517_v45 = vpop.permute.xlu0 %1516 }
 0x3bb   : > { %1604 = vst.msk [vmem:[#allocation2 + $0x203] sm:$0x1] %vm931_vm1, %v1517_v45 }
 0x3bc   : > { %v1519_v61 = vpop.permute.xlu1 %1518  ;;  %2096 = vrot.lane.b32.xlu0 %v7585_v49, %s7173_s17 }
 0x3bd   : > { %1605 = vst.msk [vmem:[#allocation2 + $0x213] sm:$0x1] %vm931_vm1, %v1519_v61 }
 0x3be   : > { %2098 = vrot.lane.b32.xlu1 %v7589_v52, %s7173_s17  ;;  %v1673_v0 = vpop.permute.xlu0 %1672 }
 0x3bf   : > { %1762 = vst.msk [vmem:[#allocation2 + $0x1e4] sm:$0x1] %vm931_vm1, %v1673_v0 }
 0x3c0   : > { %v1675_v5 = vpop.permute.xlu1 %1674  ;;  %2100 = vrot.lane.b32.xlu0 %v7597_v53, %s7173_s17 }
 0x3c1   : > { %1763 = vst.msk [vmem:[#allocation2 + $0x1f4] sm:$0x1] %vm931_vm1, %v1675_v5 }
 0x3c2   : > { %2102 = vrot.lane.b32.xlu1 %v7601_v54, %s7173_s17  ;;  %v1677_v62 = vpop.permute.xlu0 %1676 }
 0x3c3   : > { %1764 = vst.msk [vmem:[#allocation2 + $0x204] sm:$0x1] %vm931_vm1, %v1677_v62 }
 0x3c4   : > { %v1679_v3 = vpop.permute.xlu1 %1678  ;;  %2104 = vrot.lane.b32.xlu0 %v7833_v57, %s7173_s17 }
 0x3c5   : > { %1765 = vst.msk [vmem:[#allocation2 + $0x214] sm:$0x1] %vm931_vm1, %v1679_v3 }
 0x3c6   : > { %2106 = vrot.lane.b32.xlu1 %v7837_v58, %s7173_s17  ;;  %v1833_v49 = vpop.permute.xlu0 %1832 }
 0x3c7   : > { %1922 = vst.msk [vmem:[#allocation2 + $0x1e5] sm:$0x1] %vm931_vm1, %v1833_v49 }
 0x3c8   : > { %v1835_v52 = vpop.permute.xlu1 %1834  ;;  %2108 = vrot.lane.b32.xlu0 %v7845_v47, %s7173_s17 }
 0x3c9   : > { %1923 = vst.msk [vmem:[#allocation2 + $0x1f5] sm:$0x1] %vm931_vm1, %v1835_v52 }
 0x3ca   : > { %2110 = vrot.lane.b32.xlu1 %v7849_v29, %s7173_s17  ;;  %v1837_v53 = vpop.permute.xlu0 %1836 }
 0x3cb   : > { %1924 = vst.msk [vmem:[#allocation2 + $0x205] sm:$0x1] %vm931_vm1, %v1837_v53  ;;  %v12770_v53 = vld [vmem:[#allocation16_spill] sm:$0xff] }
 0x3cc   : > { %v1839_v54 = vpop.permute.xlu1 %1838  ;;  %2112 = vrot.lane.b32.xlu0 %v7906_v26, %s7173_s17 }
 0x3cd   : > { %1925 = vst.msk [vmem:[#allocation2 + $0x215] sm:$0x1] %vm931_vm1, %v1839_v54  ;;  %v8819_v54 = vrot.slane %v12770_v53, %v7372_v50 }
 0x3ce   : > { %2114 = vrot.lane.b32.xlu1 %v7910_v6, %s7173_s17  ;;  %v1201_v57 = vpop.permute.xlu0 %1200 }
 0x3cf   : > { %1286 = vst.msk [vmem:[#allocation2 + $0x221] sm:$0x1] %vm931_vm1, %v1201_v57  ;;  %v12771_v57 = vld [vmem:[#allocation17_spill] sm:$0xff] }
 0x3d0   : > { %v1203_v58 = vpop.permute.xlu1 %1202  ;;  %2116 = vrot.lane.b32.xlu0 %v7919_v12, %s7173_s17 }
 0x3d1   : > { %v8823_v58 = vrot.slane %v12771_v57, %v7372_v50  ;;  %v12786_v57 = vld [vmem:[#allocation31_spill] sm:$0xff] }
 0x3d2   : > { %2118 = vrot.lane.b32.xlu1 %v7923_v1, %s7173_s17  ;;  %v1205_v47 = vpop.permute.xlu0 %1204 }
 0x3d3   : > { %v12772_v47 = vld [vmem:[#allocation18_spill] sm:$0xff] }
 0x3d4   : > { %v1207_v29 = vpop.permute.xlu1 %1206  ;;  %2120 = vrot.lane.b32.xlu0 %v7989_v27, %s7173_s17 }
 0x3d5   : > { %v8831_v29 = vrot.slane %v12772_v47, %v7372_v50 }
 0x3d6   : > { %2122 = vrot.lane.b32.xlu1 %v7993_v32, %s7173_s17  ;;  %v1361_v26 = vpop.permute.xlu0 %1360 }
 0x3d7   : > { %1446 = vst.msk [vmem:[#allocation2 + $0x222] sm:$0x1] %vm931_vm1, %v1361_v26 }
 0x3d8   : > { %v1363_v6 = vpop.permute.xlu1 %1362  ;;  %2124 = vrot.lane.b32.xlu0 %v7998_v63, %s7173_s17 }
 0x3d9   : > { %v12773_v6 = vld [vmem:[#allocation20_spill] sm:$0xff] }
 0x3da   : > { %2126 = vrot.lane.b32.xlu1 %v8005_v33, %s7173_s17  ;;  %v1365_v12 = vpop.permute.xlu0 %1364 }
 0x3db   : > { %v8835_v12 = vrot.slane %v12773_v6, %v7372_v50 }
 0x3dc   : > { %v1367_v1 = vpop.permute.xlu1 %1366  ;;  %2128 = vrot.lane.b32.xlu0 %v8077_v36, %s7173_s17 }
 0x3de   : > { %2130 = vrot.lane.b32.xlu1 %v8082_v60, %s7173_s17  ;;  %v1521_v27 = vpop.permute.xlu0 %1520 }
 0x3df   : > { %1606 = vst.msk [vmem:[#allocation2 + $0x223] sm:$0x1] %vm931_vm1, %v1521_v27  ;;  %v12774_v27 = vld [vmem:[#allocation22_spill] sm:$0xff] }
 0x3e0   : > { %v1523_v32 = vpop.permute.xlu1 %1522  ;;  %2132 = vrot.lane.b32.xlu0 %v8094_v25, %s7173_s17 }
 0x3e1   : > { %v8843_v32 = vrot.slane %v12774_v27, %v7372_v50  ;;  %v8940_v27 = vrot.slane %v8118_v55, %v7372_v50  ;;  %v8954_v55 = vrot.slane %v8152_v7, %v7372_v50  ;;  %v12789_v7 = vld [vmem:[#allocation38_spill] sm:$0xff] }
 0x3e2   : > { %2134 = vrot.lane.b32.xlu1 %v8113_v4, %s7173_s17  ;;  %v1525_v63 = vpop.permute.xlu0 %1524 }
 0x3e4   : > { %v1527_v33 = vpop.permute.xlu1 %1526  ;;  %2136 = vrot.lane.b32.xlu0 %v8225_v19, %s7173_s17 }
 0x3e5   : > { %v12775_v33 = vld [vmem:[#allocation24_spill] sm:$0xff] }
 0x3e6   : > { %2138 = vrot.lane.b32.xlu1 %v8229_v43, %s7173_s17  ;;  %v1681_v36 = vpop.permute.xlu0 %1680 }
 0x3e7   : > { %1766 = vst.msk [vmem:[#allocation2 + $0x224] sm:$0x1] %vm931_vm1, %v1681_v36  ;;  %v8847_v36 = vrot.slane %v12775_v33, %v7372_v50  ;;  %v8944_v33 = vrot.slane %v8145_v18, %v7372_v50 }
 0x3e8   : > { %v1683_v60 = vpop.permute.xlu1 %1682  ;;  %2140 = vrot.lane.b32.xlu0 %v8239_v24, %s7173_s17 }
 0x3ea   : > { %2142 = vrot.lane.b32.xlu1 %v8243_v35, %s7173_s17  ;;  %v1685_v25 = vpop.permute.xlu0 %1684 }
 0x3eb   : > { %v12776_v25 = vld [vmem:[#allocation19_spill] sm:$0xff] }
 0x3ec   : > { %v1687_v4 = vpop.permute.xlu1 %1686  ;;  %2144 = vrot.lane.b32.xlu0 %v8307_v56, %s7173_s17 }
 0x3ed   : > { %v8856_v4 = vrot.slane %v12776_v25, %v7372_v50 }
 0x3ee   : > { %2146 = vrot.lane.b32.xlu1 %v8311_v13, %s7173_s17  ;;  %v1841_v19 = vpop.permute.xlu0 %1840 }
 0x3ef   : > { %1926 = vst.msk [vmem:[#allocation2 + $0x225] sm:$0x1] %vm931_vm1, %v1841_v19 }
 0x3f0   : > { %v1843_v43 = vpop.permute.xlu1 %1842  ;;  %2148 = vrot.lane.b32.xlu0 %v8321_v2, %s7173_s17 }
 0x3f1   : > { %v12777_v43 = vld [vmem:[#allocation21_spill] sm:$0xff] }
 0x3f2   : > { %2150 = vrot.lane.b32.xlu1 %v8325_v22, %s7173_s17  ;;  %v1845_v24 = vpop.permute.xlu0 %1844 }
 0x3f3   : > { %v8860_v24 = vrot.slane %v12777_v43, %v7372_v50 }
 0x3f4   : > { %v1847_v35 = vpop.permute.xlu1 %1846  ;;  %2152 = vrot.lane.b32.xlu0 %v8383_v21, %s7173_s17 }
 0x3f6   : > { %2154 = vrot.lane.b32.xlu1 %v8387_v59, %s7173_s17  ;;  %v1209_v56 = vpop.permute.xlu0 %1208 }
 0x3f7   : > { %v12778_v56 = vld [vmem:[#allocation23_spill] sm:$0xff] }
 0x3f8   : > { %v1211_v13 = vpop.permute.xlu1 %1210  ;;  %2156 = vrot.lane.b32.xlu0 %v8392_v20, %s7173_s17 }
 0x3f9   : > { %v8870_v13 = vrot.slane %v12778_v56, %v7372_v50  ;;  %v8970_v56 = vrot.slane %v12789_v7, %v7372_v50 }
 0x3fa   : > { %2158 = vrot.lane.b32.xlu1 %v8399_v11, %s7173_s17  ;;  %v1369_v2 = vpop.permute.xlu0 %1368  ;;  %v8724_v11 = vrot.slane %v7424_v8, %v7372_v50  ;;  %v8740_v8 = vrot.slane %v7448_v17, %v7372_v50  ;;  %v8754_v17 = vrot.slane %v7436_v14, %v7372_v50  ;;  %v8768_v14 = vrot.slane %v7461_v23, %v7372_v50 }
 0x3fb   : > { %v8782_v23 = vrot.slane %v7534_v40, %v7372_v50  ;;  %v8796_v40 = vrot.slane %v7553_v44, %v7372_v50  ;;  %v8810_v44 = vrot.slane %v7537_v41, %v7372_v50 }
 0x3fc   : > { %v1371_v48 = vpop.permute.xlu1 %1370  ;;  %2160 = vrot.lane.b32.xlu0 %v8459_v34, %s7173_s17  ;;  %v8728_v34 = vrot.slane %v7430_v10, %v7372_v50 }
 0x3fd   : > { %v12779_v48 = vld [vmem:[#allocation25_spill] sm:$0xff] }
 0x3fe   : > { %2162 = vrot.lane.b32.xlu1 %v8465_v37, %s7173_s17  ;;  %v1529_v22 = vpop.permute.xlu0 %1528 }
 0x3ff   : > { %v8874_v22 = vrot.slane %v12779_v48, %v7372_v50 }
 0x400   : > { %v1531_v21 = vpop.permute.xlu1 %1530  ;;  %2164 = vrot.lane.b32.xlu0 %v8475_v28, %s7173_s17 }
 0x402   : > { %2166 = vrot.lane.b32.xlu1 %v8479_v30, %s7173_s17  ;;  %v1689_v59 = vpop.permute.xlu0 %1688  ;;  %v8736_v30 = vrot.slane %v7440_v15, %v7372_v50  ;;  %v8750_v15 = vrot.slane %v7427_v9, %v7372_v50  ;;  %v8764_v9 = vrot.slane %v7444_v16, %v7372_v50  ;;  %v8778_v16 = vrot.slane %v7520_v38, %v7372_v50 }
 0x403   : > { %v8792_v38 = vrot.slane %v7541_v42, %v7372_v50  ;;  %v8806_v42 = vrot.slane %v7529_v39, %v7372_v50  ;;  %v12780_v59 = vld [vmem:[#allocation26_spill] sm:$0xff] }
 0x404   : > { %v1691_v20 = vpop.permute.xlu1 %1690  ;;  %2168 = vrot.lane.b32.xlu0 %v8539_v51, %s7173_s17 }
 0x405   : > { %v8884_v20 = vrot.slane %v12780_v59, %v7372_v50  ;;  %v12791_v59 = vcombine.high %v12789_v7, %v12789_v7 }
 0x406   : > { %2170 = vrot.lane.b32.xlu1 %v8545_v31, %s7173_s17  ;;  %v1849_v37 = vpop.permute.xlu0 %1848 }
 0x408   : > { %v1851_v28 = vpop.permute.xlu1 %1850  ;;  %2742 = vrot.lane.b32.xlu0 %v8724_v11, %s7167_s20 }
 0x409   : > { %v12781_v28 = vld [vmem:[#allocation28_spill] sm:$0xff] }
 0x40a   : > { %2744 = vrot.lane.b32.xlu1 %v8728_v34, %s7167_s20  ;;  %v1981_v31 = vpop.permute.xlu0 %1980 }
 0x40b   : > { %2076 = vst.msk [vmem:[#allocation2 + $0x186] sm:$0x1] %vm931_vm1, %v1981_v31  ;;  %v8888_v31 = vrot.slane %v12781_v28, %v7372_v50 }
 0x40c   : > { %v1983_v10 = vpop.permute.xlu1 %1982  ;;  %2746 = vrot.lane.b32.xlu0 %v8736_v30, %s7167_s20 }
 0x40d   : > { %2077 = vst.msk [vmem:[#allocation2 + $0x196] sm:$0x1] %vm931_vm1, %v1983_v10 }
 0x40e   : > { %2748 = vrot.lane.b32.xlu1 %v8740_v8, %s7167_s20  ;;  %v1985_v51 = vpop.permute.xlu0 %1984 }
 0x40f   : > { %2078 = vst.msk [vmem:[#allocation2 + $0x1a6] sm:$0x1] %vm931_vm1, %v1985_v51  ;;  %v12782_v51 = vld [vmem:[#allocation30_spill] sm:$0xff] }
 0x410   : > { %v1987_v46 = vpop.permute.xlu1 %1986  ;;  %2750 = vrot.lane.b32.xlu0 %v8750_v15, %s7167_s20 }
 0x411   : > { %2079 = vst.msk [vmem:[#allocation2 + $0x1b6] sm:$0x1] %vm931_vm1, %v1987_v46  ;;  %v8898_v46 = vrot.slane %v12782_v51, %v7372_v50 }
 0x412   : > { %2752 = vrot.lane.b32.xlu1 %v8754_v17, %s7167_s20  ;;  %v1989_v45 = vpop.permute.xlu0 %1988 }
 0x413   : > { %2080 = vst.msk [vmem:[#allocation2 + $0x1c6] sm:$0x1] %vm931_vm1, %v1989_v45 }
 0x414   : > { %v1991_v61 = vpop.permute.xlu1 %1990  ;;  %2754 = vrot.lane.b32.xlu0 %v8764_v9, %s7167_s20 }
 0x415   : > { %2081 = vst.msk [vmem:[#allocation2 + $0x1d6] sm:$0x1] %vm931_vm1, %v1991_v61  ;;  %v12783_v61 = vld [vmem:[#allocation32_spill] sm:$0xff] }
 0x416   : > { %2756 = vrot.lane.b32.xlu1 %v8768_v14, %s7167_s20  ;;  %v1993_v0 = vpop.permute.xlu0 %1992 }
 0x417   : > { %2082 = vst.msk [vmem:[#allocation2 + $0x1e6] sm:$0x1] %vm931_vm1, %v1993_v0  ;;  %v8902_v0 = vrot.slane %v12783_v61, %v7372_v50 }
 0x418   : > { %v1995_v5 = vpop.permute.xlu1 %1994  ;;  %2758 = vrot.lane.b32.xlu0 %v8778_v16, %s7167_s20 }
 0x419   : > { %2083 = vst.msk [vmem:[#allocation2 + $0x1f6] sm:$0x1] %vm931_vm1, %v1995_v5 }
 0x41a   : > { %2760 = vrot.lane.b32.xlu1 %v8782_v23, %s7167_s20  ;;  %v1997_v62 = vpop.permute.xlu0 %1996 }
 0x41b   : > { %2084 = vst.msk [vmem:[#allocation2 + $0x206] sm:$0x1] %vm931_vm1, %v1997_v62  ;;  %v12784_v62 = vld [vmem:[#allocation27_spill] sm:$0xff] }
 0x41c   : > { %v1999_v3 = vpop.permute.xlu1 %1998  ;;  %2762 = vrot.lane.b32.xlu0 %v8792_v38, %s7167_s20 }
 0x41d   : > { %2085 = vst.msk [vmem:[#allocation2 + $0x216] sm:$0x1] %vm931_vm1, %v1999_v3  ;;  %v8912_v3 = vrot.slane %v12784_v62, %v7372_v50 }
 0x41e   : > { %2764 = vrot.lane.b32.xlu1 %v8796_v40, %s7167_s20  ;;  %v2001_v49 = vpop.permute.xlu0 %2000 }
 0x41f   : > { %2086 = vst.msk [vmem:[#allocation2 + $0x226] sm:$0x1] %vm931_vm1, %v2001_v49 }
 0x420   : > { %v2003_v52 = vpop.permute.xlu1 %2002  ;;  %2766 = vrot.lane.b32.xlu0 %v8806_v42, %s7167_s20 }
 0x421   : > { %v12785_v52 = vld [vmem:[#allocation29_spill] sm:$0xff] }
 0x422   : > { %2768 = vrot.lane.b32.xlu1 %v8810_v44, %s7167_s20  ;;  %v2005_v39 = vpop.permute.xlu0 %2004  ;;  %v8916_v53 = vrot.slane %v12785_v52, %v7372_v50 }
 0x424   : > { %v2007_v41 = vpop.permute.xlu1 %2006  ;;  %2770 = vrot.lane.b32.xlu0 %v8819_v54, %s7167_s20 }
 0x425   : > { %v8926_v41 = vrot.slane %v12786_v57, %v7372_v50 }
 0x426   : > { %2772 = vrot.lane.b32.xlu1 %v8823_v58, %s7167_s20  ;;  %v2009_v26 = vpop.permute.xlu0 %2008 }
 0x427   : > { %v12787_v26 = vld [vmem:[#allocation33_spill] sm:$0xff] }
 0x428   : > { %v2011_v1 = vpop.permute.xlu1 %2010  ;;  %2774 = vrot.lane.b32.xlu0 %v8831_v29, %s7167_s20  ;;  %v8930_v6 = vrot.slane %v12787_v26, %v7372_v50 }
 0x42a   : > { %2776 = vrot.lane.b32.xlu1 %v8835_v12, %s7167_s20  ;;  %v2093_v63 = vpop.permute.xlu0 %2092 }
 0x42c   : > { %v2095_v60 = vpop.permute.xlu1 %2094  ;;  %2778 = vrot.lane.b32.xlu0 %v8843_v32, %s7167_s20 }
 0x42d   : > { %2213 = vst.msk [vmem:[#allocation2 + $0x17] sm:$0x1] %vm931_vm1, %v2095_v60 }
 0x42e   : > { %2780 = vrot.lane.b32.xlu1 %v8847_v36, %s7167_s20  ;;  %v2097_v19 = vpop.permute.xlu0 %2096 }
 0x42f   : > { %2214 = vst.msk [vmem:[#allocation2 + $0x27] sm:$0x1] %vm931_vm1, %v2097_v19  ;;  %v12788_v19 = vcombine.high %v8145_v18, %v8145_v18  ;;  %v12790_v18 = vld [vmem:[#allocation39_spill] sm:$0xff] }
 0x430   : > { %v2099_v35 = vpop.permute.xlu1 %2098  ;;  %2782 = vrot.lane.b32.xlu0 %v8856_v4, %s7167_s20  ;;  %v8974_v48 = vrot.slane %v12790_v18, %v7372_v50 }
 0x431   : > { %2215 = vst.msk [vmem:[#allocation2 + $0x37] sm:$0x1] %vm931_vm1, %v2099_v35  ;;  %v8960_v43 = vrot.slane %v12788_v19, %v7372_v50 }
 0x432   : > { %2784 = vrot.lane.b32.xlu1 %v8860_v24, %s7167_s20  ;;  %v2101_v2 = vpop.permute.xlu0 %2100 }
 0x433   : > { %2216 = vst.msk [vmem:[#allocation2 + $0x47] sm:$0x1] %vm931_vm1, %v2101_v2 }
 0x434   : > { %v2103_v21 = vpop.permute.xlu1 %2102  ;;  %2786 = vrot.lane.b32.xlu0 %v8870_v13, %s7167_s20 }
 0x435   : > { %2217 = vst.msk [vmem:[#allocation2 + $0x57] sm:$0x1] %vm931_vm1, %v2103_v21 }
 0x436   : > { %2788 = vrot.lane.b32.xlu1 %v8874_v22, %s7167_s20  ;;  %v2105_v37 = vpop.permute.xlu0 %2104 }
 0x437   : > { %2218 = vst.msk [vmem:[#allocation2 + $0x67] sm:$0x1] %vm931_vm1, %v2105_v37  ;;  %v8986_v37 = vrot.slane %v12791_v59, %v7372_v50 }
 0x438   : > { %v2107_v10 = vpop.permute.xlu1 %2106  ;;  %2790 = vrot.lane.b32.xlu0 %v8884_v20, %s7167_s20 }
 0x439   : > { %2219 = vst.msk [vmem:[#allocation2 + $0x77] sm:$0x1] %vm931_vm1, %v2107_v10  ;;  %v12792_v10 = vcombine.high %v12790_v18, %v12790_v18 }
 0x43a   : > { %2792 = vrot.lane.b32.xlu1 %v8888_v31, %s7167_s20  ;;  %v2109_v45 = vpop.permute.xlu0 %2108 }
 0x43b   : > { %2220 = vst.msk [vmem:[#allocation2 + $0x87] sm:$0x1] %vm931_vm1, %v2109_v45  ;;  %v8992_v51 = vrot.slane %v12792_v10, %v7372_v50 }
 0x43c   : > { %v2111_v5 = vpop.permute.xlu1 %2110  ;;  %2794 = vrot.lane.b32.xlu0 %v8898_v46, %s7167_s20 }
 0x43d   : > { %2221 = vst.msk [vmem:[#allocation2 + $0x97] sm:$0x1] %vm931_vm1, %v2111_v5 }
 0x43e   : > { %2796 = vrot.lane.b32.xlu1 %v8902_v0, %s7167_s20  ;;  %v2113_v49 = vpop.permute.xlu0 %2112 }
 0x43f   : > { %2222 = vst.msk [vmem:[#allocation2 + $0xa7] sm:$0x1] %vm931_vm1, %v2113_v49 }
 0x440   : > { %v2115_v39 = vpop.permute.xlu1 %2114  ;;  %2798 = vrot.lane.b32.xlu0 %v8912_v3, %s7167_s20 }
 0x441   : > { %2223 = vst.msk [vmem:[#allocation2 + $0xb7] sm:$0x1] %vm931_vm1, %v2115_v39 }
 0x442   : > { %2800 = vrot.lane.b32.xlu1 %v8916_v53, %s7167_s20  ;;  %v2117_v47 = vpop.permute.xlu0 %2116 }
 0x443   : > { %2224 = vst.msk [vmem:[#allocation2 + $0xc7] sm:$0x1] %vm931_vm1, %v2117_v47 }
 0x444   : > { %v2119_v1 = vpop.permute.xlu1 %2118  ;;  %2802 = vrot.lane.b32.xlu0 %v8926_v41, %s7167_s20 }
 0x445   : > { %2225 = vst.msk [vmem:[#allocation2 + $0xd7] sm:$0x1] %vm931_vm1, %v2119_v1 }
 0x446   : > { %2804 = vrot.lane.b32.xlu1 %v8930_v6, %s7167_s20  ;;  %v2121_v63 = vpop.permute.xlu0 %2120 }
 0x447   : > { %2226 = vst.msk [vmem:[#allocation2 + $0xe7] sm:$0x1] %vm931_vm1, %v2121_v63 }
 0x448   : > { %v2123_v60 = vpop.permute.xlu1 %2122  ;;  %2806 = vrot.lane.b32.xlu0 %v8940_v27, %s7167_s20 }
 0x449   : > { %2227 = vst.msk [vmem:[#allocation2 + $0xf7] sm:$0x1] %vm931_vm1, %v2123_v60 }
 0x44a   : > { %2808 = vrot.lane.b32.xlu1 %v8944_v33, %s7167_s20  ;;  %v2125_v25 = vpop.permute.xlu0 %2124 }
 0x44b   : > { %2228 = vst.msk [vmem:[#allocation2 + $0x107] sm:$0x1] %vm931_vm1, %v2125_v25 }
 0x44c   : > { %v2127_v35 = vpop.permute.xlu1 %2126  ;;  %2810 = vrot.lane.b32.xlu0 %v8954_v55, %s7167_s20 }
 0x44d   : > { %2229 = vst.msk [vmem:[#allocation2 + $0x117] sm:$0x1] %vm931_vm1, %v2127_v35 }
 0x44e   : > { %2812 = vrot.lane.b32.xlu1 %v8960_v43, %s7167_s20  ;;  %v2129_v2 = vpop.permute.xlu0 %2128 }
 0x44f   : > { %2230 = vst.msk [vmem:[#allocation2 + $0x127] sm:$0x1] %vm931_vm1, %v2129_v2 }
 0x450   : > { %v2131_v21 = vpop.permute.xlu1 %2130  ;;  %2814 = vrot.lane.b32.xlu0 %v8970_v56, %s7167_s20 }
 0x451   : > { %2231 = vst.msk [vmem:[#allocation2 + $0x137] sm:$0x1] %vm931_vm1, %v2131_v21 }
 0x452   : > { %2816 = vrot.lane.b32.xlu1 %v8974_v48, %s7167_s20  ;;  %v2133_v28 = vpop.permute.xlu0 %2132 }
 0x453   : > { %2232 = vst.msk [vmem:[#allocation2 + $0x147] sm:$0x1] %vm931_vm1, %v2133_v28 }
 0x454   : > { %v2135_v45 = vpop.permute.xlu1 %2134  ;;  %2818 = vrot.lane.b32.xlu0 %v8986_v37, %s7167_s20 }
 0x455   : > { %2233 = vst.msk [vmem:[#allocation2 + $0x157] sm:$0x1] %vm931_vm1, %v2135_v45 }
 0x456   : > { %2820 = vrot.lane.b32.xlu1 %v8992_v51, %s7167_s20  ;;  %v2137_v61 = vpop.permute.xlu0 %2136  ;;  %s7179_s20 = smov 125  }
 0x457   : > { %2234 = vst.msk [vmem:[#allocation2 + $0x167] sm:$0x1] %vm931_vm1, %v2137_v61 }
 0x458   : > { %v2139_v5 = vpop.permute.xlu1 %2138  ;;  %2902 = vrot.lane.b32.xlu0 %v8724_v11, %s7168_s29 }
 0x459   : > { %2235 = vst.msk [vmem:[#allocation2 + $0x177] sm:$0x1] %vm931_vm1, %v2139_v5 }
 0x45a   : > { %2904 = vrot.lane.b32.xlu1 %v8728_v34, %s7168_s29  ;;  %v2141_v62 = vpop.permute.xlu0 %2140 }
 0x45b   : > { %2236 = vst.msk [vmem:[#allocation2 + $0x187] sm:$0x1] %vm931_vm1, %v2141_v62 }
 0x45c   : > { %v2143_v49 = vpop.permute.xlu1 %2142  ;;  %2906 = vrot.lane.b32.xlu0 %v8736_v30, %s7168_s29 }
 0x45d   : > { %2237 = vst.msk [vmem:[#allocation2 + $0x197] sm:$0x1] %vm931_vm1, %v2143_v49 }
 0x45e   : > { %2908 = vrot.lane.b32.xlu1 %v8740_v8, %s7168_s29  ;;  %v2145_v52 = vpop.permute.xlu0 %2144 }
 0x45f   : > { %2238 = vst.msk [vmem:[#allocation2 + $0x1a7] sm:$0x1] %vm931_vm1, %v2145_v52 }
 0x460   : > { %v2147_v39 = vpop.permute.xlu1 %2146  ;;  %2910 = vrot.lane.b32.xlu0 %v8750_v15, %s7168_s29 }
 0x461   : > { %2239 = vst.msk [vmem:[#allocation2 + $0x1b7] sm:$0x1] %vm931_vm1, %v2147_v39 }
 0x462   : > { %2912 = vrot.lane.b32.xlu1 %v8754_v17, %s7168_s29  ;;  %v2149_v57 = vpop.permute.xlu0 %2148 }
 0x463   : > { %2240 = vst.msk [vmem:[#allocation2 + $0x1c7] sm:$0x1] %vm931_vm1, %v2149_v57 }
 0x464   : > { %v2151_v47 = vpop.permute.xlu1 %2150  ;;  %2914 = vrot.lane.b32.xlu0 %v8764_v9, %s7168_s29 }
 0x465   : > { %2241 = vst.msk [vmem:[#allocation2 + $0x1d7] sm:$0x1] %vm931_vm1, %v2151_v47 }
 0x466   : > { %2916 = vrot.lane.b32.xlu1 %v8768_v14, %s7168_s29  ;;  %v2153_v26 = vpop.permute.xlu0 %2152 }
 0x467   : > { %2242 = vst.msk [vmem:[#allocation2 + $0x1e7] sm:$0x1] %vm931_vm1, %v2153_v26 }
 0x468   : > { %v2155_v1 = vpop.permute.xlu1 %2154  ;;  %2918 = vrot.lane.b32.xlu0 %v8778_v16, %s7168_s29 }
 0x469   : > { %2243 = vst.msk [vmem:[#allocation2 + $0x1f7] sm:$0x1] %vm931_vm1, %v2155_v1 }
 0x46a   : > { %2920 = vrot.lane.b32.xlu1 %v8782_v23, %s7168_s29  ;;  %v2157_v63 = vpop.permute.xlu0 %2156 }
 0x46b   : > { %2244 = vst.msk [vmem:[#allocation2 + $0x207] sm:$0x1] %vm931_vm1, %v2157_v63 }
 0x46c   : > { %v2159_v60 = vpop.permute.xlu1 %2158  ;;  %2922 = vrot.lane.b32.xlu0 %v8792_v38, %s7168_s29 }
 0x46d   : > { %2245 = vst.msk [vmem:[#allocation2 + $0x217] sm:$0x1] %vm931_vm1, %v2159_v60 }
 0x46e   : > { %2924 = vrot.lane.b32.xlu1 %v8796_v40, %s7168_s29  ;;  %v2161_v25 = vpop.permute.xlu0 %2160 }
 0x46f   : > { %2246 = vst.msk [vmem:[#allocation2 + $0x227] sm:$0x1] %vm931_vm1, %v2161_v25 }
 0x470   : > { %v2163_v19 = vpop.permute.xlu1 %2162  ;;  %2926 = vrot.lane.b32.xlu0 %v8806_v42, %s7168_s29 }
 0x472   : > { %2928 = vrot.lane.b32.xlu1 %v8810_v44, %s7168_s29  ;;  %v2165_v35 = vpop.permute.xlu0 %2164 }
 0x474   : > { %v2167_v7 = vpop.permute.xlu1 %2166  ;;  %2930 = vrot.lane.b32.xlu0 %v8819_v54, %s7168_s29 }
 0x476   : > { %2932 = vrot.lane.b32.xlu1 %v8823_v58, %s7168_s29  ;;  %v2169_v2 = vpop.permute.xlu0 %2168 }
 0x478   : > { %v2171_v18 = vpop.permute.xlu1 %2170  ;;  %2934 = vrot.lane.b32.xlu0 %v8831_v29, %s7168_s29 }
 0x47a   : > { %2936 = vrot.lane.b32.xlu1 %v8835_v12, %s7168_s29  ;;  %v2743_v21 = vpop.permute.xlu0 %2742 }
 0x47c   : > { %v2745_v59 = vpop.permute.xlu1 %2744  ;;  %2938 = vrot.lane.b32.xlu0 %v8843_v32, %s7168_s29 }
 0x47d   : > { %2863 = vst.msk [vmem:[#allocation2 + $0x19] sm:$0x1] %vm931_vm1, %v2745_v59 }
 0x47e   : > { %2940 = vrot.lane.b32.xlu1 %v8847_v36, %s7168_s29  ;;  %v2747_v28 = vpop.permute.xlu0 %2746 }
 0x47f   : > { %2864 = vst.msk [vmem:[#allocation2 + $0x29] sm:$0x1] %vm931_vm1, %v2747_v28 }
 0x480   : > { %v2749_v10 = vpop.permute.xlu1 %2748  ;;  %2942 = vrot.lane.b32.xlu0 %v8856_v4, %s7168_s29 }
 0x481   : > { %2865 = vst.msk [vmem:[#allocation2 + $0x39] sm:$0x1] %vm931_vm1, %v2749_v10 }
 0x482   : > { %2944 = vrot.lane.b32.xlu1 %v8860_v24, %s7168_s29  ;;  %v2751_v45 = vpop.permute.xlu0 %2750 }
 0x483   : > { %2866 = vst.msk [vmem:[#allocation2 + $0x49] sm:$0x1] %vm931_vm1, %v2751_v45 }
 0x484   : > { %v2753_v61 = vpop.permute.xlu1 %2752  ;;  %2946 = vrot.lane.b32.xlu0 %v8870_v13, %s7168_s29 }
 0x485   : > { %2867 = vst.msk [vmem:[#allocation2 + $0x59] sm:$0x1] %vm931_vm1, %v2753_v61 }
 0x486   : > { %2948 = vrot.lane.b32.xlu1 %v8874_v22, %s7168_s29  ;;  %v2755_v5 = vpop.permute.xlu0 %2754 }
 0x487   : > { %2868 = vst.msk [vmem:[#allocation2 + $0x69] sm:$0x1] %vm931_vm1, %v2755_v5 }
 0x488   : > { %v2757_v62 = vpop.permute.xlu1 %2756  ;;  %2950 = vrot.lane.b32.xlu0 %v8884_v20, %s7168_s29 }
 0x489   : > { %2869 = vst.msk [vmem:[#allocation2 + $0x79] sm:$0x1] %vm931_vm1, %v2757_v62 }
 0x48a   : > { %2952 = vrot.lane.b32.xlu1 %v8888_v31, %s7168_s29  ;;  %v2759_v49 = vpop.permute.xlu0 %2758 }
 0x48b   : > { %2870 = vst.msk [vmem:[#allocation2 + $0x89] sm:$0x1] %vm931_vm1, %v2759_v49 }
 0x48c   : > { %v2761_v52 = vpop.permute.xlu1 %2760  ;;  %2954 = vrot.lane.b32.xlu0 %v8898_v46, %s7168_s29 }
 0x48d   : > { %2871 = vst.msk [vmem:[#allocation2 + $0x99] sm:$0x1] %vm931_vm1, %v2761_v52 }
 0x48e   : > { %2956 = vrot.lane.b32.xlu1 %v8902_v0, %s7168_s29  ;;  %v2763_v39 = vpop.permute.xlu0 %2762 }
 0x48f   : > { %2872 = vst.msk [vmem:[#allocation2 + $0xa9] sm:$0x1] %vm931_vm1, %v2763_v39 }
 0x490   : > { %v2765_v57 = vpop.permute.xlu1 %2764  ;;  %2958 = vrot.lane.b32.xlu0 %v8912_v3, %s7168_s29 }
 0x491   : > { %2873 = vst.msk [vmem:[#allocation2 + $0xb9] sm:$0x1] %vm931_vm1, %v2765_v57 }
 0x492   : > { %2960 = vrot.lane.b32.xlu1 %v8916_v53, %s7168_s29  ;;  %v2767_v47 = vpop.permute.xlu0 %2766 }
 0x493   : > { %2874 = vst.msk [vmem:[#allocation2 + $0xc9] sm:$0x1] %vm931_vm1, %v2767_v47 }
 0x494   : > { %v2769_v26 = vpop.permute.xlu1 %2768  ;;  %2962 = vrot.lane.b32.xlu0 %v8926_v41, %s7168_s29 }
 0x495   : > { %2875 = vst.msk [vmem:[#allocation2 + $0xd9] sm:$0x1] %vm931_vm1, %v2769_v26 }
 0x496   : > { %2964 = vrot.lane.b32.xlu1 %v8930_v6, %s7168_s29  ;;  %v2771_v1 = vpop.permute.xlu0 %2770 }
 0x497   : > { %2876 = vst.msk [vmem:[#allocation2 + $0xe9] sm:$0x1] %vm931_vm1, %v2771_v1 }
 0x498   : > { %v2773_v63 = vpop.permute.xlu1 %2772  ;;  %2966 = vrot.lane.b32.xlu0 %v8940_v27, %s7168_s29 }
 0x499   : > { %2877 = vst.msk [vmem:[#allocation2 + $0xf9] sm:$0x1] %vm931_vm1, %v2773_v63 }
 0x49a   : > { %2968 = vrot.lane.b32.xlu1 %v8944_v33, %s7168_s29  ;;  %v2775_v60 = vpop.permute.xlu0 %2774 }
 0x49b   : > { %2878 = vst.msk [vmem:[#allocation2 + $0x109] sm:$0x1] %vm931_vm1, %v2775_v60 }
 0x49c   : > { %v2777_v25 = vpop.permute.xlu1 %2776  ;;  %2970 = vrot.lane.b32.xlu0 %v8954_v55, %s7168_s29 }
 0x49d   : > { %2879 = vst.msk [vmem:[#allocation2 + $0x119] sm:$0x1] %vm931_vm1, %v2777_v25 }
 0x49e   : > { %2972 = vrot.lane.b32.xlu1 %v8960_v43, %s7168_s29  ;;  %v2779_v19 = vpop.permute.xlu0 %2778 }
 0x49f   : > { %2880 = vst.msk [vmem:[#allocation2 + $0x129] sm:$0x1] %vm931_vm1, %v2779_v19 }
 0x4a0   : > { %v2781_v35 = vpop.permute.xlu1 %2780  ;;  %2974 = vrot.lane.b32.xlu0 %v8970_v56, %s7168_s29 }
 0x4a1   : > { %2881 = vst.msk [vmem:[#allocation2 + $0x139] sm:$0x1] %vm931_vm1, %v2781_v35 }
 0x4a2   : > { %2976 = vrot.lane.b32.xlu1 %v8974_v48, %s7168_s29  ;;  %v2783_v7 = vpop.permute.xlu0 %2782 }
 0x4a3   : > { %2882 = vst.msk [vmem:[#allocation2 + $0x149] sm:$0x1] %vm931_vm1, %v2783_v7 }
 0x4a4   : > { %v2785_v2 = vpop.permute.xlu1 %2784  ;;  %2978 = vrot.lane.b32.xlu0 %v8986_v37, %s7168_s29 }
 0x4a5   : > { %2883 = vst.msk [vmem:[#allocation2 + $0x159] sm:$0x1] %vm931_vm1, %v2785_v2 }
 0x4a6   : > { %2980 = vrot.lane.b32.xlu1 %v8992_v51, %s7168_s29  ;;  %v2787_v18 = vpop.permute.xlu0 %2786  ;;  %s7180_s29 = smov 124  }
 0x4a7   : > { %2884 = vst.msk [vmem:[#allocation2 + $0x169] sm:$0x1] %vm931_vm1, %v2787_v18 }
 0x4a8   : > { %v2789_v21 = vpop.permute.xlu1 %2788  ;;  %3062 = vrot.lane.b32.xlu0 %v8724_v11, %s7169_s9 }
 0x4a9   : > { %2885 = vst.msk [vmem:[#allocation2 + $0x179] sm:$0x1] %vm931_vm1, %v2789_v21 }
 0x4aa   : > { %3064 = vrot.lane.b32.xlu1 %v8728_v34, %s7169_s9  ;;  %v2791_v59 = vpop.permute.xlu0 %2790 }
 0x4ab   : > { %2886 = vst.msk [vmem:[#allocation2 + $0x189] sm:$0x1] %vm931_vm1, %v2791_v59 }
 0x4ac   : > { %v2793_v28 = vpop.permute.xlu1 %2792  ;;  %3066 = vrot.lane.b32.xlu0 %v8736_v30, %s7169_s9 }
 0x4ad   : > { %2887 = vst.msk [vmem:[#allocation2 + $0x199] sm:$0x1] %vm931_vm1, %v2793_v28 }
 0x4ae   : > { %3068 = vrot.lane.b32.xlu1 %v8740_v8, %s7169_s9  ;;  %v2795_v10 = vpop.permute.xlu0 %2794 }
 0x4af   : > { %2888 = vst.msk [vmem:[#allocation2 + $0x1a9] sm:$0x1] %vm931_vm1, %v2795_v10 }
 0x4b0   : > { %v2797_v45 = vpop.permute.xlu1 %2796  ;;  %3070 = vrot.lane.b32.xlu0 %v8750_v15, %s7169_s9 }
 0x4b1   : > { %2889 = vst.msk [vmem:[#allocation2 + $0x1b9] sm:$0x1] %vm931_vm1, %v2797_v45 }
 0x4b2   : > { %3072 = vrot.lane.b32.xlu1 %v8754_v17, %s7169_s9  ;;  %v2799_v61 = vpop.permute.xlu0 %2798 }
 0x4b3   : > { %2890 = vst.msk [vmem:[#allocation2 + $0x1c9] sm:$0x1] %vm931_vm1, %v2799_v61 }
 0x4b4   : > { %v2801_v5 = vpop.permute.xlu1 %2800  ;;  %3074 = vrot.lane.b32.xlu0 %v8764_v9, %s7169_s9 }
 0x4b5   : > { %2891 = vst.msk [vmem:[#allocation2 + $0x1d9] sm:$0x1] %vm931_vm1, %v2801_v5 }
 0x4b6   : > { %3076 = vrot.lane.b32.xlu1 %v8768_v14, %s7169_s9  ;;  %v2803_v62 = vpop.permute.xlu0 %2802 }
 0x4b7   : > { %2892 = vst.msk [vmem:[#allocation2 + $0x1e9] sm:$0x1] %vm931_vm1, %v2803_v62 }
 0x4b8   : > { %v2805_v49 = vpop.permute.xlu1 %2804  ;;  %3078 = vrot.lane.b32.xlu0 %v8778_v16, %s7169_s9 }
 0x4b9   : > { %2893 = vst.msk [vmem:[#allocation2 + $0x1f9] sm:$0x1] %vm931_vm1, %v2805_v49 }
 0x4ba   : > { %3080 = vrot.lane.b32.xlu1 %v8782_v23, %s7169_s9  ;;  %v2807_v52 = vpop.permute.xlu0 %2806 }
 0x4bb   : > { %2894 = vst.msk [vmem:[#allocation2 + $0x209] sm:$0x1] %vm931_vm1, %v2807_v52 }
 0x4bc   : > { %v2809_v39 = vpop.permute.xlu1 %2808  ;;  %3082 = vrot.lane.b32.xlu0 %v8792_v38, %s7169_s9 }
 0x4bd   : > { %2895 = vst.msk [vmem:[#allocation2 + $0x219] sm:$0x1] %vm931_vm1, %v2809_v39 }
 0x4be   : > { %3084 = vrot.lane.b32.xlu1 %v8796_v40, %s7169_s9  ;;  %v2811_v57 = vpop.permute.xlu0 %2810 }
 0x4bf   : > { %2896 = vst.msk [vmem:[#allocation2 + $0x229] sm:$0x1] %vm931_vm1, %v2811_v57 }
 0x4c0   : > { %v2813_v47 = vpop.permute.xlu1 %2812  ;;  %3086 = vrot.lane.b32.xlu0 %v8806_v42, %s7169_s9 }
 0x4c2   : > { %3088 = vrot.lane.b32.xlu1 %v8810_v44, %s7169_s9  ;;  %v2815_v26 = vpop.permute.xlu0 %2814 }
 0x4c4   : > { %v2817_v1 = vpop.permute.xlu1 %2816  ;;  %3090 = vrot.lane.b32.xlu0 %v8819_v54, %s7169_s9 }
 0x4c6   : > { %3092 = vrot.lane.b32.xlu1 %v8823_v58, %s7169_s9  ;;  %v2819_v63 = vpop.permute.xlu0 %2818 }
 0x4c8   : > { %v2821_v60 = vpop.permute.xlu1 %2820  ;;  %3094 = vrot.lane.b32.xlu0 %v8831_v29, %s7169_s9 }
 0x4ca   : > { %3096 = vrot.lane.b32.xlu1 %v8835_v12, %s7169_s9  ;;  %v2903_v25 = vpop.permute.xlu0 %2902 }
 0x4cc   : > { %v2905_v19 = vpop.permute.xlu1 %2904  ;;  %3098 = vrot.lane.b32.xlu0 %v8843_v32, %s7169_s9 }
 0x4cd   : > { %3023 = vst.msk [vmem:[#allocation2 + $0x1a] sm:$0x1] %vm931_vm1, %v2905_v19 }
 0x4ce   : > { %3100 = vrot.lane.b32.xlu1 %v8847_v36, %s7169_s9  ;;  %v2907_v35 = vpop.permute.xlu0 %2906 }
 0x4cf   : > { %3024 = vst.msk [vmem:[#allocation2 + $0x2a] sm:$0x1] %vm931_vm1, %v2907_v35 }
 0x4d0   : > { %v2909_v7 = vpop.permute.xlu1 %2908  ;;  %3102 = vrot.lane.b32.xlu0 %v8856_v4, %s7169_s9 }
 0x4d1   : > { %3025 = vst.msk [vmem:[#allocation2 + $0x3a] sm:$0x1] %vm931_vm1, %v2909_v7 }
 0x4d2   : > { %3104 = vrot.lane.b32.xlu1 %v8860_v24, %s7169_s9  ;;  %v2911_v2 = vpop.permute.xlu0 %2910 }
 0x4d3   : > { %3026 = vst.msk [vmem:[#allocation2 + $0x4a] sm:$0x1] %vm931_vm1, %v2911_v2 }
 0x4d4   : > { %v2913_v18 = vpop.permute.xlu1 %2912  ;;  %3106 = vrot.lane.b32.xlu0 %v8870_v13, %s7169_s9 }
 0x4d5   : > { %3027 = vst.msk [vmem:[#allocation2 + $0x5a] sm:$0x1] %vm931_vm1, %v2913_v18 }
 0x4d6   : > { %3108 = vrot.lane.b32.xlu1 %v8874_v22, %s7169_s9  ;;  %v2915_v21 = vpop.permute.xlu0 %2914 }
 0x4d7   : > { %3028 = vst.msk [vmem:[#allocation2 + $0x6a] sm:$0x1] %vm931_vm1, %v2915_v21 }
 0x4d8   : > { %v2917_v59 = vpop.permute.xlu1 %2916  ;;  %3110 = vrot.lane.b32.xlu0 %v8884_v20, %s7169_s9 }
 0x4d9   : > { %3029 = vst.msk [vmem:[#allocation2 + $0x7a] sm:$0x1] %vm931_vm1, %v2917_v59 }
 0x4da   : > { %3112 = vrot.lane.b32.xlu1 %v8888_v31, %s7169_s9  ;;  %v2919_v28 = vpop.permute.xlu0 %2918 }
 0x4db   : > { %3030 = vst.msk [vmem:[#allocation2 + $0x8a] sm:$0x1] %vm931_vm1, %v2919_v28 }
 0x4dc   : > { %v2921_v10 = vpop.permute.xlu1 %2920  ;;  %3114 = vrot.lane.b32.xlu0 %v8898_v46, %s7169_s9 }
 0x4dd   : > { %3031 = vst.msk [vmem:[#allocation2 + $0x9a] sm:$0x1] %vm931_vm1, %v2921_v10 }
 0x4de   : > { %3116 = vrot.lane.b32.xlu1 %v8902_v0, %s7169_s9  ;;  %v2923_v45 = vpop.permute.xlu0 %2922 }
 0x4df   : > { %3032 = vst.msk [vmem:[#allocation2 + $0xaa] sm:$0x1] %vm931_vm1, %v2923_v45 }
 0x4e0   : > { %v2925_v61 = vpop.permute.xlu1 %2924  ;;  %3118 = vrot.lane.b32.xlu0 %v8912_v3, %s7169_s9 }
 0x4e1   : > { %3033 = vst.msk [vmem:[#allocation2 + $0xba] sm:$0x1] %vm931_vm1, %v2925_v61 }
 0x4e2   : > { %3120 = vrot.lane.b32.xlu1 %v8916_v53, %s7169_s9  ;;  %v2927_v5 = vpop.permute.xlu0 %2926 }
 0x4e3   : > { %3034 = vst.msk [vmem:[#allocation2 + $0xca] sm:$0x1] %vm931_vm1, %v2927_v5 }
 0x4e4   : > { %v2929_v62 = vpop.permute.xlu1 %2928  ;;  %3122 = vrot.lane.b32.xlu0 %v8926_v41, %s7169_s9 }
 0x4e5   : > { %3035 = vst.msk [vmem:[#allocation2 + $0xda] sm:$0x1] %vm931_vm1, %v2929_v62 }
 0x4e6   : > { %3124 = vrot.lane.b32.xlu1 %v8930_v6, %s7169_s9  ;;  %v2931_v49 = vpop.permute.xlu0 %2930 }
 0x4e7   : > { %3036 = vst.msk [vmem:[#allocation2 + $0xea] sm:$0x1] %vm931_vm1, %v2931_v49 }
 0x4e8   : > { %v2933_v52 = vpop.permute.xlu1 %2932  ;;  %3126 = vrot.lane.b32.xlu0 %v8940_v27, %s7169_s9 }
 0x4e9   : > { %3037 = vst.msk [vmem:[#allocation2 + $0xfa] sm:$0x1] %vm931_vm1, %v2933_v52 }
 0x4ea   : > { %3128 = vrot.lane.b32.xlu1 %v8944_v33, %s7169_s9  ;;  %v2935_v39 = vpop.permute.xlu0 %2934 }
 0x4eb   : > { %3038 = vst.msk [vmem:[#allocation2 + $0x10a] sm:$0x1] %vm931_vm1, %v2935_v39 }
 0x4ec   : > { %v2937_v57 = vpop.permute.xlu1 %2936  ;;  %3130 = vrot.lane.b32.xlu0 %v8954_v55, %s7169_s9 }
 0x4ed   : > { %3039 = vst.msk [vmem:[#allocation2 + $0x11a] sm:$0x1] %vm931_vm1, %v2937_v57 }
 0x4ee   : > { %3132 = vrot.lane.b32.xlu1 %v8960_v43, %s7169_s9  ;;  %v2939_v47 = vpop.permute.xlu0 %2938 }
 0x4ef   : > { %3040 = vst.msk [vmem:[#allocation2 + $0x12a] sm:$0x1] %vm931_vm1, %v2939_v47 }
 0x4f0   : > { %v2941_v26 = vpop.permute.xlu1 %2940  ;;  %3134 = vrot.lane.b32.xlu0 %v8970_v56, %s7169_s9 }
 0x4f1   : > { %3041 = vst.msk [vmem:[#allocation2 + $0x13a] sm:$0x1] %vm931_vm1, %v2941_v26 }
 0x4f2   : > { %3136 = vrot.lane.b32.xlu1 %v8974_v48, %s7169_s9  ;;  %v2943_v1 = vpop.permute.xlu0 %2942 }
 0x4f3   : > { %3042 = vst.msk [vmem:[#allocation2 + $0x14a] sm:$0x1] %vm931_vm1, %v2943_v1 }
 0x4f4   : > { %v2945_v63 = vpop.permute.xlu1 %2944  ;;  %3138 = vrot.lane.b32.xlu0 %v8986_v37, %s7169_s9 }
 0x4f5   : > { %3043 = vst.msk [vmem:[#allocation2 + $0x15a] sm:$0x1] %vm931_vm1, %v2945_v63 }
 0x4f6   : > { %3140 = vrot.lane.b32.xlu1 %v8992_v51, %s7169_s9  ;;  %v2947_v60 = vpop.permute.xlu0 %2946  ;;  %s12337_s9 = sld [smem:[#allocation3 + $0x2]] }
 0x4f7   : > { %3044 = vst.msk [vmem:[#allocation2 + $0x16a] sm:$0x1] %vm931_vm1, %v2947_v60 }
 0x4f8   : > { %v2949_v25 = vpop.permute.xlu1 %2948  ;;  %3222 = vrot.lane.b32.xlu0 %v8724_v11, %s7170_s8 }
 0x4f9   : > { %3045 = vst.msk [vmem:[#allocation2 + $0x17a] sm:$0x1] %vm931_vm1, %v2949_v25 }
 0x4fa   : > { %3224 = vrot.lane.b32.xlu1 %v8728_v34, %s7170_s8  ;;  %v2951_v19 = vpop.permute.xlu0 %2950 }
 0x4fb   : > { %3046 = vst.msk [vmem:[#allocation2 + $0x18a] sm:$0x1] %vm931_vm1, %v2951_v19 }
 0x4fc   : > { %v2953_v35 = vpop.permute.xlu1 %2952  ;;  %3226 = vrot.lane.b32.xlu0 %v8736_v30, %s7170_s8 }
 0x4fd   : > { %3047 = vst.msk [vmem:[#allocation2 + $0x19a] sm:$0x1] %vm931_vm1, %v2953_v35 }
 0x4fe   : > { %3228 = vrot.lane.b32.xlu1 %v8740_v8, %s7170_s8  ;;  %v2955_v7 = vpop.permute.xlu0 %2954 }
 0x4ff   : > { %3048 = vst.msk [vmem:[#allocation2 + $0x1aa] sm:$0x1] %vm931_vm1, %v2955_v7 }
 0x500   : > { %v2957_v2 = vpop.permute.xlu1 %2956  ;;  %3230 = vrot.lane.b32.xlu0 %v8750_v15, %s7170_s8 }
 0x501   : > { %3049 = vst.msk [vmem:[#allocation2 + $0x1ba] sm:$0x1] %vm931_vm1, %v2957_v2 }
 0x502   : > { %3232 = vrot.lane.b32.xlu1 %v8754_v17, %s7170_s8  ;;  %v2959_v18 = vpop.permute.xlu0 %2958 }
 0x503   : > { %3050 = vst.msk [vmem:[#allocation2 + $0x1ca] sm:$0x1] %vm931_vm1, %v2959_v18 }
 0x504   : > { %v2961_v21 = vpop.permute.xlu1 %2960  ;;  %3234 = vrot.lane.b32.xlu0 %v8764_v9, %s7170_s8 }
 0x505   : > { %3051 = vst.msk [vmem:[#allocation2 + $0x1da] sm:$0x1] %vm931_vm1, %v2961_v21 }
 0x506   : > { %3236 = vrot.lane.b32.xlu1 %v8768_v14, %s7170_s8  ;;  %v2963_v59 = vpop.permute.xlu0 %2962 }
 0x507   : > { %3052 = vst.msk [vmem:[#allocation2 + $0x1ea] sm:$0x1] %vm931_vm1, %v2963_v59 }
 0x508   : > { %v2965_v28 = vpop.permute.xlu1 %2964  ;;  %3238 = vrot.lane.b32.xlu0 %v8778_v16, %s7170_s8 }
 0x509   : > { %3053 = vst.msk [vmem:[#allocation2 + $0x1fa] sm:$0x1] %vm931_vm1, %v2965_v28 }
 0x50a   : > { %3240 = vrot.lane.b32.xlu1 %v8782_v23, %s7170_s8  ;;  %v2967_v10 = vpop.permute.xlu0 %2966 }
 0x50b   : > { %3054 = vst.msk [vmem:[#allocation2 + $0x20a] sm:$0x1] %vm931_vm1, %v2967_v10 }
 0x50c   : > { %v2969_v45 = vpop.permute.xlu1 %2968  ;;  %3242 = vrot.lane.b32.xlu0 %v8792_v38, %s7170_s8 }
 0x50d   : > { %3055 = vst.msk [vmem:[#allocation2 + $0x21a] sm:$0x1] %vm931_vm1, %v2969_v45 }
 0x50e   : > { %3244 = vrot.lane.b32.xlu1 %v8796_v40, %s7170_s8  ;;  %v2971_v61 = vpop.permute.xlu0 %2970 }
 0x50f   : > { %3056 = vst.msk [vmem:[#allocation2 + $0x22a] sm:$0x1] %vm931_vm1, %v2971_v61 }
 0x510   : > { %v2973_v5 = vpop.permute.xlu1 %2972  ;;  %3246 = vrot.lane.b32.xlu0 %v8806_v42, %s7170_s8 }
 0x512   : > { %3248 = vrot.lane.b32.xlu1 %v8810_v44, %s7170_s8  ;;  %v2975_v62 = vpop.permute.xlu0 %2974 }
 0x514   : > { %v2977_v49 = vpop.permute.xlu1 %2976  ;;  %3250 = vrot.lane.b32.xlu0 %v8819_v54, %s7170_s8 }
 0x516   : > { %3252 = vrot.lane.b32.xlu1 %v8823_v58, %s7170_s8  ;;  %v2979_v52 = vpop.permute.xlu0 %2978 }
 0x518   : > { %v2981_v39 = vpop.permute.xlu1 %2980  ;;  %3254 = vrot.lane.b32.xlu0 %v8831_v29, %s7170_s8 }
 0x51a   : > { %3256 = vrot.lane.b32.xlu1 %v8835_v12, %s7170_s8  ;;  %v3063_v57 = vpop.permute.xlu0 %3062 }
 0x51c   : > { %v3065_v47 = vpop.permute.xlu1 %3064  ;;  %3258 = vrot.lane.b32.xlu0 %v8843_v32, %s7170_s8 }
 0x51d   : > { %3183 = vst.msk [vmem:[#allocation2 + $0x1b] sm:$0x1] %vm931_vm1, %v3065_v47 }
 0x51e   : > { %3260 = vrot.lane.b32.xlu1 %v8847_v36, %s7170_s8  ;;  %v3067_v26 = vpop.permute.xlu0 %3066 }
 0x51f   : > { %3184 = vst.msk [vmem:[#allocation2 + $0x2b] sm:$0x1] %vm931_vm1, %v3067_v26 }
 0x520   : > { %v3069_v1 = vpop.permute.xlu1 %3068  ;;  %3262 = vrot.lane.b32.xlu0 %v8856_v4, %s7170_s8 }
 0x521   : > { %3185 = vst.msk [vmem:[#allocation2 + $0x3b] sm:$0x1] %vm931_vm1, %v3069_v1 }
 0x522   : > { %3264 = vrot.lane.b32.xlu1 %v8860_v24, %s7170_s8  ;;  %v3071_v63 = vpop.permute.xlu0 %3070 }
 0x523   : > { %3186 = vst.msk [vmem:[#allocation2 + $0x4b] sm:$0x1] %vm931_vm1, %v3071_v63 }
 0x524   : > { %v3073_v60 = vpop.permute.xlu1 %3072  ;;  %3266 = vrot.lane.b32.xlu0 %v8870_v13, %s7170_s8 }
 0x525   : > { %3187 = vst.msk [vmem:[#allocation2 + $0x5b] sm:$0x1] %vm931_vm1, %v3073_v60 }
 0x526   : > { %3268 = vrot.lane.b32.xlu1 %v8874_v22, %s7170_s8  ;;  %v3075_v25 = vpop.permute.xlu0 %3074 }
 0x527   : > { %3188 = vst.msk [vmem:[#allocation2 + $0x6b] sm:$0x1] %vm931_vm1, %v3075_v25 }
 0x528   : > { %v3077_v19 = vpop.permute.xlu1 %3076  ;;  %3270 = vrot.lane.b32.xlu0 %v8884_v20, %s7170_s8 }
 0x529   : > { %3189 = vst.msk [vmem:[#allocation2 + $0x7b] sm:$0x1] %vm931_vm1, %v3077_v19 }
 0x52a   : > { %3272 = vrot.lane.b32.xlu1 %v8888_v31, %s7170_s8  ;;  %v3079_v35 = vpop.permute.xlu0 %3078 }
 0x52b   : > { %3190 = vst.msk [vmem:[#allocation2 + $0x8b] sm:$0x1] %vm931_vm1, %v3079_v35 }
 0x52c   : > { %v3081_v7 = vpop.permute.xlu1 %3080  ;;  %3274 = vrot.lane.b32.xlu0 %v8898_v46, %s7170_s8 }
 0x52d   : > { %3191 = vst.msk [vmem:[#allocation2 + $0x9b] sm:$0x1] %vm931_vm1, %v3081_v7 }
 0x52e   : > { %3276 = vrot.lane.b32.xlu1 %v8902_v0, %s7170_s8  ;;  %v3083_v2 = vpop.permute.xlu0 %3082 }
 0x52f   : > { %3192 = vst.msk [vmem:[#allocation2 + $0xab] sm:$0x1] %vm931_vm1, %v3083_v2 }
 0x530   : > { %v3085_v18 = vpop.permute.xlu1 %3084  ;;  %3278 = vrot.lane.b32.xlu0 %v8912_v3, %s7170_s8 }
 0x531   : > { %3193 = vst.msk [vmem:[#allocation2 + $0xbb] sm:$0x1] %vm931_vm1, %v3085_v18 }
 0x532   : > { %3280 = vrot.lane.b32.xlu1 %v8916_v53, %s7170_s8  ;;  %v3087_v21 = vpop.permute.xlu0 %3086 }
 0x533   : > { %3194 = vst.msk [vmem:[#allocation2 + $0xcb] sm:$0x1] %vm931_vm1, %v3087_v21 }
 0x534   : > { %v3089_v59 = vpop.permute.xlu1 %3088  ;;  %3282 = vrot.lane.b32.xlu0 %v8926_v41, %s7170_s8 }
 0x535   : > { %3195 = vst.msk [vmem:[#allocation2 + $0xdb] sm:$0x1] %vm931_vm1, %v3089_v59 }
 0x536   : > { %3284 = vrot.lane.b32.xlu1 %v8930_v6, %s7170_s8  ;;  %v3091_v28 = vpop.permute.xlu0 %3090 }
 0x537   : > { %3196 = vst.msk [vmem:[#allocation2 + $0xeb] sm:$0x1] %vm931_vm1, %v3091_v28 }
 0x538   : > { %v3093_v10 = vpop.permute.xlu1 %3092  ;;  %3286 = vrot.lane.b32.xlu0 %v8940_v27, %s7170_s8 }
 0x539   : > { %3197 = vst.msk [vmem:[#allocation2 + $0xfb] sm:$0x1] %vm931_vm1, %v3093_v10 }
 0x53a   : > { %3288 = vrot.lane.b32.xlu1 %v8944_v33, %s7170_s8  ;;  %v3095_v45 = vpop.permute.xlu0 %3094 }
 0x53b   : > { %3198 = vst.msk [vmem:[#allocation2 + $0x10b] sm:$0x1] %vm931_vm1, %v3095_v45 }
 0x53c   : > { %v3097_v61 = vpop.permute.xlu1 %3096  ;;  %3290 = vrot.lane.b32.xlu0 %v8954_v55, %s7170_s8 }
 0x53d   : > { %3199 = vst.msk [vmem:[#allocation2 + $0x11b] sm:$0x1] %vm931_vm1, %v3097_v61 }
 0x53e   : > { %3292 = vrot.lane.b32.xlu1 %v8960_v43, %s7170_s8  ;;  %v3099_v5 = vpop.permute.xlu0 %3098 }
 0x53f   : > { %3200 = vst.msk [vmem:[#allocation2 + $0x12b] sm:$0x1] %vm931_vm1, %v3099_v5 }
 0x540   : > { %v3101_v62 = vpop.permute.xlu1 %3100  ;;  %3294 = vrot.lane.b32.xlu0 %v8970_v56, %s7170_s8 }
 0x541   : > { %3201 = vst.msk [vmem:[#allocation2 + $0x13b] sm:$0x1] %vm931_vm1, %v3101_v62 }
 0x542   : > { %3296 = vrot.lane.b32.xlu1 %v8974_v48, %s7170_s8  ;;  %v3103_v49 = vpop.permute.xlu0 %3102 }
 0x543   : > { %3202 = vst.msk [vmem:[#allocation2 + $0x14b] sm:$0x1] %vm931_vm1, %v3103_v49 }
 0x544   : > { %v3105_v52 = vpop.permute.xlu1 %3104  ;;  %3298 = vrot.lane.b32.xlu0 %v8986_v37, %s7170_s8 }
 0x545   : > { %3203 = vst.msk [vmem:[#allocation2 + $0x15b] sm:$0x1] %vm931_vm1, %v3105_v52 }
 0x546   : > { %3300 = vrot.lane.b32.xlu1 %v8992_v51, %s7170_s8  ;;  %v3107_v39 = vpop.permute.xlu0 %3106  ;;  %s7181_s8 = smov 1  }
 0x547   : > { %3204 = vst.msk [vmem:[#allocation2 + $0x16b] sm:$0x1] %vm931_vm1, %v3107_v39 }
 0x548   : > { %v3109_v57 = vpop.permute.xlu1 %3108  ;;  %3382 = vrot.lane.b32.xlu0 %v8724_v11, %s7171_s13 }
 0x549   : > { %3205 = vst.msk [vmem:[#allocation2 + $0x17b] sm:$0x1] %vm931_vm1, %v3109_v57 }
 0x54a   : > { %3384 = vrot.lane.b32.xlu1 %v8728_v34, %s7171_s13  ;;  %v3111_v47 = vpop.permute.xlu0 %3110 }
 0x54b   : > { %3206 = vst.msk [vmem:[#allocation2 + $0x18b] sm:$0x1] %vm931_vm1, %v3111_v47 }
 0x54c   : > { %v3113_v26 = vpop.permute.xlu1 %3112  ;;  %3386 = vrot.lane.b32.xlu0 %v8736_v30, %s7171_s13 }
 0x54d   : > { %3207 = vst.msk [vmem:[#allocation2 + $0x19b] sm:$0x1] %vm931_vm1, %v3113_v26 }
 0x54e   : > { %3388 = vrot.lane.b32.xlu1 %v8740_v8, %s7171_s13  ;;  %v3115_v1 = vpop.permute.xlu0 %3114 }
 0x54f   : > { %3208 = vst.msk [vmem:[#allocation2 + $0x1ab] sm:$0x1] %vm931_vm1, %v3115_v1 }
 0x550   : > { %v3117_v63 = vpop.permute.xlu1 %3116  ;;  %3390 = vrot.lane.b32.xlu0 %v8750_v15, %s7171_s13 }
 0x551   : > { %3209 = vst.msk [vmem:[#allocation2 + $0x1bb] sm:$0x1] %vm931_vm1, %v3117_v63 }
 0x552   : > { %3392 = vrot.lane.b32.xlu1 %v8754_v17, %s7171_s13  ;;  %v3119_v60 = vpop.permute.xlu0 %3118 }
 0x553   : > { %3210 = vst.msk [vmem:[#allocation2 + $0x1cb] sm:$0x1] %vm931_vm1, %v3119_v60 }
 0x554   : > { %v3121_v25 = vpop.permute.xlu1 %3120  ;;  %3394 = vrot.lane.b32.xlu0 %v8764_v9, %s7171_s13 }
 0x555   : > { %3211 = vst.msk [vmem:[#allocation2 + $0x1db] sm:$0x1] %vm931_vm1, %v3121_v25 }
 0x556   : > { %3396 = vrot.lane.b32.xlu1 %v8768_v14, %s7171_s13  ;;  %v3123_v19 = vpop.permute.xlu0 %3122 }
 0x557   : > { %3212 = vst.msk [vmem:[#allocation2 + $0x1eb] sm:$0x1] %vm931_vm1, %v3123_v19 }
 0x558   : > { %v3125_v35 = vpop.permute.xlu1 %3124  ;;  %3398 = vrot.lane.b32.xlu0 %v8778_v16, %s7171_s13 }
 0x559   : > { %3213 = vst.msk [vmem:[#allocation2 + $0x1fb] sm:$0x1] %vm931_vm1, %v3125_v35 }
 0x55a   : > { %3400 = vrot.lane.b32.xlu1 %v8782_v23, %s7171_s13  ;;  %v3127_v7 = vpop.permute.xlu0 %3126 }
 0x55b   : > { %3214 = vst.msk [vmem:[#allocation2 + $0x20b] sm:$0x1] %vm931_vm1, %v3127_v7 }
 0x55c   : > { %v3129_v2 = vpop.permute.xlu1 %3128  ;;  %3402 = vrot.lane.b32.xlu0 %v8792_v38, %s7171_s13 }
 0x55d   : > { %3215 = vst.msk [vmem:[#allocation2 + $0x21b] sm:$0x1] %vm931_vm1, %v3129_v2 }
 0x55e   : > { %3404 = vrot.lane.b32.xlu1 %v8796_v40, %s7171_s13  ;;  %v3131_v18 = vpop.permute.xlu0 %3130 }
 0x55f   : > { %3216 = vst.msk [vmem:[#allocation2 + $0x22b] sm:$0x1] %vm931_vm1, %v3131_v18 }
 0x560   : > { %v3133_v21 = vpop.permute.xlu1 %3132  ;;  %3406 = vrot.lane.b32.xlu0 %v8806_v42, %s7171_s13 }
 0x562   : > { %3408 = vrot.lane.b32.xlu1 %v8810_v44, %s7171_s13  ;;  %v3135_v59 = vpop.permute.xlu0 %3134 }
 0x564   : > { %v3137_v28 = vpop.permute.xlu1 %3136  ;;  %3410 = vrot.lane.b32.xlu0 %v8819_v54, %s7171_s13 }
 0x566   : > { %3412 = vrot.lane.b32.xlu1 %v8823_v58, %s7171_s13  ;;  %v3139_v10 = vpop.permute.xlu0 %3138 }
 0x568   : > { %v3141_v45 = vpop.permute.xlu1 %3140  ;;  %3414 = vrot.lane.b32.xlu0 %v8831_v29, %s7171_s13 }
 0x56a   : > { %3416 = vrot.lane.b32.xlu1 %v8835_v12, %s7171_s13  ;;  %v3223_v61 = vpop.permute.xlu0 %3222 }
 0x56c   : > { %v3225_v5 = vpop.permute.xlu1 %3224  ;;  %3418 = vrot.lane.b32.xlu0 %v8843_v32, %s7171_s13 }
 0x56d   : > { %3343 = vst.msk [vmem:[#allocation2 + $0x1c] sm:$0x1] %vm931_vm1, %v3225_v5 }
 0x56e   : > { %3420 = vrot.lane.b32.xlu1 %v8847_v36, %s7171_s13  ;;  %v3227_v62 = vpop.permute.xlu0 %3226 }
 0x56f   : > { %3344 = vst.msk [vmem:[#allocation2 + $0x2c] sm:$0x1] %vm931_vm1, %v3227_v62 }
 0x570   : > { %v3229_v49 = vpop.permute.xlu1 %3228  ;;  %3422 = vrot.lane.b32.xlu0 %v8856_v4, %s7171_s13 }
 0x571   : > { %3345 = vst.msk [vmem:[#allocation2 + $0x3c] sm:$0x1] %vm931_vm1, %v3229_v49 }
 0x572   : > { %3424 = vrot.lane.b32.xlu1 %v8860_v24, %s7171_s13  ;;  %v3231_v52 = vpop.permute.xlu0 %3230 }
 0x573   : > { %3346 = vst.msk [vmem:[#allocation2 + $0x4c] sm:$0x1] %vm931_vm1, %v3231_v52 }
 0x574   : > { %v3233_v39 = vpop.permute.xlu1 %3232  ;;  %3426 = vrot.lane.b32.xlu0 %v8870_v13, %s7171_s13 }
 0x575   : > { %3347 = vst.msk [vmem:[#allocation2 + $0x5c] sm:$0x1] %vm931_vm1, %v3233_v39 }
 0x576   : > { %3428 = vrot.lane.b32.xlu1 %v8874_v22, %s7171_s13  ;;  %v3235_v57 = vpop.permute.xlu0 %3234 }
 0x577   : > { %3348 = vst.msk [vmem:[#allocation2 + $0x6c] sm:$0x1] %vm931_vm1, %v3235_v57 }
 0x578   : > { %v3237_v47 = vpop.permute.xlu1 %3236  ;;  %3430 = vrot.lane.b32.xlu0 %v8884_v20, %s7171_s13 }
 0x579   : > { %3349 = vst.msk [vmem:[#allocation2 + $0x7c] sm:$0x1] %vm931_vm1, %v3237_v47 }
 0x57a   : > { %3432 = vrot.lane.b32.xlu1 %v8888_v31, %s7171_s13  ;;  %v3239_v26 = vpop.permute.xlu0 %3238 }
 0x57b   : > { %3350 = vst.msk [vmem:[#allocation2 + $0x8c] sm:$0x1] %vm931_vm1, %v3239_v26 }
 0x57c   : > { %v3241_v1 = vpop.permute.xlu1 %3240  ;;  %3434 = vrot.lane.b32.xlu0 %v8898_v46, %s7171_s13 }
 0x57d   : > { %3351 = vst.msk [vmem:[#allocation2 + $0x9c] sm:$0x1] %vm931_vm1, %v3241_v1 }
 0x57e   : > { %3436 = vrot.lane.b32.xlu1 %v8902_v0, %s7171_s13  ;;  %v3243_v63 = vpop.permute.xlu0 %3242 }
 0x57f   : > { %3352 = vst.msk [vmem:[#allocation2 + $0xac] sm:$0x1] %vm931_vm1, %v3243_v63 }
 0x580   : > { %v3245_v60 = vpop.permute.xlu1 %3244  ;;  %3438 = vrot.lane.b32.xlu0 %v8912_v3, %s7171_s13 }
 0x581   : > { %3353 = vst.msk [vmem:[#allocation2 + $0xbc] sm:$0x1] %vm931_vm1, %v3245_v60 }
 0x582   : > { %3440 = vrot.lane.b32.xlu1 %v8916_v53, %s7171_s13  ;;  %v3247_v25 = vpop.permute.xlu0 %3246 }
 0x583   : > { %3354 = vst.msk [vmem:[#allocation2 + $0xcc] sm:$0x1] %vm931_vm1, %v3247_v25 }
 0x584   : > { %v3249_v19 = vpop.permute.xlu1 %3248  ;;  %3442 = vrot.lane.b32.xlu0 %v8926_v41, %s7171_s13 }
 0x585   : > { %3355 = vst.msk [vmem:[#allocation2 + $0xdc] sm:$0x1] %vm931_vm1, %v3249_v19 }
 0x586   : > { %3444 = vrot.lane.b32.xlu1 %v8930_v6, %s7171_s13  ;;  %v3251_v35 = vpop.permute.xlu0 %3250 }
 0x587   : > { %3356 = vst.msk [vmem:[#allocation2 + $0xec] sm:$0x1] %vm931_vm1, %v3251_v35 }
 0x588   : > { %v3253_v7 = vpop.permute.xlu1 %3252  ;;  %3446 = vrot.lane.b32.xlu0 %v8940_v27, %s7171_s13 }
 0x589   : > { %3357 = vst.msk [vmem:[#allocation2 + $0xfc] sm:$0x1] %vm931_vm1, %v3253_v7 }
 0x58a   : > { %3448 = vrot.lane.b32.xlu1 %v8944_v33, %s7171_s13  ;;  %v3255_v2 = vpop.permute.xlu0 %3254 }
 0x58b   : > { %3358 = vst.msk [vmem:[#allocation2 + $0x10c] sm:$0x1] %vm931_vm1, %v3255_v2 }
 0x58c   : > { %v3257_v18 = vpop.permute.xlu1 %3256  ;;  %3450 = vrot.lane.b32.xlu0 %v8954_v55, %s7171_s13 }
 0x58d   : > { %3359 = vst.msk [vmem:[#allocation2 + $0x11c] sm:$0x1] %vm931_vm1, %v3257_v18 }
 0x58e   : > { %3452 = vrot.lane.b32.xlu1 %v8960_v43, %s7171_s13  ;;  %v3259_v21 = vpop.permute.xlu0 %3258 }
 0x58f   : > { %3360 = vst.msk [vmem:[#allocation2 + $0x12c] sm:$0x1] %vm931_vm1, %v3259_v21 }
 0x590   : > { %v3261_v59 = vpop.permute.xlu1 %3260  ;;  %3454 = vrot.lane.b32.xlu0 %v8970_v56, %s7171_s13 }
 0x591   : > { %3361 = vst.msk [vmem:[#allocation2 + $0x13c] sm:$0x1] %vm931_vm1, %v3261_v59 }
 0x592   : > { %3456 = vrot.lane.b32.xlu1 %v8974_v48, %s7171_s13  ;;  %v3263_v28 = vpop.permute.xlu0 %3262 }
 0x593   : > { %3362 = vst.msk [vmem:[#allocation2 + $0x14c] sm:$0x1] %vm931_vm1, %v3263_v28 }
 0x594   : > { %v3265_v10 = vpop.permute.xlu1 %3264  ;;  %3458 = vrot.lane.b32.xlu0 %v8986_v37, %s7171_s13 }
 0x595   : > { %3363 = vst.msk [vmem:[#allocation2 + $0x15c] sm:$0x1] %vm931_vm1, %v3265_v10 }
 0x596   : > { %3460 = vrot.lane.b32.xlu1 %v8992_v51, %s7171_s13  ;;  %v3267_v45 = vpop.permute.xlu0 %3266  ;;  %s6945_s13 = sld [smem:[#allocation3 + $0x1]] }
 0x597   : > { %3364 = vst.msk [vmem:[#allocation2 + $0x16c] sm:$0x1] %vm931_vm1, %v3267_v45 }
 0x598   : > { %v3269_v61 = vpop.permute.xlu1 %3268  ;;  %3542 = vrot.lane.b32.xlu0 %v8724_v11, %s7172_s16 }
 0x599   : > { %3365 = vst.msk [vmem:[#allocation2 + $0x17c] sm:$0x1] %vm931_vm1, %v3269_v61 }
 0x59a   : > { %3544 = vrot.lane.b32.xlu1 %v8728_v34, %s7172_s16  ;;  %v3271_v5 = vpop.permute.xlu0 %3270 }
 0x59b   : > { %3366 = vst.msk [vmem:[#allocation2 + $0x18c] sm:$0x1] %vm931_vm1, %v3271_v5 }
 0x59c   : > { %v3273_v62 = vpop.permute.xlu1 %3272  ;;  %3546 = vrot.lane.b32.xlu0 %v8736_v30, %s7172_s16 }
 0x59d   : > { %3367 = vst.msk [vmem:[#allocation2 + $0x19c] sm:$0x1] %vm931_vm1, %v3273_v62 }
 0x59e   : > { %3548 = vrot.lane.b32.xlu1 %v8740_v8, %s7172_s16  ;;  %v3275_v49 = vpop.permute.xlu0 %3274 }
 0x59f   : > { %3368 = vst.msk [vmem:[#allocation2 + $0x1ac] sm:$0x1] %vm931_vm1, %v3275_v49 }
 0x5a0   : > { %v3277_v52 = vpop.permute.xlu1 %3276  ;;  %3550 = vrot.lane.b32.xlu0 %v8750_v15, %s7172_s16 }
 0x5a1   : > { %3369 = vst.msk [vmem:[#allocation2 + $0x1bc] sm:$0x1] %vm931_vm1, %v3277_v52 }
 0x5a2   : > { %3552 = vrot.lane.b32.xlu1 %v8754_v17, %s7172_s16  ;;  %v3279_v39 = vpop.permute.xlu0 %3278 }
 0x5a3   : > { %3370 = vst.msk [vmem:[#allocation2 + $0x1cc] sm:$0x1] %vm931_vm1, %v3279_v39 }
 0x5a4   : > { %v3281_v57 = vpop.permute.xlu1 %3280  ;;  %3554 = vrot.lane.b32.xlu0 %v8764_v9, %s7172_s16 }
 0x5a5   : > { %3371 = vst.msk [vmem:[#allocation2 + $0x1dc] sm:$0x1] %vm931_vm1, %v3281_v57 }
 0x5a6   : > { %3556 = vrot.lane.b32.xlu1 %v8768_v14, %s7172_s16  ;;  %v3283_v47 = vpop.permute.xlu0 %3282 }
 0x5a7   : > { %3372 = vst.msk [vmem:[#allocation2 + $0x1ec] sm:$0x1] %vm931_vm1, %v3283_v47 }
 0x5a8   : > { %v3285_v26 = vpop.permute.xlu1 %3284  ;;  %3558 = vrot.lane.b32.xlu0 %v8778_v16, %s7172_s16 }
 0x5a9   : > { %3373 = vst.msk [vmem:[#allocation2 + $0x1fc] sm:$0x1] %vm931_vm1, %v3285_v26 }
 0x5aa   : > { %3560 = vrot.lane.b32.xlu1 %v8782_v23, %s7172_s16  ;;  %v3287_v1 = vpop.permute.xlu0 %3286 }
 0x5ab   : > { %3374 = vst.msk [vmem:[#allocation2 + $0x20c] sm:$0x1] %vm931_vm1, %v3287_v1 }
 0x5ac   : > { %v3289_v63 = vpop.permute.xlu1 %3288  ;;  %3562 = vrot.lane.b32.xlu0 %v8792_v38, %s7172_s16 }
 0x5ad   : > { %3375 = vst.msk [vmem:[#allocation2 + $0x21c] sm:$0x1] %vm931_vm1, %v3289_v63 }
 0x5ae   : > { %3564 = vrot.lane.b32.xlu1 %v8796_v40, %s7172_s16  ;;  %v3291_v60 = vpop.permute.xlu0 %3290 }
 0x5af   : > { %3376 = vst.msk [vmem:[#allocation2 + $0x22c] sm:$0x1] %vm931_vm1, %v3291_v60 }
 0x5b0   : > { %v3293_v25 = vpop.permute.xlu1 %3292  ;;  %3566 = vrot.lane.b32.xlu0 %v8806_v42, %s7172_s16 }
 0x5b2   : > { %3568 = vrot.lane.b32.xlu1 %v8810_v44, %s7172_s16  ;;  %v3295_v19 = vpop.permute.xlu0 %3294 }
 0x5b4   : > { %v3297_v35 = vpop.permute.xlu1 %3296  ;;  %3570 = vrot.lane.b32.xlu0 %v8819_v54, %s7172_s16 }
 0x5b6   : > { %3572 = vrot.lane.b32.xlu1 %v8823_v58, %s7172_s16  ;;  %v3299_v7 = vpop.permute.xlu0 %3298 }
 0x5b8   : > { %v3301_v2 = vpop.permute.xlu1 %3300  ;;  %3574 = vrot.lane.b32.xlu0 %v8831_v29, %s7172_s16 }
 0x5ba   : > { %3576 = vrot.lane.b32.xlu1 %v8835_v12, %s7172_s16  ;;  %v3383_v18 = vpop.permute.xlu0 %3382 }
 0x5bc   : > { %v3385_v21 = vpop.permute.xlu1 %3384  ;;  %3578 = vrot.lane.b32.xlu0 %v8843_v32, %s7172_s16 }
 0x5bd   : > { %3503 = vst.msk [vmem:[#allocation2 + $0x1d] sm:$0x1] %vm931_vm1, %v3385_v21 }
 0x5be   : > { %3580 = vrot.lane.b32.xlu1 %v8847_v36, %s7172_s16  ;;  %v3387_v59 = vpop.permute.xlu0 %3386 }
 0x5bf   : > { %3504 = vst.msk [vmem:[#allocation2 + $0x2d] sm:$0x1] %vm931_vm1, %v3387_v59 }
 0x5c0   : > { %v3389_v28 = vpop.permute.xlu1 %3388  ;;  %3582 = vrot.lane.b32.xlu0 %v8856_v4, %s7172_s16 }
 0x5c1   : > { %3505 = vst.msk [vmem:[#allocation2 + $0x3d] sm:$0x1] %vm931_vm1, %v3389_v28 }
 0x5c2   : > { %3584 = vrot.lane.b32.xlu1 %v8860_v24, %s7172_s16  ;;  %v3391_v10 = vpop.permute.xlu0 %3390 }
 0x5c3   : > { %3506 = vst.msk [vmem:[#allocation2 + $0x4d] sm:$0x1] %vm931_vm1, %v3391_v10 }
 0x5c4   : > { %v3393_v45 = vpop.permute.xlu1 %3392  ;;  %3586 = vrot.lane.b32.xlu0 %v8870_v13, %s7172_s16 }
 0x5c5   : > { %3507 = vst.msk [vmem:[#allocation2 + $0x5d] sm:$0x1] %vm931_vm1, %v3393_v45 }
 0x5c6   : > { %3588 = vrot.lane.b32.xlu1 %v8874_v22, %s7172_s16  ;;  %v3395_v61 = vpop.permute.xlu0 %3394 }
 0x5c7   : > { %3508 = vst.msk [vmem:[#allocation2 + $0x6d] sm:$0x1] %vm931_vm1, %v3395_v61 }
 0x5c8   : > { %v3397_v5 = vpop.permute.xlu1 %3396  ;;  %3590 = vrot.lane.b32.xlu0 %v8884_v20, %s7172_s16 }
 0x5c9   : > { %3509 = vst.msk [vmem:[#allocation2 + $0x7d] sm:$0x1] %vm931_vm1, %v3397_v5 }
 0x5ca   : > { %3592 = vrot.lane.b32.xlu1 %v8888_v31, %s7172_s16  ;;  %v3399_v62 = vpop.permute.xlu0 %3398 }
 0x5cb   : > { %3510 = vst.msk [vmem:[#allocation2 + $0x8d] sm:$0x1] %vm931_vm1, %v3399_v62 }
 0x5cc   : > { %v3401_v49 = vpop.permute.xlu1 %3400  ;;  %3594 = vrot.lane.b32.xlu0 %v8898_v46, %s7172_s16 }
 0x5cd   : > { %3511 = vst.msk [vmem:[#allocation2 + $0x9d] sm:$0x1] %vm931_vm1, %v3401_v49 }
 0x5ce   : > { %3596 = vrot.lane.b32.xlu1 %v8902_v0, %s7172_s16  ;;  %v3403_v52 = vpop.permute.xlu0 %3402 }
 0x5cf   : > { %3512 = vst.msk [vmem:[#allocation2 + $0xad] sm:$0x1] %vm931_vm1, %v3403_v52 }
 0x5d0   : > { %v3405_v39 = vpop.permute.xlu1 %3404  ;;  %3598 = vrot.lane.b32.xlu0 %v8912_v3, %s7172_s16 }
 0x5d1   : > { %3513 = vst.msk [vmem:[#allocation2 + $0xbd] sm:$0x1] %vm931_vm1, %v3405_v39 }
 0x5d2   : > { %3600 = vrot.lane.b32.xlu1 %v8916_v53, %s7172_s16  ;;  %v3407_v57 = vpop.permute.xlu0 %3406 }
 0x5d3   : > { %3514 = vst.msk [vmem:[#allocation2 + $0xcd] sm:$0x1] %vm931_vm1, %v3407_v57 }
 0x5d4   : > { %v3409_v47 = vpop.permute.xlu1 %3408  ;;  %3602 = vrot.lane.b32.xlu0 %v8926_v41, %s7172_s16 }
 0x5d5   : > { %3515 = vst.msk [vmem:[#allocation2 + $0xdd] sm:$0x1] %vm931_vm1, %v3409_v47 }
 0x5d6   : > { %3604 = vrot.lane.b32.xlu1 %v8930_v6, %s7172_s16  ;;  %v3411_v26 = vpop.permute.xlu0 %3410 }
 0x5d7   : > { %3516 = vst.msk [vmem:[#allocation2 + $0xed] sm:$0x1] %vm931_vm1, %v3411_v26 }
 0x5d8   : > { %v3413_v1 = vpop.permute.xlu1 %3412  ;;  %3606 = vrot.lane.b32.xlu0 %v8940_v27, %s7172_s16 }
 0x5d9   : > { %3517 = vst.msk [vmem:[#allocation2 + $0xfd] sm:$0x1] %vm931_vm1, %v3413_v1 }
 0x5da   : > { %3608 = vrot.lane.b32.xlu1 %v8944_v33, %s7172_s16  ;;  %v3415_v63 = vpop.permute.xlu0 %3414 }
 0x5db   : > { %3518 = vst.msk [vmem:[#allocation2 + $0x10d] sm:$0x1] %vm931_vm1, %v3415_v63 }
 0x5dc   : > { %v3417_v60 = vpop.permute.xlu1 %3416  ;;  %3610 = vrot.lane.b32.xlu0 %v8954_v55, %s7172_s16 }
 0x5dd   : > { %3519 = vst.msk [vmem:[#allocation2 + $0x11d] sm:$0x1] %vm931_vm1, %v3417_v60 }
 0x5de   : > { %3612 = vrot.lane.b32.xlu1 %v8960_v43, %s7172_s16  ;;  %v3419_v25 = vpop.permute.xlu0 %3418 }
 0x5df   : > { %3520 = vst.msk [vmem:[#allocation2 + $0x12d] sm:$0x1] %vm931_vm1, %v3419_v25 }
 0x5e0   : > { %v3421_v19 = vpop.permute.xlu1 %3420  ;;  %3614 = vrot.lane.b32.xlu0 %v8970_v56, %s7172_s16 }
 0x5e1   : > { %3521 = vst.msk [vmem:[#allocation2 + $0x13d] sm:$0x1] %vm931_vm1, %v3421_v19 }
 0x5e2   : > { %3616 = vrot.lane.b32.xlu1 %v8974_v48, %s7172_s16  ;;  %v3423_v35 = vpop.permute.xlu0 %3422 }
 0x5e3   : > { %3522 = vst.msk [vmem:[#allocation2 + $0x14d] sm:$0x1] %vm931_vm1, %v3423_v35 }
 0x5e4   : > { %v3425_v7 = vpop.permute.xlu1 %3424  ;;  %3618 = vrot.lane.b32.xlu0 %v8986_v37, %s7172_s16 }
 0x5e5   : > { %3523 = vst.msk [vmem:[#allocation2 + $0x15d] sm:$0x1] %vm931_vm1, %v3425_v7 }
 0x5e6   : > { %3620 = vrot.lane.b32.xlu1 %v8992_v51, %s7172_s16  ;;  %v3427_v2 = vpop.permute.xlu0 %3426  ;;  %s7184_s16 = smov 47  }
 0x5e7   : > { %3524 = vst.msk [vmem:[#allocation2 + $0x16d] sm:$0x1] %vm931_vm1, %v3427_v2 }
 0x5e8   : > { %v3429_v18 = vpop.permute.xlu1 %3428  ;;  %3702 = vrot.lane.b32.xlu0 %v8724_v11, %s7173_s17 }
 0x5e9   : > { %3525 = vst.msk [vmem:[#allocation2 + $0x17d] sm:$0x1] %vm931_vm1, %v3429_v18 }
 0x5ea   : > { %3704 = vrot.lane.b32.xlu1 %v8728_v34, %s7173_s17  ;;  %v3431_v21 = vpop.permute.xlu0 %3430 }
 0x5eb   : > { %3526 = vst.msk [vmem:[#allocation2 + $0x18d] sm:$0x1] %vm931_vm1, %v3431_v21 }
 0x5ec   : > { %v3433_v59 = vpop.permute.xlu1 %3432  ;;  %3706 = vrot.lane.b32.xlu0 %v8736_v30, %s7173_s17 }
 0x5ed   : > { %3527 = vst.msk [vmem:[#allocation2 + $0x19d] sm:$0x1] %vm931_vm1, %v3433_v59 }
 0x5ee   : > { %3708 = vrot.lane.b32.xlu1 %v8740_v8, %s7173_s17  ;;  %v3435_v28 = vpop.permute.xlu0 %3434 }
 0x5ef   : > { %3528 = vst.msk [vmem:[#allocation2 + $0x1ad] sm:$0x1] %vm931_vm1, %v3435_v28  ;;  %v3864_v28 = vld [vmem:[#allocation2 + $0x20] sm:$0xff] }
 0x5f0   : > { %v3437_v11 = vpop.permute.xlu1 %3436  ;;  %3710 = vrot.lane.b32.xlu0 %v8750_v15, %s7173_s17 }
 0x5f1   : > { %3529 = vst.msk [vmem:[#allocation2 + $0x1bd] sm:$0x1] %vm931_vm1, %v3437_v11 }
 0x5f2   : > { %3712 = vrot.lane.b32.xlu1 %v8754_v17, %s7173_s17  ;;  %v3439_v34 = vpop.permute.xlu0 %3438 }
 0x5f3   : > { %3530 = vst.msk [vmem:[#allocation2 + $0x1cd] sm:$0x1] %vm931_vm1, %v3439_v34 }
 0x5f4   : > { %v3441_v30 = vpop.permute.xlu1 %3440  ;;  %3714 = vrot.lane.b32.xlu0 %v8764_v9, %s7173_s17 }
 0x5f5   : > { %3531 = vst.msk [vmem:[#allocation2 + $0x1dd] sm:$0x1] %vm931_vm1, %v3441_v30 }
 0x5f6   : > { %3716 = vrot.lane.b32.xlu1 %v8768_v14, %s7173_s17  ;;  %v3443_v8 = vpop.permute.xlu0 %3442 }
 0x5f7   : > { %3532 = vst.msk [vmem:[#allocation2 + $0x1ed] sm:$0x1] %vm931_vm1, %v3443_v8  ;;  %v3965_v8 = vrot.slane %v3864_v28, 2 }
 0x5f8   : > { %v3445_v15 = vpop.permute.xlu1 %3444  ;;  %3718 = vrot.lane.b32.xlu0 %v8778_v16, %s7173_s17 }
 0x5f9   : > { %3533 = vst.msk [vmem:[#allocation2 + $0x1fd] sm:$0x1] %vm931_vm1, %v3445_v15 }
 0x5fa   : > { %3720 = vrot.lane.b32.xlu1 %v8782_v23, %s7173_s17  ;;  %v3447_v17 = vpop.permute.xlu0 %3446 }
 0x5fb   : > { %3534 = vst.msk [vmem:[#allocation2 + $0x20d] sm:$0x1] %vm931_vm1, %v3447_v17 }
 0x5fc   : > { %v3449_v9 = vpop.permute.xlu1 %3448  ;;  %3722 = vrot.lane.b32.xlu0 %v8792_v38, %s7173_s17 }
 0x5fd   : > { %3535 = vst.msk [vmem:[#allocation2 + $0x21d] sm:$0x1] %vm931_vm1, %v3449_v9 }
 0x5fe   : > { %3724 = vrot.lane.b32.xlu1 %v8796_v40, %s7173_s17  ;;  %v3451_v14 = vpop.permute.xlu0 %3450 }
 0x5ff   : > { %3536 = vst.msk [vmem:[#allocation2 + $0x22d] sm:$0x1] %vm931_vm1, %v3451_v14  ;;  %v3866_v14 = vld [vmem:[#allocation2 + $0x30] sm:$0xff] }
 0x600   : > { %v3453_v16 = vpop.permute.xlu1 %3452  ;;  %3726 = vrot.lane.b32.xlu0 %v8806_v42, %s7173_s17 }
 0x602   : > { %3728 = vrot.lane.b32.xlu1 %v8810_v44, %s7173_s17  ;;  %v3455_v23 = vpop.permute.xlu0 %3454 }
 0x604   : > { %v3457_v10 = vpop.permute.xlu1 %3456  ;;  %3730 = vrot.lane.b32.xlu0 %v8819_v54, %s7173_s17 }
 0x606   : > { %3732 = vrot.lane.b32.xlu1 %v8823_v58, %s7173_s17  ;;  %v3459_v38 = vpop.permute.xlu0 %3458 }
 0x607   : > { %v4070_v38 = vrot.slane %v3864_v28, 6 }
 0x608   : > { %v3461_v40 = vpop.permute.xlu1 %3460  ;;  %3734 = vrot.lane.b32.xlu0 %v8831_v29, %s7173_s17 }
 0x60a   : > { %3736 = vrot.lane.b32.xlu1 %v8835_v12, %s7173_s17  ;;  %v3543_v42 = vpop.permute.xlu0 %3542 }
 0x60c   : > { %v3545_v45 = vpop.permute.xlu1 %3544  ;;  %3738 = vrot.lane.b32.xlu0 %v8843_v32, %s7173_s17 }
 0x60d   : > { %3663 = vst.msk [vmem:[#allocation2 + $0x1e] sm:$0x1] %vm931_vm1, %v3545_v45 }
 0x60e   : > { %3740 = vrot.lane.b32.xlu1 %v8847_v36, %s7173_s17  ;;  %v3547_v44 = vpop.permute.xlu0 %3546 }
 0x60f   : > { %3664 = vst.msk [vmem:[#allocation2 + $0x2e] sm:$0x1] %vm931_vm1, %v3547_v44  ;;  %v4384_v44 = vsel %vm4382_vm2, %v3965_v8, %v3864_v28 }
 0x610   : > { %v3549_v54 = vpop.permute.xlu1 %3548  ;;  %3742 = vrot.lane.b32.xlu0 %v8856_v4, %s7173_s17 }
 0x611   : > { %3665 = vst.msk [vmem:[#allocation2 + $0x3e] sm:$0x1] %vm931_vm1, %v3549_v54 }
 0x612   : > { %3744 = vrot.lane.b32.xlu1 %v8860_v24, %s7173_s17  ;;  %v3551_v58 = vpop.permute.xlu0 %3550 }
 0x613   : > { %3666 = vst.msk [vmem:[#allocation2 + $0x4e] sm:$0x1] %vm931_vm1, %v3551_v58 }
 0x614   : > { %v3553_v29 = vpop.permute.xlu1 %3552  ;;  %3746 = vrot.lane.b32.xlu0 %v8870_v13, %s7173_s17 }
 0x615   : > { %3667 = vst.msk [vmem:[#allocation2 + $0x5e] sm:$0x1] %vm931_vm1, %v3553_v29  ;;  %v3966_v29 = vrot.slane %v3866_v14, 2 }
 0x616   : > { %3748 = vrot.lane.b32.xlu1 %v8874_v22, %s7173_s17  ;;  %v3555_v12 = vpop.permute.xlu0 %3554 }
 0x617   : > { %3668 = vst.msk [vmem:[#allocation2 + $0x6e] sm:$0x1] %vm931_vm1, %v3555_v12 }
 0x618   : > { %v3557_v32 = vpop.permute.xlu1 %3556  ;;  %3750 = vrot.lane.b32.xlu0 %v8884_v20, %s7173_s17 }
 0x619   : > { %3669 = vst.msk [vmem:[#allocation2 + $0x7e] sm:$0x1] %vm931_vm1, %v3557_v32 }
 0x61a   : > { %3752 = vrot.lane.b32.xlu1 %v8888_v31, %s7173_s17  ;;  %v3559_v36 = vpop.permute.xlu0 %3558 }
 0x61b   : > { %3670 = vst.msk [vmem:[#allocation2 + $0x8e] sm:$0x1] %vm931_vm1, %v3559_v36  ;;  %v9728_v36 = vsel %vm4066_vm3, %v4384_v44, %v4070_v38 }
 0x61c   : > { %v3561_v4 = vpop.permute.xlu1 %3560  ;;  %3754 = vrot.lane.b32.xlu0 %v8898_v46, %s7173_s17  ;;  %12796 = vst [vmem:[#allocation20_spill] sm:$0xff] %v9728_v36 }
 0x61d   : > { %3671 = vst.msk [vmem:[#allocation2 + $0x9e] sm:$0x1] %vm931_vm1, %v3561_v4 }
 0x61e   : > { %3756 = vrot.lane.b32.xlu1 %v8902_v0, %s7173_s17  ;;  %v3563_v24 = vpop.permute.xlu0 %3562 }
 0x61f   : > { %3672 = vst.msk [vmem:[#allocation2 + $0xae] sm:$0x1] %vm931_vm1, %v3563_v24 }
 0x620   : > { %v3565_v13 = vpop.permute.xlu1 %3564  ;;  %3758 = vrot.lane.b32.xlu0 %v8912_v3, %s7173_s17 }
 0x621   : > { %3673 = vst.msk [vmem:[#allocation2 + $0xbe] sm:$0x1] %vm931_vm1, %v3565_v13 }
 0x622   : > { %3760 = vrot.lane.b32.xlu1 %v8916_v53, %s7173_s17  ;;  %v3567_v22 = vpop.permute.xlu0 %3566  ;;  %v9672_v53 = vld [vmem:[#allocation2 + $0x10] sm:$0xff] }
 0x623   : > { %3674 = vst.msk [vmem:[#allocation2 + $0xce] sm:$0x1] %vm931_vm1, %v3567_v22 }
 0x624   : > { %v3569_v20 = vpop.permute.xlu1 %3568  ;;  %3762 = vrot.lane.b32.xlu0 %v8926_v41, %s7173_s17 }
 0x625   : > { %3675 = vst.msk [vmem:[#allocation2 + $0xde] sm:$0x1] %vm931_vm1, %v3569_v20  ;;  %v4073_v20 = vrot.slane %v3866_v14, 6 }
 0x626   : > { %3764 = vrot.lane.b32.xlu1 %v8930_v6, %s7173_s17  ;;  %v3571_v31 = vpop.permute.xlu0 %3570 }
 0x627   : > { %3676 = vst.msk [vmem:[#allocation2 + $0xee] sm:$0x1] %vm931_vm1, %v3571_v31  ;;  %v4385_v31 = vsel %vm4382_vm2, %v3966_v29, %v3866_v14  ;;  %v3874_v14 = vld [vmem:[#allocation2 + $0x70] sm:$0xff] }
 0x628   : > { %v3573_v46 = vpop.permute.xlu1 %3572  ;;  %3766 = vrot.lane.b32.xlu0 %v8940_v27, %s7173_s17  ;;  %v3964_v27 = vrot.slane %v9672_v53, 2  ;;  %v3970_v29 = vrot.slane %v3874_v14, 2 }
 0x629   : > { %3677 = vst.msk [vmem:[#allocation2 + $0xfe] sm:$0x1] %vm931_vm1, %v3573_v46 }
 0x62a   : > { %3768 = vrot.lane.b32.xlu1 %v8944_v33, %s7173_s17  ;;  %v3575_v0 = vpop.permute.xlu0 %3574 }
 0x62b   : > { %3678 = vst.msk [vmem:[#allocation2 + $0x10e] sm:$0x1] %vm931_vm1, %v3575_v0 }
 0x62c   : > { %v3577_v3 = vpop.permute.xlu1 %3576  ;;  %3770 = vrot.lane.b32.xlu0 %v8954_v55, %s7173_s17 }
 0x62d   : > { %3679 = vst.msk [vmem:[#allocation2 + $0x11e] sm:$0x1] %vm931_vm1, %v3577_v3  ;;  %v3868_v3 = vld [vmem:[#allocation2 + $0x40] sm:$0xff] }
 0x62e   : > { %3772 = vrot.lane.b32.xlu1 %v8960_v43, %s7173_s17  ;;  %v3579_v41 = vpop.permute.xlu0 %3578  ;;  %v4067_v43 = vrot.slane %v9672_v53, 6 }
 0x62f   : > { %3680 = vst.msk [vmem:[#allocation2 + $0x12e] sm:$0x1] %vm931_vm1, %v3579_v41 }
 0x630   : > { %v3581_v6 = vpop.permute.xlu1 %3580  ;;  %3774 = vrot.lane.b32.xlu0 %v8970_v56, %s7173_s17  ;;  %v4383_v56 = vsel %vm4382_vm2, %v3964_v27, %v9672_v53  ;;  %v9748_v27 = vsel %vm4066_vm3, %v4385_v31, %v4073_v20 }
 0x631   : > { %3681 = vst.msk [vmem:[#allocation2 + $0x13e] sm:$0x1] %vm931_vm1, %v3581_v6  ;;  %v9692_v61 = vsel %vm4066_vm3, %v4383_v56, %v4067_v43  ;;  %12799 = vst [vmem:[#allocation19_spill] sm:$0xff] %v9748_v27 }
 0x632   : > { %3776 = vrot.lane.b32.xlu1 %v8974_v48, %s7173_s17  ;;  %v3583_v33 = vpop.permute.xlu0 %3582  ;;  %12793 = vst [vmem:[#allocation16_spill] sm:$0xff] %v9692_v61 }
 0x633   : > { %3682 = vst.msk [vmem:[#allocation2 + $0x14e] sm:$0x1] %vm931_vm1, %v3583_v33 }
 0x634   : > { %v3585_v55 = vpop.permute.xlu1 %3584  ;;  %3778 = vrot.lane.b32.xlu0 %v8986_v37, %s7173_s17 }
 0x635   : > { %3683 = vst.msk [vmem:[#allocation2 + $0x15e] sm:$0x1] %vm931_vm1, %v3585_v55  ;;  %v3967_v55 = vrot.slane %v3868_v3, 2 }
 0x636   : > { %3780 = vrot.lane.b32.xlu1 %v8992_v51, %s7173_s17  ;;  %v3587_v48 = vpop.permute.xlu0 %3586 }
 0x637   : > { %3684 = vst.msk [vmem:[#allocation2 + $0x16e] sm:$0x1] %vm931_vm1, %v3587_v48  ;;  %v3870_v48 = vld [vmem:[#allocation2 + $0x50] sm:$0xff] }
 0x638   : > { %v3589_v5 = vpop.permute.xlu1 %3588  ;;  %4573 = vrot.lane.b32.xlu0 %v9692_v61, %s7174_s18 }
 0x639   : > { %3685 = vst.msk [vmem:[#allocation2 + $0x17e] sm:$0x1] %vm931_vm1, %v3589_v5 }
 0x63a   : > { %v3591_v37 = vpop.permute.xlu0 %3590 }
 0x63b   : > { %3686 = vst.msk [vmem:[#allocation2 + $0x18e] sm:$0x1] %vm931_vm1, %v3591_v37 }
 0x63c   : > { %v3593_v62 = vpop.permute.xlu1 %3592 }
 0x63d   : > { %3687 = vst.msk [vmem:[#allocation2 + $0x19e] sm:$0x1] %vm931_vm1, %v3593_v62  ;;  %v4076_v62 = vrot.slane %v3868_v3, 6 }
 0x63e   : > { %v3595_v51 = vpop.permute.xlu0 %3594 }
 0x63f   : > { %3688 = vst.msk [vmem:[#allocation2 + $0x1ae] sm:$0x1] %vm931_vm1, %v3595_v51 }
 0x640   : > { %v3597_v49 = vpop.permute.xlu1 %3596 }
 0x641   : > { %3689 = vst.msk [vmem:[#allocation2 + $0x1be] sm:$0x1] %vm931_vm1, %v3597_v49 }
 0x642   : > { %v3599_v52 = vpop.permute.xlu0 %3598 }
 0x643   : > { %3690 = vst.msk [vmem:[#allocation2 + $0x1ce] sm:$0x1] %vm931_vm1, %v3599_v52  ;;  %v4386_v52 = vsel %vm4382_vm2, %v3967_v55, %v3868_v3 }
 0x644   : > { %v3601_v39 = vpop.permute.xlu1 %3600 }
 0x645   : > { %3691 = vst.msk [vmem:[#allocation2 + $0x1de] sm:$0x1] %vm931_vm1, %v3601_v39 }
 0x646   : > { %v3603_v57 = vpop.permute.xlu0 %3602 }
 0x647   : > { %3692 = vst.msk [vmem:[#allocation2 + $0x1ee] sm:$0x1] %vm931_vm1, %v3603_v57 }
 0x648   : > { %v3605_v47 = vpop.permute.xlu1 %3604 }
 0x649   : > { %3693 = vst.msk [vmem:[#allocation2 + $0x1fe] sm:$0x1] %vm931_vm1, %v3605_v47  ;;  %v3968_v47 = vrot.slane %v3870_v48, 2 }
 0x64a   : > { %v3607_v26 = vpop.permute.xlu0 %3606 }
 0x64b   : > { %3694 = vst.msk [vmem:[#allocation2 + $0x20e] sm:$0x1] %vm931_vm1, %v3607_v26 }
 0x64c   : > { %v3609_v1 = vpop.permute.xlu1 %3608 }
 0x64d   : > { %3695 = vst.msk [vmem:[#allocation2 + $0x21e] sm:$0x1] %vm931_vm1, %v3609_v1 }
 0x64e   : > { %v3611_v63 = vpop.permute.xlu0 %3610 }
 0x64f   : > { %3696 = vst.msk [vmem:[#allocation2 + $0x22e] sm:$0x1] %vm931_vm1, %v3611_v63  ;;  %v9768_v63 = vsel %vm4066_vm3, %v4386_v52, %v4076_v62  ;;  %v3878_v52 = vld [vmem:[#allocation2 + $0x90] sm:$0xff] }
 0x650   : > { %v3613_v60 = vpop.permute.xlu1 %3612  ;;  %12802 = vst [vmem:[#allocation25_spill] sm:$0xff] %v9768_v63 }
 0x652   : > { %v3615_v25 = vpop.permute.xlu0 %3614 }
 0x654   : > { %v3617_v19 = vpop.permute.xlu1 %3616 }
 0x656   : > { %v3619_v35 = vpop.permute.xlu0 %3618 }
 0x658   : > { %v3621_v7 = vpop.permute.xlu1 %3620 }
 0x659   : > { %v4079_v7 = vrot.slane %v3870_v48, 6 }
 0x65a   : > { %v3703_v2 = vpop.permute.xlu0 %3702 }
 0x65b   : > { %v4387_v2 = vsel %vm4382_vm2, %v3968_v47, %v3870_v48 }
 0x65c   : > { %v3705_v18 = vpop.permute.xlu1 %3704 }
 0x65d   : > { %3823 = vst.msk [vmem:[#allocation2 + $0x1f] sm:$0x1] %vm931_vm1, %v3705_v18 }
 0x65e   : > { %v3707_v21 = vpop.permute.xlu0 %3706 }
 0x65f   : > { %3824 = vst.msk [vmem:[#allocation2 + $0x2f] sm:$0x1] %vm931_vm1, %v3707_v21 }
 0x660   : > { %v3709_v59 = vpop.permute.xlu1 %3708 }
 0x661   : > { %3825 = vst.msk [vmem:[#allocation2 + $0x3f] sm:$0x1] %vm931_vm1, %v3709_v59  ;;  %v3872_v59 = vld [vmem:[#allocation2 + $0x60] sm:$0xff] }
 0x662   : > { %v3711_v11 = vpop.permute.xlu0 %3710 }
 0x663   : > { %3826 = vst.msk [vmem:[#allocation2 + $0x4f] sm:$0x1] %vm931_vm1, %v3711_v11 }
 0x664   : > { %v3713_v34 = vpop.permute.xlu1 %3712  ;;  %v3863_v30 = vld [vmem:[#allocation2 + $0x18] sm:$0xff] }
 0x665   : > { %3827 = vst.msk [vmem:[#allocation2 + $0x5f] sm:$0x1] %vm931_vm1, %v3713_v34  ;;  %v4068_v15 = vrot.slane %v3863_v30, 6  ;;  %v4266_v17 = vrot.slane %v3863_v30, 4  ;;  %v4324_v9 = vrot.slane %v3863_v30, 2  ;;  %v9788_v30 = vsel %vm4066_vm3, %v4387_v2, %v4079_v7 }
 0x666   : > { %v3715_v16 = vpop.permute.xlu0 %3714  ;;  %v3865_v40 = vld [vmem:[#allocation2 + $0x28] sm:$0xff]  ;;  %12805 = vst [vmem:[#allocation30_spill] sm:$0xff] %v9788_v30 }
 0x667   : > { %v9714_v23 = vsel %vm4066_vm3, %v4067_v43, %v4068_v15  ;;  %v4451_v10 = vsel %vm4066_vm3, %v4068_v15, %v4266_v17  ;;  %3828 = vst.msk [vmem:[#allocation2 + $0x6f] sm:$0x1] %vm931_vm1, %v3715_v16  ;;  %v4071_v54 = vrot.slane %v3865_v40, 6  ;;  %v4267_v58 = vrot.slane %v3865_v40, 4 }
 0x668   : > { %12794 = vst [vmem:[#allocation17_spill] sm:$0xff] %v9714_v23  ;;  %4575 = vrot.lane.b32.xlu1 %v9714_v23, %s7174_s18  ;;  %v3717_v42 = vpop.permute.xlu1 %3716  ;;  %v9721_v45 = vsel %vm4480_vm4, %v4451_v10, %v4324_v9  ;;  %v3867_v12 = vld [vmem:[#allocation2 + $0x38] sm:$0xff]  ;;  %v4325_v4 = vrot.slane %v3865_v40, 2  ;;  %v3969_v15 = vrot.slane %v3872_v59, 2 }
 0x669   : > { %12795 = vst [vmem:[#allocation18_spill] sm:$0xff] %v9721_v45  ;;  %3829 = vst.msk [vmem:[#allocation2 + $0x7f] sm:$0x1] %vm931_vm1, %v3717_v42  ;;  %4577 = vrot.lane.b32.xlu0 %v9721_v45, %s7174_s18  ;;  %v9734_v13 = vsel %vm4066_vm3, %v4070_v38, %v4071_v54  ;;  %v4452_v22 = vsel %vm4066_vm3, %v4071_v54, %v4267_v58  ;;  %v4074_v46 = vrot.slane %v3867_v12, 6  ;;  %v4268_v0 = vrot.slane %v3867_v12, 4 }
 0x66a   : > { %v3719_v32 = vpop.permute.xlu0 %3718  ;;  %12797 = vst [vmem:[#allocation22_spill] sm:$0xff] %v9734_v13  ;;  %v9742_v41 = vsel %vm4480_vm4, %v4452_v22, %v4325_v4  ;;  %v4326_v33 = vrot.slane %v3867_v12, 2  ;;  %v3869_v56 = vld [vmem:[#allocation2 + $0x48] sm:$0xff]  ;;  %v4082_v38 = vrot.slane %v3872_v59, 6  ;;  %v4388_v44 = vsel %vm4382_vm2, %v3969_v15, %v3872_v59 }
 0x66b   : > { %3830 = vst.msk [vmem:[#allocation2 + $0x8f] sm:$0x1] %vm931_vm1, %v3719_v32  ;;  %12798 = vst [vmem:[#allocation24_spill] sm:$0xff] %v9742_v41  ;;  %v4453_v43 = vsel %vm4066_vm3, %v4074_v46, %v4268_v0  ;;  %v9755_v37 = vsel %vm4066_vm3, %v4073_v20, %v4074_v46  ;;  %v4077_v39 = vrot.slane %v3869_v56, 6  ;;  %v4269_v57 = vrot.slane %v3869_v56, 4 }
 0x66c   : > { %4579 = vrot.lane.b32.xlu1 %v9728_v36, %s7174_s18  ;;  %v3721_v24 = vpop.permute.xlu1 %3720  ;;  %12800 = vst [vmem:[#allocation21_spill] sm:$0xff] %v9755_v37  ;;  %v9761_v49 = vsel %vm4480_vm4, %v4453_v43, %v4326_v33  ;;  %v3871_v26 = vld [vmem:[#allocation2 + $0x58] sm:$0xff]  ;;  %v4327_v60 = vrot.slane %v3869_v56, 2  ;;  %v9808_v4 = vsel %vm4066_vm3, %v4388_v44, %v4082_v38  ;;  %v4085_v46 = vrot.slane %v3874_v14, 6 }
 0x66d   : > { %3831 = vst.msk [vmem:[#allocation2 + $0x9f] sm:$0x1] %vm931_vm1, %v3721_v24  ;;  %4581 = vrot.lane.b32.xlu0 %v9734_v13, %s7174_s18  ;;  %12801 = vst [vmem:[#allocation23_spill] sm:$0xff] %v9761_v49  ;;  %v9774_v19 = vsel %vm4066_vm3, %v4076_v62, %v4077_v39  ;;  %v4454_v35 = vsel %vm4066_vm3, %v4077_v39, %v4269_v57  ;;  %v4080_v18 = vrot.slane %v3871_v26, 6  ;;  %v4270_v21 = vrot.slane %v3871_v26, 4 }
 0x66e   : > { %v3723_v53 = vpop.permute.xlu0 %3722  ;;  %12803 = vst [vmem:[#allocation26_spill] sm:$0xff] %v9774_v19  ;;  %v9782_v11 = vsel %vm4480_vm4, %v4454_v35, %v4327_v60  ;;  %v4328_v8 = vrot.slane %v3871_v26, 2  ;;  %v3873_v9 = vld [vmem:[#allocation2 + $0x68] sm:$0xff]  ;;  %12808 = vst [vmem:[#allocation29_spill] sm:$0xff] %v9808_v4  ;;  %v4389_v0 = vsel %vm4382_vm2, %v3970_v29, %v3874_v14  ;;  %v4091_v15 = vrot.slane %v3878_v52, 6 }
 0x66f   : > { %3832 = vst.msk [vmem:[#allocation2 + $0xaf] sm:$0x1] %vm931_vm1, %v3723_v53  ;;  %12804 = vst [vmem:[#allocation28_spill] sm:$0xff] %v9782_v11  ;;  %v4455_v17 = vsel %vm4066_vm3, %v4080_v18, %v4270_v21  ;;  %v9795_v10 = vsel %vm4066_vm3, %v4079_v7, %v4080_v18  ;;  %v4083_v54 = vrot.slane %v3873_v9, 6  ;;  %v4271_v58 = vrot.slane %v3873_v9, 4 }
 0x670   : > { %4583 = vrot.lane.b32.xlu1 %v9742_v41, %s7174_s18  ;;  %v3725_v6 = vpop.permute.xlu1 %3724  ;;  %12806 = vst [vmem:[#allocation32_spill] sm:$0xff] %v9795_v10  ;;  %v9801_v42 = vsel %vm4480_vm4, %v4455_v17, %v4328_v8  ;;  %v3875_v12 = vld [vmem:[#allocation2 + $0x78] sm:$0xff]  ;;  %v4329_v24 = vrot.slane %v3873_v9, 2  ;;  %v9828_v56 = vsel %vm4066_vm3, %v4389_v0, %v4085_v46  ;;  %v3972_v7 = vrot.slane %v3878_v52, 2 }
 0x671   : > { %3833 = vst.msk [vmem:[#allocation2 + $0xbf] sm:$0x1] %vm931_vm1, %v3725_v6  ;;  %4585 = vrot.lane.b32.xlu0 %v9748_v27, %s7174_s18  ;;  %12807 = vst [vmem:[#allocation27_spill] sm:$0xff] %v9801_v42  ;;  %v9814_v20 = vsel %vm4066_vm3, %v4082_v38, %v4083_v54  ;;  %v4456_v31 = vsel %vm4066_vm3, %v4083_v54, %v4271_v58  ;;  %v4086_v3 = vrot.slane %v3875_v12, 6  ;;  %v4272_v53 = vrot.slane %v3875_v12, 4  ;;  %v3876_v6 = vld [vmem:[#allocation2 + $0x80] sm:$0xff] }
 0x672   : > { %v3727_v5 = vpop.permute.xlu0 %3726  ;;  %12809 = vst [vmem:[#allocation31_spill] sm:$0xff] %v9814_v20  ;;  %v9822_v55 = vsel %vm4480_vm4, %v4456_v31, %v4329_v24  ;;  %12811 = vst [vmem:[#allocation38_spill] sm:$0xff] %v9828_v56  ;;  %v4330_v48 = vrot.slane %v3875_v12, 2  ;;  %v4088_v47 = vrot.slane %v3876_v6, 6  ;;  %v4391_v17 = vsel %vm4382_vm2, %v3972_v7, %v3878_v52  ;;  %v3882_v24 = vld [vmem:[#allocation2 + $0xb0] sm:$0xff] }
 0x673   : > { %3834 = vst.msk [vmem:[#allocation2 + $0xcf] sm:$0x1] %vm931_vm1, %v3727_v5  ;;  %12810 = vst [vmem:[#allocation33_spill] sm:$0xff] %v9822_v55  ;;  %v3971_v5 = vrot.slane %v3876_v6, 2  ;;  %v4457_v62 = vsel %vm4066_vm3, %v4086_v3, %v4272_v53  ;;  %v9835_v57 = vsel %vm4066_vm3, %v4085_v46, %v4086_v3  ;;  %v9868_v54 = vsel %vm4066_vm3, %v4391_v17, %v4091_v15 }
 0x674   : > { %4587 = vrot.lane.b32.xlu1 %v9755_v37, %s7174_s18  ;;  %v3729_v51 = vpop.permute.xlu1 %3728  ;;  %12812 = vst [vmem:[#allocation39_spill] sm:$0xff] %v9835_v57  ;;  %v3879_v2 = vld [vmem:[#allocation2 + $0x98] sm:$0xff]  ;;  %12817 = vst [vmem:[#allocation44_spill] sm:$0xff] %v9868_v54 }
 0x675   : > { %3835 = vst.msk [vmem:[#allocation2 + $0xdf] sm:$0x1] %vm931_vm1, %v3729_v51  ;;  %4589 = vrot.lane.b32.xlu0 %v9761_v49, %s7174_s18  ;;  %v3877_v51 = vld [vmem:[#allocation2 + $0x88] sm:$0xff]  ;;  %v4390_v60 = vsel %vm4382_vm2, %v3971_v5, %v3876_v6  ;;  %v4092_v9 = vrot.slane %v3879_v2, 6  ;;  %v4274_v14 = vrot.slane %v3879_v2, 4  ;;  %v4332_v58 = vrot.slane %v3879_v2, 2 }
 0x676   : > { %v3731_v1 = vpop.permute.xlu0 %3730  ;;  %v4273_v35 = vrot.slane %v3877_v51, 4  ;;  %v9848_v21 = vsel %vm4066_vm3, %v4390_v60, %v4088_v47  ;;  %v4331_v59 = vrot.slane %v3877_v51, 2 }
 0x677   : > { %3836 = vst.msk [vmem:[#allocation2 + $0xef] sm:$0x1] %vm931_vm1, %v3731_v1  ;;  %v9841_v1 = vsel %vm4480_vm4, %v4457_v62, %v4330_v48  ;;  %12814 = vst [vmem:[#allocation41_spill] sm:$0xff] %v9848_v21  ;;  %v4459_v12 = vsel %vm4066_vm3, %v4092_v9, %v4274_v14  ;;  %v9875_v31 = vsel %vm4066_vm3, %v4091_v15, %v4092_v9  ;;  %v3884_v48 = vld [vmem:[#allocation2 + $0xc0] sm:$0xff] }
 0x678   : > { %4591 = vrot.lane.b32.xlu1 %v9768_v63, %s7174_s18  ;;  %v3733_v25 = vpop.permute.xlu1 %3732  ;;  %12813 = vst [vmem:[#allocation40_spill] sm:$0xff] %v9841_v1  ;;  %12818 = vst [vmem:[#allocation45_spill] sm:$0xff] %v9875_v31  ;;  %v9881_v3 = vsel %vm4480_vm4, %v4459_v12, %v4332_v58  ;;  %v3975_v60 = vrot.slane %v3884_v48, 2  ;;  %v3888_v14 = vld [vmem:[#allocation2 + $0xe0] sm:$0xff] }
 0x679   : > { %3837 = vst.msk [vmem:[#allocation2 + $0xff] sm:$0x1] %vm931_vm1, %v3733_v25  ;;  %4593 = vrot.lane.b32.xlu0 %v9774_v19, %s7174_s18  ;;  %v4089_v25 = vrot.slane %v3877_v51, 6  ;;  %12819 = vst [vmem:[#allocation46_spill] sm:$0xff] %v9881_v3  ;;  %v4097_v51 = vrot.slane %v3882_v24, 6 }
 0x67a   : > { %v3735_v28 = vpop.permute.xlu0 %3734 }
 0x67b   : > { %3838 = vst.msk [vmem:[#allocation2 + $0x10f] sm:$0x1] %vm931_vm1, %v3735_v28  ;;  %v4458_v8 = vsel %vm4066_vm3, %v4089_v25, %v4273_v35  ;;  %v3886_v35 = vld [vmem:[#allocation2 + $0xd0] sm:$0xff] }
 0x67c   : > { %4595 = vrot.lane.b32.xlu1 %v9782_v11, %s7174_s18  ;;  %v3737_v34 = vpop.permute.xlu1 %3736  ;;  %v3976_v17 = vrot.slane %v3886_v35, 2  ;;  %v3887_v9 = vld [vmem:[#allocation2 + $0xd8] sm:$0xff] }
 0x67d   : > { %3839 = vst.msk [vmem:[#allocation2 + $0x11f] sm:$0x1] %vm931_vm1, %v3737_v34  ;;  %4597 = vrot.lane.b32.xlu0 %v9788_v30, %s7174_s18  ;;  %v9854_v34 = vsel %vm4066_vm3, %v4088_v47, %v4089_v25  ;;  %v3885_v25 = vld [vmem:[#allocation2 + $0xc8] sm:$0xff] }
 0x67e   : > { %v3739_v16 = vpop.permute.xlu0 %3738  ;;  %12815 = vst [vmem:[#allocation42_spill] sm:$0xff] %v9854_v34  ;;  %v4101_v15 = vrot.slane %v3885_v25, 6  ;;  %v4395_v12 = vsel %vm4382_vm2, %v3976_v17, %v3886_v35 }
 0x67f   : > { %3840 = vst.msk [vmem:[#allocation2 + $0x12f] sm:$0x1] %vm931_vm1, %v3739_v16  ;;  %v3880_v16 = vld [vmem:[#allocation2 + $0xa0] sm:$0xff] }
 0x680   : > { %4599 = vrot.lane.b32.xlu1 %v9795_v10, %s7174_s18  ;;  %v3741_v40 = vpop.permute.xlu1 %3740  ;;  %v3973_v29 = vrot.slane %v3880_v16, 2  ;;  %v4094_v46 = vrot.slane %v3880_v16, 6 }
 0x681   : > { %3841 = vst.msk [vmem:[#allocation2 + $0x13f] sm:$0x1] %vm931_vm1, %v3741_v40  ;;  %4601 = vrot.lane.b32.xlu0 %v9801_v42, %s7174_s18  ;;  %v9862_v40 = vsel %vm4480_vm4, %v4458_v8, %v4331_v59  ;;  %v4394_v8 = vsel %vm4382_vm2, %v3975_v60, %v3884_v48 }
 0x682   : > { %v3743_v32 = vpop.permute.xlu0 %3742  ;;  %12816 = vst [vmem:[#allocation43_spill] sm:$0xff] %v9862_v40  ;;  %v4392_v53 = vsel %vm4382_vm2, %v3973_v29, %v3880_v16 }
 0x683   : > { %3842 = vst.msk [vmem:[#allocation2 + $0x14f] sm:$0x1] %vm931_vm1, %v3743_v32  ;;  %v3881_v32 = vld [vmem:[#allocation2 + $0xa8] sm:$0xff]  ;;  %v9888_v62 = vsel %vm4066_vm3, %v4392_v53, %v4094_v46 }
 0x684   : > { %4603 = vrot.lane.b32.xlu1 %v9808_v4, %s7174_s18  ;;  %v3745_v22 = vpop.permute.xlu1 %3744  ;;  %v4095_v6 = vrot.slane %v3881_v32, 6  ;;  %12820 = vst [vmem:[#allocation47_spill] sm:$0xff] %v9888_v62  ;;  %v4104_v32 = vrot.slane %v3887_v9, 6 }
 0x685   : > { %3843 = vst.msk [vmem:[#allocation2 + $0x15f] sm:$0x1] %vm931_vm1, %v3745_v22  ;;  %4605 = vrot.lane.b32.xlu0 %v9814_v20, %s7174_s18 }
 0x686   : > { %v3747_v33 = vpop.permute.xlu0 %3746 }
 0x687   : > { %3844 = vst.msk [vmem:[#allocation2 + $0x16f] sm:$0x1] %vm931_vm1, %v3747_v33  ;;  %v3974_v33 = vrot.slane %v3882_v24, 2 }
 0x688   : > { %4607 = vrot.lane.b32.xlu1 %v9822_v55, %s7174_s18  ;;  %v3749_v43 = vpop.permute.xlu1 %3748 }
 0x689   : > { %3845 = vst.msk [vmem:[#allocation2 + $0x17f] sm:$0x1] %vm931_vm1, %v3749_v43  ;;  %4609 = vrot.lane.b32.xlu0 %v9828_v56, %s7174_s18  ;;  %v3883_v43 = vld [vmem:[#allocation2 + $0xb8] sm:$0xff]  ;;  %v4393_v47 = vsel %vm4382_vm2, %v3974_v33, %v3882_v24  ;;  %v3977_v24 = vrot.slane %v3888_v14, 2 }
 0x68a   : > { %v3751_v39 = vpop.permute.xlu0 %3750  ;;  %v9901_v2 = vsel %vm4066_vm3, %v4393_v47, %v4097_v51  ;;  %v3892_v47 = vld [vmem:[#allocation2 + $0x100] sm:$0xff] }
 0x68b   : > { %3846 = vst.msk [vmem:[#allocation2 + $0x18f] sm:$0x1] %vm931_vm1, %v3751_v39  ;;  %v9894_v39 = vsel %vm4066_vm3, %v4094_v46, %v4095_v6  ;;  %v3890_v46 = vld [vmem:[#allocation2 + $0xf0] sm:$0xff]  ;;  %v4106_v6 = vrot.slane %v3888_v14, 6 }
 0x68c   : > { %4611 = vrot.lane.b32.xlu1 %v9835_v57, %s7174_s18  ;;  %v3753_v26 = vpop.permute.xlu1 %3752  ;;  %v4109_v60 = vrot.slane %v3890_v46, 6 }
 0x68d   : > { %3847 = vst.msk [vmem:[#allocation2 + $0x19f] sm:$0x1] %vm931_vm1, %v3753_v26  ;;  %4613 = vrot.lane.b32.xlu0 %v9841_v1, %s7174_s18  ;;  %v4098_v26 = vrot.slane %v3883_v43, 6 }
 0x68e   : > { %v3755_v18 = vpop.permute.xlu0 %3754 }
 0x68f   : > { %3848 = vst.msk [vmem:[#allocation2 + $0x1af] sm:$0x1] %vm931_vm1, %v3755_v18  ;;  %v4100_v18 = vrot.slane %v3884_v48, 6  ;;  %v4396_v48 = vsel %vm4382_vm2, %v3977_v24, %v3888_v14 }
 0x690   : > { %4615 = vrot.lane.b32.xlu1 %v9848_v21, %s7174_s18  ;;  %v3757_v28 = vpop.permute.xlu1 %3756 }
 0x691   : > { %3849 = vst.msk [vmem:[#allocation2 + $0x1bf] sm:$0x1] %vm931_vm1, %v3757_v28  ;;  %4617 = vrot.lane.b32.xlu0 %v9854_v34, %s7174_s18  ;;  %v9907_v28 = vsel %vm4066_vm3, %v4097_v51, %v4098_v26  ;;  %v9918_v29 = vsel %vm4066_vm3, %v4100_v18, %v4101_v15  ;;  %v3978_v51 = vrot.slane %v3890_v46, 2  ;;  %v9935_v26 = vsel %vm4066_vm3, %v4396_v48, %v4106_v6  ;;  %v3896_v48 = vld [vmem:[#allocation2 + $0x120] sm:$0xff] }
 0x692   : > { %v3759_v38 = vpop.permute.xlu0 %3758 }
 0x693   : > { %3850 = vst.msk [vmem:[#allocation2 + $0x1cf] sm:$0x1] %vm931_vm1, %v3759_v38  ;;  %v9913_v38 = vsel %vm4066_vm3, %v4394_v8, %v4100_v18  ;;  %v3893_v8 = vld [vmem:[#allocation2 + $0x108] sm:$0xff] }
 0x694   : > { %4619 = vrot.lane.b32.xlu1 %v9862_v40, %s7174_s18  ;;  %v3761_v44 = vpop.permute.xlu1 %3760 }
 0x695   : > { %3851 = vst.msk [vmem:[#allocation2 + $0x1df] sm:$0x1] %vm931_vm1, %v3761_v44  ;;  %4621 = vrot.lane.b32.xlu0 %v9868_v54, %s7174_s18  ;;  %v4103_v44 = vrot.slane %v3886_v35, 6  ;;  %v4397_v35 = vsel %vm4382_vm2, %v3978_v51, %v3890_v46  ;;  %v4334_v46 = vrot.slane %v3893_v8, 2 }
 0x696   : > { %v3763_v22 = vpop.permute.xlu0 %3762  ;;  %v9946_v15 = vsel %vm4066_vm3, %v4397_v35, %v4109_v60 }
 0x697   : > { %3852 = vst.msk [vmem:[#allocation2 + $0x1ef] sm:$0x1] %vm931_vm1, %v3763_v22  ;;  %v3889_v22 = vld [vmem:[#allocation2 + $0xe8] sm:$0xff]  ;;  %v9924_v53 = vsel %vm4066_vm3, %v4395_v12, %v4103_v44  ;;  %v9929_v43 = vsel %vm4066_vm3, %v4103_v44, %v4104_v32  ;;  %12821 = vst [vmem:[#allocation48_spill] sm:$0xff] %v9946_v15  ;;  %v4276_v12 = vrot.slane %v3893_v8, 4  ;;  %v3894_v32 = vld [vmem:[#allocation2 + $0x110] sm:$0xff] }
 0x698   : > { %4623 = vrot.lane.b32.xlu1 %v9875_v31, %s7174_s18  ;;  %v3765_v0 = vpop.permute.xlu1 %3764  ;;  %v4115_v51 = vrot.slane %v3894_v32, 6 }
 0x699   : > { %3853 = vst.msk [vmem:[#allocation2 + $0x1ff] sm:$0x1] %vm931_vm1, %v3765_v0  ;;  %4625 = vrot.lane.b32.xlu0 %v9881_v3, %s7174_s18 }
 0x69a   : > { %v3767_v5 = vpop.permute.xlu0 %3766 }
 0x69b   : > { %3854 = vst.msk [vmem:[#allocation2 + $0x20f] sm:$0x1] %vm931_vm1, %v3767_v5  ;;  %v4107_v5 = vrot.slane %v3889_v22, 6 }
 0x69c   : > { %4627 = vrot.lane.b32.xlu1 %v9888_v62, %s7174_s18  ;;  %v3769_v52 = vpop.permute.xlu1 %3768 }
 0x69d   : > { %3855 = vst.msk [vmem:[#allocation2 + $0x21f] sm:$0x1] %vm931_vm1, %v3769_v52  ;;  %4629 = vrot.lane.b32.xlu0 %v9894_v39, %s7174_s18  ;;  %v3891_v52 = vld [vmem:[#allocation2 + $0xf8] sm:$0xff]  ;;  %v9940_v25 = vsel %vm4066_vm3, %v4106_v6, %v4107_v5 }
 0x69e   : > { %v3771_v7 = vpop.permute.xlu0 %3770  ;;  %v4275_v18 = vrot.slane %v3891_v52, 4  ;;  %v4333_v17 = vrot.slane %v3891_v52, 2 }
 0x69f   : > { %3856 = vst.msk [vmem:[#allocation2 + $0x22f] sm:$0x1] %vm931_vm1, %v3771_v7  ;;  %v4110_v7 = vrot.slane %v3891_v52, 6  ;;  %vm6749_vm1 = vcmask 654336  }
 0x6a0   : > { %4631 = vrot.lane.b32.xlu1 %v9901_v2, %s7174_s18  ;;  %v3773_v59 = vpop.permute.xlu1 %3772 }
 0x6a1   : > { %4633 = vrot.lane.b32.xlu0 %v9907_v28, %s7174_s18  ;;  %v3979_v59 = vrot.slane %v3892_v47, 2  ;;  %v9951_v9 = vsel %vm4066_vm3, %v4109_v60, %v4110_v7  ;;  %v4460_v14 = vsel %vm4066_vm3, %v4110_v7, %v4275_v18  ;;  %v3981_v7 = vrot.slane %v3896_v48, 2  ;;  %v3897_v18 = vld [vmem:[#allocation2 + $0x128] sm:$0xff] }
 0x6a2   : > { %v3775_v16 = vpop.permute.xlu0 %3774  ;;  %12822 = vst [vmem:[#allocation49_spill] sm:$0xff] %v9951_v9  ;;  %v9958_v24 = vsel %vm4480_vm4, %v4460_v14, %v4333_v17 }
 0x6a3   : > { %v4112_v16 = vrot.slane %v3892_v47, 6  ;;  %v4398_v44 = vsel %vm4382_vm2, %v3979_v59, %v3892_v47  ;;  %12823 = vst [vmem:[#allocation50_spill] sm:$0xff] %v9958_v24 }
 0x6a4   : > { %4635 = vrot.lane.b32.xlu1 %v9913_v38, %s7174_s18  ;;  %v3777_v58 = vpop.permute.xlu1 %3776 }
 0x6a5   : > { %4637 = vrot.lane.b32.xlu0 %v9918_v29, %s7174_s18  ;;  %v4113_v58 = vrot.slane %v3893_v8, 6  ;;  %v9963_v22 = vsel %vm4066_vm3, %v4398_v44, %v4112_v16  ;;  %v4400_v44 = vsel %vm4382_vm2, %v3981_v7, %v3896_v48 }
 0x6a6   : > { %v3779_v0 = vpop.permute.xlu0 %3778 }
 0x6a7   : > { %v3980_v0 = vrot.slane %v3894_v32, 2  ;;  %v4461_v6 = vsel %vm4066_vm3, %v4113_v58, %v4276_v12  ;;  %v9969_v5 = vsel %vm4066_vm3, %v4112_v16, %v4113_v58  ;;  %v4118_v16 = vrot.slane %v3896_v48, 6  ;;  %v3899_v48 = vld [vmem:[#allocation2 + $0x138] sm:$0xff] }
 0x6a8   : > { %4639 = vrot.lane.b32.xlu1 %v9924_v53, %s7174_s18  ;;  %v3781_v33 = vpop.permute.xlu1 %3780  ;;  %v9974_v52 = vsel %vm4480_vm4, %v4461_v6, %v4334_v46  ;;  %v4119_v58 = vrot.slane %v3897_v18, 6  ;;  %v4278_v12 = vrot.slane %v3897_v18, 4  ;;  %v4336_v6 = vrot.slane %v3897_v18, 2 }
 0x6a9   : > { %4641 = vrot.lane.b32.xlu0 %v9929_v43, %s7174_s18  ;;  %v3895_v33 = vld [vmem:[#allocation2 + $0x118] sm:$0xff]  ;;  %v4399_v47 = vsel %vm4382_vm2, %v3980_v0, %v3894_v32  ;;  %v3898_v32 = vld [vmem:[#allocation2 + $0x130] sm:$0xff]  ;;  %v9997_v0 = vsel %vm4066_vm3, %v4400_v44, %v4118_v16 }
 0x6aa   : > { %v4116_v60 = vrot.slane %v3895_v33, 6  ;;  %v4277_v35 = vrot.slane %v3895_v33, 4  ;;  %v9980_v59 = vsel %vm4066_vm3, %v4399_v47, %v4115_v51  ;;  %v4335_v8 = vrot.slane %v3895_v33, 2  ;;  %v3900_v47 = vld [vmem:[#allocation2 + $0x140] sm:$0xff] }
 0x6ab   : > { %v3982_v33 = vrot.slane %v3898_v32, 2  ;;  %v3983_v44 = vrot.slane %v3900_v47, 2 }
 0x6ac   : > { %4643 = vrot.lane.b32.xlu1 %v9935_v26, %s7174_s18  ;;  %v9985_v17 = vsel %vm4066_vm3, %v4115_v51, %v4116_v60  ;;  %v4462_v14 = vsel %vm4066_vm3, %v4116_v60, %v4277_v35  ;;  %v4463_v51 = vsel %vm4066_vm3, %v4119_v58, %v4278_v12  ;;  %v10003_v60 = vsel %vm4066_vm3, %v4118_v16, %v4119_v58  ;;  %v3901_v12 = vld [vmem:[#allocation2 + $0x148] sm:$0xff] }
 0x6ad   : > { %4645 = vrot.lane.b32.xlu0 %v9940_v25, %s7174_s18  ;;  %v9992_v46 = vsel %vm4480_vm4, %v4462_v14, %v4335_v8  ;;  %12824 = vst [vmem:[#allocation51_spill] sm:$0xff] %v10003_v60  ;;  %v4121_v35 = vrot.slane %v3898_v32, 6  ;;  %v10008_v7 = vsel %vm4480_vm4, %v4463_v51, %v4336_v6  ;;  %v4401_v18 = vsel %vm4382_vm2, %v3982_v33, %v3898_v32 }
 0x6ae   : > { %12825 = vst [vmem:[#allocation52_spill] sm:$0xff] %v10008_v7  ;;  %v4122_v8 = vrot.slane %v3899_v48, 6  ;;  %v4279_v14 = vrot.slane %v3899_v48, 4  ;;  %v4337_v16 = vrot.slane %v3899_v48, 2  ;;  %v4124_v32 = vrot.slane %v3900_v47, 6 }
 0x6af   : > { %v10014_v50 = vsel %vm4066_vm3, %v4401_v18, %v4121_v35  ;;  %v4402_v33 = vsel %vm4382_vm2, %v3983_v44, %v3900_v47  ;;  %v4125_v51 = vrot.slane %v3901_v12, 6  ;;  %v3903_v47 = vld [vmem:[#allocation2 + $0x158] sm:$0xff]  ;;  %v3904_v44 = vld [vmem:[#allocation2 + $0x160] sm:$0xff] }
 0x6b0   : > { %4647 = vrot.lane.b32.xlu1 %v9946_v15, %s7174_s18  ;;  %12826 = vst [vmem:[#allocation53_spill] sm:$0xff] %v10014_v50  ;;  %v10019_v58 = vsel %vm4066_vm3, %v4121_v35, %v4122_v8  ;;  %v4464_v6 = vsel %vm4066_vm3, %v4122_v8, %v4279_v14  ;;  %v10031_v48 = vsel %vm4066_vm3, %v4402_v33, %v4124_v32  ;;  %v4338_v35 = vrot.slane %v3901_v12, 2 }
 0x6b1   : > { %4649 = vrot.lane.b32.xlu0 %v9951_v9, %s7174_s18  ;;  %12827 = vst [vmem:[#allocation54_spill] sm:$0xff] %v10019_v58  ;;  %v10026_v18 = vsel %vm4480_vm4, %v4464_v6, %v4337_v16  ;;  %12829 = vst [vmem:[#allocation56_spill] sm:$0xff] %v10031_v48  ;;  %v4128_v33 = vrot.slane %v3903_v47, 6 }
 0x6b2   : > { %12828 = vst [vmem:[#allocation55_spill] sm:$0xff] %v10026_v18 }
 0x6b4   : > { %4651 = vrot.lane.b32.xlu1 %v9958_v24, %s7174_s18 }
 0x6b5   : > { %4653 = vrot.lane.b32.xlu0 %v9963_v22, %s7174_s18 }
 0x6b8   : > { %4655 = vrot.lane.b32.xlu1 %v9969_v5, %s7174_s18 }
 0x6b9   : > { %4657 = vrot.lane.b32.xlu0 %v9974_v52, %s7174_s18 }
 0x6bc   : > { %4659 = vrot.lane.b32.xlu1 %v9980_v59, %s7174_s18 }
 0x6bd   : > { %4661 = vrot.lane.b32.xlu0 %v9985_v17, %s7174_s18 }
 0x6c0   : > { %4663 = vrot.lane.b32.xlu1 %v9992_v46, %s7174_s18 }
 0x6c1   : > { %4665 = vrot.lane.b32.xlu0 %v9997_v0, %s7174_s18 }
 0x6c4   : > { %4667 = vrot.lane.b32.xlu1 %v10003_v60, %s7174_s18  ;;  %v3902_v60 = vld [vmem:[#allocation2 + $0x150] sm:$0xff] }
 0x6c5   : > { %4669 = vrot.lane.b32.xlu0 %v10008_v7, %s7174_s18  ;;  %v4280_v7 = vrot.slane %v3901_v12, 4  ;;  %v3984_v8 = vrot.slane %v3902_v60, 2  ;;  %v4127_v16 = vrot.slane %v3902_v60, 6 }
 0x6c7   : > { %v4465_v14 = vsel %vm4066_vm3, %v4125_v51, %v4280_v7  ;;  %v4403_v12 = vsel %vm4382_vm2, %v3984_v8, %v3902_v60  ;;  %v3985_v7 = vrot.slane %v3904_v44, 2  ;;  %v4130_v60 = vrot.slane %v3904_v44, 6 }
 0x6c8   : > { %4671 = vrot.lane.b32.xlu1 %v10014_v50, %s7174_s18  ;;  %v10042_v6 = vsel %vm4480_vm4, %v4465_v14, %v4338_v35  ;;  %v10048_v50 = vsel %vm4066_vm3, %v4403_v12, %v4127_v16  ;;  %v10059_v12 = vpop.permute.xlu0 %4573 }
 0x6c9   : > { %4673 = vrot.lane.b32.xlu0 %v10019_v58, %s7174_s18  ;;  %v10037_v58 = vsel %vm4066_vm3, %v4124_v32, %v4125_v51  ;;  %12831 = vst [vmem:[#allocation58_spill] sm:$0xff] %v10042_v6  ;;  %12832 = vst [vmem:[#allocation59_spill] sm:$0xff] %v10048_v50  ;;  %v4339_v32 = vrot.slane %v3903_v47, 2  ;;  %v10053_v51 = vsel %vm4066_vm3, %v4127_v16, %v4128_v33 }
 0x6ca   : > { %12830 = vst [vmem:[#allocation57_spill] sm:$0xff] %v10037_v58  ;;  %12833 = vst [vmem:[#allocation60_spill] sm:$0xff] %v10053_v51  ;;  %v4404_v8 = vsel %vm4382_vm2, %v3985_v7, %v3904_v44  ;;  %v3907_v7 = vld [vmem:[#allocation2 + $0x178] sm:$0xff] }
 0x6cb   : > { %12834 = vst [vmem:[#allocation61_spill] sm:$0xff] %v10059_v12  ;;  %v10067_v16 = vsel %vm4066_vm3, %v4404_v8, %v4130_v60  ;;  %v3908_v12 = vld [vmem:[#allocation2 + $0x180] sm:$0xff] }
 0x6cc   : > { %4675 = vrot.lane.b32.xlu1 %v10026_v18, %s7174_s18  ;;  %v4281_v18 = vrot.slane %v3903_v47, 4  ;;  %12836 = vst [vmem:[#allocation63_spill] sm:$0xff] %v10067_v16 }
 0x6cd   : > { %4677 = vrot.lane.b32.xlu0 %v10031_v48, %s7174_s18  ;;  %v3905_v48 = vld [vmem:[#allocation2 + $0x168] sm:$0xff] }
 0x6ce   : > { %v4466_v35 = vsel %vm4066_vm3, %v4128_v33, %v4281_v18  ;;  %v4131_v14 = vrot.slane %v3905_v48, 6  ;;  %v4340_v18 = vrot.slane %v3905_v48, 2 }
 0x6cf   : > { %v10062_v47 = vsel %vm4480_vm4, %v4466_v35, %v4339_v32 }
 0x6d0   : > { %4679 = vrot.lane.b32.xlu1 %v10037_v58, %s7174_s18  ;;  %v3906_v58 = vld [vmem:[#allocation2 + $0x170] sm:$0xff]  ;;  %12835 = vst [vmem:[#allocation62_spill] sm:$0xff] %v10062_v47  ;;  %v10077_v32 = vsel %vm4066_vm3, %v4130_v60, %v4131_v14 }
 0x6d1   : > { %4681 = vrot.lane.b32.xlu0 %v10042_v6, %s7174_s18  ;;  %v4282_v6 = vrot.slane %v3905_v48, 4  ;;  %v3986_v33 = vrot.slane %v3906_v58, 2  ;;  %12839 = vst [vmem:[#allocation66_spill] sm:$0xff] %v10077_v32  ;;  %v4133_v35 = vrot.slane %v3906_v58, 6 }
 0x6d3   : > { %v4467_v44 = vsel %vm4066_vm3, %v4131_v14, %v4282_v6  ;;  %v4405_v8 = vsel %vm4382_vm2, %v3986_v33, %v3906_v58  ;;  %v4283_v6 = vrot.slane %v3907_v7, 4  ;;  %v4136_v33 = vrot.slane %v3908_v12, 6 }
 0x6d4   : > { %4683 = vrot.lane.b32.xlu1 %v10048_v50, %s7174_s18  ;;  %v10082_v48 = vsel %vm4480_vm4, %v4467_v44, %v4340_v18  ;;  %v10092_v14 = vsel %vm4066_vm3, %v4405_v8, %v4133_v35 }
 0x6d5   : > { %4685 = vrot.lane.b32.xlu0 %v10053_v51, %s7174_s18  ;;  %12840 = vst [vmem:[#allocation67_spill] sm:$0xff] %v10082_v48  ;;  %12843 = vst [vmem:[#allocation70_spill] sm:$0xff] %v10092_v14 }
 0x6d8   : > { %4687 = vrot.lane.b32.xlu1 %v10062_v47, %s7174_s18 }
 0x6d9   : > { %4689 = vrot.lane.b32.xlu0 %v10067_v16, %s7174_s18  ;;  %v4134_v16 = vrot.slane %v3907_v7, 6 }
 0x6da   : > { %v10072_v51 = vpop.permute.xlu1 %4575 }
 0x6db   : > { %12837 = vst [vmem:[#allocation64_spill] sm:$0xff] %v10072_v51  ;;  %v10074_v50 = vpop.permute.xlu0 %4577  ;;  %v3987_v51 = vrot.slane %v3908_v12, 2  ;;  %v10097_v58 = vsel %vm4066_vm3, %v4133_v35, %v4134_v16  ;;  %v4468_v18 = vsel %vm4066_vm3, %v4134_v16, %v4283_v6 }
 0x6dc   : > { %12838 = vst [vmem:[#allocation65_spill] sm:$0xff] %v10074_v50  ;;  %4691 = vrot.lane.b32.xlu1 %v10077_v32, %s7174_s18  ;;  %v3909_v50 = vld [vmem:[#allocation2 + $0x188] sm:$0xff]  ;;  %v4341_v32 = vrot.slane %v3907_v7, 2  ;;  %12844 = vst [vmem:[#allocation71_spill] sm:$0xff] %v10097_v58 }
 0x6dd   : > { %4693 = vrot.lane.b32.xlu0 %v10082_v48, %s7174_s18  ;;  %v4406_v44 = vsel %vm4382_vm2, %v3987_v51, %v3908_v12  ;;  %v3910_v48 = vld [vmem:[#allocation2 + $0x190] sm:$0xff]  ;;  %v4342_v35 = vrot.slane %v3909_v50, 2  ;;  %v3911_v12 = vld [vmem:[#allocation2 + $0x198] sm:$0xff] }
 0x6de   : > { %v10087_v47 = vpop.permute.xlu1 %4579  ;;  %v10113_v16 = vsel %vm4066_vm3, %v4406_v44, %v4136_v33  ;;  %v3988_v6 = vrot.slane %v3910_v48, 2 }
 0x6df   : > { %12841 = vst [vmem:[#allocation68_spill] sm:$0xff] %v10087_v47  ;;  %v10089_v60 = vpop.permute.xlu0 %4581  ;;  %v4137_v47 = vrot.slane %v3909_v50, 6  ;;  %12848 = vst [vmem:[#allocation75_spill] sm:$0xff] %v10113_v16 }
 0x6e0   : > { %12842 = vst [vmem:[#allocation69_spill] sm:$0xff] %v10089_v60  ;;  %4695 = vrot.lane.b32.xlu1 %v10092_v14, %s7174_s18  ;;  %v4284_v60 = vrot.slane %v3909_v50, 4  ;;  %v10108_v14 = vsel %vm4480_vm4, %v4468_v18, %v4341_v32  ;;  %v4139_v18 = vrot.slane %v3910_v48, 6  ;;  %v4407_v44 = vsel %vm4382_vm2, %v3988_v6, %v3910_v48 }
 0x6e1   : > { %4697 = vrot.lane.b32.xlu0 %v10097_v58, %s7174_s18  ;;  %12847 = vst [vmem:[#allocation74_spill] sm:$0xff] %v10108_v14  ;;  %v10123_v32 = vsel %vm4066_vm3, %v4136_v33, %v4137_v47 }
 0x6e2   : > { %v10103_v8 = vpop.permute.xlu1 %4583  ;;  %v4469_v51 = vsel %vm4066_vm3, %v4137_v47, %v4284_v60  ;;  %12851 = vst [vmem:[#allocation78_spill] sm:$0xff] %v10123_v32  ;;  %v4285_v60 = vrot.slane %v3911_v12, 4  ;;  %v10138_v33 = vsel %vm4066_vm3, %v4407_v44, %v4139_v18 }
 0x6e3   : > { %12845 = vst [vmem:[#allocation72_spill] sm:$0xff] %v10103_v8  ;;  %v10105_v7 = vpop.permute.xlu0 %4585  ;;  %v10128_v50 = vsel %vm4480_vm4, %v4469_v51, %v4342_v35  ;;  %12855 = vst [vmem:[#allocation82_spill] sm:$0xff] %v10138_v33 }
 0x6e4   : > { %12846 = vst [vmem:[#allocation73_spill] sm:$0xff] %v10105_v7  ;;  %4699 = vrot.lane.b32.xlu1 %v10108_v14, %s7174_s18  ;;  %v3912_v7 = vld [vmem:[#allocation2 + $0x1a0] sm:$0xff]  ;;  %12852 = vst [vmem:[#allocation79_spill] sm:$0xff] %v10128_v50 }
 0x6e5   : > { %4701 = vrot.lane.b32.xlu0 %v10113_v16, %s7174_s18  ;;  %v4140_v16 = vrot.slane %v3911_v12, 6  ;;  %v4142_v6 = vrot.slane %v3912_v7, 6 }
 0x6e6   : > { %v10118_v8 = vpop.permute.xlu1 %4587 }
 0x6e7   : > { %12849 = vst [vmem:[#allocation76_spill] sm:$0xff] %v10118_v8  ;;  %v10120_v58 = vpop.permute.xlu0 %4589  ;;  %v3989_v8 = vrot.slane %v3912_v7, 2  ;;  %v10143_v48 = vsel %vm4066_vm3, %v4139_v18, %v4140_v16  ;;  %v4470_v35 = vsel %vm4066_vm3, %v4140_v16, %v4285_v60 }
 0x6e8   : > { %12850 = vst [vmem:[#allocation77_spill] sm:$0xff] %v10120_v58  ;;  %4703 = vrot.lane.b32.xlu1 %v10123_v32, %s7174_s18  ;;  %v3913_v58 = vld [vmem:[#allocation2 + $0x1a8] sm:$0xff]  ;;  %v4343_v32 = vrot.slane %v3911_v12, 2  ;;  %12856 = vst [vmem:[#allocation83_spill] sm:$0xff] %v10143_v48 }
 0x6e9   : > { %4705 = vrot.lane.b32.xlu0 %v10128_v50, %s7174_s18  ;;  %v4408_v51 = vsel %vm4382_vm2, %v3989_v8, %v3912_v7  ;;  %v3914_v50 = vld [vmem:[#allocation2 + $0x1b0] sm:$0xff]  ;;  %v4344_v18 = vrot.slane %v3913_v58, 2  ;;  %v3915_v7 = vld [vmem:[#allocation2 + $0x1b8] sm:$0xff] }
 0x6ea   : > { %v10133_v14 = vpop.permute.xlu1 %4591  ;;  %v10159_v16 = vsel %vm4066_vm3, %v4408_v51, %v4142_v6  ;;  %v3990_v60 = vrot.slane %v3914_v50, 2 }
 0x6eb   : > { %12853 = vst [vmem:[#allocation80_spill] sm:$0xff] %v10133_v14  ;;  %v10135_v47 = vpop.permute.xlu0 %4593  ;;  %v4143_v14 = vrot.slane %v3913_v58, 6  ;;  %12860 = vst [vmem:[#allocation87_spill] sm:$0xff] %v10159_v16 }
 0x6ec   : > { %12854 = vst [vmem:[#allocation81_spill] sm:$0xff] %v10135_v47  ;;  %4707 = vrot.lane.b32.xlu1 %v10138_v33, %s7174_s18  ;;  %v4286_v47 = vrot.slane %v3913_v58, 4  ;;  %v10154_v33 = vsel %vm4480_vm4, %v4470_v35, %v4343_v32  ;;  %v4145_v35 = vrot.slane %v3914_v50, 6  ;;  %v4409_v51 = vsel %vm4382_vm2, %v3990_v60, %v3914_v50 }
 0x6ed   : > { %4709 = vrot.lane.b32.xlu0 %v10143_v48, %s7174_s18  ;;  %12859 = vst [vmem:[#allocation86_spill] sm:$0xff] %v10154_v33  ;;  %v10169_v32 = vsel %vm4066_vm3, %v4142_v6, %v4143_v14 }
 0x6ee   : > { %v10149_v44 = vpop.permute.xlu1 %4595  ;;  %v4471_v8 = vsel %vm4066_vm3, %v4143_v14, %v4286_v47  ;;  %12863 = vst [vmem:[#allocation90_spill] sm:$0xff] %v10169_v32  ;;  %v4287_v47 = vrot.slane %v3915_v7, 4  ;;  %v10184_v6 = vsel %vm4066_vm3, %v4409_v51, %v4145_v35 }
 0x6ef   : > { %12857 = vst [vmem:[#allocation84_spill] sm:$0xff] %v10149_v44  ;;  %v10151_v12 = vpop.permute.xlu0 %4597  ;;  %v10174_v58 = vsel %vm4480_vm4, %v4471_v8, %v4344_v18  ;;  %12867 = vst [vmem:[#allocation94_spill] sm:$0xff] %v10184_v6 }
 0x6f0   : > { %12858 = vst [vmem:[#allocation85_spill] sm:$0xff] %v10151_v12  ;;  %4711 = vrot.lane.b32.xlu1 %v10154_v33, %s7174_s18  ;;  %v3916_v12 = vld [vmem:[#allocation2 + $0x1c0] sm:$0xff]  ;;  %12864 = vst [vmem:[#allocation91_spill] sm:$0xff] %v10174_v58 }
 0x6f1   : > { %4713 = vrot.lane.b32.xlu0 %v10159_v16, %s7174_s18  ;;  %v4146_v16 = vrot.slane %v3915_v7, 6  ;;  %v4148_v60 = vrot.slane %v3916_v12, 6 }
 0x6f2   : > { %v10164_v44 = vpop.permute.xlu1 %4599 }
 0x6f3   : > { %12861 = vst [vmem:[#allocation88_spill] sm:$0xff] %v10164_v44  ;;  %v10166_v48 = vpop.permute.xlu0 %4601  ;;  %v3991_v44 = vrot.slane %v3916_v12, 2  ;;  %v10189_v50 = vsel %vm4066_vm3, %v4145_v35, %v4146_v16  ;;  %v4472_v18 = vsel %vm4066_vm3, %v4146_v16, %v4287_v47 }
 0x6f4   : > { %12862 = vst [vmem:[#allocation89_spill] sm:$0xff] %v10166_v48  ;;  %4715 = vrot.lane.b32.xlu1 %v10169_v32, %s7174_s18  ;;  %v3917_v48 = vld [vmem:[#allocation2 + $0x1c8] sm:$0xff]  ;;  %v4345_v32 = vrot.slane %v3915_v7, 2  ;;  %12868 = vst [vmem:[#allocation95_spill] sm:$0xff] %v10189_v50 }
 0x6f5   : > { %4717 = vrot.lane.b32.xlu0 %v10174_v58, %s7174_s18  ;;  %v4410_v8 = vsel %vm4382_vm2, %v3991_v44, %v3916_v12  ;;  %v3918_v58 = vld [vmem:[#allocation2 + $0x1d0] sm:$0xff]  ;;  %v4346_v35 = vrot.slane %v3917_v48, 2  ;;  %v3919_v12 = vld [vmem:[#allocation2 + $0x1d8] sm:$0xff] }
 0x6f6   : > { %v10179_v33 = vpop.permute.xlu1 %4603  ;;  %v10205_v16 = vsel %vm4066_vm3, %v4410_v8, %v4148_v60  ;;  %v3992_v47 = vrot.slane %v3918_v58, 2 }
 0x6f7   : > { %12865 = vst [vmem:[#allocation92_spill] sm:$0xff] %v10179_v33  ;;  %v10181_v14 = vpop.permute.xlu0 %4605  ;;  %v4149_v33 = vrot.slane %v3917_v48, 6  ;;  %12872 = vst [vmem:[#allocation99_spill] sm:$0xff] %v10205_v16 }
 0x6f8   : > { %12866 = vst [vmem:[#allocation93_spill] sm:$0xff] %v10181_v14  ;;  %4719 = vrot.lane.b32.xlu1 %v10184_v6, %s7174_s18  ;;  %v4288_v14 = vrot.slane %v3917_v48, 4  ;;  %v10200_v6 = vsel %vm4480_vm4, %v4472_v18, %v4345_v32  ;;  %v4151_v18 = vrot.slane %v3918_v58, 6  ;;  %v4411_v8 = vsel %vm4382_vm2, %v3992_v47, %v3918_v58 }
 0x6f9   : > { %4721 = vrot.lane.b32.xlu0 %v10189_v50, %s7174_s18  ;;  %12871 = vst [vmem:[#allocation98_spill] sm:$0xff] %v10200_v6  ;;  %v10215_v32 = vsel %vm4066_vm3, %v4148_v60, %v4149_v33 }
 0x6fa   : > { %v10195_v51 = vpop.permute.xlu1 %4607  ;;  %v4473_v44 = vsel %vm4066_vm3, %v4149_v33, %v4288_v14  ;;  %12875 = vst [vmem:[#allocation102_spill] sm:$0xff] %v10215_v32  ;;  %v4289_v14 = vrot.slane %v3919_v12, 4  ;;  %v10230_v60 = vsel %vm4066_vm3, %v4411_v8, %v4151_v18 }
 0x6fb   : > { %12869 = vst [vmem:[#allocation96_spill] sm:$0xff] %v10195_v51  ;;  %v10197_v7 = vpop.permute.xlu0 %4609  ;;  %v10220_v48 = vsel %vm4480_vm4, %v4473_v44, %v4346_v35  ;;  %12879 = vst [vmem:[#allocation106_spill] sm:$0xff] %v10230_v60 }
 0x6fc   : > { %12870 = vst [vmem:[#allocation97_spill] sm:$0xff] %v10197_v7  ;;  %4723 = vrot.lane.b32.xlu1 %v10200_v6, %s7174_s18  ;;  %v3920_v7 = vld [vmem:[#allocation2 + $0x1e0] sm:$0xff]  ;;  %12876 = vst [vmem:[#allocation103_spill] sm:$0xff] %v10220_v48 }
 0x6fd   : > { %4725 = vrot.lane.b32.xlu0 %v10205_v16, %s7174_s18  ;;  %v4152_v16 = vrot.slane %v3919_v12, 6  ;;  %v4154_v47 = vrot.slane %v3920_v7, 6 }
 0x6fe   : > { %v10210_v51 = vpop.permute.xlu1 %4611 }
 0x6ff   : > { %12873 = vst [vmem:[#allocation100_spill] sm:$0xff] %v10210_v51  ;;  %v10212_v50 = vpop.permute.xlu0 %4613  ;;  %v3993_v51 = vrot.slane %v3920_v7, 2  ;;  %v10235_v58 = vsel %vm4066_vm3, %v4151_v18, %v4152_v16  ;;  %v4474_v35 = vsel %vm4066_vm3, %v4152_v16, %v4289_v14 }
 0x700   : > { %12874 = vst [vmem:[#allocation101_spill] sm:$0xff] %v10212_v50  ;;  %4727 = vrot.lane.b32.xlu1 %v10215_v32, %s7174_s18  ;;  %v3921_v50 = vld [vmem:[#allocation2 + $0x1e8] sm:$0xff]  ;;  %v4347_v32 = vrot.slane %v3919_v12, 2  ;;  %12880 = vst [vmem:[#allocation107_spill] sm:$0xff] %v10235_v58 }
 0x701   : > { %4729 = vrot.lane.b32.xlu0 %v10220_v48, %s7174_s18  ;;  %v4412_v44 = vsel %vm4382_vm2, %v3993_v51, %v3920_v7  ;;  %v3922_v48 = vld [vmem:[#allocation2 + $0x1f0] sm:$0xff]  ;;  %v4348_v18 = vrot.slane %v3921_v50, 2  ;;  %v3923_v7 = vld [vmem:[#allocation2 + $0x1f8] sm:$0xff] }
 0x702   : > { %v10225_v6 = vpop.permute.xlu1 %4615  ;;  %v10251_v16 = vsel %vm4066_vm3, %v4412_v44, %v4154_v47  ;;  %v3994_v14 = vrot.slane %v3922_v48, 2 }
 0x703   : > { %12877 = vst [vmem:[#allocation104_spill] sm:$0xff] %v10225_v6  ;;  %v10227_v33 = vpop.permute.xlu0 %4617  ;;  %v4155_v6 = vrot.slane %v3921_v50, 6  ;;  %12884 = vst [vmem:[#allocation111_spill] sm:$0xff] %v10251_v16 }
 0x704   : > { %12878 = vst [vmem:[#allocation105_spill] sm:$0xff] %v10227_v33  ;;  %4731 = vrot.lane.b32.xlu1 %v10230_v60, %s7174_s18  ;;  %v4290_v33 = vrot.slane %v3921_v50, 4  ;;  %v10246_v60 = vsel %vm4480_vm4, %v4474_v35, %v4347_v32  ;;  %v4157_v35 = vrot.slane %v3922_v48, 6  ;;  %v4413_v44 = vsel %vm4382_vm2, %v3994_v14, %v3922_v48 }
 0x705   : > { %4733 = vrot.lane.b32.xlu0 %v10235_v58, %s7174_s18  ;;  %12883 = vst [vmem:[#allocation110_spill] sm:$0xff] %v10246_v60  ;;  %v10261_v32 = vsel %vm4066_vm3, %v4154_v47, %v4155_v6 }
 0x706   : > { %v10241_v8 = vpop.permute.xlu1 %4619  ;;  %v4475_v51 = vsel %vm4066_vm3, %v4155_v6, %v4290_v33  ;;  %12887 = vst [vmem:[#allocation114_spill] sm:$0xff] %v10261_v32  ;;  %v4291_v33 = vrot.slane %v3923_v7, 4  ;;  %v10276_v47 = vsel %vm4066_vm3, %v4413_v44, %v4157_v35 }
 0x707   : > { %12881 = vst [vmem:[#allocation108_spill] sm:$0xff] %v10241_v8  ;;  %v10243_v12 = vpop.permute.xlu0 %4621  ;;  %v10266_v50 = vsel %vm4480_vm4, %v4475_v51, %v4348_v18  ;;  %12891 = vst [vmem:[#allocation118_spill] sm:$0xff] %v10276_v47 }
 0x708   : > { %12882 = vst [vmem:[#allocation109_spill] sm:$0xff] %v10243_v12  ;;  %4735 = vrot.lane.b32.xlu1 %v10246_v60, %s7174_s18  ;;  %v3924_v12 = vld [vmem:[#allocation2 + $0x200] sm:$0xff]  ;;  %12888 = vst [vmem:[#allocation115_spill] sm:$0xff] %v10266_v50 }
 0x709   : > { %4737 = vrot.lane.b32.xlu0 %v10251_v16, %s7174_s18  ;;  %v4158_v16 = vrot.slane %v3923_v7, 6  ;;  %v4160_v14 = vrot.slane %v3924_v12, 6 }
 0x70a   : > { %v10256_v8 = vpop.permute.xlu1 %4623 }
 0x70b   : > { %12885 = vst [vmem:[#allocation112_spill] sm:$0xff] %v10256_v8  ;;  %v10258_v58 = vpop.permute.xlu0 %4625  ;;  %v3995_v8 = vrot.slane %v3924_v12, 2  ;;  %v10281_v48 = vsel %vm4066_vm3, %v4157_v35, %v4158_v16  ;;  %v4476_v18 = vsel %vm4066_vm3, %v4158_v16, %v4291_v33 }
 0x70c   : > { %12886 = vst [vmem:[#allocation113_spill] sm:$0xff] %v10258_v58  ;;  %4739 = vrot.lane.b32.xlu1 %v10261_v32, %s7174_s18  ;;  %v3925_v58 = vld [vmem:[#allocation2 + $0x208] sm:$0xff]  ;;  %v4349_v32 = vrot.slane %v3923_v7, 2  ;;  %12892 = vst [vmem:[#allocation119_spill] sm:$0xff] %v10281_v48 }
 0x70d   : > { %4741 = vrot.lane.b32.xlu0 %v10266_v50, %s7174_s18  ;;  %v4414_v51 = vsel %vm4382_vm2, %v3995_v8, %v3924_v12  ;;  %v3926_v50 = vld [vmem:[#allocation2 + $0x210] sm:$0xff]  ;;  %v4350_v35 = vrot.slane %v3925_v58, 2  ;;  %v3927_v12 = vld [vmem:[#allocation2 + $0x218] sm:$0xff] }
 0x70e   : > { %v10271_v60 = vpop.permute.xlu1 %4627  ;;  %v10297_v16 = vsel %vm4066_vm3, %v4414_v51, %v4160_v14  ;;  %v3996_v33 = vrot.slane %v3926_v50, 2 }
 0x70f   : > { %12889 = vst [vmem:[#allocation116_spill] sm:$0xff] %v10271_v60  ;;  %v10273_v6 = vpop.permute.xlu0 %4629  ;;  %v4161_v60 = vrot.slane %v3925_v58, 6  ;;  %12896 = vst [vmem:[#allocation123_spill] sm:$0xff] %v10297_v16 }
 0x710   : > { %12890 = vst [vmem:[#allocation117_spill] sm:$0xff] %v10273_v6  ;;  %4743 = vrot.lane.b32.xlu1 %v10276_v47, %s7174_s18  ;;  %v4292_v6 = vrot.slane %v3925_v58, 4  ;;  %v10292_v47 = vsel %vm4480_vm4, %v4476_v18, %v4349_v32  ;;  %v4163_v18 = vrot.slane %v3926_v50, 6  ;;  %v4415_v51 = vsel %vm4382_vm2, %v3996_v33, %v3926_v50 }
 0x711   : > { %4745 = vrot.lane.b32.xlu0 %v10281_v48, %s7174_s18  ;;  %12895 = vst [vmem:[#allocation122_spill] sm:$0xff] %v10292_v47  ;;  %v10307_v32 = vsel %vm4066_vm3, %v4160_v14, %v4161_v60 }
 0x712   : > { %v10287_v44 = vpop.permute.xlu1 %4631  ;;  %v4477_v8 = vsel %vm4066_vm3, %v4161_v60, %v4292_v6  ;;  %12899 = vst [vmem:[#allocation126_spill] sm:$0xff] %v10307_v32  ;;  %v4293_v6 = vrot.slane %v3927_v12, 4  ;;  %v10322_v14 = vsel %vm4066_vm3, %v4415_v51, %v4163_v18 }
 0x713   : > { %12893 = vst [vmem:[#allocation120_spill] sm:$0xff] %v10287_v44  ;;  %v10289_v7 = vpop.permute.xlu0 %4633  ;;  %v10312_v58 = vsel %vm4480_vm4, %v4477_v8, %v4350_v35  ;;  %12903 = vst [vmem:[#allocation130_spill] sm:$0xff] %v10322_v14 }
 0x714   : > { %12894 = vst [vmem:[#allocation121_spill] sm:$0xff] %v10289_v7  ;;  %4747 = vrot.lane.b32.xlu1 %v10292_v47, %s7174_s18  ;;  %v3928_v7 = vld [vmem:[#allocation2 + $0x220] sm:$0xff]  ;;  %12900 = vst [vmem:[#allocation127_spill] sm:$0xff] %v10312_v58 }
 0x715   : > { %4749 = vrot.lane.b32.xlu0 %v10297_v16, %s7174_s18  ;;  %v4164_v16 = vrot.slane %v3927_v12, 6  ;;  %v4166_v33 = vrot.slane %v3928_v7, 6 }
 0x716   : > { %v10302_v44 = vpop.permute.xlu1 %4635 }
 0x717   : > { %12897 = vst [vmem:[#allocation124_spill] sm:$0xff] %v10302_v44  ;;  %v10304_v48 = vpop.permute.xlu0 %4637  ;;  %v3997_v44 = vrot.slane %v3928_v7, 2  ;;  %v10327_v50 = vsel %vm4066_vm3, %v4163_v18, %v4164_v16  ;;  %v4478_v35 = vsel %vm4066_vm3, %v4164_v16, %v4293_v6 }
 0x718   : > { %12898 = vst [vmem:[#allocation125_spill] sm:$0xff] %v10304_v48  ;;  %4751 = vrot.lane.b32.xlu1 %v10307_v32, %s7174_s18  ;;  %v3929_v48 = vld [vmem:[#allocation2 + $0x228] sm:$0xff]  ;;  %v4351_v32 = vrot.slane %v3927_v12, 2  ;;  %12904 = vst [vmem:[#allocation131_spill] sm:$0xff] %v10327_v50 }
 0x719   : > { %4753 = vrot.lane.b32.xlu0 %v10312_v58, %s7174_s18  ;;  %v4416_v8 = vsel %vm4382_vm2, %v3997_v44, %v3928_v7  ;;  %v4352_v18 = vrot.slane %v3929_v48, 2 }
 0x71a   : > { %v10317_v47 = vpop.permute.xlu1 %4639  ;;  %v10338_v12 = vsel %vm4480_vm4, %v4478_v35, %v4351_v32  ;;  %v10343_v16 = vsel %vm4066_vm3, %v4416_v8, %v4166_v33 }
 0x71b   : > { %12901 = vst [vmem:[#allocation128_spill] sm:$0xff] %v10317_v47  ;;  %v10319_v60 = vpop.permute.xlu0 %4641  ;;  %v4167_v47 = vrot.slane %v3929_v48, 6  ;;  %12907 = vst [vmem:[#allocation134_spill] sm:$0xff] %v10338_v12 }
 0x71c   : > { %12902 = vst [vmem:[#allocation129_spill] sm:$0xff] %v10319_v60  ;;  %4755 = vrot.lane.b32.xlu1 %v10322_v14, %s7174_s18  ;;  %v4294_v60 = vrot.slane %v3929_v48, 4  ;;  %12908 = vst [vmem:[#allocation135_spill] sm:$0xff] %v10343_v16 }
 0x71d   : > { %4757 = vrot.lane.b32.xlu0 %v10327_v50, %s7174_s18 }
 0x71e   : > { %v10333_v58 = vpop.permute.xlu1 %4643  ;;  %v4479_v44 = vsel %vm4066_vm3, %v4167_v47, %v4294_v60 }
 0x71f   : > { %12905 = vst [vmem:[#allocation132_spill] sm:$0xff] %v10333_v58  ;;  %v10335_v51 = vpop.permute.xlu0 %4645  ;;  %v10358_v32 = vsel %vm4480_vm4, %v4479_v44, %v4352_v18  ;;  %v12973_v58 = vld [vmem:[#allocation57_spill] sm:$0xff] }
 0x720   : > { %12906 = vst [vmem:[#allocation133_spill] sm:$0xff] %v10335_v51  ;;  %4759 = vrot.lane.b32.xlu1 %v10338_v12, %s7174_s18  ;;  %v10353_v51 = vsel %vm4066_vm3, %v4166_v33, %v4167_v47  ;;  %12912 = vst [vmem:[#allocation139_spill] sm:$0xff] %v10358_v32  ;;  %vm6753_vm3 = vcmask 916480  }
 0x721   : > { %4761 = vrot.lane.b32.xlu0 %v10343_v16, %s7174_s18  ;;  %12911 = vst [vmem:[#allocation138_spill] sm:$0xff] %v10353_v51 }
 0x722   : > { %v10348_v7 = vpop.permute.xlu1 %4647 }
 0x723   : > { %12909 = vst [vmem:[#allocation136_spill] sm:$0xff] %v10348_v7  ;;  %v10350_v6 = vpop.permute.xlu0 %4649 }
 0x724   : > { %12910 = vst [vmem:[#allocation137_spill] sm:$0xff] %v10350_v6  ;;  %4763 = vrot.lane.b32.xlu1 %v10353_v51, %s7174_s18 }
 0x725   : > { %4765 = vrot.lane.b32.xlu0 %v10358_v32, %s7174_s18 }
 0x726   : > { %v10362_v48 = vpop.permute.xlu1 %4651 }
 0x727   : > { %12913 = vst [vmem:[#allocation140_spill] sm:$0xff] %v10362_v48  ;;  %v10364_v35 = vpop.permute.xlu0 %4653 }
 0x728   : > { %12914 = vst [vmem:[#allocation141_spill] sm:$0xff] %v10364_v35  ;;  %4864 = vrot.lane.b32.xlu1 %v9692_v61, %s7175_s19 }
 0x729   : > { %4866 = vrot.lane.b32.xlu0 %v9714_v23, %s7175_s19 }
 0x72a   : > { %v10370_v47 = vpop.permute.xlu1 %4655 }
 0x72b   : > { %12915 = vst [vmem:[#allocation142_spill] sm:$0xff] %v10370_v47  ;;  %v10372_v60 = vpop.permute.xlu0 %4657  ;;  %v12969_v47 = vld [vmem:[#allocation55_spill] sm:$0xff] }
 0x72c   : > { %12916 = vst [vmem:[#allocation143_spill] sm:$0xff] %v10372_v60  ;;  %4868 = vrot.lane.b32.xlu1 %v9721_v45, %s7175_s19 }
 0x72d   : > { %4870 = vrot.lane.b32.xlu0 %v9728_v36, %s7175_s19 }
 0x72e   : > { %v10378_v33 = vpop.permute.xlu1 %4659 }
 0x72f   : > { %12917 = vst [vmem:[#allocation144_spill] sm:$0xff] %v10378_v33  ;;  %v10380_v8 = vpop.permute.xlu0 %4661  ;;  %v12965_v33 = vld [vmem:[#allocation53_spill] sm:$0xff] }
 0x730   : > { %12918 = vst [vmem:[#allocation145_spill] sm:$0xff] %v10380_v8  ;;  %4872 = vrot.lane.b32.xlu1 %v9734_v13, %s7175_s19 }
 0x731   : > { %4874 = vrot.lane.b32.xlu0 %v9742_v41, %s7175_s19 }
 0x732   : > { %v10386_v18 = vpop.permute.xlu1 %4663 }
 0x733   : > { %12919 = vst [vmem:[#allocation146_spill] sm:$0xff] %v10386_v18  ;;  %v10388_v44 = vpop.permute.xlu0 %4665 }
 0x734   : > { %12920 = vst [vmem:[#allocation147_spill] sm:$0xff] %v10388_v44  ;;  %4876 = vrot.lane.b32.xlu1 %v9748_v27, %s7175_s19 }
 0x735   : > { %4878 = vrot.lane.b32.xlu0 %v9755_v37, %s7175_s19 }
 0x736   : > { %v10394_v48 = vpop.permute.xlu1 %4667 }
 0x737   : > { %12921 = vst [vmem:[#allocation148_spill] sm:$0xff] %v10394_v48  ;;  %v10396_v6 = vpop.permute.xlu0 %4669 }
 0x738   : > { %12922 = vst [vmem:[#allocation149_spill] sm:$0xff] %v10396_v6  ;;  %4880 = vrot.lane.b32.xlu1 %v9761_v49, %s7175_s19 }
 0x739   : > { %4882 = vrot.lane.b32.xlu0 %v9768_v63, %s7175_s19 }
 0x73a   : > { %v10402_v7 = vpop.permute.xlu1 %4671 }
 0x73b   : > { %12923 = vst [vmem:[#allocation150_spill] sm:$0xff] %v10402_v7  ;;  %v10404_v18 = vpop.permute.xlu0 %4673 }
 0x73c   : > { %12924 = vst [vmem:[#allocation151_spill] sm:$0xff] %v10404_v18  ;;  %4884 = vrot.lane.b32.xlu1 %v9774_v19, %s7175_s19 }
 0x73d   : > { %4886 = vrot.lane.b32.xlu0 %v9782_v11, %s7175_s19 }
 0x73e   : > { %v10410_v44 = vpop.permute.xlu1 %4675 }
 0x73f   : > { %12925 = vst [vmem:[#allocation152_spill] sm:$0xff] %v10410_v44  ;;  %v10412_v48 = vpop.permute.xlu0 %4677 }
 0x740   : > { %12926 = vst [vmem:[#allocation153_spill] sm:$0xff] %v10412_v48  ;;  %4888 = vrot.lane.b32.xlu1 %v9788_v30, %s7175_s19 }
 0x741   : > { %4890 = vrot.lane.b32.xlu0 %v9795_v10, %s7175_s19 }
 0x742   : > { %v10418_v6 = vpop.permute.xlu1 %4679 }
 0x743   : > { %12927 = vst [vmem:[#allocation154_spill] sm:$0xff] %v10418_v6  ;;  %v10420_v7 = vpop.permute.xlu0 %4681 }
 0x744   : > { %12928 = vst [vmem:[#allocation155_spill] sm:$0xff] %v10420_v7  ;;  %4892 = vrot.lane.b32.xlu1 %v9801_v42, %s7175_s19 }
 0x745   : > { %4894 = vrot.lane.b32.xlu0 %v9808_v4, %s7175_s19 }
 0x746   : > { %v10426_v18 = vpop.permute.xlu1 %4683 }
 0x747   : > { %12929 = vst [vmem:[#allocation156_spill] sm:$0xff] %v10426_v18  ;;  %v10428_v44 = vpop.permute.xlu0 %4685 }
 0x748   : > { %12930 = vst [vmem:[#allocation157_spill] sm:$0xff] %v10428_v44  ;;  %4896 = vrot.lane.b32.xlu1 %v9814_v20, %s7175_s19 }
 0x749   : > { %4898 = vrot.lane.b32.xlu0 %v9822_v55, %s7175_s19 }
 0x74a   : > { %v10434_v48 = vpop.permute.xlu1 %4687 }
 0x74b   : > { %12931 = vst [vmem:[#allocation158_spill] sm:$0xff] %v10434_v48  ;;  %v10436_v6 = vpop.permute.xlu0 %4689 }
 0x74c   : > { %12932 = vst [vmem:[#allocation159_spill] sm:$0xff] %v10436_v6  ;;  %4900 = vrot.lane.b32.xlu1 %v9828_v56, %s7175_s19 }
 0x74d   : > { %4902 = vrot.lane.b32.xlu0 %v9835_v57, %s7175_s19 }
 0x74e   : > { %v10442_v7 = vpop.permute.xlu1 %4691 }
 0x74f   : > { %12933 = vst [vmem:[#allocation160_spill] sm:$0xff] %v10442_v7  ;;  %v10444_v18 = vpop.permute.xlu0 %4693 }
 0x750   : > { %12934 = vst [vmem:[#allocation161_spill] sm:$0xff] %v10444_v18  ;;  %4904 = vrot.lane.b32.xlu1 %v9841_v1, %s7175_s19 }
 0x751   : > { %4906 = vrot.lane.b32.xlu0 %v9848_v21, %s7175_s19 }
 0x752   : > { %v10450_v44 = vpop.permute.xlu1 %4695 }
 0x753   : > { %12935 = vst [vmem:[#allocation162_spill] sm:$0xff] %v10450_v44  ;;  %v10452_v48 = vpop.permute.xlu0 %4697 }
 0x754   : > { %12936 = vst [vmem:[#allocation163_spill] sm:$0xff] %v10452_v48  ;;  %4908 = vrot.lane.b32.xlu1 %v9854_v34, %s7175_s19 }
 0x755   : > { %4910 = vrot.lane.b32.xlu0 %v9862_v40, %s7175_s19 }
 0x756   : > { %v10458_v6 = vpop.permute.xlu1 %4699 }
 0x757   : > { %12937 = vst [vmem:[#allocation164_spill] sm:$0xff] %v10458_v6  ;;  %v10460_v7 = vpop.permute.xlu0 %4701 }
 0x758   : > { %12938 = vst [vmem:[#allocation165_spill] sm:$0xff] %v10460_v7  ;;  %4912 = vrot.lane.b32.xlu1 %v9868_v54, %s7175_s19 }
 0x759   : > { %4914 = vrot.lane.b32.xlu0 %v9875_v31, %s7175_s19 }
 0x75a   : > { %v10466_v18 = vpop.permute.xlu1 %4703 }
 0x75b   : > { %12939 = vst [vmem:[#allocation166_spill] sm:$0xff] %v10466_v18  ;;  %v10468_v44 = vpop.permute.xlu0 %4705 }
 0x75c   : > { %12940 = vst [vmem:[#allocation167_spill] sm:$0xff] %v10468_v44  ;;  %4916 = vrot.lane.b32.xlu1 %v9881_v3, %s7175_s19 }
 0x75d   : > { %4918 = vrot.lane.b32.xlu0 %v9888_v62, %s7175_s19 }
 0x75e   : > { %v10474_v48 = vpop.permute.xlu1 %4707 }
 0x75f   : > { %12941 = vst [vmem:[#allocation168_spill] sm:$0xff] %v10474_v48  ;;  %v10476_v6 = vpop.permute.xlu0 %4709 }
 0x760   : > { %12942 = vst [vmem:[#allocation169_spill] sm:$0xff] %v10476_v6  ;;  %4920 = vrot.lane.b32.xlu1 %v9894_v39, %s7175_s19 }
 0x761   : > { %4922 = vrot.lane.b32.xlu0 %v9901_v2, %s7175_s19 }
 0x762   : > { %v10482_v7 = vpop.permute.xlu1 %4711 }
 0x763   : > { %12943 = vst [vmem:[#allocation170_spill] sm:$0xff] %v10482_v7  ;;  %v10484_v18 = vpop.permute.xlu0 %4713 }
 0x764   : > { %12944 = vst [vmem:[#allocation171_spill] sm:$0xff] %v10484_v18  ;;  %4924 = vrot.lane.b32.xlu1 %v9907_v28, %s7175_s19 }
 0x765   : > { %4926 = vrot.lane.b32.xlu0 %v9913_v38, %s7175_s19 }
 0x766   : > { %v10490_v44 = vpop.permute.xlu1 %4715 }
 0x767   : > { %12945 = vst [vmem:[#allocation172_spill] sm:$0xff] %v10490_v44  ;;  %v10492_v48 = vpop.permute.xlu0 %4717 }
 0x768   : > { %12946 = vst [vmem:[#allocation173_spill] sm:$0xff] %v10492_v48  ;;  %4928 = vrot.lane.b32.xlu1 %v9918_v29, %s7175_s19 }
 0x769   : > { %4930 = vrot.lane.b32.xlu0 %v9924_v53, %s7175_s19 }
 0x76a   : > { %v10498_v6 = vpop.permute.xlu1 %4719 }
 0x76b   : > { %12947 = vst [vmem:[#allocation174_spill] sm:$0xff] %v10498_v6  ;;  %v10500_v7 = vpop.permute.xlu0 %4721 }
 0x76c   : > { %12948 = vst [vmem:[#allocation175_spill] sm:$0xff] %v10500_v7  ;;  %4932 = vrot.lane.b32.xlu1 %v9929_v43, %s7175_s19 }
 0x76d   : > { %4934 = vrot.lane.b32.xlu0 %v9935_v26, %s7175_s19 }
 0x76e   : > { %v10506_v18 = vpop.permute.xlu1 %4723 }
 0x76f   : > { %12949 = vst [vmem:[#allocation176_spill] sm:$0xff] %v10506_v18  ;;  %v10508_v44 = vpop.permute.xlu0 %4725 }
 0x770   : > { %12950 = vst [vmem:[#allocation177_spill] sm:$0xff] %v10508_v44  ;;  %4936 = vrot.lane.b32.xlu1 %v9940_v25, %s7175_s19 }
 0x771   : > { %4938 = vrot.lane.b32.xlu0 %v9946_v15, %s7175_s19 }
 0x772   : > { %v10514_v48 = vpop.permute.xlu1 %4727 }
 0x773   : > { %12951 = vst [vmem:[#allocation178_spill] sm:$0xff] %v10514_v48  ;;  %v10516_v6 = vpop.permute.xlu0 %4729 }
 0x774   : > { %12952 = vst [vmem:[#allocation179_spill] sm:$0xff] %v10516_v6  ;;  %4940 = vrot.lane.b32.xlu1 %v9951_v9, %s7175_s19 }
 0x775   : > { %4942 = vrot.lane.b32.xlu0 %v9958_v24, %s7175_s19 }
 0x776   : > { %v10522_v7 = vpop.permute.xlu1 %4731 }
 0x777   : > { %12953 = vst [vmem:[#allocation180_spill] sm:$0xff] %v10522_v7  ;;  %v10524_v18 = vpop.permute.xlu0 %4733 }
 0x778   : > { %12954 = vst [vmem:[#allocation181_spill] sm:$0xff] %v10524_v18  ;;  %4944 = vrot.lane.b32.xlu1 %v9963_v22, %s7175_s19 }
 0x779   : > { %4946 = vrot.lane.b32.xlu0 %v9969_v5, %s7175_s19 }
 0x77a   : > { %v10530_v44 = vpop.permute.xlu1 %4735 }
 0x77b   : > { %12955 = vst [vmem:[#allocation182_spill] sm:$0xff] %v10530_v44  ;;  %v10532_v48 = vpop.permute.xlu0 %4737 }
 0x77c   : > { %12956 = vst [vmem:[#allocation183_spill] sm:$0xff] %v10532_v48  ;;  %4948 = vrot.lane.b32.xlu1 %v9974_v52, %s7175_s19  ;;  %v12961_v48 = vld [vmem:[#allocation51_spill] sm:$0xff] }
 0x77d   : > { %4950 = vrot.lane.b32.xlu0 %v9980_v59, %s7175_s19 }
 0x77e   : > { %v10538_v6 = vpop.permute.xlu1 %4739 }
 0x77f   : > { %12957 = vst [vmem:[#allocation184_spill] sm:$0xff] %v10538_v6  ;;  %v10540_v7 = vpop.permute.xlu0 %4741 }
 0x780   : > { %12958 = vst [vmem:[#allocation185_spill] sm:$0xff] %v10540_v7  ;;  %4952 = vrot.lane.b32.xlu1 %v9985_v17, %s7175_s19  ;;  %v12964_v7 = vld [vmem:[#allocation52_spill] sm:$0xff] }
 0x781   : > { %4954 = vrot.lane.b32.xlu0 %v9992_v46, %s7175_s19 }
 0x782   : > { %v10546_v18 = vpop.permute.xlu1 %4743 }
 0x783   : > { %12959 = vst [vmem:[#allocation186_spill] sm:$0xff] %v10546_v18  ;;  %v10548_v44 = vpop.permute.xlu0 %4745 }
 0x784   : > { %12960 = vst [vmem:[#allocation187_spill] sm:$0xff] %v10548_v44  ;;  %4956 = vrot.lane.b32.xlu1 %v9997_v0, %s7175_s19  ;;  %v12968_v44 = vld [vmem:[#allocation54_spill] sm:$0xff] }
 0x785   : > { %4958 = vrot.lane.b32.xlu0 %v12961_v48, %s7175_s19 }
 0x786   : > { %v10554_v8 = vpop.permute.xlu1 %4747 }
 0x787   : > { %12962 = vst [vmem:[#allocation51_spill] sm:$0xff] %v10554_v8  ;;  %v10556_v6 = vpop.permute.xlu0 %4749 }
 0x788   : > { %12963 = vst [vmem:[#allocation188_spill] sm:$0xff] %v10556_v6  ;;  %4960 = vrot.lane.b32.xlu1 %v12964_v7, %s7175_s19  ;;  %v12972_v6 = vld [vmem:[#allocation56_spill] sm:$0xff] }
 0x789   : > { %4962 = vrot.lane.b32.xlu0 %v12965_v33, %s7175_s19 }
 0x78a   : > { %v10562_v60 = vpop.permute.xlu1 %4751 }
 0x78b   : > { %12966 = vst [vmem:[#allocation52_spill] sm:$0xff] %v10562_v60  ;;  %v10564_v18 = vpop.permute.xlu0 %4753 }
 0x78c   : > { %12967 = vst [vmem:[#allocation189_spill] sm:$0xff] %v10564_v18  ;;  %4964 = vrot.lane.b32.xlu1 %v12968_v44, %s7175_s19  ;;  %v12976_v18 = vld [vmem:[#allocation58_spill] sm:$0xff]  ;;  %v12977_v44 = vld [vmem:[#allocation59_spill] sm:$0xff] }
 0x78d   : > { %4966 = vrot.lane.b32.xlu0 %v12969_v47, %s7175_s19 }
 0x78e   : > { %v10570_v35 = vpop.permute.xlu1 %4755 }
 0x78f   : > { %12970 = vst [vmem:[#allocation190_spill] sm:$0xff] %v10570_v35  ;;  %v10572_v8 = vpop.permute.xlu0 %4757 }
 0x790   : > { %12971 = vst [vmem:[#allocation191_spill] sm:$0xff] %v10572_v8  ;;  %4968 = vrot.lane.b32.xlu1 %v12972_v6, %s7175_s19  ;;  %v12980_v8 = vld [vmem:[#allocation60_spill] sm:$0xff]  ;;  %v12981_v6 = vld [vmem:[#allocation62_spill] sm:$0xff] }
 0x791   : > { %4970 = vrot.lane.b32.xlu0 %v12973_v58, %s7175_s19 }
 0x792   : > { %v10578_v33 = vpop.permute.xlu1 %4759 }
 0x793   : > { %12974 = vst [vmem:[#allocation192_spill] sm:$0xff] %v10578_v33  ;;  %v10580_v60 = vpop.permute.xlu0 %4761 }
 0x794   : > { %12975 = vst [vmem:[#allocation193_spill] sm:$0xff] %v10580_v60  ;;  %4972 = vrot.lane.b32.xlu1 %v12976_v18, %s7175_s19  ;;  %v12984_v60 = vld [vmem:[#allocation63_spill] sm:$0xff]  ;;  %v12985_v18 = vld [vmem:[#allocation66_spill] sm:$0xff] }
 0x795   : > { %4974 = vrot.lane.b32.xlu0 %v12977_v44, %s7175_s19 }
 0x796   : > { %v10586_v47 = vpop.permute.xlu1 %4763 }
 0x797   : > { %12978 = vst [vmem:[#allocation194_spill] sm:$0xff] %v10586_v47  ;;  %v10588_v35 = vpop.permute.xlu0 %4765 }
 0x798   : > { %12979 = vst [vmem:[#allocation195_spill] sm:$0xff] %v10588_v35  ;;  %4976 = vrot.lane.b32.xlu1 %v12980_v8, %s7175_s19  ;;  %v12988_v35 = vld [vmem:[#allocation67_spill] sm:$0xff]  ;;  %v12989_v8 = vld [vmem:[#allocation70_spill] sm:$0xff] }
 0x799   : > { %4978 = vrot.lane.b32.xlu0 %v12981_v6, %s7175_s19 }
 0x79a   : > { %v10594_v58 = vpop.permute.xlu1 %4864 }
 0x79b   : > { %12982 = vst [vmem:[#allocation196_spill] sm:$0xff] %v10594_v58  ;;  %v10596_v33 = vpop.permute.xlu0 %4866 }
 0x79c   : > { %12983 = vst [vmem:[#allocation197_spill] sm:$0xff] %v10596_v33  ;;  %4980 = vrot.lane.b32.xlu1 %v12984_v60, %s7175_s19  ;;  %v12992_v33 = vld [vmem:[#allocation71_spill] sm:$0xff]  ;;  %v12993_v60 = vld [vmem:[#allocation74_spill] sm:$0xff] }
 0x79d   : > { %4982 = vrot.lane.b32.xlu0 %v12985_v18, %s7175_s19 }
 0x79e   : > { %v10602_v44 = vpop.permute.xlu1 %4868 }
 0x79f   : > { %12986 = vst [vmem:[#allocation198_spill] sm:$0xff] %v10602_v44  ;;  %v10604_v47 = vpop.permute.xlu0 %4870 }
 0x7a0   : > { %12987 = vst [vmem:[#allocation199_spill] sm:$0xff] %v10604_v47  ;;  %4984 = vrot.lane.b32.xlu1 %v12988_v35, %s7175_s19  ;;  %v12996_v47 = vld [vmem:[#allocation75_spill] sm:$0xff]  ;;  %v12997_v35 = vld [vmem:[#allocation78_spill] sm:$0xff] }
 0x7a1   : > { %4986 = vrot.lane.b32.xlu0 %v12989_v8, %s7175_s19 }
 0x7a2   : > { %v10610_v6 = vpop.permute.xlu1 %4872 }
 0x7a3   : > { %12990 = vst [vmem:[#allocation200_spill] sm:$0xff] %v10610_v6  ;;  %v10612_v58 = vpop.permute.xlu0 %4874 }
 0x7a4   : > { %12991 = vst [vmem:[#allocation201_spill] sm:$0xff] %v10612_v58  ;;  %4988 = vrot.lane.b32.xlu1 %v12992_v33, %s7175_s19  ;;  %v13000_v58 = vld [vmem:[#allocation79_spill] sm:$0xff]  ;;  %v13001_v33 = vld [vmem:[#allocation82_spill] sm:$0xff] }
 0x7a5   : > { %4990 = vrot.lane.b32.xlu0 %v12993_v60, %s7175_s19 }
 0x7a6   : > { %v10618_v18 = vpop.permute.xlu1 %4876 }
 0x7a7   : > { %12994 = vst [vmem:[#allocation202_spill] sm:$0xff] %v10618_v18  ;;  %v10620_v44 = vpop.permute.xlu0 %4878 }
 0x7a8   : > { %12995 = vst [vmem:[#allocation203_spill] sm:$0xff] %v10620_v44  ;;  %4992 = vrot.lane.b32.xlu1 %v12996_v47, %s7175_s19  ;;  %v13004_v44 = vld [vmem:[#allocation83_spill] sm:$0xff]  ;;  %v13005_v47 = vld [vmem:[#allocation86_spill] sm:$0xff] }
 0x7a9   : > { %4994 = vrot.lane.b32.xlu0 %v12997_v35, %s7175_s19 }
 0x7aa   : > { %v10626_v8 = vpop.permute.xlu1 %4880 }
 0x7ab   : > { %12998 = vst [vmem:[#allocation204_spill] sm:$0xff] %v10626_v8  ;;  %v10628_v6 = vpop.permute.xlu0 %4882 }
 0x7ac   : > { %12999 = vst [vmem:[#allocation205_spill] sm:$0xff] %v10628_v6  ;;  %4996 = vrot.lane.b32.xlu1 %v13000_v58, %s7175_s19  ;;  %v13008_v6 = vld [vmem:[#allocation87_spill] sm:$0xff]  ;;  %v13009_v58 = vld [vmem:[#allocation90_spill] sm:$0xff] }
 0x7ad   : > { %4998 = vrot.lane.b32.xlu0 %v13001_v33, %s7175_s19 }
 0x7ae   : > { %v10634_v60 = vpop.permute.xlu1 %4884 }
 0x7af   : > { %13002 = vst [vmem:[#allocation206_spill] sm:$0xff] %v10634_v60  ;;  %v10636_v18 = vpop.permute.xlu0 %4886 }
 0x7b0   : > { %13003 = vst [vmem:[#allocation207_spill] sm:$0xff] %v10636_v18  ;;  %5000 = vrot.lane.b32.xlu1 %v13004_v44, %s7175_s19  ;;  %v13012_v18 = vld [vmem:[#allocation91_spill] sm:$0xff]  ;;  %v13013_v44 = vld [vmem:[#allocation94_spill] sm:$0xff] }
 0x7b1   : > { %5002 = vrot.lane.b32.xlu0 %v13005_v47, %s7175_s19 }
 0x7b2   : > { %v10642_v35 = vpop.permute.xlu1 %4888 }
 0x7b3   : > { %13006 = vst [vmem:[#allocation208_spill] sm:$0xff] %v10642_v35  ;;  %v10644_v8 = vpop.permute.xlu0 %4890 }
 0x7b4   : > { %13007 = vst [vmem:[#allocation209_spill] sm:$0xff] %v10644_v8  ;;  %5004 = vrot.lane.b32.xlu1 %v13008_v6, %s7175_s19  ;;  %v13016_v8 = vld [vmem:[#allocation95_spill] sm:$0xff]  ;;  %v13017_v6 = vld [vmem:[#allocation98_spill] sm:$0xff] }
 0x7b5   : > { %5006 = vrot.lane.b32.xlu0 %v13009_v58, %s7175_s19 }
 0x7b6   : > { %v10650_v33 = vpop.permute.xlu1 %4892 }
 0x7b7   : > { %13010 = vst [vmem:[#allocation210_spill] sm:$0xff] %v10650_v33  ;;  %v10652_v60 = vpop.permute.xlu0 %4894 }
 0x7b8   : > { %13011 = vst [vmem:[#allocation211_spill] sm:$0xff] %v10652_v60  ;;  %5008 = vrot.lane.b32.xlu1 %v13012_v18, %s7175_s19  ;;  %v13020_v60 = vld [vmem:[#allocation99_spill] sm:$0xff]  ;;  %v13021_v18 = vld [vmem:[#allocation102_spill] sm:$0xff] }
 0x7b9   : > { %5010 = vrot.lane.b32.xlu0 %v13013_v44, %s7175_s19 }
 0x7ba   : > { %v10658_v47 = vpop.permute.xlu1 %4896 }
 0x7bb   : > { %13014 = vst [vmem:[#allocation212_spill] sm:$0xff] %v10658_v47  ;;  %v10660_v35 = vpop.permute.xlu0 %4898 }
 0x7bc   : > { %13015 = vst [vmem:[#allocation213_spill] sm:$0xff] %v10660_v35  ;;  %5012 = vrot.lane.b32.xlu1 %v13016_v8, %s7175_s19  ;;  %v13024_v35 = vld [vmem:[#allocation103_spill] sm:$0xff]  ;;  %v13025_v8 = vld [vmem:[#allocation106_spill] sm:$0xff] }
 0x7bd   : > { %5014 = vrot.lane.b32.xlu0 %v13017_v6, %s7175_s19 }
 0x7be   : > { %v10666_v58 = vpop.permute.xlu1 %4900 }
 0x7bf   : > { %13018 = vst [vmem:[#allocation214_spill] sm:$0xff] %v10666_v58  ;;  %v10668_v33 = vpop.permute.xlu0 %4902 }
 0x7c0   : > { %13019 = vst [vmem:[#allocation215_spill] sm:$0xff] %v10668_v33  ;;  %5016 = vrot.lane.b32.xlu1 %v13020_v60, %s7175_s19  ;;  %v13028_v33 = vld [vmem:[#allocation107_spill] sm:$0xff]  ;;  %v13029_v60 = vld [vmem:[#allocation110_spill] sm:$0xff] }
 0x7c1   : > { %5018 = vrot.lane.b32.xlu0 %v13021_v18, %s7175_s19 }
 0x7c2   : > { %v10674_v44 = vpop.permute.xlu1 %4904 }
 0x7c3   : > { %13022 = vst [vmem:[#allocation216_spill] sm:$0xff] %v10674_v44  ;;  %v10676_v47 = vpop.permute.xlu0 %4906 }
 0x7c4   : > { %13023 = vst [vmem:[#allocation217_spill] sm:$0xff] %v10676_v47  ;;  %5020 = vrot.lane.b32.xlu1 %v13024_v35, %s7175_s19  ;;  %v13032_v47 = vld [vmem:[#allocation111_spill] sm:$0xff]  ;;  %v13033_v35 = vld [vmem:[#allocation114_spill] sm:$0xff] }
 0x7c5   : > { %5022 = vrot.lane.b32.xlu0 %v13025_v8, %s7175_s19 }
 0x7c6   : > { %v10682_v6 = vpop.permute.xlu1 %4908 }
 0x7c7   : > { %13026 = vst [vmem:[#allocation218_spill] sm:$0xff] %v10682_v6  ;;  %v10684_v58 = vpop.permute.xlu0 %4910 }
 0x7c8   : > { %13027 = vst [vmem:[#allocation219_spill] sm:$0xff] %v10684_v58  ;;  %5024 = vrot.lane.b32.xlu1 %v13028_v33, %s7175_s19  ;;  %v13036_v58 = vld [vmem:[#allocation115_spill] sm:$0xff]  ;;  %v13037_v33 = vld [vmem:[#allocation118_spill] sm:$0xff] }
 0x7c9   : > { %5026 = vrot.lane.b32.xlu0 %v13029_v60, %s7175_s19 }
 0x7ca   : > { %v10690_v18 = vpop.permute.xlu1 %4912 }
 0x7cb   : > { %13030 = vst [vmem:[#allocation220_spill] sm:$0xff] %v10690_v18  ;;  %v10692_v44 = vpop.permute.xlu0 %4914 }
 0x7cc   : > { %13031 = vst [vmem:[#allocation221_spill] sm:$0xff] %v10692_v44  ;;  %5028 = vrot.lane.b32.xlu1 %v13032_v47, %s7175_s19  ;;  %v13040_v44 = vld [vmem:[#allocation119_spill] sm:$0xff]  ;;  %v13041_v47 = vld [vmem:[#allocation122_spill] sm:$0xff] }
 0x7cd   : > { %5030 = vrot.lane.b32.xlu0 %v13033_v35, %s7175_s19 }
 0x7ce   : > { %v10698_v8 = vpop.permute.xlu1 %4916 }
 0x7cf   : > { %13034 = vst [vmem:[#allocation222_spill] sm:$0xff] %v10698_v8  ;;  %v10700_v6 = vpop.permute.xlu0 %4918 }
 0x7d0   : > { %13035 = vst [vmem:[#allocation223_spill] sm:$0xff] %v10700_v6  ;;  %5032 = vrot.lane.b32.xlu1 %v13036_v58, %s7175_s19  ;;  %v13044_v6 = vld [vmem:[#allocation123_spill] sm:$0xff]  ;;  %v13045_v58 = vld [vmem:[#allocation126_spill] sm:$0xff] }
 0x7d1   : > { %5034 = vrot.lane.b32.xlu0 %v13037_v33, %s7175_s19 }
 0x7d2   : > { %v10706_v60 = vpop.permute.xlu1 %4920 }
 0x7d3   : > { %13038 = vst [vmem:[#allocation224_spill] sm:$0xff] %v10706_v60  ;;  %v10708_v18 = vpop.permute.xlu0 %4922 }
 0x7d4   : > { %13039 = vst [vmem:[#allocation225_spill] sm:$0xff] %v10708_v18  ;;  %5036 = vrot.lane.b32.xlu1 %v13040_v44, %s7175_s19  ;;  %v13048_v18 = vld [vmem:[#allocation127_spill] sm:$0xff] }
 0x7d5   : > { %5038 = vrot.lane.b32.xlu0 %v13041_v47, %s7175_s19 }
 0x7d6   : > { %v10714_v35 = vpop.permute.xlu1 %4924 }
 0x7d7   : > { %13042 = vst [vmem:[#allocation119_spill] sm:$0xff] %v10714_v35  ;;  %v10716_v8 = vpop.permute.xlu0 %4926 }
 0x7d8   : > { %13043 = vst [vmem:[#allocation226_spill] sm:$0xff] %v10716_v8  ;;  %5040 = vrot.lane.b32.xlu1 %v13044_v6, %s7175_s19 }
 0x7d9   : > { %5042 = vrot.lane.b32.xlu0 %v13045_v58, %s7175_s19 }
 0x7da   : > { %v10722_v33 = vpop.permute.xlu1 %4928 }
 0x7db   : > { %13046 = vst [vmem:[#allocation126_spill] sm:$0xff] %v10722_v33  ;;  %v10724_v60 = vpop.permute.xlu0 %4930 }
 0x7dc   : > { %13047 = vst [vmem:[#allocation227_spill] sm:$0xff] %v10724_v60  ;;  %5044 = vrot.lane.b32.xlu1 %v13048_v18, %s7175_s19 }
 0x7dd   : > { %5046 = vrot.lane.b32.xlu0 %v10322_v14, %s7175_s19 }
 0x7de   : > { %v10730_v47 = vpop.permute.xlu1 %4932 }
 0x7df   : > { %13049 = vst [vmem:[#allocation228_spill] sm:$0xff] %v10730_v47  ;;  %v10732_v35 = vpop.permute.xlu0 %4934 }
 0x7e0   : > { %13050 = vst [vmem:[#allocation229_spill] sm:$0xff] %v10732_v35  ;;  %5048 = vrot.lane.b32.xlu1 %v10327_v50, %s7175_s19 }
 0x7e1   : > { %5050 = vrot.lane.b32.xlu0 %v10338_v12, %s7175_s19 }
 0x7e2   : > { %v10738_v8 = vpop.permute.xlu1 %4936 }
 0x7e3   : > { %13051 = vst [vmem:[#allocation230_spill] sm:$0xff] %v10738_v8  ;;  %v10740_v33 = vpop.permute.xlu0 %4938 }
 0x7e4   : > { %13052 = vst [vmem:[#allocation231_spill] sm:$0xff] %v10740_v33  ;;  %5052 = vrot.lane.b32.xlu1 %v10343_v16, %s7175_s19 }
 0x7e5   : > { %5054 = vrot.lane.b32.xlu0 %v10353_v51, %s7175_s19 }
 0x7e6   : > { %v10746_v60 = vpop.permute.xlu1 %4940 }
 0x7e7   : > { %13053 = vst [vmem:[#allocation232_spill] sm:$0xff] %v10746_v60  ;;  %v10748_v47 = vpop.permute.xlu0 %4942 }
 0x7e8   : > { %13054 = vst [vmem:[#allocation233_spill] sm:$0xff] %v10748_v47  ;;  %5056 = vrot.lane.b32.xlu1 %v10358_v32, %s7175_s19  ;;  %s7186_s19 = smov 79  }
 0x7e9   : > { %5155 = vrot.lane.b32.xlu0 %v9692_v61, %s7176_s21 }
 0x7ea   : > { %v10754_v8 = vpop.permute.xlu1 %4944 }
 0x7eb   : > { %13055 = vst [vmem:[#allocation234_spill] sm:$0xff] %v10754_v8  ;;  %v10756_v33 = vpop.permute.xlu0 %4946  ;;  %v13170_v8 = vld [vmem:[#allocation111_spill] sm:$0xff] }
 0x7ec   : > { %13056 = vst [vmem:[#allocation235_spill] sm:$0xff] %v10756_v33  ;;  %5157 = vrot.lane.b32.xlu1 %v9714_v23, %s7176_s21 }
 0x7ed   : > { %5159 = vrot.lane.b32.xlu0 %v9721_v45, %s7176_s21 }
 0x7ee   : > { %v10762_v60 = vpop.permute.xlu1 %4948 }
 0x7ef   : > { %13057 = vst [vmem:[#allocation236_spill] sm:$0xff] %v10762_v60  ;;  %v10764_v47 = vpop.permute.xlu0 %4950  ;;  %v13166_v60 = vld [vmem:[#allocation107_spill] sm:$0xff] }
 0x7f0   : > { %13058 = vst [vmem:[#allocation237_spill] sm:$0xff] %v10764_v47  ;;  %5161 = vrot.lane.b32.xlu1 %v9728_v36, %s7176_s21 }
 0x7f1   : > { %5163 = vrot.lane.b32.xlu0 %v9734_v13, %s7176_s21 }
 0x7f2   : > { %v10770_v61 = vpop.permute.xlu1 %4952 }
 0x7f3   : > { %13059 = vst [vmem:[#allocation238_spill] sm:$0xff] %v10770_v61  ;;  %v10772_v35 = vpop.permute.xlu0 %4954  ;;  %v13162_v61 = vld [vmem:[#allocation103_spill] sm:$0xff] }
 0x7f4   : > { %13060 = vst [vmem:[#allocation239_spill] sm:$0xff] %v10772_v35  ;;  %5165 = vrot.lane.b32.xlu1 %v9742_v41, %s7176_s21 }
 0x7f5   : > { %5167 = vrot.lane.b32.xlu0 %v9748_v27, %s7176_s21 }
 0x7f6   : > { %v10778_v45 = vpop.permute.xlu1 %4956 }
 0x7f7   : > { %13061 = vst [vmem:[#allocation240_spill] sm:$0xff] %v10778_v45  ;;  %v10780_v23 = vpop.permute.xlu0 %4958  ;;  %v13158_v45 = vld [vmem:[#allocation99_spill] sm:$0xff] }
 0x7f8   : > { %13062 = vst [vmem:[#allocation241_spill] sm:$0xff] %v10780_v23  ;;  %5169 = vrot.lane.b32.xlu1 %v9755_v37, %s7176_s21 }
 0x7f9   : > { %5171 = vrot.lane.b32.xlu0 %v9761_v49, %s7176_s21 }
 0x7fa   : > { %v10786_v13 = vpop.permute.xlu1 %4960 }
 0x7fb   : > { %13063 = vst [vmem:[#allocation242_spill] sm:$0xff] %v10786_v13  ;;  %v10788_v36 = vpop.permute.xlu0 %4962 }
 0x7fc   : > { %13064 = vst [vmem:[#allocation243_spill] sm:$0xff] %v10788_v36  ;;  %5173 = vrot.lane.b32.xlu1 %v9768_v63, %s7176_s21  ;;  %v13146_v36 = vld [vmem:[#allocation87_spill] sm:$0xff] }
 0x7fd   : > { %5175 = vrot.lane.b32.xlu0 %v9774_v19, %s7176_s21 }
 0x7fe   : > { %v10794_v41 = vpop.permute.xlu1 %4964 }
 0x7ff   : > { %13065 = vst [vmem:[#allocation244_spill] sm:$0xff] %v10794_v41  ;;  %v10796_v27 = vpop.permute.xlu0 %4966 }
 0x800   : > { %13066 = vst [vmem:[#allocation245_spill] sm:$0xff] %v10796_v27  ;;  %5177 = vrot.lane.b32.xlu1 %v9782_v11, %s7176_s21  ;;  %v13138_v27 = vld [vmem:[#allocation79_spill] sm:$0xff] }
 0x801   : > { %5179 = vrot.lane.b32.xlu0 %v9788_v30, %s7176_s21 }
 0x802   : > { %v10802_v49 = vpop.permute.xlu1 %4968 }
 0x803   : > { %13067 = vst [vmem:[#allocation246_spill] sm:$0xff] %v10802_v49  ;;  %v10804_v37 = vpop.permute.xlu0 %4970 }
 0x804   : > { %13068 = vst [vmem:[#allocation247_spill] sm:$0xff] %v10804_v37  ;;  %5181 = vrot.lane.b32.xlu1 %v9795_v10, %s7176_s21 }
 0x805   : > { %5183 = vrot.lane.b32.xlu0 %v9801_v42, %s7176_s21 }
 0x806   : > { %v10810_v19 = vpop.permute.xlu1 %4972 }
 0x807   : > { %13069 = vst [vmem:[#allocation248_spill] sm:$0xff] %v10810_v19  ;;  %v10812_v63 = vpop.permute.xlu0 %4974 }
 0x808   : > { %13070 = vst [vmem:[#allocation249_spill] sm:$0xff] %v10812_v63  ;;  %5185 = vrot.lane.b32.xlu1 %v9808_v4, %s7176_s21  ;;  %v13134_v63 = vld [vmem:[#allocation75_spill] sm:$0xff] }
 0x809   : > { %5187 = vrot.lane.b32.xlu0 %v9814_v20, %s7176_s21 }
 0x80a   : > { %v10818_v11 = vpop.permute.xlu1 %4976 }
 0x80b   : > { %13071 = vst [vmem:[#allocation250_spill] sm:$0xff] %v10818_v11  ;;  %v10820_v49 = vpop.permute.xlu0 %4978 }
 0x80c   : > { %13072 = vst [vmem:[#allocation251_spill] sm:$0xff] %v10820_v49  ;;  %5189 = vrot.lane.b32.xlu1 %v9822_v55, %s7176_s21  ;;  %v13130_v49 = vld [vmem:[#allocation71_spill] sm:$0xff] }
 0x80d   : > { %5191 = vrot.lane.b32.xlu0 %v9828_v56, %s7176_s21 }
 0x80e   : > { %v10826_v37 = vpop.permute.xlu1 %4980 }
 0x80f   : > { %13073 = vst [vmem:[#allocation252_spill] sm:$0xff] %v10826_v37  ;;  %v10828_v19 = vpop.permute.xlu0 %4982 }
 0x810   : > { %13074 = vst [vmem:[#allocation253_spill] sm:$0xff] %v10828_v19  ;;  %5193 = vrot.lane.b32.xlu1 %v9835_v57, %s7176_s21  ;;  %v13126_v19 = vld [vmem:[#allocation67_spill] sm:$0xff] }
 0x811   : > { %5195 = vrot.lane.b32.xlu0 %v9841_v1, %s7176_s21 }
 0x812   : > { %v10834_v20 = vpop.permute.xlu1 %4984 }
 0x813   : > { %13075 = vst [vmem:[#allocation254_spill] sm:$0xff] %v10834_v20  ;;  %v10836_v4 = vpop.permute.xlu0 %4986 }
 0x814   : > { %13076 = vst [vmem:[#allocation255_spill] sm:$0xff] %v10836_v4  ;;  %5197 = vrot.lane.b32.xlu1 %v9848_v21, %s7176_s21  ;;  %v13122_v4 = vld [vmem:[#allocation63_spill] sm:$0xff] }
 0x815   : > { %5199 = vrot.lane.b32.xlu0 %v9854_v34, %s7176_s21 }
 0x816   : > { %v10842_v56 = vpop.permute.xlu1 %4988 }
 0x817   : > { %13077 = vst [vmem:[#allocation256_spill] sm:$0xff] %v10842_v56  ;;  %v10844_v55 = vpop.permute.xlu0 %4990 }
 0x818   : > { %13078 = vst [vmem:[#allocation257_spill] sm:$0xff] %v10844_v55  ;;  %5201 = vrot.lane.b32.xlu1 %v9862_v40, %s7176_s21  ;;  %v13118_v55 = vld [vmem:[#allocation60_spill] sm:$0xff] }
 0x819   : > { %5203 = vrot.lane.b32.xlu0 %v9868_v54, %s7176_s21 }
 0x81a   : > { %v10850_v1 = vpop.permute.xlu1 %4992 }
 0x81b   : > { %13079 = vst [vmem:[#allocation258_spill] sm:$0xff] %v10850_v1  ;;  %v10852_v57 = vpop.permute.xlu0 %4994 }
 0x81c   : > { %13080 = vst [vmem:[#allocation259_spill] sm:$0xff] %v10852_v57  ;;  %5205 = vrot.lane.b32.xlu1 %v9875_v31, %s7176_s21  ;;  %v13114_v57 = vld [vmem:[#allocation58_spill] sm:$0xff] }
 0x81d   : > { %5207 = vrot.lane.b32.xlu0 %v9881_v3, %s7176_s21 }
 0x81e   : > { %v10858_v34 = vpop.permute.xlu1 %4996 }
 0x81f   : > { %13081 = vst [vmem:[#allocation260_spill] sm:$0xff] %v10858_v34  ;;  %v10860_v21 = vpop.permute.xlu0 %4998 }
 0x820   : > { %13082 = vst [vmem:[#allocation261_spill] sm:$0xff] %v10860_v21  ;;  %5209 = vrot.lane.b32.xlu1 %v9888_v62, %s7176_s21 }
 0x821   : > { %5211 = vrot.lane.b32.xlu0 %v9894_v39, %s7176_s21 }
 0x822   : > { %v10866_v54 = vpop.permute.xlu1 %5000 }
 0x823   : > { %13083 = vst [vmem:[#allocation262_spill] sm:$0xff] %v10866_v54  ;;  %v10868_v40 = vpop.permute.xlu0 %5002 }
 0x824   : > { %13084 = vst [vmem:[#allocation263_spill] sm:$0xff] %v10868_v40  ;;  %5213 = vrot.lane.b32.xlu1 %v9901_v2, %s7176_s21 }
 0x825   : > { %5215 = vrot.lane.b32.xlu0 %v9907_v28, %s7176_s21 }
 0x826   : > { %v10874_v3 = vpop.permute.xlu1 %5004 }
 0x827   : > { %13085 = vst [vmem:[#allocation264_spill] sm:$0xff] %v10874_v3  ;;  %v10876_v31 = vpop.permute.xlu0 %5006  ;;  %v13110_v3 = vld [vmem:[#allocation56_spill] sm:$0xff] }
 0x828   : > { %13086 = vst [vmem:[#allocation265_spill] sm:$0xff] %v10876_v31  ;;  %5217 = vrot.lane.b32.xlu1 %v9913_v38, %s7176_s21 }
 0x829   : > { %5219 = vrot.lane.b32.xlu0 %v9918_v29, %s7176_s21 }
 0x82a   : > { %v10882_v21 = vpop.permute.xlu1 %5008 }
 0x82b   : > { %13087 = vst [vmem:[#allocation266_spill] sm:$0xff] %v10882_v21  ;;  %v10884_v54 = vpop.permute.xlu0 %5010  ;;  %v13106_v21 = vld [vmem:[#allocation54_spill] sm:$0xff] }
 0x82c   : > { %13088 = vst [vmem:[#allocation267_spill] sm:$0xff] %v10884_v54  ;;  %5221 = vrot.lane.b32.xlu1 %v9924_v53, %s7176_s21 }
 0x82d   : > { %5223 = vrot.lane.b32.xlu0 %v9929_v43, %s7176_s21 }
 0x82e   : > { %v10890_v40 = vpop.permute.xlu1 %5012 }
 0x82f   : > { %13089 = vst [vmem:[#allocation268_spill] sm:$0xff] %v10890_v40  ;;  %v10892_v42 = vpop.permute.xlu0 %5014 }
 0x830   : > { %13090 = vst [vmem:[#allocation269_spill] sm:$0xff] %v10892_v42  ;;  %5225 = vrot.lane.b32.xlu1 %v9935_v26, %s7176_s21 }
 0x831   : > { %5227 = vrot.lane.b32.xlu0 %v9940_v25, %s7176_s21 }
 0x832   : > { %v10898_v10 = vpop.permute.xlu1 %5016 }
 0x833   : > { %13091 = vst [vmem:[#allocation270_spill] sm:$0xff] %v10898_v10  ;;  %v10900_v30 = vpop.permute.xlu0 %5018 }
 0x834   : > { %13092 = vst [vmem:[#allocation271_spill] sm:$0xff] %v10900_v30  ;;  %5229 = vrot.lane.b32.xlu1 %v9946_v15, %s7176_s21 }
 0x835   : > { %5231 = vrot.lane.b32.xlu0 %v9951_v9, %s7176_s21  ;;  %v13174_v9 = vld [vmem:[#allocation115_spill] sm:$0xff] }
 0x836   : > { %v10906_v54 = vpop.permute.xlu1 %5020 }
 0x837   : > { %13093 = vst [vmem:[#allocation272_spill] sm:$0xff] %v10906_v54  ;;  %v10908_v40 = vpop.permute.xlu0 %5022 }
 0x838   : > { %13094 = vst [vmem:[#allocation273_spill] sm:$0xff] %v10908_v40  ;;  %5233 = vrot.lane.b32.xlu1 %v9958_v24, %s7176_s21 }
 0x839   : > { %5235 = vrot.lane.b32.xlu0 %v9963_v22, %s7176_s21 }
 0x83a   : > { %v10914_v42 = vpop.permute.xlu1 %5024 }
 0x83b   : > { %13095 = vst [vmem:[#allocation274_spill] sm:$0xff] %v10914_v42  ;;  %v10916_v10 = vpop.permute.xlu0 %5026 }
 0x83c   : > { %13096 = vst [vmem:[#allocation275_spill] sm:$0xff] %v10916_v10  ;;  %5237 = vrot.lane.b32.xlu1 %v9969_v5, %s7176_s21 }
 0x83d   : > { %5239 = vrot.lane.b32.xlu0 %v9974_v52, %s7176_s21 }
 0x83e   : > { %v10922_v30 = vpop.permute.xlu1 %5028 }
 0x83f   : > { %13097 = vst [vmem:[#allocation276_spill] sm:$0xff] %v10922_v30  ;;  %v10924_v54 = vpop.permute.xlu0 %5030 }
 0x840   : > { %13098 = vst [vmem:[#allocation277_spill] sm:$0xff] %v10924_v54  ;;  %5241 = vrot.lane.b32.xlu1 %v9980_v59, %s7176_s21 }
 0x841   : > { %5243 = vrot.lane.b32.xlu0 %v9985_v17, %s7176_s21 }
 0x842   : > { %v10930_v40 = vpop.permute.xlu1 %5032 }
 0x843   : > { %13099 = vst [vmem:[#allocation278_spill] sm:$0xff] %v10930_v40  ;;  %v10932_v42 = vpop.permute.xlu0 %5034 }
 0x844   : > { %13100 = vst [vmem:[#allocation279_spill] sm:$0xff] %v10932_v42  ;;  %5245 = vrot.lane.b32.xlu1 %v9992_v46, %s7176_s21  ;;  %v13105_v42 = vld [vmem:[#allocation53_spill] sm:$0xff] }
 0x845   : > { %5247 = vrot.lane.b32.xlu0 %v9997_v0, %s7176_s21 }
 0x846   : > { %v10938_v10 = vpop.permute.xlu1 %5036 }
 0x847   : > { %13101 = vst [vmem:[#allocation280_spill] sm:$0xff] %v10938_v10  ;;  %v10940_v30 = vpop.permute.xlu0 %5038 }
 0x848   : > { %13102 = vst [vmem:[#allocation281_spill] sm:$0xff] %v10940_v30  ;;  %5249 = vrot.lane.b32.xlu1 %v12961_v48, %s7176_s21  ;;  %v13109_v30 = vld [vmem:[#allocation55_spill] sm:$0xff] }
 0x849   : > { %5251 = vrot.lane.b32.xlu0 %v12964_v7, %s7176_s21 }
 0x84a   : > { %v10946_v54 = vpop.permute.xlu1 %5040 }
 0x84b   : > { %13103 = vst [vmem:[#allocation282_spill] sm:$0xff] %v10946_v54  ;;  %v10948_v40 = vpop.permute.xlu0 %5042 }
 0x84c   : > { %13104 = vst [vmem:[#allocation283_spill] sm:$0xff] %v10948_v40  ;;  %5253 = vrot.lane.b32.xlu1 %v13105_v42, %s7176_s21  ;;  %v13113_v40 = vld [vmem:[#allocation57_spill] sm:$0xff] }
 0x84d   : > { %5255 = vrot.lane.b32.xlu0 %v13106_v21, %s7176_s21 }
 0x84e   : > { %v10954_v31 = vpop.permute.xlu1 %5044 }
 0x84f   : > { %13107 = vst [vmem:[#allocation53_spill] sm:$0xff] %v10954_v31  ;;  %v10956_v10 = vpop.permute.xlu0 %5046 }
 0x850   : > { %13108 = vst [vmem:[#allocation54_spill] sm:$0xff] %v10956_v10  ;;  %5257 = vrot.lane.b32.xlu1 %v13109_v30, %s7176_s21  ;;  %v13117_v10 = vld [vmem:[#allocation59_spill] sm:$0xff] }
 0x851   : > { %5259 = vrot.lane.b32.xlu0 %v13110_v3, %s7176_s21 }
 0x852   : > { %v10962_v34 = vpop.permute.xlu1 %5048 }
 0x853   : > { %13111 = vst [vmem:[#allocation55_spill] sm:$0xff] %v10962_v34  ;;  %v10964_v54 = vpop.permute.xlu0 %5050 }
 0x854   : > { %13112 = vst [vmem:[#allocation284_spill] sm:$0xff] %v10964_v54  ;;  %5261 = vrot.lane.b32.xlu1 %v13113_v40, %s7176_s21  ;;  %v13121_v54 = vld [vmem:[#allocation62_spill] sm:$0xff]  ;;  %v13142_v40 = vld [vmem:[#allocation83_spill] sm:$0xff] }
 0x855   : > { %5263 = vrot.lane.b32.xlu0 %v13114_v57, %s7176_s21 }
 0x856   : > { %v10970_v1 = vpop.permute.xlu1 %5052 }
 0x857   : > { %13115 = vst [vmem:[#allocation285_spill] sm:$0xff] %v10970_v1  ;;  %v10972_v31 = vpop.permute.xlu0 %5054 }
 0x858   : > { %13116 = vst [vmem:[#allocation286_spill] sm:$0xff] %v10972_v31  ;;  %5265 = vrot.lane.b32.xlu1 %v13117_v10, %s7176_s21  ;;  %v13125_v31 = vld [vmem:[#allocation66_spill] sm:$0xff] }
 0x859   : > { %5267 = vrot.lane.b32.xlu0 %v13118_v55, %s7176_s21 }
 0x85a   : > { %v10978_v56 = vpop.permute.xlu1 %5056 }
 0x85b   : > { %13119 = vst [vmem:[#allocation59_spill] sm:$0xff] %v10978_v56  ;;  %v10980_v34 = vpop.permute.xlu0 %5155 }
 0x85c   : > { %13120 = vst [vmem:[#allocation60_spill] sm:$0xff] %v10980_v34  ;;  %5269 = vrot.lane.b32.xlu1 %v13121_v54, %s7176_s21  ;;  %v13129_v34 = vld [vmem:[#allocation70_spill] sm:$0xff] }
 0x85d   : > { %5271 = vrot.lane.b32.xlu0 %v13122_v4, %s7176_s21 }
 0x85e   : > { %v10986_v20 = vpop.permute.xlu1 %5157 }
 0x85f   : > { %13123 = vst [vmem:[#allocation62_spill] sm:$0xff] %v10986_v20  ;;  %v10988_v1 = vpop.permute.xlu0 %5159 }
 0x860   : > { %13124 = vst [vmem:[#allocation63_spill] sm:$0xff] %v10988_v1  ;;  %5273 = vrot.lane.b32.xlu1 %v13125_v31, %s7176_s21  ;;  %v13133_v1 = vld [vmem:[#allocation74_spill] sm:$0xff] }
 0x861   : > { %5275 = vrot.lane.b32.xlu0 %v13126_v19, %s7176_s21 }
 0x862   : > { %v10994_v37 = vpop.permute.xlu1 %5161 }
 0x863   : > { %13127 = vst [vmem:[#allocation66_spill] sm:$0xff] %v10994_v37  ;;  %v10996_v56 = vpop.permute.xlu0 %5163 }
 0x864   : > { %13128 = vst [vmem:[#allocation67_spill] sm:$0xff] %v10996_v56  ;;  %5277 = vrot.lane.b32.xlu1 %v13129_v34, %s7176_s21  ;;  %v13137_v56 = vld [vmem:[#allocation78_spill] sm:$0xff] }
 0x865   : > { %5279 = vrot.lane.b32.xlu0 %v13130_v49, %s7176_s21 }
 0x866   : > { %v11002_v11 = vpop.permute.xlu1 %5165 }
 0x867   : > { %13131 = vst [vmem:[#allocation70_spill] sm:$0xff] %v11002_v11  ;;  %v11004_v20 = vpop.permute.xlu0 %5167 }
 0x868   : > { %13132 = vst [vmem:[#allocation71_spill] sm:$0xff] %v11004_v20  ;;  %5281 = vrot.lane.b32.xlu1 %v13133_v1, %s7176_s21  ;;  %v13141_v20 = vld [vmem:[#allocation82_spill] sm:$0xff] }
 0x869   : > { %5283 = vrot.lane.b32.xlu0 %v13134_v63, %s7176_s21 }
 0x86a   : > { %v11010_v57 = vpop.permute.xlu1 %5169 }
 0x86b   : > { %13135 = vst [vmem:[#allocation74_spill] sm:$0xff] %v11010_v57  ;;  %v11012_v37 = vpop.permute.xlu0 %5171 }
 0x86c   : > { %13136 = vst [vmem:[#allocation75_spill] sm:$0xff] %v11012_v37  ;;  %5285 = vrot.lane.b32.xlu1 %v13137_v56, %s7176_s21  ;;  %v13145_v37 = vld [vmem:[#allocation86_spill] sm:$0xff] }
 0x86d   : > { %5287 = vrot.lane.b32.xlu0 %v13138_v27, %s7176_s21 }
 0x86e   : > { %v11018_v41 = vpop.permute.xlu1 %5173 }
 0x86f   : > { %13139 = vst [vmem:[#allocation78_spill] sm:$0xff] %v11018_v41  ;;  %v11020_v11 = vpop.permute.xlu0 %5175 }
 0x870   : > { %13140 = vst [vmem:[#allocation79_spill] sm:$0xff] %v11020_v11  ;;  %5289 = vrot.lane.b32.xlu1 %v13141_v20, %s7176_s21  ;;  %v13149_v11 = vld [vmem:[#allocation90_spill] sm:$0xff]  ;;  %v13150_v20 = vld [vmem:[#allocation91_spill] sm:$0xff] }
 0x871   : > { %5291 = vrot.lane.b32.xlu0 %v13142_v40, %s7176_s21 }
 0x872   : > { %v11026_v3 = vpop.permute.xlu1 %5177 }
 0x873   : > { %13143 = vst [vmem:[#allocation287_spill] sm:$0xff] %v11026_v3  ;;  %v11028_v57 = vpop.permute.xlu0 %5179 }
 0x874   : > { %13144 = vst [vmem:[#allocation288_spill] sm:$0xff] %v11028_v57  ;;  %5293 = vrot.lane.b32.xlu1 %v13145_v37, %s7176_s21  ;;  %v13153_v57 = vld [vmem:[#allocation94_spill] sm:$0xff]  ;;  %v13154_v37 = vld [vmem:[#allocation95_spill] sm:$0xff] }
 0x875   : > { %5295 = vrot.lane.b32.xlu0 %v13146_v36, %s7176_s21 }
 0x876   : > { %v11034_v13 = vpop.permute.xlu1 %5181 }
 0x877   : > { %13147 = vst [vmem:[#allocation87_spill] sm:$0xff] %v11034_v13  ;;  %v11036_v41 = vpop.permute.xlu0 %5183 }
 0x878   : > { %13148 = vst [vmem:[#allocation289_spill] sm:$0xff] %v11036_v41  ;;  %5297 = vrot.lane.b32.xlu1 %v13149_v11, %s7176_s21  ;;  %v13157_v41 = vld [vmem:[#allocation98_spill] sm:$0xff] }
 0x879   : > { %5299 = vrot.lane.b32.xlu0 %v13150_v20, %s7176_s21 }
 0x87a   : > { %v11042_v40 = vpop.permute.xlu1 %5185 }
 0x87b   : > { %13151 = vst [vmem:[#allocation90_spill] sm:$0xff] %v11042_v40  ;;  %v11044_v3 = vpop.permute.xlu0 %5187 }
 0x87c   : > { %13152 = vst [vmem:[#allocation91_spill] sm:$0xff] %v11044_v3  ;;  %5301 = vrot.lane.b32.xlu1 %v13153_v57, %s7176_s21  ;;  %v13161_v3 = vld [vmem:[#allocation102_spill] sm:$0xff] }
 0x87d   : > { %5303 = vrot.lane.b32.xlu0 %v13154_v37, %s7176_s21 }
 0x87e   : > { %v11050_v23 = vpop.permute.xlu1 %5189 }
 0x87f   : > { %13155 = vst [vmem:[#allocation94_spill] sm:$0xff] %v11050_v23  ;;  %v11052_v13 = vpop.permute.xlu0 %5191 }
 0x880   : > { %13156 = vst [vmem:[#allocation95_spill] sm:$0xff] %v11052_v13  ;;  %5305 = vrot.lane.b32.xlu1 %v13157_v41, %s7176_s21  ;;  %v13165_v13 = vld [vmem:[#allocation106_spill] sm:$0xff] }
 0x881   : > { %5307 = vrot.lane.b32.xlu0 %v13158_v45, %s7176_s21 }
 0x882   : > { %v11058_v35 = vpop.permute.xlu1 %5193 }
 0x883   : > { %13159 = vst [vmem:[#allocation98_spill] sm:$0xff] %v11058_v35  ;;  %v11060_v40 = vpop.permute.xlu0 %5195 }
 0x884   : > { %13160 = vst [vmem:[#allocation99_spill] sm:$0xff] %v11060_v40  ;;  %5309 = vrot.lane.b32.xlu1 %v13161_v3, %s7176_s21  ;;  %v13169_v40 = vld [vmem:[#allocation110_spill] sm:$0xff] }
 0x885   : > { %5311 = vrot.lane.b32.xlu0 %v13162_v61, %s7176_s21 }
 0x886   : > { %v11066_v47 = vpop.permute.xlu1 %5197 }
 0x887   : > { %13163 = vst [vmem:[#allocation102_spill] sm:$0xff] %v11066_v47  ;;  %v11068_v23 = vpop.permute.xlu0 %5199 }
 0x888   : > { %13164 = vst [vmem:[#allocation103_spill] sm:$0xff] %v11068_v23  ;;  %5313 = vrot.lane.b32.xlu1 %v13165_v13, %s7176_s21  ;;  %v13173_v23 = vld [vmem:[#allocation114_spill] sm:$0xff] }
 0x889   : > { %5315 = vrot.lane.b32.xlu0 %v13166_v60, %s7176_s21 }
 0x88a   : > { %v11074_v33 = vpop.permute.xlu1 %5201 }
 0x88b   : > { %13167 = vst [vmem:[#allocation106_spill] sm:$0xff] %v11074_v33  ;;  %v11076_v35 = vpop.permute.xlu0 %5203 }
 0x88c   : > { %13168 = vst [vmem:[#allocation107_spill] sm:$0xff] %v11076_v35  ;;  %5317 = vrot.lane.b32.xlu1 %v13169_v40, %s7176_s21  ;;  %v13177_v35 = vld [vmem:[#allocation118_spill] sm:$0xff] }
 0x88d   : > { %5319 = vrot.lane.b32.xlu0 %v13170_v8, %s7176_s21 }
 0x88e   : > { %v11082_v24 = vpop.permute.xlu1 %5205 }
 0x88f   : > { %13171 = vst [vmem:[#allocation110_spill] sm:$0xff] %v11082_v24  ;;  %v11084_v47 = vpop.permute.xlu0 %5207 }
 0x890   : > { %13172 = vst [vmem:[#allocation290_spill] sm:$0xff] %v11084_v47  ;;  %5321 = vrot.lane.b32.xlu1 %v13173_v23, %s7176_s21  ;;  %v13179_v47 = vld [vmem:[#allocation122_spill] sm:$0xff] }
 0x891   : > { %5323 = vrot.lane.b32.xlu0 %v13174_v9, %s7176_s21 }
 0x892   : > { %v11090_v15 = vpop.permute.xlu1 %5209 }
 0x893   : > { %13175 = vst [vmem:[#allocation291_spill] sm:$0xff] %v11090_v15  ;;  %v11092_v33 = vpop.permute.xlu0 %5211 }
 0x894   : > { %13176 = vst [vmem:[#allocation292_spill] sm:$0xff] %v11092_v33  ;;  %5325 = vrot.lane.b32.xlu1 %v13177_v35, %s7176_s21 }
 0x895   : > { %5327 = vrot.lane.b32.xlu0 %v13040_v44, %s7176_s21 }
 0x896   : > { %v11098_v8 = vpop.permute.xlu1 %5213 }
 0x897   : > { %v11100_v24 = vpop.permute.xlu0 %5215 }
 0x898   : > { %13178 = vst [vmem:[#allocation118_spill] sm:$0xff] %v11100_v24  ;;  %5329 = vrot.lane.b32.xlu1 %v13179_v47, %s7176_s21 }
 0x899   : > { %5331 = vrot.lane.b32.xlu0 %v13044_v6, %s7176_s21 }
 0x89a   : > { %v11106_v9 = vpop.permute.xlu1 %5217 }
 0x89b   : > { %13180 = vst [vmem:[#allocation122_spill] sm:$0xff] %v11106_v9  ;;  %v11108_v15 = vpop.permute.xlu0 %5219 }
 0x89c   : > { %13181 = vst [vmem:[#allocation293_spill] sm:$0xff] %v11108_v15  ;;  %5333 = vrot.lane.b32.xlu1 %v13045_v58, %s7176_s21 }
 0x89d   : > { %5335 = vrot.lane.b32.xlu0 %v13048_v18, %s7176_s21 }
 0x89e   : > { %v11114_v33 = vpop.permute.xlu1 %5221 }
 0x89f   : > { %13182 = vst [vmem:[#allocation294_spill] sm:$0xff] %v11114_v33  ;;  %v11116_v23 = vpop.permute.xlu0 %5223 }
 0x8a0   : > { %13183 = vst [vmem:[#allocation295_spill] sm:$0xff] %v11116_v23  ;;  %5337 = vrot.lane.b32.xlu1 %v10322_v14, %s7176_s21 }
 0x8a1   : > { %5339 = vrot.lane.b32.xlu0 %v10327_v50, %s7176_s21 }
 0x8a2   : > { %v11122_v24 = vpop.permute.xlu1 %5225 }
 0x8a3   : > { %13184 = vst [vmem:[#allocation296_spill] sm:$0xff] %v11122_v24  ;;  %v11124_v9 = vpop.permute.xlu0 %5227 }
 0x8a4   : > { %13185 = vst [vmem:[#allocation297_spill] sm:$0xff] %v11124_v9  ;;  %5341 = vrot.lane.b32.xlu1 %v10338_v12, %s7176_s21 }
 0x8a5   : > { %5343 = vrot.lane.b32.xlu0 %v10343_v16, %s7176_s21 }
 0x8a6   : > { %v11130_v15 = vpop.permute.xlu1 %5229 }
 0x8a7   : > { %13186 = vst [vmem:[#allocation298_spill] sm:$0xff] %v11130_v15  ;;  %v11132_v33 = vpop.permute.xlu0 %5231 }
 0x8a8   : > { %13187 = vst [vmem:[#allocation299_spill] sm:$0xff] %v11132_v33  ;;  %5345 = vrot.lane.b32.xlu1 %v10353_v51, %s7176_s21 }
 0x8a9   : > { %5347 = vrot.lane.b32.xlu0 %v10358_v32, %s7176_s21  ;;  %s7187_s21 = smov 95  }
 0x8aa   : > { %v11138_v23 = vpop.permute.xlu1 %5233 }
 0x8ab   : > { %13188 = vst [vmem:[#allocation300_spill] sm:$0xff] %v11138_v23  ;;  %v11140_v24 = vpop.permute.xlu0 %5235 }
 0x8ac   : > { %13189 = vst [vmem:[#allocation301_spill] sm:$0xff] %v11140_v24  ;;  %5504 = vrot.lane.b32.xlu1 %v9901_v2, %s7177_s22 }
 0x8ad   : > { %5506 = vrot.lane.b32.xlu0 %v9907_v28, %s7177_s22 }
 0x8ae   : > { %v11146_v15 = vpop.permute.xlu1 %5237 }
 0x8af   : > { %13190 = vst [vmem:[#allocation302_spill] sm:$0xff] %v11146_v15  ;;  %v11148_v33 = vpop.permute.xlu0 %5239 }
 0x8b0   : > { %13191 = vst [vmem:[#allocation303_spill] sm:$0xff] %v11148_v33  ;;  %5508 = vrot.lane.b32.xlu1 %v9913_v38, %s7177_s22 }
 0x8b1   : > { %5510 = vrot.lane.b32.xlu0 %v9918_v29, %s7177_s22 }
 0x8b2   : > { %v11154_v23 = vpop.permute.xlu1 %5241 }
 0x8b3   : > { %13192 = vst [vmem:[#allocation304_spill] sm:$0xff] %v11154_v23  ;;  %v11156_v9 = vpop.permute.xlu0 %5243 }
 0x8b4   : > { %13193 = vst [vmem:[#allocation305_spill] sm:$0xff] %v11156_v9  ;;  %5512 = vrot.lane.b32.xlu1 %v9924_v53, %s7177_s22 }
 0x8b5   : > { %5514 = vrot.lane.b32.xlu0 %v9929_v43, %s7177_s22 }
 0x8b6   : > { %v11162_v24 = vpop.permute.xlu1 %5245 }
 0x8b7   : > { %13194 = vst [vmem:[#allocation306_spill] sm:$0xff] %v11162_v24  ;;  %v11164_v15 = vpop.permute.xlu0 %5247 }
 0x8b8   : > { %13195 = vst [vmem:[#allocation307_spill] sm:$0xff] %v11164_v15  ;;  %5516 = vrot.lane.b32.xlu1 %v9935_v26, %s7177_s22 }
 0x8b9   : > { %5518 = vrot.lane.b32.xlu0 %v9940_v25, %s7177_s22 }
 0x8ba   : > { %v11170_v33 = vpop.permute.xlu1 %5249 }
 0x8bb   : > { %13196 = vst [vmem:[#allocation308_spill] sm:$0xff] %v11170_v33  ;;  %v11172_v23 = vpop.permute.xlu0 %5251 }
 0x8bc   : > { %13197 = vst [vmem:[#allocation309_spill] sm:$0xff] %v11172_v23  ;;  %5526 = vrot.lane.b32.xlu1 %v9963_v22, %s7177_s22 }
 0x8bd   : > { %5528 = vrot.lane.b32.xlu0 %v9969_v5, %s7177_s22 }
 0x8be   : > { %v11178_v9 = vpop.permute.xlu1 %5253 }
 0x8bf   : > { %13198 = vst [vmem:[#allocation310_spill] sm:$0xff] %v11178_v9  ;;  %v11180_v24 = vpop.permute.xlu0 %5255 }
 0x8c0   : > { %13199 = vst [vmem:[#allocation311_spill] sm:$0xff] %v11180_v24  ;;  %5530 = vrot.lane.b32.xlu1 %v9974_v52, %s7177_s22 }
 0x8c1   : > { %5532 = vrot.lane.b32.xlu0 %v9980_v59, %s7177_s22 }
 0x8c2   : > { %v11186_v15 = vpop.permute.xlu1 %5257 }
 0x8c3   : > { %13200 = vst [vmem:[#allocation312_spill] sm:$0xff] %v11186_v15  ;;  %v11188_v33 = vpop.permute.xlu0 %5259 }
 0x8c4   : > { %13201 = vst [vmem:[#allocation313_spill] sm:$0xff] %v11188_v33  ;;  %5534 = vrot.lane.b32.xlu1 %v9985_v17, %s7177_s22 }
 0x8c5   : > { %5536 = vrot.lane.b32.xlu0 %v9992_v46, %s7177_s22 }
 0x8c6   : > { %v11194_v23 = vpop.permute.xlu1 %5261 }
 0x8c7   : > { %13202 = vst [vmem:[#allocation314_spill] sm:$0xff] %v11194_v23  ;;  %v11196_v9 = vpop.permute.xlu0 %5263 }
 0x8c8   : > { %13203 = vst [vmem:[#allocation315_spill] sm:$0xff] %v11196_v9  ;;  %5538 = vrot.lane.b32.xlu1 %v9997_v0, %s7177_s22 }
 0x8c9   : > { %5540 = vrot.lane.b32.xlu0 %v12961_v48, %s7177_s22 }
 0x8ca   : > { %v11202_v24 = vpop.permute.xlu1 %5265 }
 0x8cb   : > { %13204 = vst [vmem:[#allocation316_spill] sm:$0xff] %v11202_v24  ;;  %v11204_v15 = vpop.permute.xlu0 %5267 }
 0x8cc   : > { %13205 = vst [vmem:[#allocation317_spill] sm:$0xff] %v11204_v15  ;;  %5542 = vrot.lane.b32.xlu1 %v12964_v7, %s7177_s22 }
 0x8cd   : > { %5544 = vrot.lane.b32.xlu0 %v13105_v42, %s7177_s22 }
 0x8ce   : > { %v11210_v33 = vpop.permute.xlu1 %5269 }
 0x8cf   : > { %13206 = vst [vmem:[#allocation318_spill] sm:$0xff] %v11210_v33  ;;  %v11212_v23 = vpop.permute.xlu0 %5271 }
 0x8d0   : > { %13207 = vst [vmem:[#allocation319_spill] sm:$0xff] %v11212_v23  ;;  %5546 = vrot.lane.b32.xlu1 %v13106_v21, %s7177_s22 }
 0x8d1   : > { %5548 = vrot.lane.b32.xlu0 %v13109_v30, %s7177_s22 }
 0x8d2   : > { %v11218_v9 = vpop.permute.xlu1 %5273 }
 0x8d3   : > { %13208 = vst [vmem:[#allocation320_spill] sm:$0xff] %v11218_v9  ;;  %v11220_v24 = vpop.permute.xlu0 %5275 }
 0x8d4   : > { %13209 = vst [vmem:[#allocation321_spill] sm:$0xff] %v11220_v24  ;;  %5556 = vrot.lane.b32.xlu1 %v13117_v10, %s7177_s22 }
 0x8d5   : > { %5558 = vrot.lane.b32.xlu0 %v13118_v55, %s7177_s22 }
 0x8d6   : > { %v11226_v15 = vpop.permute.xlu1 %5277 }
 0x8d7   : > { %13210 = vst [vmem:[#allocation322_spill] sm:$0xff] %v11226_v15  ;;  %v11228_v33 = vpop.permute.xlu0 %5279 }
 0x8d8   : > { %13211 = vst [vmem:[#allocation323_spill] sm:$0xff] %v11228_v33  ;;  %5560 = vrot.lane.b32.xlu1 %v13121_v54, %s7177_s22 }
 0x8d9   : > { %5562 = vrot.lane.b32.xlu0 %v13122_v4, %s7177_s22 }
 0x8da   : > { %v11234_v23 = vpop.permute.xlu1 %5281 }
 0x8db   : > { %13212 = vst [vmem:[#allocation324_spill] sm:$0xff] %v11234_v23  ;;  %v11236_v9 = vpop.permute.xlu0 %5283 }
 0x8dc   : > { %13213 = vst [vmem:[#allocation325_spill] sm:$0xff] %v11236_v9  ;;  %5564 = vrot.lane.b32.xlu1 %v13125_v31, %s7177_s22 }
 0x8dd   : > { %5566 = vrot.lane.b32.xlu0 %v13126_v19, %s7177_s22 }
 0x8de   : > { %v11242_v24 = vpop.permute.xlu1 %5285 }
 0x8df   : > { %13214 = vst [vmem:[#allocation326_spill] sm:$0xff] %v11242_v24  ;;  %v11244_v15 = vpop.permute.xlu0 %5287 }
 0x8e0   : > { %13215 = vst [vmem:[#allocation327_spill] sm:$0xff] %v11244_v15  ;;  %5568 = vrot.lane.b32.xlu1 %v13129_v34, %s7177_s22 }
 0x8e1   : > { %5570 = vrot.lane.b32.xlu0 %v13130_v49, %s7177_s22 }
 0x8e2   : > { %v11250_v33 = vpop.permute.xlu1 %5289 }
 0x8e3   : > { %13216 = vst [vmem:[#allocation328_spill] sm:$0xff] %v11250_v33  ;;  %v11252_v23 = vpop.permute.xlu0 %5291 }
 0x8e4   : > { %13217 = vst [vmem:[#allocation329_spill] sm:$0xff] %v11252_v23  ;;  %5572 = vrot.lane.b32.xlu1 %v13133_v1, %s7177_s22 }
 0x8e5   : > { %5574 = vrot.lane.b32.xlu0 %v13134_v63, %s7177_s22 }
 0x8e6   : > { %v11258_v9 = vpop.permute.xlu1 %5293 }
 0x8e7   : > { %13218 = vst [vmem:[#allocation330_spill] sm:$0xff] %v11258_v9  ;;  %v11260_v24 = vpop.permute.xlu0 %5295 }
 0x8e8   : > { %13219 = vst [vmem:[#allocation331_spill] sm:$0xff] %v11260_v24  ;;  %5576 = vrot.lane.b32.xlu1 %v13137_v56, %s7177_s22 }
 0x8e9   : > { %5578 = vrot.lane.b32.xlu0 %v13138_v27, %s7177_s22 }
 0x8ea   : > { %v11266_v15 = vpop.permute.xlu1 %5297 }
 0x8eb   : > { %13220 = vst [vmem:[#allocation332_spill] sm:$0xff] %v11266_v15  ;;  %v11268_v33 = vpop.permute.xlu0 %5299 }
 0x8ec   : > { %13221 = vst [vmem:[#allocation333_spill] sm:$0xff] %v11268_v33  ;;  %5586 = vrot.lane.b32.xlu1 %v13146_v36, %s7177_s22 }
 0x8ed   : > { %5588 = vrot.lane.b32.xlu0 %v13149_v11, %s7177_s22 }
 0x8ee   : > { %v11274_v23 = vpop.permute.xlu1 %5301 }
 0x8ef   : > { %13222 = vst [vmem:[#allocation334_spill] sm:$0xff] %v11274_v23  ;;  %v11276_v9 = vpop.permute.xlu0 %5303 }
 0x8f0   : > { %13223 = vst [vmem:[#allocation335_spill] sm:$0xff] %v11276_v9  ;;  %5590 = vrot.lane.b32.xlu1 %v13150_v20, %s7177_s22 }
 0x8f1   : > { %5592 = vrot.lane.b32.xlu0 %v13153_v57, %s7177_s22 }
 0x8f2   : > { %v11282_v24 = vpop.permute.xlu1 %5305 }
 0x8f3   : > { %13224 = vst [vmem:[#allocation336_spill] sm:$0xff] %v11282_v24  ;;  %v11284_v15 = vpop.permute.xlu0 %5307 }
 0x8f4   : > { %13225 = vst [vmem:[#allocation337_spill] sm:$0xff] %v11284_v15  ;;  %5594 = vrot.lane.b32.xlu1 %v13154_v37, %s7177_s22 }
 0x8f5   : > { %5596 = vrot.lane.b32.xlu0 %v13157_v41, %s7177_s22 }
 0x8f6   : > { %v11290_v33 = vpop.permute.xlu1 %5309 }
 0x8f7   : > { %13226 = vst [vmem:[#allocation338_spill] sm:$0xff] %v11290_v33  ;;  %v11292_v23 = vpop.permute.xlu0 %5311 }
 0x8f8   : > { %13227 = vst [vmem:[#allocation339_spill] sm:$0xff] %v11292_v23  ;;  %5598 = vrot.lane.b32.xlu1 %v13158_v45, %s7177_s22 }
 0x8f9   : > { %5600 = vrot.lane.b32.xlu0 %v13161_v3, %s7177_s22 }
 0x8fa   : > { %v11298_v9 = vpop.permute.xlu1 %5313 }
 0x8fb   : > { %13228 = vst [vmem:[#allocation340_spill] sm:$0xff] %v11298_v9  ;;  %v11300_v24 = vpop.permute.xlu0 %5315 }
 0x8fc   : > { %13229 = vst [vmem:[#allocation341_spill] sm:$0xff] %v11300_v24  ;;  %5602 = vrot.lane.b32.xlu1 %v13162_v61, %s7177_s22 }
 0x8fd   : > { %5604 = vrot.lane.b32.xlu0 %v13165_v13, %s7177_s22 }
 0x8fe   : > { %v11306_v15 = vpop.permute.xlu1 %5317 }
 0x8ff   : > { %13230 = vst [vmem:[#allocation342_spill] sm:$0xff] %v11306_v15  ;;  %v11308_v33 = vpop.permute.xlu0 %5319 }
 0x900   : > { %13231 = vst [vmem:[#allocation343_spill] sm:$0xff] %v11308_v33  ;;  %5606 = vrot.lane.b32.xlu1 %v13166_v60, %s7177_s22 }
 0x901   : > { %5608 = vrot.lane.b32.xlu0 %v13169_v40, %s7177_s22 }
 0x902   : > { %v11314_v23 = vpop.permute.xlu1 %5321 }
 0x903   : > { %13232 = vst [vmem:[#allocation344_spill] sm:$0xff] %v11314_v23  ;;  %v11316_v9 = vpop.permute.xlu0 %5323 }
 0x904   : > { %13233 = vst [vmem:[#allocation345_spill] sm:$0xff] %v11316_v9  ;;  %5616 = vrot.lane.b32.xlu1 %v13177_v35, %s7177_s22 }
 0x905   : > { %5618 = vrot.lane.b32.xlu0 %v13040_v44, %s7177_s22 }
 0x906   : > { %v11322_v24 = vpop.permute.xlu1 %5325 }
 0x907   : > { %13234 = vst [vmem:[#allocation346_spill] sm:$0xff] %v11322_v24  ;;  %v11324_v15 = vpop.permute.xlu0 %5327 }
 0x908   : > { %5620 = vrot.lane.b32.xlu1 %v13179_v47, %s7177_s22 }
 0x909   : > { %5622 = vrot.lane.b32.xlu0 %v13044_v6, %s7177_s22 }
 0x90a   : > { %v11330_v33 = vpop.permute.xlu1 %5329 }
 0x90b   : > { %13235 = vst [vmem:[#allocation347_spill] sm:$0xff] %v11330_v33  ;;  %v11332_v23 = vpop.permute.xlu0 %5331 }
 0x90c   : > { %13236 = vst [vmem:[#allocation348_spill] sm:$0xff] %v11332_v23  ;;  %5624 = vrot.lane.b32.xlu1 %v13045_v58, %s7177_s22 }
 0x90d   : > { %5626 = vrot.lane.b32.xlu0 %v13048_v18, %s7177_s22 }
 0x90e   : > { %v11338_v9 = vpop.permute.xlu1 %5333 }
 0x90f   : > { %v11340_v24 = vpop.permute.xlu0 %5335 }
 0x910   : > { %5628 = vrot.lane.b32.xlu1 %v10322_v14, %s7177_s22 }
 0x911   : > { %5630 = vrot.lane.b32.xlu0 %v10327_v50, %s7177_s22 }
 0x912   : > { %v11346_v6 = vpop.permute.xlu1 %5337 }
 0x913   : > { %13237 = vst [vmem:[#allocation349_spill] sm:$0xff] %v11346_v6  ;;  %v11348_v33 = vpop.permute.xlu0 %5339  ;;  %v13243_v6 = vld [vmem:[#allocation120_spill] sm:$0xff] }
 0x914   : > { %13238 = vst [vmem:[#allocation350_spill] sm:$0xff] %v11348_v33  ;;  %5632 = vrot.lane.b32.xlu1 %v10338_v12, %s7177_s22  ;;  %v5767_v12 = vsel %vm5737_vm5, %v13243_v6, %v9901_v2 }
 0x915   : > { %5634 = vrot.lane.b32.xlu0 %v10343_v16, %s7177_s22 }
 0x916   : > { %v11354_v23 = vpop.permute.xlu1 %5341 }
 0x917   : > { %13239 = vst [vmem:[#allocation351_spill] sm:$0xff] %v11354_v23  ;;  %v11356_v18 = vpop.permute.xlu0 %5343 }
 0x918   : > { %13240 = vst [vmem:[#allocation352_spill] sm:$0xff] %v11356_v18  ;;  %5636 = vrot.lane.b32.xlu1 %v10353_v51, %s7177_s22  ;;  %v13244_v18 = vld [vmem:[#allocation121_spill] sm:$0xff] }
 0x919   : > { %5638 = vrot.lane.b32.xlu0 %v10358_v32, %s7177_s22  ;;  %v5768_v16 = vsel %vm5737_vm5, %v13244_v18, %v9907_v28  ;;  %v13245_v51 = vld [vmem:[#allocation225_spill] sm:$0xff]  ;;  %v13248_v18 = vld [vmem:[#allocation124_spill] sm:$0xff] }
 0x91a   : > { %v11362_v50 = vpop.permute.xlu1 %5345  ;;  %v5865_v32 = vsel %vm5835_vm6, %v5767_v12, %v13245_v51  ;;  %v5769_v51 = vsel %vm5737_vm5, %v13248_v18, %v9913_v38 }
 0x91b   : > { %13241 = vst [vmem:[#allocation353_spill] sm:$0xff] %v11362_v50  ;;  %v11364_v33 = vpop.permute.xlu0 %5347  ;;  %v5963_v2 = vsel %vm5933_vm8, %v5865_v32, %v11098_v8 }
 0x91c   : > { %13242 = vst [vmem:[#allocation354_spill] sm:$0xff] %v11364_v33  ;;  %5500 = vrot.lane.b32.xlu1 %v9888_v62, %s7177_s22  ;;  %v13246_v33 = vld [vmem:[#allocation119_spill] sm:$0xff]  ;;  %v13247_v62 = vld [vmem:[#allocation118_spill] sm:$0xff] }
 0x91d   : > { %5502 = vrot.lane.b32.xlu0 %v9894_v39, %s7177_s22  ;;  %v5866_v50 = vsel %vm5835_vm6, %v5768_v16, %v13246_v33  ;;  %v13249_v16 = vld [vmem:[#allocation125_spill] sm:$0xff]  ;;  %v13250_v33 = vld [vmem:[#allocation226_spill] sm:$0xff] }
 0x91e   : > { %v5505_v6 = vpop.permute.xlu1 %5504  ;;  %v5964_v23 = vsel %vm5933_vm8, %v5866_v50, %v13247_v62  ;;  %v5770_v32 = vsel %vm5737_vm5, %v13249_v16, %v9918_v29  ;;  %v5867_v8 = vsel %vm5835_vm6, %v5769_v51, %v13250_v33  ;;  %v13251_v62 = vld [vmem:[#allocation126_spill] sm:$0xff]  ;;  %v13254_v16 = vld [vmem:[#allocation48_spill] sm:$0xff] }
 0x91f   : > { %v6061_v14 = vsel %vm6031_vm7, %v5963_v2, %v5505_v6  ;;  %v5507_v28 = vpop.permute.xlu0 %5506  ;;  %v5868_v50 = vsel %vm5835_vm6, %v5770_v32, %v13251_v62  ;;  %v13252_v2 = vld [vmem:[#allocation122_spill] sm:$0xff]  ;;  %v13255_v32 = vld [vmem:[#allocation128_spill] sm:$0xff]  ;;  %v13257_v62 = vld [vmem:[#allocation227_spill] sm:$0xff] }
 0x920   : > { %v6062_v12 = vsel %vm6031_vm7, %v5964_v23, %v5507_v28  ;;  %6271 = vrot.lane.b32.xlu1 %v6061_v14, %s7178_s23  ;;  %v5965_v38 = vsel %vm5933_vm8, %v5867_v8, %v13252_v2  ;;  %v13253_v23 = vld [vmem:[#allocation293_spill] sm:$0xff]  ;;  %v5771_v33 = vsel %vm5737_vm5, %v13255_v32, %v9924_v53 }
 0x921   : > { %6273 = vrot.lane.b32.xlu0 %v6062_v12, %s7178_s23  ;;  %v5966_v28 = vsel %vm5933_vm8, %v5868_v50, %v13253_v23  ;;  %v13256_v8 = vld [vmem:[#allocation49_spill] sm:$0xff]  ;;  %v5869_v50 = vsel %vm5835_vm6, %v5771_v33, %v13257_v62  ;;  %v13259_v23 = vld [vmem:[#allocation294_spill] sm:$0xff] }
 0x922   : > { %v5509_v6 = vpop.permute.xlu1 %5508  ;;  %v13261_v53 = vld [vmem:[#allocation133_spill] sm:$0xff] }
 0x923   : > { %v6063_v14 = vsel %vm6031_vm7, %v5965_v38, %v5509_v6  ;;  %v5511_v18 = vpop.permute.xlu0 %5510  ;;  %v13258_v38 = vld [vmem:[#allocation129_spill] sm:$0xff]  ;;  %v5774_v32 = vsel %vm5737_vm5, %v13261_v53, %v9940_v25  ;;  %v13267_v53 = vld [vmem:[#allocation234_spill] sm:$0xff] }
 0x924   : > { %v6064_v29 = vsel %vm6031_vm7, %v5966_v28, %v5511_v18  ;;  %6281 = vrot.lane.b32.xlu1 %v6063_v14, %s7174_s18  ;;  %v5772_v6 = vsel %vm5737_vm5, %v13258_v38, %v9929_v43  ;;  %v5967_v28 = vsel %vm5933_vm8, %v5869_v50, %v13259_v23  ;;  %v13260_v18 = vld [vmem:[#allocation132_spill] sm:$0xff]  ;;  %v13263_v43 = vld [vmem:[#allocation50_spill] sm:$0xff]  ;;  %v13265_v23 = vld [vmem:[#allocation143_spill] sm:$0xff] }
 0x925   : > { %6283 = vrot.lane.b32.xlu0 %v6064_v29, %s7174_s18  ;;  %v5773_v29 = vsel %vm5737_vm5, %v13260_v18, %v9935_v26  ;;  %v13264_v50 = vld [vmem:[#allocation142_spill] sm:$0xff]  ;;  %v5780_v26 = vsel %vm5737_vm5, %v13265_v23, %v9974_v52  ;;  %v13266_v18 = vld [vmem:[#allocation228_spill] sm:$0xff] }
 0x926   : > { %v5513_v51 = vpop.permute.xlu1 %5512  ;;  %v5779_v38 = vsel %vm5737_vm5, %v13264_v50, %v9969_v5  ;;  %v5870_v25 = vsel %vm5835_vm6, %v5772_v6, %v13266_v18  ;;  %v13270_v5 = vld [vmem:[#allocation295_spill] sm:$0xff]  ;;  %v13272_v6 = vld [vmem:[#allocation296_spill] sm:$0xff] }
 0x927   : > { %v5515_v12 = vpop.permute.xlu0 %5514  ;;  %v6065_v62 = vsel %vm6031_vm7, %v5967_v28, %v5513_v51  ;;  %v5968_v50 = vsel %vm5933_vm8, %v5870_v25, %v13270_v5 }
 0x928   : > { %5520 = vrot.lane.b32.xlu1 %v13254_v16, %s7177_s22 }
 0x929   : > { %5522 = vrot.lane.b32.xlu0 %v13256_v8, %s7177_s22  ;;  %v13262_v8 = vld [vmem:[#allocation141_spill] sm:$0xff] }
 0x92a   : > { %v5517_v2 = vpop.permute.xlu1 %5516  ;;  %v5778_v33 = vsel %vm5737_vm5, %v13262_v8, %v9963_v22  ;;  %v13268_v22 = vld [vmem:[#allocation229_spill] sm:$0xff]  ;;  %v13269_v8 = vld [vmem:[#allocation235_spill] sm:$0xff] }
 0x92b   : > { %v5519_v14 = vpop.permute.xlu0 %5518  ;;  %v5876_v16 = vsel %vm5835_vm6, %v5778_v33, %v13267_v53  ;;  %v5871_v51 = vsel %vm5835_vm6, %v5773_v29, %v13268_v22  ;;  %v5877_v28 = vsel %vm5835_vm6, %v5779_v38, %v13269_v8  ;;  %v13273_v33 = vld [vmem:[#allocation302_spill] sm:$0xff] }
 0x92c   : > { %5524 = vrot.lane.b32.xlu1 %v13263_v43, %s7177_s22  ;;  %v13271_v43 = vld [vmem:[#allocation301_spill] sm:$0xff]  ;;  %v5969_v18 = vsel %vm5933_vm8, %v5871_v51, %v13272_v6  ;;  %v5975_v53 = vsel %vm5933_vm8, %v5877_v28, %v13273_v33  ;;  %v13275_v51 = vld [vmem:[#allocation236_spill] sm:$0xff] }
 0x92d   : > { %6291 = vrot.lane.b32.xlu0 %v6065_v62, %s7179_s20  ;;  %v5974_v52 = vsel %vm5933_vm8, %v5876_v16, %v13271_v43  ;;  %v6066_v62 = vsel %vm6031_vm7, %v5968_v50, %v5515_v12  ;;  %v6067_v38 = vsel %vm6031_vm7, %v5969_v18, %v5517_v2  ;;  %v13274_v16 = vld [vmem:[#allocation230_spill] sm:$0xff]  ;;  %v5878_v5 = vsel %vm5835_vm6, %v5780_v26, %v13275_v51  ;;  %v13276_v12 = vld [vmem:[#allocation144_spill] sm:$0xff]  ;;  %v13277_v50 = vld [vmem:[#allocation297_spill] sm:$0xff] }
 0x92e   : > { %v5527_v23 = vpop.permute.xlu1 %5526  ;;  %v5872_v43 = vsel %vm5835_vm6, %v5774_v32, %v13274_v16  ;;  %v5781_v2 = vsel %vm5737_vm5, %v13276_v12, %v9980_v59  ;;  %v13279_v33 = vld [vmem:[#allocation237_spill] sm:$0xff] }
 0x92f   : > { %v6072_v29 = vsel %vm6031_vm7, %v5974_v52, %v5527_v23  ;;  %v5529_v22 = vpop.permute.xlu0 %5528  ;;  %v5970_v52 = vsel %vm5933_vm8, %v5872_v43, %v13277_v50  ;;  %v13278_v23 = vld [vmem:[#allocation303_spill] sm:$0xff]  ;;  %v5879_v32 = vsel %vm5835_vm6, %v5781_v2, %v13279_v33  ;;  %v13282_v43 = vld [vmem:[#allocation146_spill] sm:$0xff]  ;;  %v13285_v2 = vld [vmem:[#allocation305_spill] sm:$0xff] }
 0x930   : > { %v6324_v8 = vrot.slane %v6072_v29, 1  ;;  %v6073_v25 = vsel %vm6031_vm7, %v5975_v53, %v5529_v22  ;;  %6293 = vrot.lane.b32.xlu1 %v6066_v62, %s7179_s20  ;;  %v5976_v6 = vsel %vm5933_vm8, %v5878_v5, %v13278_v23  ;;  %v6068_v26 = vsel %vm6031_vm7, %v5970_v52, %v5519_v14  ;;  %v13280_v22 = vld [vmem:[#allocation145_spill] sm:$0xff]  ;;  %v13283_v14 = vld [vmem:[#allocation238_spill] sm:$0xff] }
 0x931   : > { %v6325_v28 = vrot.slane %v6073_v25, 1  ;;  %6301 = vrot.lane.b32.xlu0 %v6067_v38, %s7180_s29  ;;  %v5782_v59 = vsel %vm5737_vm5, %v13280_v22, %v9985_v17  ;;  %v13281_v38 = vld [vmem:[#allocation304_spill] sm:$0xff]  ;;  %v5783_v51 = vsel %vm5737_vm5, %v13282_v43, %v9992_v46 }
 0x932   : > { %v5531_v18 = vpop.permute.xlu1 %5530  ;;  %v5977_v25 = vsel %vm5933_vm8, %v5879_v32, %v13281_v38  ;;  %v5880_v5 = vsel %vm5835_vm6, %v5782_v59, %v13283_v14  ;;  %v13288_v22 = vld [vmem:[#allocation148_spill] sm:$0xff] }
 0x933   : > { %v6074_v53 = vsel %vm6031_vm7, %v5976_v6, %v5531_v18  ;;  %v5533_v62 = vpop.permute.xlu0 %5532  ;;  %v6326_v29 = vsel %vm6162_vm9, %v6324_v8, %v6325_v28  ;;  %v13284_v8 = vld [vmem:[#allocation239_spill] sm:$0xff]  ;;  %v5978_v50 = vsel %vm5933_vm8, %v5880_v5, %v13285_v2  ;;  %v13286_v6 = vld [vmem:[#allocation306_spill] sm:$0xff]  ;;  %v13289_v38 = vld [vmem:[#allocation240_spill] sm:$0xff] }
 0x934   : > { %v6327_v16 = vrot.slane %v6074_v53, 1  ;;  %6303 = vrot.lane.b32.xlu1 %v6068_v26, %s7180_s29  ;;  %v6075_v12 = vsel %vm6031_vm7, %v5977_v25, %v5533_v62  ;;  %v5881_v17 = vsel %vm5835_vm6, %v5783_v51, %v13284_v8  ;;  %v13287_v62 = vld [vmem:[#allocation147_spill] sm:$0xff]  ;;  %v13292_v8 = vld [vmem:[#allocation308_spill] sm:$0xff]  ;;  %v13293_v2 = vld [vmem:[#allocation149_spill] sm:$0xff] }
 0x935   : > { %6329 = vrot.lane.b32.xlu0 %v6326_v29, %s7178_s23  ;;  %v5979_v18 = vsel %vm5933_vm8, %v5881_v17, %v13286_v6  ;;  %v6340_v32 = vrot.slane %v6075_v12, 1  ;;  %v5784_v29 = vsel %vm5737_vm5, %v13287_v62, %v9997_v0  ;;  %v13291_v5 = vld [vmem:[#allocation307_spill] sm:$0xff]  ;;  %v13294_v6 = vld [vmem:[#allocation242_spill] sm:$0xff] }
 0x936   : > { %v5535_v52 = vpop.permute.xlu1 %5534  ;;  %v6328_v23 = vsel %vm6162_vm9, %v6325_v28, %v6327_v16  ;;  %v5785_v28 = vsel %vm5737_vm5, %v13288_v22, %v12961_v48  ;;  %v5882_v25 = vsel %vm5835_vm6, %v5784_v29, %v13289_v38  ;;  %v13290_v16 = vld [vmem:[#allocation241_spill] sm:$0xff]  ;;  %v13297_v62 = vld [vmem:[#allocation243_spill] sm:$0xff]  ;;  %v13298_v38 = vld [vmem:[#allocation56_spill] sm:$0xff] }
 0x937   : > { %v6076_v46 = vsel %vm6031_vm7, %v5978_v50, %v5535_v52  ;;  %v5537_v33 = vpop.permute.xlu0 %5536  ;;  %v5883_v43 = vsel %vm5835_vm6, %v5785_v28, %v13290_v16  ;;  %v5980_v12 = vsel %vm5933_vm8, %v5882_v25, %v13291_v5  ;;  %v5786_v50 = vsel %vm5737_vm5, %v13293_v2, %v12964_v7  ;;  %v13299_v25 = vld [vmem:[#allocation151_spill] sm:$0xff] }
 0x938   : > { %v6341_v26 = vrot.slane %v6076_v46, 1  ;;  %v6077_v53 = vsel %vm6031_vm7, %v5979_v18, %v5537_v33  ;;  %6331 = vrot.lane.b32.xlu1 %v6328_v23, %s7178_s23  ;;  %v5981_v0 = vsel %vm5933_vm8, %v5883_v43, %v13292_v8  ;;  %v5884_v18 = vsel %vm5835_vm6, %v5786_v50, %v13294_v6  ;;  %v13295_v46 = vld [vmem:[#allocation150_spill] sm:$0xff]  ;;  %v13305_v2 = vld [vmem:[#allocation311_spill] sm:$0xff] }
 0x939   : > { %v6343_v59 = vrot.slane %v6077_v53, 1  ;;  %v5787_v33 = vsel %vm5737_vm5, %v13295_v46, %v13105_v42  ;;  %v5788_v16 = vsel %vm5737_vm5, %v13299_v25, %v13106_v21  ;;  %v13300_v42 = vld [vmem:[#allocation310_spill] sm:$0xff] }
 0x93a   : > { %v5539_v51 = vpop.permute.xlu1 %5538  ;;  %v6342_v14 = vsel %vm6162_vm9, %v6340_v32, %v6341_v26  ;;  %v13296_v32 = vld [vmem:[#allocation309_spill] sm:$0xff]  ;;  %v5885_v7 = vsel %vm5835_vm6, %v5787_v33, %v13297_v62 }
 0x93b   : > { %v5541_v17 = vpop.permute.xlu0 %5540  ;;  %6345 = vrot.lane.b32.xlu0 %v6342_v14, %s7174_s18  ;;  %v6344_v48 = vsel %vm6162_vm9, %v6341_v26, %v6343_v59  ;;  %v6078_v52 = vsel %vm6031_vm7, %v5980_v12, %v5539_v51  ;;  %v5982_v26 = vsel %vm5933_vm8, %v5884_v18, %v13296_v32  ;;  %v5983_v43 = vsel %vm5933_vm8, %v5885_v7, %v13300_v42  ;;  %v13301_v51 = vld [vmem:[#allocation57_spill] sm:$0xff]  ;;  %v13302_v14 = vld [vmem:[#allocation152_spill] sm:$0xff]  ;;  %v13308_v32 = vld [vmem:[#allocation58_spill] sm:$0xff] }
 0x93c   : > { %v6079_v23 = vsel %vm6031_vm7, %v5981_v0, %v5541_v17  ;;  %6347 = vrot.lane.b32.xlu1 %v6344_v48, %s7174_s18  ;;  %v6356_v29 = vrot.slane %v6078_v52, 1  ;;  %v5789_v5 = vsel %vm5737_vm5, %v13302_v14, %v13109_v30  ;;  %v13303_v12 = vld [vmem:[#allocation244_spill] sm:$0xff]  ;;  %v13304_v17 = vld [vmem:[#allocation245_spill] sm:$0xff] }
 0x93d   : > { %v6357_v22 = vrot.slane %v6079_v23, 1  ;;  %v5886_v8 = vsel %vm5835_vm6, %v5788_v16, %v13303_v12  ;;  %v5887_v48 = vsel %vm5835_vm6, %v5789_v5, %v13304_v17  ;;  %v13306_v23 = vld [vmem:[#allocation156_spill] sm:$0xff]  ;;  %v13311_v16 = vld [vmem:[#allocation250_spill] sm:$0xff] }
 0x93e   : > { %v5543_v53 = vpop.permute.xlu1 %5542  ;;  %v5984_v21 = vsel %vm5933_vm8, %v5886_v8, %v13305_v2  ;;  %v5793_v6 = vsel %vm5737_vm5, %v13306_v23, %v13117_v10  ;;  %v13307_v18 = vld [vmem:[#allocation312_spill] sm:$0xff]  ;;  %v13310_v10 = vld [vmem:[#allocation249_spill] sm:$0xff]  ;;  %v13314_v2 = vld [vmem:[#allocation158_spill] sm:$0xff] }
 0x93f   : > { %v6080_v28 = vsel %vm6031_vm7, %v5982_v26, %v5543_v53  ;;  %v5545_v59 = vpop.permute.xlu0 %5544  ;;  %5550 = vrot.lane.b32.xlu0 %v13298_v38, %s7177_s22  ;;  %v5985_v30 = vsel %vm5933_vm8, %v5887_v48, %v13307_v18  ;;  %v6358_v26 = vsel %vm6162_vm9, %v6356_v29, %v6357_v22  ;;  %v13309_v53 = vld [vmem:[#allocation157_spill] sm:$0xff]  ;;  %v5891_v25 = vsel %vm5835_vm6, %v5793_v6, %v13310_v10  ;;  %v13316_v18 = vld [vmem:[#allocation159_spill] sm:$0xff] }
 0x940   : > { %5552 = vrot.lane.b32.xlu1 %v13301_v51, %s7177_s22  ;;  %v6081_v0 = vsel %vm6031_vm7, %v5983_v43, %v5545_v59  ;;  %v6359_v50 = vrot.slane %v6080_v28, 1  ;;  %v5794_v62 = vsel %vm5737_vm5, %v13309_v53, %v13118_v55  ;;  %v13312_v43 = vld [vmem:[#allocation316_spill] sm:$0xff]  ;;  %v13313_v8 = vld [vmem:[#allocation317_spill] sm:$0xff] }
 0x941   : > { %v6372_v7 = vrot.slane %v6081_v0, 1  ;;  %v5892_v42 = vsel %vm5835_vm6, %v5794_v62, %v13311_v16  ;;  %v5989_v14 = vsel %vm5933_vm8, %v5891_v25, %v13312_v43  ;;  %v13318_v53 = vld [vmem:[#allocation252_spill] sm:$0xff]  ;;  %v13320_v16 = vld [vmem:[#allocation319_spill] sm:$0xff] }
 0x942   : > { %v5547_v52 = vpop.permute.xlu1 %5546  ;;  %v6360_v12 = vsel %vm6162_vm9, %v6357_v22, %v6359_v50  ;;  %v5990_v0 = vsel %vm5933_vm8, %v5892_v42, %v13313_v8  ;;  %v13315_v22 = vld [vmem:[#allocation251_spill] sm:$0xff]  ;;  %v13319_v25 = vld [vmem:[#allocation160_spill] sm:$0xff] }
 0x943   : > { %v6082_v46 = vsel %vm6031_vm7, %v5984_v21, %v5547_v52  ;;  %v5549_v33 = vpop.permute.xlu0 %5548  ;;  %5554 = vrot.lane.b32.xlu0 %v13308_v32, %s7177_s22  ;;  %v5795_v21 = vsel %vm5737_vm5, %v13314_v2, %v13121_v54  ;;  %v13325_v2 = vld [vmem:[#allocation321_spill] sm:$0xff] }
 0x944   : > { %v6373_v28 = vrot.slane %v6082_v46, 1  ;;  %v6083_v59 = vsel %vm6031_vm7, %v5985_v30, %v5549_v33  ;;  %6361 = vrot.lane.b32.xlu1 %v6358_v26, %s7179_s20  ;;  %v5893_v50 = vsel %vm5835_vm6, %v5795_v21, %v13315_v22  ;;  %v5796_v30 = vsel %vm5737_vm5, %v13316_v18, %v13122_v4  ;;  %v13317_v46 = vld [vmem:[#allocation318_spill] sm:$0xff] }
 0x945   : > { %v6375_v29 = vrot.slane %v6083_v59, 1  ;;  %v5991_v33 = vsel %vm5933_vm8, %v5893_v50, %v13317_v46  ;;  %v5894_v62 = vsel %vm5835_vm6, %v5796_v30, %v13318_v53  ;;  %v5797_v4 = vsel %vm5737_vm5, %v13319_v25, %v13125_v31  ;;  %v13326_v18 = vld [vmem:[#allocation162_spill] sm:$0xff]  ;;  %v13327_v46 = vld [vmem:[#allocation163_spill] sm:$0xff]  ;;  %v13329_v53 = vld [vmem:[#allocation256_spill] sm:$0xff] }
 0x946   : > { %v5557_v5 = vpop.permute.xlu1 %5556  ;;  %v6374_v55 = vsel %vm6162_vm9, %v6372_v7, %v6373_v28  ;;  %v5992_v42 = vsel %vm5933_vm8, %v5894_v62, %v13320_v16  ;;  %v5799_v30 = vsel %vm5737_vm5, %v13326_v18, %v13129_v34  ;;  %v13340_v18 = vld [vmem:[#allocation83_spill] sm:$0xff] }
 0x947   : > { %v6087_v17 = vsel %vm6031_vm7, %v5989_v14, %v5557_v5  ;;  %v5559_v48 = vpop.permute.xlu0 %5558  ;;  %6363 = vrot.lane.b32.xlu0 %v6360_v12, %s7179_s20  ;;  %v6376_v54 = vsel %vm6162_vm9, %v6373_v28, %v6375_v29  ;;  %v13321_v28 = vld [vmem:[#allocation161_spill] sm:$0xff] }
 0x948   : > { %v6400_v52 = vrot.slane %v6087_v17, 2  ;;  %v6088_v23 = vsel %vm6031_vm7, %v5990_v0, %v5559_v48  ;;  %6377 = vrot.lane.b32.xlu1 %v6374_v55, %s7180_s29  ;;  %v5798_v14 = vsel %vm5737_vm5, %v13321_v28, %v13126_v19  ;;  %v13322_v29 = vld [vmem:[#allocation253_spill] sm:$0xff]  ;;  %v13323_v55 = vld [vmem:[#allocation254_spill] sm:$0xff]  ;;  %v13324_v0 = vld [vmem:[#allocation320_spill] sm:$0xff] }
 0x949   : > { %v6401_v6 = vrot.slane %v6088_v23, 2  ;;  %v5895_v5 = vsel %vm5835_vm6, %v5797_v4, %v13322_v29  ;;  %v5896_v8 = vsel %vm5835_vm6, %v5798_v14, %v13323_v55  ;;  %v13331_v4 = vld [vmem:[#allocation323_spill] sm:$0xff]  ;;  %v13333_v29 = vld [vmem:[#allocation257_spill] sm:$0xff] }
 0x94a   : > { %v5561_v26 = vpop.permute.xlu1 %5560  ;;  %v5993_v31 = vsel %vm5933_vm8, %v5895_v5, %v13324_v0  ;;  %v5994_v21 = vsel %vm5933_vm8, %v5896_v8, %v13325_v2  ;;  %v13335_v8 = vld [vmem:[#allocation324_spill] sm:$0xff] }
 0x94b   : > { %v6089_v7 = vsel %vm6031_vm7, %v5991_v33, %v5561_v26  ;;  %v5563_v59 = vpop.permute.xlu0 %5562  ;;  %6379 = vrot.lane.b32.xlu0 %v6376_v54, %s7180_s29  ;;  %v6402_v10 = vsel %vm6217_vm10, %v6400_v52, %v6401_v6  ;;  %v13328_v26 = vld [vmem:[#allocation255_spill] sm:$0xff] }
 0x94c   : > { %v6403_v43 = vrot.slane %v6089_v7, 2  ;;  %6405 = vrot.lane.b32.xlu1 %v6402_v10, %s7178_s23  ;;  %v6090_v12 = vsel %vm6031_vm7, %v5992_v42, %v5563_v59  ;;  %v5897_v54 = vsel %vm5835_vm6, %v5799_v30, %v13328_v26  ;;  %v13330_v10 = vld [vmem:[#allocation322_spill] sm:$0xff]  ;;  %v13332_v42 = vld [vmem:[#allocation164_spill] sm:$0xff]  ;;  %v13341_v30 = vld [vmem:[#allocation167_spill] sm:$0xff] }
 0x94d   : > { %v6416_v23 = vrot.slane %v6090_v12, 2  ;;  %v5995_v25 = vsel %vm5933_vm8, %v5897_v54, %v13330_v10  ;;  %v13334_v12 = vld [vmem:[#allocation165_spill] sm:$0xff]  ;;  %v13343_v54 = vld [vmem:[#allocation260_spill] sm:$0xff]  ;;  %v13345_v10 = vld [vmem:[#allocation171_spill] sm:$0xff] }
 0x94e   : > { %v5565_v17 = vpop.permute.xlu1 %5564  ;;  %v6404_v48 = vsel %vm6217_vm10, %v6401_v6, %v6403_v43  ;;  %v5800_v6 = vsel %vm5737_vm5, %v13327_v46, %v13130_v49  ;;  %v5801_v43 = vsel %vm5737_vm5, %v13332_v42, %v13133_v1  ;;  %v5802_v55 = vsel %vm5737_vm5, %v13334_v12, %v13134_v63  ;;  %v13339_v63 = vld [vmem:[#allocation325_spill] sm:$0xff] }
 0x94f   : > { %v6091_v52 = vsel %vm6031_vm7, %v5993_v31, %v5565_v17  ;;  %v5567_v19 = vpop.permute.xlu0 %5566  ;;  %6407 = vrot.lane.b32.xlu0 %v6404_v48, %s7178_s23  ;;  %v5898_v62 = vsel %vm5835_vm6, %v5800_v6, %v13329_v53  ;;  %v5899_v5 = vsel %vm5835_vm6, %v5801_v43, %v13333_v29  ;;  %v13336_v17 = vld [vmem:[#allocation258_spill] sm:$0xff]  ;;  %v5804_v46 = vsel %vm5737_vm5, %v13341_v30, %v13138_v27  ;;  %v13342_v6 = vld [vmem:[#allocation259_spill] sm:$0xff]  ;;  %v13348_v43 = vld [vmem:[#allocation172_spill] sm:$0xff] }
 0x950   : > { %v6417_v22 = vrot.slane %v6091_v52, 2  ;;  %v6092_v50 = vsel %vm6031_vm7, %v5994_v21, %v5567_v19  ;;  %v5996_v34 = vsel %vm5933_vm8, %v5898_v62, %v13331_v4  ;;  %v5997_v0 = vsel %vm5933_vm8, %v5899_v5, %v13335_v8  ;;  %v13337_v19 = vld [vmem:[#allocation82_spill] sm:$0xff]  ;;  %v13346_v4 = vld [vmem:[#allocation327_spill] sm:$0xff] }
 0x951   : > { %v6419_v33 = vrot.slane %v6092_v50, 2  ;;  %v5900_v1 = vsel %vm5835_vm6, %v5802_v55, %v13336_v17  ;;  %v5902_v53 = vsel %vm5835_vm6, %v5804_v46, %v13343_v54  ;;  %v13344_v62 = vld [vmem:[#allocation326_spill] sm:$0xff]  ;;  %v13350_v55 = vld [vmem:[#allocation265_spill] sm:$0xff] }
 0x952   : > { %v5569_v7 = vpop.permute.xlu1 %5568  ;;  %v6418_v59 = vsel %vm6217_vm10, %v6416_v23, %v6417_v22  ;;  %v13338_v23 = vld [vmem:[#allocation166_spill] sm:$0xff]  ;;  %v5998_v50 = vsel %vm5933_vm8, %v5900_v1, %v13339_v63  ;;  %v6000_v27 = vsel %vm5933_vm8, %v5902_v53, %v13346_v4  ;;  %v13353_v63 = vld [vmem:[#allocation173_spill] sm:$0xff] }
 0x953   : > { %v5571_v16 = vpop.permute.xlu0 %5570  ;;  %6421 = vrot.lane.b32.xlu1 %v6418_v59, %s7174_s18  ;;  %v6420_v49 = vsel %vm6217_vm10, %v6417_v22, %v6419_v33  ;;  %v6093_v28 = vsel %vm6031_vm7, %v5995_v25, %v5569_v7  ;;  %v5803_v22 = vsel %vm5737_vm5, %v13338_v23, %v13137_v56  ;;  %v5808_v25 = vsel %vm5737_vm5, %v13345_v10, %v13146_v36  ;;  %v13349_v36 = vld [vmem:[#allocation264_spill] sm:$0xff]  ;;  %v13356_v53 = vld [vmem:[#allocation333_spill] sm:$0xff] }
 0x954   : > { %v6094_v14 = vsel %vm6031_vm7, %v5996_v34, %v5571_v16  ;;  %6423 = vrot.lane.b32.xlu0 %v6420_v49, %s7174_s18  ;;  %v6432_v48 = vrot.slane %v6093_v28, 2  ;;  %v5901_v33 = vsel %vm5835_vm6, %v5803_v22, %v13342_v6  ;;  %v13347_v49 = vld [vmem:[#allocation86_spill] sm:$0xff]  ;;  %v5809_v28 = vsel %vm5737_vm5, %v13348_v43, %v13149_v11  ;;  %v13360_v43 = vld [vmem:[#allocation176_spill] sm:$0xff] }
 0x955   : > { %v6433_v2 = vrot.slane %v6094_v14, 2  ;;  %v5999_v56 = vsel %vm5933_vm8, %v5901_v33, %v13344_v62  ;;  %v5906_v12 = vsel %vm5835_vm6, %v5808_v25, %v13349_v36  ;;  %v5907_v8 = vsel %vm5835_vm6, %v5809_v28, %v13350_v55  ;;  %v13362_v36 = vld [vmem:[#allocation269_spill] sm:$0xff]  ;;  %v13363_v55 = vld [vmem:[#allocation335_spill] sm:$0xff] }
 0x956   : > { %v5573_v31 = vpop.permute.xlu1 %5572  ;;  %v5813_v28 = vsel %vm5737_vm5, %v13360_v43, %v13157_v41 }
 0x957   : > { %v6095_v21 = vsel %vm6031_vm7, %v5997_v0, %v5573_v31  ;;  %v5575_v52 = vpop.permute.xlu0 %5574  ;;  %5580 = vrot.lane.b32.xlu1 %v13337_v19, %s7177_s22  ;;  %v6434_v42 = vsel %vm6217_vm10, %v6432_v48, %v6433_v2  ;;  %v13351_v0 = vld [vmem:[#allocation331_spill] sm:$0xff] }
 0x958   : > { %5582 = vrot.lane.b32.xlu0 %v13340_v18, %s7177_s22  ;;  %v6096_v26 = vsel %vm6031_vm7, %v5998_v50, %v5575_v52  ;;  %v6435_v7 = vrot.slane %v6095_v21, 2  ;;  %v6004_v31 = vsel %vm5933_vm8, %v5906_v12, %v13351_v0  ;;  %v13352_v21 = vld [vmem:[#allocation332_spill] sm:$0xff]  ;;  %v5810_v50 = vsel %vm5737_vm5, %v13353_v63, %v13150_v20 }
 0x959   : > { %v6448_v14 = vrot.slane %v6096_v26, 2  ;;  %v6005_v52 = vsel %vm5933_vm8, %v5907_v8, %v13352_v21  ;;  %v13355_v26 = vld [vmem:[#allocation174_spill] sm:$0xff]  ;;  %v5911_v12 = vsel %vm5835_vm6, %v5813_v28, %v13362_v36 }
 0x95a   : > { %v5577_v59 = vpop.permute.xlu1 %5576  ;;  %v6436_v48 = vsel %vm6217_vm10, %v6433_v2, %v6435_v7  ;;  %v13354_v2 = vld [vmem:[#allocation266_spill] sm:$0xff]  ;;  %v5811_v54 = vsel %vm5737_vm5, %v13355_v26, %v13153_v57  ;;  %v13357_v7 = vld [vmem:[#allocation267_spill] sm:$0xff] }
 0x95b   : > { %v6097_v34 = vsel %vm6031_vm7, %v5999_v56, %v5577_v59  ;;  %v5579_v16 = vpop.permute.xlu0 %5578  ;;  %5584 = vrot.lane.b32.xlu1 %v13347_v49, %s7177_s22  ;;  %v5908_v6 = vsel %vm5835_vm6, %v5810_v50, %v13354_v2  ;;  %v5909_v59 = vsel %vm5835_vm6, %v5811_v54, %v13357_v7  ;;  %v13366_v2 = vld [vmem:[#allocation178_spill] sm:$0xff]  ;;  %v13368_v54 = vld [vmem:[#allocation271_spill] sm:$0xff] }
 0x95c   : > { %v6449_v29 = vrot.slane %v6097_v34, 2  ;;  %v6098_v5 = vsel %vm6031_vm7, %v6000_v27, %v5579_v16  ;;  %6437 = vrot.lane.b32.xlu0 %v6434_v42, %s7179_s20  ;;  %v6006_v62 = vsel %vm5933_vm8, %v5908_v6, %v13356_v53  ;;  %v13358_v27 = vld [vmem:[#allocation175_spill] sm:$0xff]  ;;  %v13359_v34 = vld [vmem:[#allocation334_spill] sm:$0xff]  ;;  %v5815_v6 = vsel %vm5737_vm5, %v13366_v2, %v13161_v3  ;;  %v13386_v2 = vld [vmem:[#allocation340_spill] sm:$0xff] }
 0x95d   : > { %v6451_v17 = vrot.slane %v6098_v5, 2  ;;  %v5812_v57 = vsel %vm5737_vm5, %v13358_v27, %v13154_v37  ;;  %v6007_v16 = vsel %vm5933_vm8, %v5909_v59, %v13359_v34  ;;  %v5913_v53 = vsel %vm5835_vm6, %v5815_v6, %v13368_v54  ;;  %v13370_v7 = vld [vmem:[#allocation338_spill] sm:$0xff]  ;;  %v13374_v34 = vld [vmem:[#allocation272_spill] sm:$0xff] }
 0x95e   : > { %v5587_v1 = vpop.permute.xlu1 %5586  ;;  %v6450_v11 = vsel %vm6217_vm10, %v6448_v14, %v6449_v29  ;;  %v13361_v14 = vld [vmem:[#allocation268_spill] sm:$0xff]  ;;  %v6011_v59 = vsel %vm5933_vm8, %v5913_v53, %v13370_v7  ;;  %v13388_v7 = vld [vmem:[#allocation19_spill] sm:$0xff] }
 0x95f   : > { %v6102_v23 = vsel %vm6031_vm7, %v6004_v31, %v5587_v1  ;;  %v5589_v22 = vpop.permute.xlu0 %5588  ;;  %6439 = vrot.lane.b32.xlu1 %v6436_v48, %s7179_s20  ;;  %v6452_v20 = vsel %vm6217_vm10, %v6449_v29, %v6451_v17  ;;  %v5910_v29 = vsel %vm5835_vm6, %v5812_v57, %v13361_v14  ;;  %v13364_v31 = vld [vmem:[#allocation336_spill] sm:$0xff]  ;;  %v13373_v57 = vld [vmem:[#allocation22_spill] sm:$0xff] }
 0x960   : > { %v6477_v30 = vrot.slane %v6102_v23, 3  ;;  %v6103_v46 = vsel %vm6031_vm7, %v6005_v52, %v5589_v22  ;;  %6453 = vrot.lane.b32.xlu0 %v6450_v11, %s7180_s29  ;;  %v6008_v37 = vsel %vm5933_vm8, %v5910_v29, %v13363_v55  ;;  %v6009_v17 = vsel %vm5933_vm8, %v5911_v12, %v13364_v31  ;;  %v13377_v12 = vld [vmem:[#allocation114_spill] sm:$0xff]  ;;  %v13378_v55 = vld [vmem:[#allocation181_spill] sm:$0xff] }
 0x961   : > { %v6478_v33 = vrot.slane %v6103_v46, 3 }
 0x962   : > { %v5591_v56 = vpop.permute.xlu1 %5590 }
 0x963   : > { %v6104_v10 = vsel %vm6031_vm7, %v6006_v62, %v5591_v56  ;;  %v5593_v25 = vpop.permute.xlu0 %5592  ;;  %6455 = vrot.lane.b32.xlu1 %v6452_v20, %s7180_s29  ;;  %v6479_v4 = vsel %vm6464_vm11, %v6477_v30, %v6478_v33  ;;  %v13365_v30 = vld [vmem:[#allocation177_spill] sm:$0xff] }
 0x964   : > { %v6480_v42 = vrot.slane %v6104_v10, 3  ;;  %6482 = vrot.lane.b32.xlu0 %v6479_v4, %s7178_s23  ;;  %v6105_v5 = vsel %vm6031_vm7, %v6007_v16, %v5593_v25  ;;  %v5814_v46 = vsel %vm5737_vm5, %v13365_v30, %v13158_v45  ;;  %v13369_v56 = vld [vmem:[#allocation337_spill] sm:$0xff]  ;;  %v13371_v45 = vld [vmem:[#allocation20_spill] sm:$0xff]  ;;  %v13372_v25 = vld [vmem:[#allocation179_spill] sm:$0xff] }
 0x965   : > { %v6493_v48 = vrot.slane %v6105_v5, 3  ;;  %v5816_v3 = vsel %vm5737_vm5, %v13372_v25, %v13162_v61  ;;  %v13376_v61 = vld [vmem:[#allocation111_spill] sm:$0xff] }
 0x966   : > { %v5595_v8 = vpop.permute.xlu1 %5594  ;;  %v6481_v0 = vsel %vm6464_vm11, %v6478_v33, %v6480_v42  ;;  %v13367_v33 = vld [vmem:[#allocation270_spill] sm:$0xff]  ;;  %v5914_v16 = vsel %vm5835_vm6, %v5816_v3, %v13374_v34  ;;  %v13375_v42 = vld [vmem:[#allocation339_spill] sm:$0xff] }
 0x967   : > { %v6106_v1 = vsel %vm6031_vm7, %v6008_v37, %v5595_v8  ;;  %v5597_v41 = vpop.permute.xlu0 %5596  ;;  %6484 = vrot.lane.b32.xlu1 %v6481_v0, %s7178_s23  ;;  %v5912_v26 = vsel %vm5835_vm6, %v5814_v46, %v13367_v33  ;;  %v6012_v43 = vsel %vm5933_vm8, %v5914_v16, %v13375_v42  ;;  %v5818_v37 = vsel %vm5737_vm5, %v13378_v55, %v13166_v60  ;;  %v13379_v8 = vld [vmem:[#allocation274_spill] sm:$0xff]  ;;  %v13393_v55 = vld [vmem:[#allocation187_spill] sm:$0xff] }
 0x968   : > { %v6494_v11 = vrot.slane %v6106_v1, 3  ;;  %v6107_v21 = vsel %vm6031_vm7, %v6009_v17, %v5597_v41  ;;  %v6010_v20 = vsel %vm5933_vm8, %v5912_v26, %v13369_v56  ;;  %v5916_v0 = vsel %vm5835_vm6, %v5818_v37, %v13379_v8  ;;  %v13380_v1 = vld [vmem:[#allocation180_spill] sm:$0xff]  ;;  %v13383_v60 = vld [vmem:[#allocation182_spill] sm:$0xff]  ;;  %v13394_v8 = vld [vmem:[#allocation27_spill] sm:$0xff] }
 0x969   : > { %v6496_v52 = vrot.slane %v6107_v21, 3  ;;  %v5817_v41 = vsel %vm5737_vm5, %v13380_v1, %v13165_v13  ;;  %v13385_v13 = vld [vmem:[#allocation275_spill] sm:$0xff]  ;;  %v13387_v33 = vld [vmem:[#allocation342_spill] sm:$0xff]  ;;  %v5824_v37 = vsel %vm5737_vm5, %v13393_v55, %v13040_v44 }
 0x96a   : > { %v5599_v23 = vpop.permute.xlu1 %5598  ;;  %v6495_v22 = vsel %vm6464_vm11, %v6493_v48, %v6494_v11  ;;  %v13381_v48 = vld [vmem:[#allocation341_spill] sm:$0xff]  ;;  %v13396_v1 = vld [vmem:[#allocation279_spill] sm:$0xff] }
 0x96b   : > { %v5601_v63 = vpop.permute.xlu0 %5600  ;;  %6498 = vrot.lane.b32.xlu0 %v6495_v22, %s7174_s18  ;;  %v6497_v50 = vsel %vm6464_vm11, %v6494_v11, %v6496_v52  ;;  %v6108_v4 = vsel %vm6031_vm7, %v6010_v20, %v5599_v23  ;;  %v6014_v11 = vsel %vm5933_vm8, %v5916_v0, %v13381_v48  ;;  %v13382_v52 = vld [vmem:[#allocation115_spill] sm:$0xff]  ;;  %v5819_v22 = vsel %vm5737_vm5, %v13383_v60, %v13169_v40  ;;  %v13397_v48 = vld [vmem:[#allocation280_spill] sm:$0xff]  ;;  %v13399_v60 = vld [vmem:[#allocation346_spill] sm:$0xff] }
 0x96c   : > { %6500 = vrot.lane.b32.xlu1 %v6497_v50, %s7174_s18  ;;  %v6109_v27 = vsel %vm6031_vm7, %v6011_v59, %v5601_v63  ;;  %v6509_v14 = vrot.slane %v6108_v4, 3  ;;  %v13384_v63 = vld [vmem:[#allocation273_spill] sm:$0xff]  ;;  %v5917_v46 = vsel %vm5835_vm6, %v5819_v22, %v13385_v13  ;;  %v13395_v0 = vld [vmem:[#allocation51_spill] sm:$0xff] }
 0x96d   : > { %v6510_v29 = vrot.slane %v6109_v27, 3  ;;  %v5915_v50 = vsel %vm5835_vm6, %v5817_v41, %v13384_v63  ;;  %v6015_v26 = vsel %vm5933_vm8, %v5917_v46, %v13387_v33  ;;  %v13389_v27 = vld [vmem:[#allocation21_spill] sm:$0xff]  ;;  %v13402_v33 = vld [vmem:[#allocation31_spill] sm:$0xff] }
 0x96e   : > { %v5603_v62 = vpop.permute.xlu1 %5602  ;;  %v6013_v6 = vsel %vm5933_vm8, %v5915_v50, %v13386_v2  ;;  %v13400_v50 = vld [vmem:[#allocation347_spill] sm:$0xff]  ;;  %v13401_v2 = vld [vmem:[#allocation29_spill] sm:$0xff] }
 0x96f   : > { %v5605_v10 = vpop.permute.xlu0 %5604  ;;  %5452 = vrot.lane.b32.xlu0 %v13371_v45, %s7177_s22  ;;  %v6110_v5 = vsel %vm6031_vm7, %v6012_v43, %v5603_v62  ;;  %v6511_v23 = vsel %vm6464_vm11, %v6509_v14, %v6510_v29  ;;  %v13390_v43 = vld [vmem:[#allocation30_spill] sm:$0xff] }
 0x970   : > { %5454 = vrot.lane.b32.xlu1 %v13373_v57, %s7177_s22  ;;  %v6512_v31 = vrot.slane %v6110_v5, 3  ;;  %v6111_v54 = vsel %vm6031_vm7, %v6013_v6, %v5605_v10  ;;  %v13392_v5 = vld [vmem:[#allocation186_spill] sm:$0xff] }
 0x971   : > { %v6525_v59 = vrot.slane %v6111_v54, 3  ;;  %v13404_v54 = vld [vmem:[#allocation283_spill] sm:$0xff] }
 0x972   : > { %v5607_v28 = vpop.permute.xlu1 %5606  ;;  %v6513_v40 = vsel %vm6464_vm11, %v6510_v29, %v6512_v31  ;;  %v13391_v29 = vld [vmem:[#allocation32_spill] sm:$0xff]  ;;  %v5825_v31 = vsel %vm5737_vm5, %v13395_v0, %v13179_v47 }
 0x973   : > { %v5609_v36 = vpop.permute.xlu0 %5608  ;;  %5610 = vrot.lane.b32.xlu0 %v13376_v61, %s7177_s22  ;;  %v6112_v30 = vsel %vm6031_vm7, %v6014_v11, %v5607_v28  ;;  %v5922_v11 = vsel %vm5835_vm6, %v5824_v37, %v13397_v48  ;;  %v13410_v37 = vld [vmem:[#allocation282_spill] sm:$0xff]  ;;  %v13413_v48 = vld [vmem:[#allocation348_spill] sm:$0xff] }
 0x974   : > { %5612 = vrot.lane.b32.xlu1 %v13377_v12, %s7177_s22  ;;  %v6526_v62 = vrot.slane %v6112_v30, 3  ;;  %v6113_v56 = vsel %vm6031_vm7, %v6015_v26, %v5609_v36  ;;  %v5823_v36 = vsel %vm5737_vm5, %v13392_v5, %v13177_v35  ;;  %v6020_v44 = vsel %vm5933_vm8, %v5922_v11, %v11324_v15  ;;  %v13403_v15 = vld [vmem:[#allocation52_spill] sm:$0xff]  ;;  %v13407_v5 = vld [vmem:[#allocation33_spill] sm:$0xff] }
 0x975   : > { %v6528_v25 = vrot.slane %v6113_v56, 3  ;;  %v5921_v41 = vsel %vm5835_vm6, %v5823_v36, %v13396_v1  ;;  %v5827_v26 = vsel %vm5737_vm5, %v13403_v15, %v13045_v58  ;;  %v13405_v56 = vld [vmem:[#allocation123_spill] sm:$0xff]  ;;  %v13409_v36 = vld [vmem:[#allocation189_spill] sm:$0xff]  ;;  %v13411_v1 = vld [vmem:[#allocation24_spill] sm:$0xff] }
 0x976   : > { %v5617_v17 = vpop.permute.xlu1 %5616  ;;  %v6527_v10 = vsel %vm6464_vm11, %v6525_v59, %v6526_v62  ;;  %v6019_v22 = vsel %vm5933_vm8, %v5921_v41, %v13399_v60  ;;  %v13406_v59 = vld [vmem:[#allocation188_spill] sm:$0xff]  ;;  %v13408_v58 = vld [vmem:[#allocation127_spill] sm:$0xff] }
 0x977   : > { %v5619_v21 = vpop.permute.xlu0 %5618  ;;  %5614 = vrot.lane.b32.xlu0 %v13382_v52, %s7177_s22  ;;  %v6529_v16 = vsel %vm6464_vm11, %v6526_v62, %v6528_v25  ;;  %v6117_v30 = vsel %vm6031_vm7, %v6019_v22, %v5617_v17  ;;  %v5826_v25 = vsel %vm5737_vm5, %v13406_v59, %v13405_v56  ;;  %v5828_v55 = vsel %vm5737_vm5, %v13409_v36, %v13408_v58  ;;  %v13419_v56 = vld [vmem:[#allocation134_spill] sm:$0xff]  ;;  %v13420_v59 = vld [vmem:[#allocation192_spill] sm:$0xff]  ;;  %v13422_v58 = vld [vmem:[#allocation55_spill] sm:$0xff] }
 0x978   : > { %6514 = vrot.lane.b32.xlu1 %v6511_v23, %s7179_s20  ;;  %v13398_v23 = vld [vmem:[#allocation281_spill] sm:$0xff]  ;;  %v6118_v13 = vsel %vm6031_vm7, %v6020_v44, %v5619_v21  ;;  %v6554_v17 = vrot.slane %v6117_v30, 4  ;;  %v5924_v0 = vsel %vm5835_vm6, %v5826_v25, %v13410_v37  ;;  %v5831_v25 = vsel %vm5737_vm5, %v13420_v59, %v13419_v56  ;;  %v13433_v59 = vld [vmem:[#allocation138_spill] sm:$0xff] }
 0x979   : > { %v5923_v35 = vsel %vm5835_vm6, %v5825_v31, %v13398_v23  ;;  %v6555_v62 = vrot.slane %v6118_v13, 4  ;;  %v6022_v11 = vsel %vm5933_vm8, %v5924_v0, %v13413_v48  ;;  %v13424_v0 = vld [vmem:[#allocation349_spill] sm:$0xff] }
 0x97a   : > { %v5621_v53 = vpop.permute.xlu1 %5620  ;;  %v6021_v47 = vsel %vm5933_vm8, %v5923_v35, %v13400_v50 }
 0x97b   : > { %v5623_v20 = vpop.permute.xlu0 %5622  ;;  %6516 = vrot.lane.b32.xlu0 %v6513_v40, %s7179_s20  ;;  %v6119_v6 = vsel %vm6031_vm7, %v6021_v47, %v5621_v53  ;;  %v5925_v40 = vsel %vm5835_vm6, %v5827_v26, %v13404_v54  ;;  %v6556_v22 = vsel %vm6541_vm12, %v6554_v17, %v6555_v62  ;;  %v13416_v26 = vld [vmem:[#allocation190_spill] sm:$0xff]  ;;  %v13418_v17 = vld [vmem:[#allocation191_spill] sm:$0xff] }
 0x97c   : > { %5458 = vrot.lane.b32.xlu1 %v13388_v7, %s7177_s22  ;;  %v6023_v53 = vsel %vm5933_vm8, %v5925_v40, %v11338_v9  ;;  %v13412_v9 = vld [vmem:[#allocation53_spill] sm:$0xff]  ;;  %v6120_v35 = vsel %vm6031_vm7, %v6022_v11, %v5623_v20  ;;  %v13417_v40 = vld [vmem:[#allocation131_spill] sm:$0xff] }
 0x97d   : > { %v5926_v41 = vsel %vm5835_vm6, %v5828_v55, %v13412_v9  ;;  %v6570_v30 = vrot.slane %v6120_v35, 4  ;;  %v13423_v55 = vld [vmem:[#allocation284_spill] sm:$0xff]  ;;  %v13425_v9 = vld [vmem:[#allocation350_spill] sm:$0xff] }
 0x97e   : > { %v5625_v3 = vpop.permute.xlu1 %5624  ;;  %v6024_v23 = vsel %vm5933_vm8, %v5926_v41, %v11340_v24  ;;  %v5929_v37 = vsel %vm5835_vm6, %v5831_v25, %v13423_v55  ;;  %v13434_v25 = vld [vmem:[#allocation194_spill] sm:$0xff]  ;;  %v13437_v55 = vld [vmem:[#allocation135_spill] sm:$0xff] }
 0x97f   : > { %v5627_v4 = vpop.permute.xlu0 %5626  ;;  %5460 = vrot.lane.b32.xlu0 %v13389_v27, %s7177_s22  ;;  %v6121_v31 = vsel %vm6031_vm7, %v6023_v53, %v5625_v3  ;;  %v13421_v53 = vld [vmem:[#allocation54_spill] sm:$0xff] }
 0x980   : > { %6530 = vrot.lane.b32.xlu1 %v6527_v10, %s7180_s29  ;;  %v6557_v10 = vrot.slane %v6119_v6, 4  ;;  %v6571_v44 = vrot.slane %v6121_v31, 4  ;;  %v6122_v3 = vsel %vm6031_vm7, %v6024_v23, %v5627_v4  ;;  %v13414_v6 = vld [vmem:[#allocation23_spill] sm:$0xff]  ;;  %v13415_v4 = vld [vmem:[#allocation130_spill] sm:$0xff] }
 0x981   : > { %v6573_v13 = vrot.slane %v6122_v3, 4  ;;  %v5829_v54 = vsel %vm5737_vm5, %v13416_v26, %v13415_v4  ;;  %v13426_v23 = vld [vmem:[#allocation351_spill] sm:$0xff] }
 0x982   : > { %v11808_v34 = vpop.permute.xlu1 %5628  ;;  %v6558_v47 = vsel %vm6541_vm12, %v6555_v62, %v6557_v10  ;;  %v6572_v15 = vsel %vm6541_vm12, %v6570_v30, %v6571_v44  ;;  %v5830_v62 = vsel %vm5737_vm5, %v13418_v17, %v13417_v40  ;;  %v5927_v10 = vsel %vm5835_vm6, %v5829_v54, %v13421_v53  ;;  %v13428_v40 = vld [vmem:[#allocation42_spill] sm:$0xff]  ;;  %v13431_v17 = vld [vmem:[#allocation116_spill] sm:$0xff] }
 0x983   : > { %v11811_v42 = vpop.permute.xlu0 %5630  ;;  %6532 = vrot.lane.b32.xlu0 %v6529_v16, %s7180_s29  ;;  %v5928_v36 = vsel %vm5835_vm6, %v5830_v62, %v13422_v58  ;;  %v6025_v31 = vsel %vm5933_vm8, %v5927_v10, %v13424_v0  ;;  %v6574_v11 = vsel %vm6541_vm12, %v6571_v44, %v6573_v13  ;;  %v6027_v35 = vsel %vm5933_vm8, %v5929_v37, %v13426_v23  ;;  %v13435_v10 = vld [vmem:[#allocation48_spill] sm:$0xff]  ;;  %v13438_v37 = vld [vmem:[#allocation193_spill] sm:$0xff] }
 0x984   : > { %5470 = vrot.lane.b32.xlu1 %v13390_v43, %s7177_s22  ;;  %v6026_v41 = vsel %vm5933_vm8, %v5928_v36, %v13425_v9  ;;  %v5833_v53 = vsel %vm5737_vm5, %v13434_v25, %v13433_v59  ;;  %v13436_v58 = vld [vmem:[#allocation136_spill] sm:$0xff]  ;;  %v5832_v0 = vsel %vm5737_vm5, %v13438_v37, %v13437_v55  ;;  %v13440_v23 = vld [vmem:[#allocation49_spill] sm:$0xff]  ;;  %v13444_v59 = vld [vmem:[#allocation139_spill] sm:$0xff] }
 0x985   : > { %v6124_v3 = vsel %vm6031_vm7, %v6026_v41, %v11811_v42  ;;  %v13430_v42 = vld [vmem:[#allocation47_spill] sm:$0xff]  ;;  %v5775_v36 = vsel %vm5737_vm5, %v13436_v58, %v13435_v10  ;;  %v13447_v58 = vld [vmem:[#allocation352_spill] sm:$0xff] }
 0x986   : > { %v11816_v28 = vpop.permute.xlu1 %5632  ;;  %v6587_v44 = vrot.slane %v6124_v3, 4  ;;  %v5765_v62 = vsel %vm5737_vm5, %v13431_v17, %v13430_v42  ;;  %v13445_v25 = vld [vmem:[#allocation195_spill] sm:$0xff] }
 0x987   : > { %v11818_v14 = vpop.permute.xlu0 %5634  ;;  %5472 = vrot.lane.b32.xlu0 %v13391_v29, %s7177_s22  ;;  %v6125_v30 = vsel %vm6031_vm7, %v6027_v35, %v11816_v28  ;;  %v13432_v28 = vld [vmem:[#allocation117_spill] sm:$0xff] }
 0x988   : > { %5474 = vrot.lane.b32.xlu1 %v13394_v8, %s7177_s22  ;;  %v6589_v26 = vrot.slane %v6125_v30, 4  ;;  %v5766_v56 = vsel %vm5737_vm5, %v13432_v28, %v9894_v39  ;;  %v13441_v39 = vld [vmem:[#allocation137_spill] sm:$0xff] }
 0x989   : > { %v5776_v35 = vsel %vm5737_vm5, %v13441_v39, %v13440_v23  ;;  %v13443_v30 = vld [vmem:[#allocation353_spill] sm:$0xff]  ;;  %v13452_v39 = vld [vmem:[#allocation224_spill] sm:$0xff] }
 0x98a   : > { %v11843_v63 = vpop.permute.xlu1 %5636  ;;  %v6590_v28 = vsel %vm6541_vm12, %v6587_v44, %v6589_v26 }
 0x98b   : > { %v11849_v46 = vpop.permute.xlu0 %5638  ;;  %5476 = vrot.lane.b32.xlu0 %v13401_v2, %s7177_s22 }
 0x98c   : > { %5478 = vrot.lane.b32.xlu1 %v13402_v33, %s7177_s22 }
 0x98e   : > { %v11861_v21 = vpop.permute.xlu1 %5500 }
 0x98f   : > { %v11868_v16 = vpop.permute.xlu0 %5502  ;;  %5480 = vrot.lane.b32.xlu0 %v13407_v5, %s7177_s22 }
 0x990   : > { %5456 = vrot.lane.b32.xlu1 %v13411_v1, %s7177_s22 }
 0x992   : > { %v11887_v60 = vpop.permute.xlu1 %6271 }
 0x993   : > { %v11891_v50 = vpop.permute.xlu0 %6273  ;;  %6559 = vrot.lane.b32.xlu0 %v6556_v22, %s7178_s23  ;;  %v6123_v22 = vsel %vm6031_vm7, %v6025_v31, %v11808_v34  ;;  %v13429_v34 = vld [vmem:[#allocation43_spill] sm:$0xff]  ;;  %v13439_v31 = vld [vmem:[#allocation286_spill] sm:$0xff] }
 0x994   : > { %6561 = vrot.lane.b32.xlu1 %v6558_v47, %s7178_s23  ;;  %v6586_v4 = vrot.slane %v6123_v22, 4  ;;  %v5931_v9 = vsel %vm5835_vm6, %v5833_v53, %v13439_v31  ;;  %v13442_v22 = vld [vmem:[#allocation285_spill] sm:$0xff]  ;;  %v5834_v53 = vsel %vm5737_vm5, %v13445_v25, %v13444_v59  ;;  %v13449_v31 = vld [vmem:[#allocation140_spill] sm:$0xff] }
 0x995   : > { %v5930_v3 = vsel %vm5835_vm6, %v5832_v0, %v13442_v22  ;;  %v6029_v42 = vsel %vm5933_vm8, %v5931_v9, %v13443_v30  ;;  %v13448_v0 = vld [vmem:[#allocation50_spill] sm:$0xff]  ;;  %v5864_v22 = vsel %vm5835_vm6, %v5766_v56, %v13452_v39  ;;  %v13455_v25 = vld [vmem:[#allocation232_spill] sm:$0xff] }
 0x996   : > { %v11896_v24 = vpop.permute.xlu1 %6281  ;;  %v6028_v55 = vsel %vm5933_vm8, %v5930_v3, %v13447_v58  ;;  %v6127_v37 = vsel %vm6031_vm7, %v6029_v42, %v11843_v63  ;;  %v5777_v9 = vsel %vm5737_vm5, %v13449_v31, %v13448_v0  ;;  %v13453_v3 = vld [vmem:[#allocation231_spill] sm:$0xff]  ;;  %v13454_v30 = vld [vmem:[#allocation354_spill] sm:$0xff]  ;;  %v13456_v56 = vld [vmem:[#allocation44_spill] sm:$0xff] }
 0x997   : > { %v11898_v20 = vpop.permute.xlu0 %6283  ;;  %5462 = vrot.lane.b32.xlu0 %v13414_v6, %s7177_s22  ;;  %v5873_v63 = vsel %vm5835_vm6, %v5775_v36, %v13453_v3  ;;  %v13457_v36 = vld [vmem:[#allocation292_spill] sm:$0xff] }
 0x998   : > { %6575 = vrot.lane.b32.xlu1 %v6572_v15, %s7174_s18  ;;  %v13427_v15 = vld [vmem:[#allocation41_spill] sm:$0xff]  ;;  %v5962_v58 = vsel %vm5933_vm8, %v5864_v22, %v13457_v36 }
 0x99a   : > { %v5521_v48 = vpop.permute.xlu1 %5520 }
 0x99b   : > { %v5523_v47 = vpop.permute.xlu0 %5522  ;;  %6577 = vrot.lane.b32.xlu0 %v6574_v11, %s7174_s18  ;;  %v6588_v11 = vsel %vm6541_vm12, %v6586_v4, %v6587_v44  ;;  %v13446_v4 = vld [vmem:[#allocation223_spill] sm:$0xff] }
 0x99c   : > { %5488 = vrot.lane.b32.xlu1 %v13427_v15, %s7177_s22  ;;  %v5863_v10 = vsel %vm5835_vm6, %v5765_v62, %v13446_v4  ;;  %v13450_v44 = vld [vmem:[#allocation59_spill] sm:$0xff]  ;;  %v6126_v62 = vsel %vm6031_vm7, %v6028_v55, %v11818_v14  ;;  %v6603_v4 = vrot.slane %v6127_v37, 4  ;;  %v13458_v55 = vld [vmem:[#allocation298_spill] sm:$0xff] }
 0x99d   : > { %v5932_v26 = vsel %vm5835_vm6, %v5834_v53, %v13450_v44  ;;  %v5874_v53 = vsel %vm5835_vm6, %v5776_v35, %v13455_v25  ;;  %v5971_v0 = vsel %vm5933_vm8, %v5873_v63, %v13458_v55  ;;  %v6602_v44 = vrot.slane %v6126_v62, 4  ;;  %v13460_v35 = vld [vmem:[#allocation45_spill] sm:$0xff]  ;;  %v13462_v63 = vld [vmem:[#allocation300_spill] sm:$0xff] }
 0x99e   : > { %v5525_v13 = vpop.permute.xlu1 %5524  ;;  %v6030_v42 = vsel %vm5933_vm8, %v5932_v26, %v13454_v30  ;;  %v6069_v37 = vsel %vm6031_vm7, %v5971_v0, %v5521_v48 }
 0x99f   : > { %v6292_v54 = vpop.permute.xlu0 %6291  ;;  %5490 = vrot.lane.b32.xlu0 %v13428_v40, %s7177_s22  ;;  %v6128_v14 = vsel %vm6031_vm7, %v6030_v42, %v11849_v46  ;;  %v6060_v46 = vsel %vm6031_vm7, %v5962_v58, %v11868_v16  ;;  %v13463_v16 = vld [vmem:[#allocation46_spill] sm:$0xff] }
 0x9a0   : > { %5492 = vrot.lane.b32.xlu1 %v13429_v34, %s7177_s22  ;;  %v6605_v22 = vrot.slane %v6128_v14, 4  ;;  %v6278_v3 = vadd.f32 %v11891_v50, %v6060_v46 }
 0x9a2   : > { %v6294_v41 = vpop.permute.xlu1 %6293  ;;  %v6288_v48 = vadd.f32 %v11898_v20, %v6278_v3  ;;  %v13464_v20 = vld [vmem:[#allocation16_spill] sm:$0xff]  ;;  %v13473_v3 = vld [vmem:[#allocation155_spill] sm:$0xff] }
 0x9a3   : > { %v6302_v17 = vpop.permute.xlu0 %6301  ;;  %6591 = vrot.lane.b32.xlu0 %v6588_v11, %s7179_s20  ;;  %v13451_v11 = vld [vmem:[#allocation291_spill] sm:$0xff] }
 0x9a4   : > { %6593 = vrot.lane.b32.xlu1 %v6590_v28, %s7179_s20  ;;  %v5961_v23 = vsel %vm5933_vm8, %v5863_v10, %v13451_v11  ;;  %s298_s20 = sand.u32 1, %s7154_s25  }
 0x9a5   : > { %v6059_v28 = vsel %vm6031_vm7, %v5961_v23, %v11861_v21  ;;  %v13459_v21 = vld [vmem:[#allocation299_spill] sm:$0xff]  ;;  %v13461_v23 = vld [vmem:[#allocation233_spill] sm:$0xff] }
 0x9a6   : > { %v6304_v59 = vpop.permute.xlu1 %6303  ;;  %v6277_v10 = vadd.f32 %v11887_v60, %v6059_v28  ;;  %v5972_v31 = vsel %vm5933_vm8, %v5874_v53, %v13459_v21  ;;  %v5875_v39 = vsel %vm5835_vm6, %v5777_v9, %v13461_v23  ;;  %v6298_v53 = vadd.f32 %v6294_v41, %v6288_v48  ;;  %v13466_v41 = vld [vmem:[#allocation154_spill] sm:$0xff] }
 0x9a7   : > { %5494 = vrot.lane.b32.xlu0 %v13456_v56, %s7177_s22  ;;  %v6070_v26 = vsel %vm6031_vm7, %v5972_v31, %v5523_v47  ;;  %v6330_v11 = vpop.permute.xlu0 %6329  ;;  %v5973_v30 = vsel %vm5933_vm8, %v5875_v39, %v13462_v63  ;;  %v6312_v47 = vrot.slane %v6069_v37, 1  ;;  %v5791_v21 = vsel %vm5737_vm5, %v13466_v41, %v13301_v51  ;;  %v13467_v31 = vld [vmem:[#allocation246_spill] sm:$0xff]  ;;  %v13469_v37 = vld [vmem:[#allocation17_spill] sm:$0xff] }
 0x9a8   : > { %5496 = vrot.lane.b32.xlu1 %v13460_v35, %s7177_s22  ;;  %v6287_v60 = vadd.f32 %v11896_v24, %v6277_v10  ;;  %v6604_v24 = vsel %vm6541_vm12, %v6602_v44, %v6603_v4  ;;  %v6313_v28 = vrot.slane %v6070_v26, 1  ;;  %v6071_v25 = vsel %vm6031_vm7, %v5973_v30, %v5525_v13  ;;  %v13465_v13 = vld [vmem:[#allocation153_spill] sm:$0xff] }
 0x9a9   : > { %v6606_v10 = vsel %vm6541_vm12, %v6603_v4, %v6605_v22  ;;  %v6308_v36 = vadd.f32 %v6304_v59, %v6298_v53  ;;  %v13468_v59 = vld [vmem:[#allocation247_spill] sm:$0xff]  ;;  %v13470_v26 = vld [vmem:[#allocation313_spill] sm:$0xff]  ;;  %v5792_v63 = vsel %vm5737_vm5, %v13473_v3, %v13308_v32 }
 0x9aa   : > { %v6332_v62 = vpop.permute.xlu1 %6331  ;;  %v6297_v42 = vadd.f32 %v6292_v54, %v6287_v60  ;;  %v6315_v54 = vrot.slane %v6071_v25, 1  ;;  %v6314_v58 = vsel %vm6162_vm9, %v6312_v47, %v6313_v28  ;;  %v5889_v46 = vsel %vm5835_vm6, %v5791_v21, %v13468_v59  ;;  %v13472_v51 = vld [vmem:[#allocation25_spill] sm:$0xff]  ;;  %v13474_v47 = vld [vmem:[#allocation248_spill] sm:$0xff] }
 0x9ab   : > { %5498 = vrot.lane.b32.xlu0 %v13463_v16, %s7177_s22 }
 0x9ac   : > { %6607 = vrot.lane.b32.xlu1 %v6604_v24, %s7180_s29  ;;  %v6307_v9 = vadd.f32 %v6302_v17, %v6297_v42  ;;  %v5790_v17 = vsel %vm5737_vm5, %v13465_v13, %v13298_v38  ;;  %v6316_v60 = vsel %vm6162_vm9, %v6313_v28, %v6315_v54  ;;  %v13471_v38 = vld [vmem:[#allocation314_spill] sm:$0xff]  ;;  %v5890_v28 = vsel %vm5835_vm6, %v5792_v63, %v13474_v47 }
 0x9ad   : > { %v6346_v50 = vpop.permute.xlu0 %6345  ;;  %v5888_v44 = vsel %vm5835_vm6, %v5790_v17, %v13467_v31  ;;  %v5987_v39 = vsel %vm5933_vm8, %v5889_v46, %v13471_v38  ;;  %v6320_v22 = vadd.f32 %v6316_v60, %v6308_v36  ;;  %v13476_v54 = vld [vmem:[#allocation26_spill] sm:$0xff] }
 0x9ae   : > { %v6348_v14 = vpop.permute.xlu1 %6347  ;;  %v6319_v55 = vadd.f32 %v6314_v58, %v6307_v9  ;;  %v5986_v23 = vsel %vm5933_vm8, %v5888_v44, %v13470_v26  ;;  %v13475_v9 = vld [vmem:[#allocation315_spill] sm:$0xff] }
 0x9af   : > { %6609 = vrot.lane.b32.xlu0 %v6606_v10, %s7180_s29  ;;  %v5988_v53 = vsel %vm5933_vm8, %v5890_v28, %v13475_v9  ;;  %v6336_v36 = vadd.f32 %v6332_v62, %v6320_v22  ;;  %s6920_s29 = sshll.u32 %s298_s20, 5 }
 0x9b0   : > { %5446 = vrot.lane.b32.xlu1 %v13464_v20, %s7177_s22  ;;  %v6335_v30 = vadd.f32 %v6330_v11, %v6319_v55  ;;  %v13477_v55 = vld [vmem:[#allocation28_spill] sm:$0xff] }
 0x9b1   : > { %v5551_v0 = vpop.permute.xlu0 %5550  ;;  %v6352_v17 = vadd.f32 %v6348_v14, %v6336_v36 }
 0x9b2   : > { %v5553_v4 = vpop.permute.xlu1 %5552  ;;  %v6084_v42 = vsel %vm6031_vm7, %v5986_v23, %v5551_v0  ;;  %v6351_v10 = vadd.f32 %v6346_v50, %v6335_v30 }
 0x9b3   : > { %5448 = vrot.lane.b32.xlu0 %v13469_v37, %s7177_s22  ;;  %v6085_v24 = vsel %vm6031_vm7, %v5987_v39, %v5553_v4  ;;  %v6388_v58 = vrot.slane %v6084_v42, 2 }
 0x9b4   : > { %5464 = vrot.lane.b32.xlu1 %v13472_v51, %s7177_s22  ;;  %v6389_v32 = vrot.slane %v6085_v24, 2 }
 0x9b5   : > { %v5555_v48 = vpop.permute.xlu0 %5554 }
 0x9b6   : > { %v6362_v25 = vpop.permute.xlu1 %6361  ;;  %v6086_v11 = vsel %vm6031_vm7, %v5988_v53, %v5555_v48  ;;  %v6390_v50 = vsel %vm6217_vm10, %v6388_v58, %v6389_v32  ;;  %v13478_v58 = vld [vmem:[#allocation68_spill] sm:$0xff] }
 0x9b7   : > { %5466 = vrot.lane.b32.xlu0 %v13476_v54, %s7177_s22  ;;  %v6367_v0 = vadd.f32 %v6362_v25, %v6351_v10  ;;  %v6391_v21 = vrot.slane %v6086_v11, 2  ;;  %v13479_v11 = vld [vmem:[#allocation69_spill] sm:$0xff] }
 0x9b8   : > { %5468 = vrot.lane.b32.xlu1 %v13477_v55, %s7177_s22 }
 0x9b9   : > { %v6364_v13 = vpop.permute.xlu0 %6363  ;;  %v6392_v26 = vsel %vm6217_vm10, %v6389_v32, %v6391_v21  ;;  %v5741_v32 = vsel %vm5737_vm5, %v13478_v58, %v13371_v45 }
 0x9ba   : > { %v6378_v41 = vpop.permute.xlu1 %6377  ;;  %v6368_v31 = vadd.f32 %v6364_v13, %v6352_v17  ;;  %v13480_v13 = vld [vmem:[#allocation199_spill] sm:$0xff] }
 0x9bb   : > { %v6383_v4 = vadd.f32 %v6378_v41, %v6367_v0  ;;  %v5742_v0 = vsel %vm5737_vm5, %v13479_v11, %v13373_v57  ;;  %v5839_v17 = vsel %vm5835_vm6, %v5741_v32, %v13480_v13  ;;  %v13481_v41 = vld [vmem:[#allocation200_spill] sm:$0xff]  ;;  %v13486_v32 = vld [vmem:[#allocation71_spill] sm:$0xff] }
 0x9bc   : > { %v5840_v21 = vsel %vm5835_vm6, %v5742_v0, %v13481_v41  ;;  %v13487_v13 = vld [vmem:[#allocation76_spill] sm:$0xff] }
 0x9bd   : > { %v6380_v44 = vpop.permute.xlu0 %6379  ;;  %v6395_v59 = vadd.f32 %v6390_v50, %v6383_v4  ;;  %v13482_v4 = vld [vmem:[#allocation66_spill] sm:$0xff] }
 0x9be   : > { %v6384_v46 = vadd.f32 %v6380_v44, %v6368_v31  ;;  %v6406_v62 = vpop.permute.xlu1 %6405  ;;  %v5937_v31 = vsel %vm5933_vm8, %v5839_v17, %v13482_v4  ;;  %v13483_v44 = vld [vmem:[#allocation67_spill] sm:$0xff]  ;;  %v5745_v17 = vsel %vm5737_vm5, %v13487_v13, %v13389_v27  ;;  %v13491_v27 = vld [vmem:[#allocation85_spill] sm:$0xff]  ;;  %v13495_v13 = vld [vmem:[#allocation38_spill] sm:$0xff] }
 0x9bf   : > { %v6411_v60 = vadd.f32 %v6406_v62, %v6395_v59  ;;  %v5938_v59 = vsel %vm5933_vm8, %v5840_v21, %v13483_v44  ;;  %v13488_v21 = vld [vmem:[#allocation203_spill] sm:$0xff] }
 0x9c0   : > { %v6396_v23 = vadd.f32 %v6392_v26, %v6384_v46  ;;  %v5843_v4 = vsel %vm5835_vm6, %v5745_v17, %v13488_v21  ;;  %v13496_v17 = vld [vmem:[#allocation209_spill] sm:$0xff]  ;;  %v13497_v21 = vld [vmem:[#allocation39_spill] sm:$0xff] }
 0x9c1   : > { %v6408_v38 = vpop.permute.xlu0 %6407 }
 0x9c2   : > { %v6412_v39 = vadd.f32 %v6408_v38, %v6396_v23  ;;  %v13484_v38 = vld [vmem:[#allocation73_spill] sm:$0xff] }
 0x9c5   : > { %v6422_v22 = vpop.permute.xlu1 %6421 }
 0x9c6   : > { %v12064_v3 = vadd.f32 %v6422_v22, %v6411_v60  ;;  %v6424_v14 = vpop.permute.xlu0 %6423  ;;  %v13485_v22 = vld [vmem:[#allocation202_spill] sm:$0xff] }
 0x9c7   : > { %v12066_v63 = vadd.f32 %v6424_v14, %v6412_v39  ;;  %v5744_v39 = vsel %vm5737_vm5, %v13484_v38, %v13388_v7  ;;  %v13489_v7 = vld [vmem:[#allocation74_spill] sm:$0xff]  ;;  %v13492_v38 = vld [vmem:[#allocation208_spill] sm:$0xff] }
 0x9c8   : > { %v5842_v14 = vsel %vm5835_vm6, %v5744_v39, %v13485_v22 }
 0x9c9   : > { %v12068_v30 = vpop.permute.xlu1 %5580  ;;  %v5940_v11 = vsel %vm5933_vm8, %v5842_v14, %v13486_v32  ;;  %v13493_v14 = vld [vmem:[#allocation88_spill] sm:$0xff] }
 0x9ca   : > { %v12070_v42 = vpop.permute.xlu0 %5582  ;;  %v5751_v32 = vsel %vm5737_vm5, %v13493_v14, %v13391_v29 }
 0x9cd   : > { %v12072_v24 = vpop.permute.xlu1 %5584 }
 0x9ce   : > { %v12074_v48 = vpop.permute.xlu0 %6437 }
 0x9d1   : > { %v12076_v47 = vpop.permute.xlu1 %6439 }
 0x9d2   : > { %v12078_v28 = vpop.permute.xlu0 %6453 }
 0x9d5   : > { %v12080_v25 = vpop.permute.xlu1 %6455 }
 0x9d6   : > { %v12082_v9 = vpop.permute.xlu0 %6482 }
 0x9d9   : > { %v12084_v53 = vpop.permute.xlu1 %6484 }
 0x9dd   : > { %v12086_v10 = vpop.permute.xlu0 %6498 }
 0x9de   : > { %v12088_v36 = vpop.permute.xlu1 %6500 }
 0x9e1   : > { %v5453_v50 = vpop.permute.xlu0 %5452 }
 0x9e2   : > { %v6035_v46 = vsel %vm6031_vm7, %v5937_v31, %v5453_v50  ;;  %v5455_v45 = vpop.permute.xlu1 %5454  ;;  %v5941_v31 = vsel %vm5933_vm8, %v5843_v4, %v13489_v7  ;;  %v13498_v4 = vld [vmem:[#allocation87_spill] sm:$0xff] }
 0x9e3   : > { %v6036_v62 = vsel %vm6031_vm7, %v5938_v59, %v5455_v45  ;;  %6132 = vrot.lane.b32.xlu0 %v6035_v46, %s7178_s23  ;;  %v13490_v46 = vld [vmem:[#allocation18_spill] sm:$0xff]  ;;  %v5750_v45 = vsel %vm5737_vm5, %v13491_v27, %v13390_v43 }
 0x9e4   : > { %6134 = vrot.lane.b32.xlu1 %v6036_v62, %s7178_s23  ;;  %v5848_v39 = vsel %vm5835_vm6, %v5750_v45, %v13492_v38  ;;  %v13499_v45 = vld [vmem:[#allocation40_spill] sm:$0xff] }
 0x9e5   : > { %v12108_v57 = vpop.permute.xlu0 %5610  ;;  %v13500_v38 = vld [vmem:[#allocation72_spill] sm:$0xff] }
 0x9e6   : > { %v12110_v60 = vpop.permute.xlu1 %5612 }
 0x9e9   : > { %v12112_v26 = vpop.permute.xlu0 %5614 }
 0x9ea   : > { %v12114_v23 = vpop.permute.xlu1 %6514 }
 0x9ed   : > { %v12121_v58 = vpop.permute.xlu0 %6516 }
 0x9ee   : > { %v5459_v0 = vpop.permute.xlu1 %5458 }
 0x9ef   : > { %v6038_v41 = vsel %vm6031_vm7, %v5940_v11, %v5459_v0  ;;  %v13494_v11 = vld [vmem:[#allocation288_spill] sm:$0xff] }
 0x9f0   : > { %6147 = vrot.lane.b32.xlu0 %v6038_v41, %s7174_s18  ;;  %v5946_v0 = vsel %vm5933_vm8, %v5848_v39, %v13494_v11  ;;  %v5849_v41 = vsel %vm5835_vm6, %v5751_v32, %v13496_v17  ;;  %v5743_v39 = vsel %vm5737_vm5, %v13500_v38, %v13411_v1  ;;  %v13502_v32 = vld [vmem:[#allocation168_spill] sm:$0xff] }
 0x9f1   : > { %v5461_v50 = vpop.permute.xlu0 %5460  ;;  %v5947_v7 = vsel %vm5933_vm8, %v5849_v41, %v13498_v4  ;;  %v5805_v11 = vsel %vm5737_vm5, %v13502_v32, %v13337_v19  ;;  %v13504_v41 = vld [vmem:[#allocation93_spill] sm:$0xff]  ;;  %v13509_v32 = vld [vmem:[#allocation328_spill] sm:$0xff] }
 0x9f2   : > { %v6039_v44 = vsel %vm6031_vm7, %v5941_v31, %v5461_v50  ;;  %v12135_v59 = vpop.permute.xlu1 %6530  ;;  %v13505_v4 = vld [vmem:[#allocation261_spill] sm:$0xff] }
 0x9f3   : > { %6149 = vrot.lane.b32.xlu1 %v6039_v44, %s7174_s18  ;;  %v13507_v19 = vld [vmem:[#allocation169_spill] sm:$0xff] }
 0x9f4   : > { %5450 = vrot.lane.b32.xlu0 %v13490_v46, %s7177_s22  ;;  %v5806_v38 = vsel %vm5737_vm5, %v13507_v19, %v13340_v18  ;;  %v13512_v46 = vld [vmem:[#allocation289_spill] sm:$0xff] }
 0x9f5   : > { %v12143_v62 = vpop.permute.xlu0 %6532 }
 0x9f6   : > { %v5471_v22 = vpop.permute.xlu1 %5470 }
 0x9f7   : > { %5482 = vrot.lane.b32.xlu1 %v13495_v13, %s7177_s22  ;;  %v6044_v43 = vsel %vm6031_vm7, %v5946_v0, %v5471_v22  ;;  %v13501_v22 = vld [vmem:[#allocation89_spill] sm:$0xff]  ;;  %v13503_v0 = vld [vmem:[#allocation92_spill] sm:$0xff] }
 0x9f8   : > { %5484 = vrot.lane.b32.xlu0 %v13497_v21, %s7177_s22  ;;  %v6177_v44 = vrot.slane %v6044_v43, 1  ;;  %v5752_v14 = vsel %vm5737_vm5, %v13501_v22, %v13394_v8  ;;  %v5753_v17 = vsel %vm5737_vm5, %v13503_v0, %v13401_v2  ;;  %v5754_v43 = vsel %vm5737_vm5, %v13504_v41, %v13402_v33  ;;  %v13506_v8 = vld [vmem:[#allocation96_spill] sm:$0xff]  ;;  %v13508_v22 = vld [vmem:[#allocation210_spill] sm:$0xff] }
 0x9f9   : > { %v5473_v31 = vpop.permute.xlu0 %5472  ;;  %v5850_v2 = vsel %vm5835_vm6, %v5752_v14, %v13508_v22  ;;  %v13513_v14 = vld [vmem:[#allocation201_spill] sm:$0xff] }
 0x9fa   : > { %v6045_v29 = vsel %vm6031_vm7, %v5947_v7, %v5473_v31  ;;  %v5475_v50 = vpop.permute.xlu1 %5474  ;;  %v5903_v7 = vsel %vm5835_vm6, %v5805_v11, %v13505_v4  ;;  %v13510_v11 = vld [vmem:[#allocation170_spill] sm:$0xff]  ;;  %v13515_v22 = vld [vmem:[#allocation329_spill] sm:$0xff] }
 0x9fb   : > { %v6178_v27 = vrot.slane %v6045_v29, 1  ;;  %5486 = vrot.lane.b32.xlu1 %v13499_v45, %s7177_s22  ;;  %v5755_v29 = vsel %vm5737_vm5, %v13506_v8, %v13407_v5  ;;  %v6001_v33 = vsel %vm5933_vm8, %v5903_v7, %v13509_v32  ;;  %v5807_v41 = vsel %vm5737_vm5, %v13510_v11, %v13347_v49  ;;  %v13514_v7 = vld [vmem:[#allocation211_spill] sm:$0xff]  ;;  %s7188_s22 = smov 111  }
 0x9fc   : > { %v5948_v5 = vsel %vm5933_vm8, %v5850_v2, %v13512_v46  ;;  %v6099_v18 = vsel %vm6031_vm7, %v6001_v33, %v12068_v30  ;;  %v5841_v8 = vsel %vm5835_vm6, %v5743_v39, %v13513_v14  ;;  %v5851_v19 = vsel %vm5835_vm6, %v5753_v17, %v13514_v7  ;;  %v13517_v2 = vld [vmem:[#allocation263_spill] sm:$0xff]  ;;  %v13518_v33 = vld [vmem:[#allocation70_spill] sm:$0xff] }
 0x9fd   : > { %v5477_v1 = vpop.permute.xlu0 %5476  ;;  %v6179_v31 = vsel %vm6162_vm9, %v6177_v44, %v6178_v27  ;;  %v13511_v44 = vld [vmem:[#allocation262_spill] sm:$0xff]  ;;  %v12209_v32 = vsel %vm6031_vm7, %v5948_v5, %v5475_v50  ;;  %v5905_v30 = vsel %vm5835_vm6, %v5807_v41, %v13517_v2 }
 0x9fe   : > { %v5479_v0 = vpop.permute.xlu1 %5478  ;;  %v5904_v4 = vsel %vm5835_vm6, %v5806_v38, %v13511_v44  ;;  %v13516_v38 = vld [vmem:[#allocation212_spill] sm:$0xff]  ;;  %v13519_v17 = vld [vmem:[#allocation90_spill] sm:$0xff] }
 0x9ff   : > { %6182 = vrot.lane.b32.xlu1 %v6179_v31, %s7178_s23  ;;  %v6002_v49 = vsel %vm5933_vm8, %v5904_v4, %v13515_v22  ;;  %v5852_v46 = vsel %vm5835_vm6, %v5754_v43, %v13516_v38  ;;  %v5939_v31 = vsel %vm5933_vm8, %v5841_v8, %v13518_v33  ;;  %v5949_v44 = vsel %vm5933_vm8, %v5851_v19, %v13519_v17  ;;  %v13520_v4 = vld [vmem:[#allocation91_spill] sm:$0xff]  ;;  %v13521_v5 = vld [vmem:[#allocation330_spill] sm:$0xff] }
 0xa00   : > { %v6100_v39 = vsel %vm6031_vm7, %v6002_v49, %v12070_v42  ;;  %v5950_v50 = vsel %vm5933_vm8, %v5852_v46, %v13520_v4  ;;  %v6003_v14 = vsel %vm5933_vm8, %v5905_v30, %v13521_v5  ;;  %v6465_v43 = vrot.slane %v6099_v18, 3  ;;  %v13522_v18 = vld [vmem:[#allocation213_spill] sm:$0xff]  ;;  %v13524_v30 = vld [vmem:[#allocation94_spill] sm:$0xff]  ;;  %v13527_v5 = vld [vmem:[#allocation104_spill] sm:$0xff] }
 0xa01   : > { %v5481_v11 = vpop.permute.xlu0 %5480  ;;  %v6101_v41 = vsel %vm6031_vm7, %v6003_v14, %v12072_v24  ;;  %v6443_v8 = vadd.f32 %v12074_v48, %v12064_v3  ;;  %v6180_v42 = vrot.slane %v12209_v32, 1  ;;  %v6466_v49 = vrot.slane %v6100_v39, 3  ;;  %v13523_v48 = vld [vmem:[#allocation77_spill] sm:$0xff]  ;;  %v13525_v39 = vld [vmem:[#allocation204_spill] sm:$0xff] }
 0xa02   : > { %v5457_v7 = vpop.permute.xlu1 %5456  ;;  %v6444_v19 = vadd.f32 %v12076_v47, %v12066_v63  ;;  %v6047_v38 = vsel %vm6031_vm7, %v5949_v44, %v5477_v1  ;;  %v6048_v46 = vsel %vm6031_vm7, %v5950_v50, %v5479_v0  ;;  %v5853_v24 = vsel %vm5835_vm6, %v5755_v29, %v13522_v18  ;;  %v13526_v44 = vld [vmem:[#allocation75_spill] sm:$0xff]  ;;  %v13531_v18 = vld [vmem:[#allocation184_spill] sm:$0xff] }
 0xa03   : > { %v6037_v22 = vsel %vm6031_vm7, %v5939_v31, %v5457_v7  ;;  %v6459_v2 = vadd.f32 %v12078_v28, %v6443_v8  ;;  %v5746_v32 = vsel %vm5737_vm5, %v13523_v48, %v13414_v6  ;;  %v5951_v63 = vsel %vm5933_vm8, %v5853_v24, %v13524_v30  ;;  %v13533_v48 = vld [vmem:[#allocation217_spill] sm:$0xff] }
 0xa04   : > { %6136 = vrot.lane.b32.xlu0 %v6037_v22, %s7178_s23  ;;  %v6468_v47 = vrot.slane %v6101_v41, 3  ;;  %v6460_v1 = vadd.f32 %v12080_v25, %v6444_v19  ;;  %v6197_v33 = vrot.slane %v6047_v38, 1  ;;  %v6198_v31 = vrot.slane %v6048_v46, 1  ;;  %v13529_v22 = vld [vmem:[#allocation108_spill] sm:$0xff] }
 0xa05   : > { %v12239_v3 = vpop.permute.xlu0 %6559  ;;  %v12250_v29 = vsel %vm6031_vm7, %v5951_v63, %v5481_v11  ;;  %v6181_v28 = vsel %vm6162_vm9, %v6178_v27, %v6180_v42  ;;  %v5844_v17 = vsel %vm5835_vm6, %v5746_v32, %v13525_v39  ;;  %v6467_v6 = vsel %vm6464_vm11, %v6465_v43, %v6466_v49  ;;  %v13528_v43 = vld [vmem:[#allocation105_spill] sm:$0xff]  ;;  %v13534_v32 = vld [vmem:[#allocation218_spill] sm:$0xff]  ;;  %v13535_v63 = vld [vmem:[#allocation276_spill] sm:$0xff] }
 0xa06   : > { %v12247_v0 = vpop.permute.xlu1 %6561  ;;  %v5942_v4 = vsel %vm5933_vm8, %v5844_v17, %v13526_v44  ;;  %v6472_v25 = vadd.f32 %v6467_v6, %v6459_v2  ;;  %v5759_v14 = vsel %vm5737_vm5, %v13527_v5, %v13427_v15  ;;  %v6469_v11 = vsel %vm6464_vm11, %v6466_v49, %v6468_v47  ;;  %v13530_v49 = vld [vmem:[#allocation183_spill] sm:$0xff]  ;;  %v13532_v2 = vld [vmem:[#allocation185_spill] sm:$0xff]  ;;  %v13539_v6 = vld [vmem:[#allocation344_spill] sm:$0xff] }
 0xa07   : > { %v6200_v27 = vrot.slane %v12250_v29, 1  ;;  %v5760_v8 = vsel %vm5737_vm5, %v13528_v43, %v13428_v40  ;;  %v5761_v19 = vsel %vm5737_vm5, %v13529_v22, %v13429_v34  ;;  %v6473_v38 = vadd.f32 %v6469_v11, %v6460_v1  ;;  %v13538_v39 = vld [vmem:[#allocation343_spill] sm:$0xff]  ;;  %v13541_v43 = vld [vmem:[#allocation278_spill] sm:$0xff] }
 0xa08   : > { %6184 = vrot.lane.b32.xlu0 %v6181_v28, %s7178_s23  ;;  %v6199_v15 = vsel %vm6162_vm9, %v6197_v33, %v6198_v31  ;;  %v5820_v46 = vsel %vm5737_vm5, %v13530_v49, %v13376_v61  ;;  %v5821_v24 = vsel %vm5737_vm5, %v13531_v18, %v13377_v12  ;;  %v5822_v40 = vsel %vm5737_vm5, %v13532_v2, %v13382_v52  ;;  %v13536_v61 = vld [vmem:[#allocation277_spill] sm:$0xff]  ;;  %v13537_v28 = vld [vmem:[#allocation102_spill] sm:$0xff]  ;;  %v13540_v11 = vld [vmem:[#allocation219_spill] sm:$0xff] }
 0xa09   : > { %v5463_v50 = vpop.permute.xlu0 %5462  ;;  %v5857_v34 = vsel %vm5835_vm6, %v5759_v14, %v13533_v48  ;;  %v5858_v30 = vsel %vm5835_vm6, %v5760_v8, %v13534_v32  ;;  %v5918_v47 = vsel %vm5835_vm6, %v5820_v46, %v13535_v63  ;;  %v5919_v1 = vsel %vm5835_vm6, %v5821_v24, %v13536_v61  ;;  %v13542_v22 = vld [vmem:[#allocation103_spill] sm:$0xff] }
 0xa0a   : > { %v6040_v7 = vsel %vm6031_vm7, %v5942_v4, %v5463_v50  ;;  %v12265_v41 = vpop.permute.xlu1 %6575  ;;  %v6488_v12 = vadd.f32 %v12082_v9, %v6472_v25  ;;  %v5955_v52 = vsel %vm5933_vm8, %v5857_v34, %v13537_v28  ;;  %v6016_v17 = vsel %vm5933_vm8, %v5918_v47, %v13538_v39  ;;  %v13547_v39 = vld [vmem:[#allocation220_spill] sm:$0xff] }
 0xa0b   : > { %6151 = vrot.lane.b32.xlu1 %v6040_v7, %s7174_s18  ;;  %v6017_v44 = vsel %vm5933_vm8, %v5919_v1, %v13539_v6  ;;  %v6201_v50 = vsel %vm6162_vm9, %v6198_v31, %v6200_v27  ;;  %v6489_v5 = vadd.f32 %v12084_v53, %v6473_v38  ;;  %v6114_v25 = vsel %vm6031_vm7, %v6016_v17, %v12108_v57  ;;  %v13544_v38 = vld [vmem:[#allocation345_spill] sm:$0xff] }
 0xa0c   : > { %6202 = vrot.lane.b32.xlu0 %v6199_v15, %s7174_s18  ;;  %v6504_v9 = vadd.f32 %v12086_v10, %v6488_v12  ;;  %v6115_v14 = vsel %vm6031_vm7, %v6017_v44, %v12110_v60  ;;  %v5859_v7 = vsel %vm5835_vm6, %v5761_v19, %v13540_v11  ;;  %v5920_v8 = vsel %vm5835_vm6, %v5822_v40, %v13541_v43  ;;  %v13543_v10 = vld [vmem:[#allocation106_spill] sm:$0xff]  ;;  %v13545_v12 = vld [vmem:[#allocation109_spill] sm:$0xff] }
 0xa0d   : > { %v12294_v33 = vpop.permute.xlu0 %6577  ;;  %v5956_v31 = vsel %vm5933_vm8, %v5858_v30, %v13542_v22  ;;  %v5957_v57 = vsel %vm5933_vm8, %v5859_v7, %v13543_v10  ;;  %v6018_v60 = vsel %vm5933_vm8, %v5920_v8, %v13544_v38  ;;  %v6505_v15 = vadd.f32 %v12088_v36, %v6489_v5  ;;  %v13548_v6 = vld [vmem:[#allocation221_spill] sm:$0xff] }
 0xa0e   : > { %v5489_v4 = vpop.permute.xlu1 %5488  ;;  %v6520_v19 = vadd.f32 %v12114_v23, %v6504_v9  ;;  %v6542_v46 = vrot.slane %v6114_v25, 4  ;;  %v6543_v18 = vrot.slane %v6115_v14, 4  ;;  %v6116_v24 = vsel %vm6031_vm7, %v6018_v60, %v12112_v26  ;;  %v13550_v25 = vld [vmem:[#allocation110_spill] sm:$0xff]  ;;  %v13551_v43 = vld [vmem:[#allocation113_spill] sm:$0xff] }
 0xa0f   : > { %6204 = vrot.lane.b32.xlu1 %v6201_v50, %s7174_s18  ;;  %v6053_v53 = vsel %vm6031_vm7, %v5955_v52, %v5489_v4  ;;  %v6521_v30 = vadd.f32 %v12121_v58, %v6505_v15  ;;  %v6545_v63 = vrot.slane %v6116_v24, 4  ;;  %v5762_v58 = vsel %vm5737_vm5, %v13545_v12, %v13456_v56  ;;  %v13546_v52 = vld [vmem:[#allocation112_spill] sm:$0xff]  ;;  %v13549_v4 = vld [vmem:[#allocation107_spill] sm:$0xff]  ;;  %v13553_v60 = vld [vmem:[#allocation290_spill] sm:$0xff] }
 0xa10   : > { %6186 = vrot.lane.b32.xlu0 %v6180_v42, %s7178_s23  ;;  %v6536_v42 = vadd.f32 %v12135_v59, %v6520_v19  ;;  %v6232_v48 = vrot.slane %v6053_v53, 2  ;;  %v6544_v26 = vsel %vm6541_vm12, %v6542_v46, %v6543_v18  ;;  %v5860_v17 = vsel %vm5835_vm6, %v5762_v58, %v13547_v39  ;;  %v13552_v53 = vld [vmem:[#allocation222_spill] sm:$0xff] }
 0xa11   : > { %v5491_v49 = vpop.permute.xlu0 %5490  ;;  %v6537_v61 = vadd.f32 %v12143_v62, %v6521_v30  ;;  %v5763_v62 = vsel %vm5737_vm5, %v13546_v52, %v13460_v35  ;;  %v5958_v50 = vsel %vm5933_vm8, %v5860_v17, %v13549_v4  ;;  %v6546_v56 = vsel %vm6541_vm12, %v6543_v18, %v6545_v63  ;;  %v13554_v17 = vld [vmem:[#allocation81_spill] sm:$0xff] }
 0xa12   : > { %v6054_v2 = vsel %vm6031_vm7, %v5956_v31, %v5491_v49  ;;  %v5493_v40 = vpop.permute.xlu1 %5492  ;;  %v6549_v28 = vadd.f32 %v6544_v26, %v6536_v42  ;;  %v5861_v44 = vsel %vm5835_vm6, %v5763_v62, %v13548_v6  ;;  %v5764_v8 = vsel %vm5737_vm5, %v13551_v43, %v13463_v16 }
 0xa13   : > { %v6233_v34 = vrot.slane %v6054_v2, 2  ;;  %v6055_v32 = vsel %vm6031_vm7, %v5957_v57, %v5493_v40  ;;  %v5959_v14 = vsel %vm5933_vm8, %v5861_v44, %v13550_v25  ;;  %v6550_v11 = vadd.f32 %v6546_v56, %v6537_v61  ;;  %v13555_v44 = vld [vmem:[#allocation61_spill] sm:$0xff] }
 0xa14   : > { %v6235_v36 = vrot.slane %v6055_v32, 2  ;;  %v6565_v5 = vadd.f32 %v12239_v3, %v6549_v28  ;;  %v5862_v10 = vsel %vm5835_vm6, %v5764_v8, %v13552_v53  ;;  %v6621_v49 = vstv %s12337_s9  ;;  %s6960_s9 = sshll.u32 %s7252_s28, 9  ;;  %s12497_s28 = scalar_lea.sflag [#allocation4], %s298_s20 }
 0xa15   : > { %v6592_v23 = vpop.permute.xlu0 %6591  ;;  %v6234_v47 = vsel %vm6217_vm10, %v6232_v48, %v6233_v34  ;;  %v6566_v57 = vadd.f32 %v12247_v0, %v6550_v11  ;;  %v5960_v29 = vsel %vm5933_vm8, %v5862_v10, %v13553_v60  ;;  %v5748_v6 = vsel %vm5737_vm5, %v13554_v17, %v13476_v54  ;;  %v13560_v54 = vld [vmem:[#allocation84_spill] sm:$0xff]  ;;  %v13565_v60 = vld [vmem:[#allocation78_spill] sm:$0xff] }
 0xa16   : > { %6237 = vrot.lane.b32.xlu1 %v6234_v47, %s7178_s23  ;;  %v6594_v1 = vpop.permute.xlu1 %6593  ;;  %v6236_v59 = vsel %vm6217_vm10, %v6233_v34, %v6235_v36  ;;  %v6581_v3 = vadd.f32 %v12265_v41, %v6565_v5  ;;  %v5738_v4 = vsel %vm5737_vm5, %v13555_v44, %v13464_v20  ;;  %v5749_v8 = vsel %vm5737_vm5, %v13560_v54, %v13477_v55  ;;  %v13561_v20 = vld [vmem:[#allocation205_spill] sm:$0xff] }
 0xa17   : > { %6239 = vrot.lane.b32.xlu0 %v6236_v59, %s7178_s23  ;;  %v6582_v19 = vadd.f32 %v12294_v33, %v6566_v57  ;;  %v13564_v57 = vld [vmem:[#allocation207_spill] sm:$0xff] }
 0xa19   : > { %v5495_v9 = vpop.permute.xlu0 %5494  ;;  %v6598_v2 = vadd.f32 %v6594_v1, %v6582_v19  ;;  %v13567_v19 = vld [vmem:[#allocation287_spill] sm:$0xff] }
 0xa1a   : > { %v6056_v35 = vsel %vm6031_vm7, %v5958_v50, %v5495_v9  ;;  %6206 = vrot.lane.b32.xlu1 %v6200_v27, %s7174_s18  ;;  %v5497_v7 = vpop.permute.xlu1 %5496  ;;  %v6597_v27 = vadd.f32 %v6592_v23, %v6581_v3  ;;  %v13556_v50 = vld [vmem:[#allocation206_spill] sm:$0xff]  ;;  %v13557_v9 = vld [vmem:[#allocation80_spill] sm:$0xff] }
 0xa1b   : > { %v6252_v22 = vrot.slane %v6056_v35, 2  ;;  %v6057_v31 = vsel %vm6031_vm7, %v5959_v14, %v5497_v7  ;;  %v5846_v5 = vsel %vm5835_vm6, %v5748_v6, %v13556_v50  ;;  %v5747_v25 = vsel %vm5737_vm5, %v13557_v9, %v13472_v51  ;;  %v13558_v14 = vld [vmem:[#allocation196_spill] sm:$0xff]  ;;  %v13559_v35 = vld [vmem:[#allocation79_spill] sm:$0xff]  ;;  %v13574_v6 = vld [vmem:[#allocation98_spill] sm:$0xff] }
 0xa1c   : > { %v6253_v38 = vrot.slane %v6057_v31, 2  ;;  %v5836_v11 = vsel %vm5835_vm6, %v5738_v4, %v13558_v14  ;;  %v5944_v7 = vsel %vm5933_vm8, %v5846_v5, %v13559_v35  ;;  %v5845_v3 = vsel %vm5835_vm6, %v5747_v25, %v13561_v20  ;;  %v13563_v51 = vld [vmem:[#allocation64_spill] sm:$0xff]  ;;  %v13577_v35 = vld [vmem:[#allocation99_spill] sm:$0xff] }
 0xa1d   : > { %v5499_v15 = vpop.permute.xlu0 %5498  ;;  %v5739_v10 = vsel %vm5737_vm5, %v13563_v51, %v13469_v37  ;;  %v13576_v14 = vld [vmem:[#allocation216_spill] sm:$0xff]  ;;  %v13579_v51 = vld [vmem:[#allocation65_spill] sm:$0xff] }
 0xa1e   : > { %v6058_v16 = vsel %vm6031_vm7, %v5960_v29, %v5499_v15  ;;  %v6608_v41 = vpop.permute.xlu1 %6607  ;;  %v6254_v46 = vsel %vm6217_vm10, %v6252_v22, %v6253_v38  ;;  %v13562_v22 = vld [vmem:[#allocation60_spill] sm:$0xff]  ;;  %v5943_v29 = vsel %vm5933_vm8, %v5845_v3, %v13565_v60 }
 0xa1f   : > { %v6255_v18 = vrot.slane %v6058_v16, 2  ;;  %v6613_v24 = vadd.f32 %v6608_v41, %v6597_v27  ;;  %6257 = vrot.lane.b32.xlu0 %v6254_v46, %s7174_s18  ;;  %v5934_v31 = vsel %vm5933_vm8, %v5836_v11, %v13562_v22  ;;  %v13566_v27 = vld [vmem:[#allocation197_spill] sm:$0xff] }
 0xa20   : > { %v5837_v15 = vsel %vm5835_vm6, %v5739_v10, %v13566_v27  ;;  %v13581_v27 = vld [vmem:[#allocation63_spill] sm:$0xff] }
 0xa21   : > { %v6622_v0 = vadd.f32 %v6621_v49, %v6613_v24  ;;  %v6610_v40 = vpop.permute.xlu0 %6609  ;;  %v6256_v42 = vsel %vm6217_vm10, %v6253_v38, %v6255_v18  ;;  %v5847_v38 = vsel %vm5835_vm6, %v5749_v8, %v13564_v57 }
 0xa22   : > { %v6614_v48 = vadd.f32 %v6610_v40, %v6598_v2  ;;  %6259 = vrot.lane.b32.xlu1 %v6256_v42, %s7174_s18  ;;  %v5447_v63 = vpop.permute.xlu1 %5446  ;;  %v5945_v16 = vsel %vm5933_vm8, %v5847_v38, %v13567_v19  ;;  %v13569_v42 = vld [vmem:[#allocation97_spill] sm:$0xff]  ;;  %v13580_v38 = vld [vmem:[#allocation198_spill] sm:$0xff] }
 0xa23   : > { %v6626_v34 = vrot.slane %v6622_v0, 7  ;;  %6241 = vrot.lane.b32.xlu0 %v6235_v36, %s7178_s23  ;;  %v6032_v55 = vsel %vm6031_vm7, %v5934_v31, %v5447_v63 }
 0xa24   : > { %v6623_v33 = vadd.f32 %v6621_v49, %v6614_v48  ;;  %v5756_v48 = vsel %vm5737_vm5, %v13569_v42, %v13495_v13 }
 0xa25   : > { %v5449_v23 = vpop.permute.xlu0 %5448 }
 0xa26   : > { %v6627_v32 = vrot.slane %v6623_v33, 7  ;;  %6629 = vrot.lane.b32.xlu1 %v6626_v34, %s7181_s8  ;;  %v5465_v47 = vpop.permute.xlu1 %5464 }
 0xa27   : > { %v6041_v49 = vsel %vm6031_vm7, %v5943_v29, %v5465_v47  ;;  %v13571_v47 = vld [vmem:[#allocation214_spill] sm:$0xff] }
 0xa28   : > { %v6628_v30 = vsel %vm4382_vm2, %v6626_v34, %v6627_v32  ;;  %v13570_v34 = vld [vmem:[#allocation100_spill] sm:$0xff]  ;;  %vm6751_vm2 = vcmask 785408  }
 0xa29   : > { %6631 = vrot.lane.b32.xlu0 %v6628_v30, %s7181_s8  ;;  %v5467_v61 = vpop.permute.xlu0 %5466  ;;  %v5757_v33 = vsel %vm5737_vm5, %v13570_v34, %v13497_v21  ;;  %v13575_v21 = vld [vmem:[#allocation101_spill] sm:$0xff] }
 0xa2a   : > { %6261 = vrot.lane.b32.xlu1 %v6255_v18, %s7174_s18  ;;  %v5469_v26 = vpop.permute.xlu1 %5468  ;;  %v6042_v53 = vsel %vm6031_vm7, %v5944_v7, %v5467_v61  ;;  %v13568_v18 = vld [vmem:[#allocation62_spill] sm:$0xff]  ;;  %v5854_v61 = vsel %vm5835_vm6, %v5756_v48, %v13571_v47  ;;  %s7185_s18 = smov 63  }
 0xa2b   : > { %v5935_v37 = vsel %vm5933_vm8, %v5837_v15, %v13568_v18  ;;  %v6164_v24 = vrot.slane %v6042_v53, 1  ;;  %v6043_v2 = vsel %vm6031_vm7, %v5945_v16, %v5469_v26  ;;  %v13578_v53 = vld [vmem:[#allocation18_spill] sm:$0xff] }
 0xa2c   : > { %v6033_v0 = vsel %vm6031_vm7, %v5935_v37, %v5449_v23  ;;  %v6166_v17 = vrot.slane %v6043_v2, 1  ;;  %v13573_v23 = vld [vmem:[#allocation95_spill] sm:$0xff]  ;;  %v5740_v10 = vsel %vm5737_vm5, %v13579_v51, %v13578_v53  ;;  %v6616_v37 = vstv %s6945_s13 }
 0xa2d   : > { %6633 = vrot.lane.b32.xlu0 %v6627_v32, %s7181_s8  ;;  %v6163_v32 = vrot.slane %v6041_v49, 1  ;;  %s300_s8 = scalar_lea.vmem [#allocation6], %s6920_s29 }
 0xa2e   : > { %s6828_s13 = sshll.u32 %s300_s8, 4  ;;  %s12493_s13 = int_to_ptr.vmem [resolvable:$true] %s6828_s13 }
 0xa2f   : > { %v6165_v4 = vsel %vm6162_vm9, %v6163_v32, %v6164_v24 }
 0xa55   : > { %v6133_v1 = vpop.permute.xlu0 %6132 }
 0xa56   : > { %v6135_v59 = vpop.permute.xlu1 %6134  ;;  %v6141_v41 = vadd.f32 %v6133_v1, %v6032_v55  ;;  %v13572_v1 = vld [vmem:[#allocation215_spill] sm:$0xff] }
 0xa57   : > { %v6142_v30 = vadd.f32 %v6135_v59, %v6033_v0  ;;  %v5855_v26 = vsel %vm5835_vm6, %v5757_v33, %v13572_v1  ;;  %v5758_v59 = vsel %vm5737_vm5, %v13575_v21, %v13499_v45 }
 0xa58   : > { %v5953_v13 = vsel %vm5933_vm8, %v5855_v26, %v13574_v6  ;;  %v5856_v11 = vsel %vm5835_vm6, %v5758_v59, %v13576_v14 }
 0xa59   : > { %v5954_v7 = vsel %vm5933_vm8, %v5856_v11, %v13577_v35 }
 0xa62   : > { %v6148_v12 = vpop.permute.xlu0 %6147 }
 0xa63   : > { %v6156_v40 = vadd.f32 %v6148_v12, %v6141_v41  ;;  %v5952_v12 = vsel %vm5933_vm8, %v5854_v61, %v13573_v23 }
 0xa65   : > { %v6150_v58 = vpop.permute.xlu1 %6149  ;;  %v6171_v9 = vadd.f32 %v6165_v4, %v6156_v40 }
 0xa66   : > { %v12380_v36 = vpop.permute.xlu0 %5450  ;;  %v6157_v44 = vadd.f32 %v6150_v58, %v6142_v30  ;;  %v6167_v58 = vsel %vm6162_vm9, %v6164_v24, %v6166_v17 }
 0xa68   : > { %v6172_v45 = vadd.f32 %v6167_v58, %v6157_v44 }
 0xa69   : > { %v5483_v28 = vpop.permute.xlu1 %5482 }
 0xa6a   : > { %v5485_v52 = vpop.permute.xlu0 %5484  ;;  %v6050_v50 = vsel %vm6031_vm7, %v5952_v12, %v5483_v28 }
 0xa6b   : > { %v6051_v5 = vsel %vm6031_vm7, %v5953_v13, %v5485_v52  ;;  %v6218_v8 = vrot.slane %v6050_v50, 2 }
 0xa6c   : > { %v6219_v20 = vrot.slane %v6051_v5, 2 }
 0xa6d   : > { %v5487_v62 = vpop.permute.xlu1 %5486 }
 0xa6e   : > { %v6052_v3 = vsel %vm6031_vm7, %v5954_v7, %v5487_v62  ;;  %v6220_v29 = vsel %vm6217_vm10, %v6218_v8, %v6219_v20 }
 0xa6f   : > { %v6221_v57 = vrot.slane %v6052_v3, 2 }
 0xa71   : > { %v6183_v56 = vpop.permute.xlu1 %6182  ;;  %v6222_v49 = vsel %vm6217_vm10, %v6219_v20, %v6221_v57 }
 0xa72   : > { %v6191_v54 = vadd.f32 %v6183_v56, %v6171_v9  ;;  %v5838_v56 = vsel %vm5835_vm6, %v5740_v10, %v13580_v38 }
 0xa73   : > { %v5936_v62 = vsel %vm5933_vm8, %v5838_v56, %v13581_v27 }
 0xa74   : > { %v6034_v19 = vsel %vm6031_vm7, %v5936_v62, %v12380_v36 }
 0xa76   : > { %v12382_v39 = vpop.permute.xlu0 %6136 }
 0xa7a   : > { %v6185_v43 = vpop.permute.xlu0 %6184 }
 0xa7b   : > { %v6192_v31 = vadd.f32 %v6185_v43, %v6172_v45  ;;  %v6143_v43 = vadd.f32 %v12382_v39, %v6034_v19 }
 0xa7d   : > { %v6152_v46 = vpop.permute.xlu1 %6151 }
 0xa7e   : > { %v6203_v63 = vpop.permute.xlu0 %6202  ;;  %v6158_v2 = vadd.f32 %v6152_v46, %v6143_v43 }
 0xa7f   : > { %v6211_v28 = vadd.f32 %v6203_v63, %v6191_v54 }
 0xa80   : > { %v6173_v33 = vadd.f32 %v6166_v17, %v6158_v2 }
 0xa81   : > { %v6205_v25 = vpop.permute.xlu1 %6204  ;;  %v6226_v15 = vadd.f32 %v6220_v29, %v6211_v28 }
 0xa82   : > { %v6187_v22 = vpop.permute.xlu0 %6186  ;;  %v6212_v60 = vadd.f32 %v6205_v25, %v6192_v31 }
 0xa83   : > { %v6193_v61 = vadd.f32 %v6187_v22, %v6173_v33 }
 0xa84   : > { %v6227_v18 = vadd.f32 %v6222_v49, %v6212_v60 }
 0xa88   : > { %v6238_v52 = vpop.permute.xlu1 %6237 }
 0xa89   : > { %v6240_v55 = vpop.permute.xlu0 %6239  ;;  %v6246_v16 = vadd.f32 %v6238_v52, %v6226_v15 }
 0xa8a   : > { %v6247_v40 = vadd.f32 %v6240_v55, %v6227_v18  ;;  %v13582_v18 = vld [vmem:[#allocation13_spill] sm:$0xff] }
 0xa8c   : > { %v6207_v41 = vpop.permute.xlu1 %6206 }
 0xa8d   : > { %v6213_v26 = vadd.f32 %v6207_v41, %v6193_v61 }
 0xa8f   : > { %v6228_v46 = vadd.f32 %v6221_v57, %v6213_v26 }
 0xa91   : > { %v6258_v24 = vpop.permute.xlu0 %6257 }
 0xa92   : > { %v6266_v0 = vadd.f32 %v6258_v24, %v6246_v16  ;;  %v13583_v24 = vld [vmem:[#allocation15_spill] sm:$0xff] }
 0xa94   : > { %v6617_v42 = vadd.f32 %v6616_v37, %v6266_v0  ;;  %v6260_v48 = vpop.permute.xlu1 %6259 }
 0xa95   : > { %v6267_v34 = vadd.f32 %v6260_v48, %v6247_v40  ;;  %v6242_v63 = vpop.permute.xlu0 %6241 }
 0xa96   : > { %v6947_v32 = vmul.f32 -1.442695, %v6617_v42  ;;  %v6248_v6 = vadd.f32 %v6242_v63, %v6228_v46 }
 0xa97   : > { %v6618_v30 = vadd.f32 %v6616_v37, %v6267_v34 }
 0xa98   : > { %7051 = vpow2.f32 %v6947_v32  ;;  %v6630_v36 = vpop.permute.xlu1 %6629 }
 0xa99   : > { %v6948_v39 = vmul.f32 -1.442695, %v6618_v30  ;;  %v6950_v47 = vmul.f32 -1.442695, %v6630_v36 }
 0xa9b   : > { %7053 = vpow2.f32 %v6948_v39  ;;  %v6632_v1 = vpop.permute.xlu0 %6631 }
 0xa9c   : > { %7055 = vpow2.f32 %v6950_v47  ;;  %v6951_v23 = vmul.f32 -1.442695, %v6632_v1  ;;  %v6262_v12 = vpop.permute.xlu1 %6261 }
 0xa9d   : > { %v6268_v13 = vadd.f32 %v6262_v12, %v6248_v6 }
 0xa9e   : > { %7057 = vpow2.f32 %v6951_v23 }
 0xa9f   : > { %v6619_v21 = vadd.f32 %v6616_v37, %v6268_v13  ;;  %v6634_v59 = vpop.permute.xlu0 %6633 }
 0xaa0   : > { %v6952_v14 = vmul.f32 -1.442695, %v6634_v59 }
 0xaa1   : > { %v6949_v35 = vmul.f32 -1.442695, %v6619_v21 }
 0xaa5   : > { %v7052_v44 = vpop.eup %7051 }
 0xaa6   : > { %v6656_v17 = vadd.f32 1.0, %v7052_v44 }
 0xaa8   : > { %v7054_v4 = vpop.eup %7053  ;;  %7059 = vrcp.f32 %v6656_v17 }
 0xaa9   : > { %v7056_v50 = vpop.eup %7055  ;;  %v6657_v5 = vadd.f32 1.0, %v7054_v4 }
 0xaaa   : > { %v6659_v9 = vadd.f32 1.0, %v7056_v50 }
 0xaab   : > { %v7058_v25 = vpop.eup %7057 }
 0xaac   : > { %7061 = vrcp.f32 %v6659_v9  ;;  %v6660_v11 = vadd.f32 1.0, %v7058_v25 }
 0xaad   : > { %7063 = vrcp.f32 %v6657_v5 }
 0xaae   : > { %7065 = vrcp.f32 %v6660_v11 }
 0xaaf   : > { %7067 = vpow2.f32 %v6952_v14 }
 0xab0   : > { %7069 = vpow2.f32 %v6949_v35 }
 0xab5   : > { %v7060_v7 = vpop.eup %7059 }
 0xab9   : > { %v7062_v54 = vpop.eup %7061 }
 0xaba   : > { %v7064_v58 = vpop.eup %7063  ;;  %v6674_v8 = vadd.f32 %v7062_v54, %v7060_v7 }
 0xabb   : > { %v7066_v20 = vpop.eup %7065 }
 0xabc   : > { %v7068_v3 = vpop.eup %7067  ;;  %v6675_v45 = vadd.f32 %v7066_v20, %v7064_v58  ;;  %6678 = vrot.lane.b32.xlu1 %v6674_v8, %s7178_s23  ;;  %v6681_v22 = vrot.slane %v6674_v8, 1  ;;  %v6685_v51 = vrot.slane %v6674_v8, 2  ;;  %v6689_v57 = vrot.slane %v6674_v8, 3 }
 0xabd   : > { %v7070_v28 = vpop.eup %7069  ;;  %v6661_v31 = vadd.f32 1.0, %v7068_v3  ;;  %v6693_v56 = vrot.slane %v6674_v8, 4  ;;  %v6697_v29 = vrot.slane %v6674_v8, 5  ;;  %v6701_v15 = vrot.slane %v6674_v8, 6  ;;  %v474_v3 = vpop.f32.mrf.mxu1 }
 0xabe   : > { %6682 = vrot.lane.b32.xlu0 %v6681_v22, %s7182_s14  ;;  %v6713_v52 = vrot.slane %v6675_v45, 1  ;;  %v6658_v53 = vadd.f32 1.0, %v7070_v28  ;;  %v6717_v10 = vrot.slane %v6675_v45, 2  ;;  %v6721_v38 = vrot.slane %v6675_v45, 3 }
 0xabf   : > { %7071 = vrcp.f32 %v6661_v31  ;;  %v6725_v60 = vrot.slane %v6675_v45, 4  ;;  %v6729_v27 = vrot.slane %v6675_v45, 5  ;;  %v6733_v19 = vrot.slane %v6675_v45, 6 }
 0xac0   : > { %6710 = vrot.lane.b32.xlu1 %v6675_v45, %s7178_s23  ;;  %7073 = vrcp.f32 %v6658_v53  ;;  %v6706_v16 = vrot.slane %v6675_v45, 7  ;;  %s625_s23 = sld [smem:[#allocation3]] }
 0xac2   : > { %6714 = vrot.lane.b32.xlu0 %v6713_v52, %s7182_s14 }
 0xac4   : > { %6686 = vrot.lane.b32.xlu1 %v6685_v51, %s7183_s15  ;;  %v476_v51 = vpop.f32.mrf.mxu1 }
 0xac6   : > { %6718 = vrot.lane.b32.xlu0 %v6717_v10, %s7183_s15  ;;  %v626_v41 = vstv %s625_s23 }
 0xac7   : > { %v627_v37 = vadd.f32 %v626_v41, %v13582_v18  ;;  %v628_v2 = vadd.f32 %v626_v41, %v13583_v24  ;;  %v13588_v18 = vld [vmem:[#allocation14_spill] sm:$0xff] }
 0xac8   : > { %6690 = vrot.lane.b32.xlu1 %v6689_v57, %s7184_s16 }
 0xac9   : > { %v6943_v0 = vmul.f32 -1.442695, %v627_v37  ;;  %v6944_v40 = vmul.f32 -1.442695, %v628_v2 }
 0xaca   : > { %6722 = vrot.lane.b32.xlu0 %v6721_v38, %s7184_s16  ;;  %s12491_s16 = scalar_lea.hbm %s12545_s7, %s6960_s9 }
 0xacb   : > { %7075 = vpow2.f32 %v6943_v0  ;;  %v13589_v0 = vld [vmem:[#allocation36_spill] sm:$0xff] }
 0xacc   : > { %6694 = vrot.lane.b32.xlu1 %v6693_v56, %s7185_s18  ;;  %v7072_v55 = vpop.eup %7071  ;;  %7077 = vpow2.f32 %v6944_v40  ;;  %v478_v56 = vpop.f32.mrf.mxu1  ;;  %v531_v40 = vadd.f32 %v13589_v0, %v474_v3 }
 0xacd   : > { %v7074_v62 = vpop.eup %7073 }
 0xace   : > { %6726 = vrot.lane.b32.xlu0 %v6725_v60, %s7185_s18  ;;  %v6676_v43 = vadd.f32 %v7074_v62, %v7072_v55  ;;  %v13584_v62 = vld [vmem:[#allocation9_spill] sm:$0xff]  ;;  %s7098_s18 = scalar_lea.vmem %s12493_s13, 512 }
 0xacf   : > { %p7099_p9 = scmp.ne.s32.totalorder %s12493_s13, %s7098_s18 }
 0xad0   : > { %6698 = vrot.lane.b32.xlu1 %v6697_v29, %s7186_s19  ;;  %v6738_v49 = vrot.slane %v6676_v43, 7  ;;  %v13586_v43 = vld [vmem:[#allocation11_spill] sm:$0xff] }
 0xad1   : > { %p7100_p10 = pnand %p7099_p9, %p7269_p5 }
 0xad2   : > { %6730 = vrot.lane.b32.xlu0 %v6729_v27, %s7186_s19  ;;  %s7189_s19 = smov [#allocation6]  }
 0xad3   : > { %p7101_p12 = pneg %p7100_p10 }
 0xad4   : > { %6702 = vrot.lane.b32.xlu1 %v6701_v15, %s7187_s21  ;;  %v13585_v15 = vld [vmem:[#allocation34_spill] sm:$0xff] }
 0xad6   : > { %6734 = vrot.lane.b32.xlu0 %v6733_v19, %s7187_s21  ;;  %v515_v19 = vadd.f32 %v13585_v15, %v13584_v62  ;;  %s7102_s21 = sshll.u32 %s7189_s19, 4  ;;  %s7103_s21 = int_to_ptr.vmem [resolvable:$false] %s7102_s21 }
 0xad7   : > { %p7105_p13 = scmp.lt.s32.totalorder %s12493_s13, %s7103_s21 }
 0xad8   : > { %6707 = vrot.lane.b32.xlu1 %v6706_v16, %s7188_s22  ;;  %v7076_v63 = vpop.eup %7075  ;;  %v13587_v16 = vld [vmem:[#allocation35_spill] sm:$0xff] }
 0xad9   : > { %v7078_v39 = vpop.eup %7077  ;;  %v635_v47 = vadd.f32 1.0, %v7076_v63 }
 0xada   : > { %6739 = vrot.lane.b32.xlu0 %v6738_v49, %s7188_s22  ;;  %v636_v1 = vadd.f32 1.0, %v7078_v39  ;;  %v517_v49 = vadd.f32 %v13587_v16, %v13586_v43  ;;  %s7104_s22 = scalar_lea.vmem %s7103_s21, 1024 }
 0xadb   : > { %7079 = vrcp.f32 %v635_v47  ;;  %v13592_v47 = vld [vmem:[#allocation12_spill] sm:$0xff]  ;;  %p7106_p0 = scmp.lt.s32.totalorder %s7104_s22, %s7098_s18 }
 0xadc   : > { %7081 = vrcp.f32 %v636_v1  ;;  %v532_v1 = vadd.f32 %v13589_v0, %v476_v51 }
 0xadd   : > { %p7107_p1 = por %p7106_p0, %p7105_p13 }
 0xadf   : > { %p7108_p2 = pnand %p7107_p1, %p7101_p12 }
 0xae8   : > { %v7080_v20 = vpop.eup %7079 }
 0xae9   : > { %v7082_v52 = vpop.eup %7081 }
 0xb2e   : > { %v6679_v42 = vpop.permute.xlu1 %6678 }
 0xb30   : > { %v6683_v48 = vpop.permute.xlu0 %6682 }
 0xb31   : > { %v6742_v6 = vsel %vm340_vm0, %v6679_v42, %v6683_v48  ;;  %v13590_v42 = vld [vmem:[#allocation37_spill] sm:$0xff] }
 0xb32   : > { %v6711_v34 = vpop.permute.xlu1 %6710  ;;  %v533_v48 = vadd.f32 %v13590_v42, %v478_v56 }
 0xb34   : > { %v6715_v33 = vpop.permute.xlu0 %6714 }
 0xb35   : > { %v6755_v17 = vsel %vm340_vm0, %v6711_v34, %v6715_v33  ;;  %v480_v34 = vpop.f32.mrf.mxu1 }
 0xb36   : > { %v6687_v32 = vpop.permute.xlu1 %6686 }
 0xb37   : > { %v6744_v13 = vsel %vm6743_vm13, %v6742_v6, %v6687_v32 }
 0xb38   : > { %v6719_v30 = vpop.permute.xlu0 %6718 }
 0xb39   : > { %v6756_v21 = vsel %vm6743_vm13, %v6755_v17, %v6719_v30 }
 0xb3a   : > { %v6691_v36 = vpop.permute.xlu1 %6690 }
 0xb3b   : > { %v6746_v4 = vsel %vm6745_vm14, %v6744_v13, %v6691_v36  ;;  %v13591_v36 = vld [vmem:[#allocation10_spill] sm:$0xff] }
 0xb3c   : > { %v6723_v61 = vpop.permute.xlu0 %6722  ;;  %v516_v39 = vadd.f32 %v13585_v15, %v13591_v36 }
 0xb3d   : > { %v6757_v5 = vsel %vm6745_vm14, %v6756_v21, %v6723_v61  ;;  %v518_v61 = vadd.f32 %v13587_v16, %v13592_v47 }
 0xb3e   : > { %v6695_v26 = vpop.permute.xlu1 %6694 }
 0xb3f   : > { %v6748_v59 = vsel %vm6747_vm15, %v6746_v4, %v6695_v26 }
 0xb40   : > { %v6727_v23 = vpop.permute.xlu0 %6726 }
 0xb41   : > { %v6758_v25 = vsel %vm6747_vm15, %v6757_v5, %v6727_v23  ;;  %v534_v23 = vadd.f32 %v13590_v42, %v480_v34 }
 0xb42   : > { %v6699_v46 = vpop.permute.xlu1 %6698 }
 0xb43   : > { %v6750_v9 = vsel %vm6749_vm1, %v6748_v59, %v6699_v46 }
 0xb44   : > { %v6731_v12 = vpop.permute.xlu0 %6730 }
 0xb45   : > { %v6759_v35 = vsel %vm6749_vm1, %v6758_v25, %v6731_v12 }
 0xb46   : > { %v6703_v44 = vpop.permute.xlu1 %6702 }
 0xb47   : > { %v6752_v14 = vsel %vm6751_vm2, %v6750_v9, %v6703_v44 }
 0xb48   : > { %v6735_v50 = vpop.permute.xlu0 %6734 }
 0xb49   : > { %v6760_v54 = vsel %vm6751_vm2, %v6759_v35, %v6735_v50 }
 0xb4a   : > { %v6708_v11 = vpop.permute.xlu1 %6707 }
 0xb4b   : > { %v6754_v7 = vsel %vm6753_vm3, %v6752_v14, %v6708_v11 }
 0xb4c   : > { %v6764_v58 = vrot.slane %v6754_v7, 1  ;;  %v6740_v8 = vpop.permute.xlu0 %6739 }
 0xb4d   : > { %v6761_v45 = vsel %vm6753_vm3, %v6760_v54, %v6740_v8 }
 0xb4e   : > { %v6768_v22 = vadd.f32 %v7080_v20, %v6764_v58  ;;  %v6765_v28 = vrot.slane %v6761_v45, 1 }
 0xb50   : > { %v6770_v31 = vmul.f32 0.33333334, %v6768_v22  ;;  %v6769_v53 = vadd.f32 %v7082_v52, %v6765_v28 }
 0xb52   : > { %v6772_v10 = vmax.f32 %v6770_v31, 0.0  ;;  %v6776_v57 = vsub.f32 1.0, %v6770_v31  ;;  %v6771_v38 = vmul.f32 0.33333334, %v6769_v53 }
 0xb54   : > { %v6774_v60 = vmin.f32 %v6772_v10, 1.0  ;;  %v6778_v29 = vmax.f32 %v6776_v57, 0.0  ;;  %v6773_v55 = vmax.f32 %v6771_v38, 0.0  ;;  %v6777_v27 = vsub.f32 1.0, %v6771_v38 }
 0xb56   : > { %v6780_v41 = vmin.f32 %v6778_v29, 1.0  ;;  %v6785_v37 = vrot.slane %v6774_v60, %v13588_v18  ;;  %v6775_v24 = vmin.f32 %v6773_v55, 1.0  ;;  %v6779_v2 = vmax.f32 %v6777_v27, 0.0 }
 0xb58   : > { %v6790_v33 = vmul.f32 %v6785_v37, %v515_v19  ;;  %v6792_v32 = vmul.f32 %v6785_v37, %v517_v49  ;;  %v6797_v30 = vrot.slane %v6780_v41, %v13588_v18  ;;  %v6781_v63 = vmin.f32 %v6779_v2, 1.0 }
 0xb59   : > { %v6789_v26 = vrot.slane %v6775_v24, %v13588_v18 }
 0xb5a   : > { %v6802_v46 = vmul.f32 %v6797_v30, %v531_v40  ;;  %v6804_v12 = vmul.f32 %v6797_v30, %v533_v48  ;;  %v6801_v6 = vrot.slane %v6781_v63, %v13588_v18 }
 0xb5b   : > { %v6791_v13 = vmul.f32 %v6789_v26, %v516_v39  ;;  %v6793_v44 = vmul.f32 %v6789_v26, %v518_v61 }
 0xb5c   : > { %v6806_v17 = vadd.f32 %v6802_v46, %v6790_v33  ;;  %v6808_v4 = vadd.f32 %v6804_v12, %v6792_v32  ;;  %v6803_v21 = vmul.f32 %v6801_v6, %v532_v1  ;;  %v6805_v59 = vmul.f32 %v6801_v6, %v534_v23 }
 0xb5e   : > { %6810 = vst [vmem:[%s300_s8] sm:$0xff] %v6806_v17  ;;  %6812 = vst [vmem:[%s300_s8 + $0x10] sm:$0xff] %v6808_v4  ;;  %v6807_v50 = vadd.f32 %v6803_v21, %v6791_v13  ;;  %v6809_v5 = vadd.f32 %v6805_v59, %v6793_v44 }
 0xb60   : > { %6811 = vst [vmem:[%s300_s8 + $0x8] sm:$0xff] %v6807_v50  ;;  %6813 = vst [vmem:[%s300_s8 + $0x18] sm:$0xff] %v6809_v5 }
 0xb61   : > { %7111 = shalt.err (!%p7108_p2)
}
 0xb62   : > { %s7112_s23 = scalar_lea.hbm %s12491_s16, 512  ;;  %s7116_s9 = scalar_lea.hbm %s12545_s7, 1024 }
 0xb63   : > { %p7113_p3 = scmp.ne.s32.totalorder %s12491_s16, %s7112_s23  ;;  %p7117_p8 = scmp.lt.s32.totalorder %s12491_s16, %s12545_s7 }
 0xb64   : > { %p7118_p11 = scmp.lt.s32.totalorder %s7116_s9, %s7112_s23 }
 0xb65   : > { %p7114_p4 = pnand %p7113_p3, %p7269_p5 }
 0xb66   : > { %p7119_p9 = por %p7118_p11, %p7117_p8 }
 0xb67   : > { %p7115_p7 = pneg %p7114_p4 }
 0xb69   : > { %p7120_p10 = pnand %p7119_p9, %p7115_p7 }
 0xb6b   : > { %7123 = shalt.err (!%p7120_p10)
}
 0xb6c   : > { %s7190_s15 = smov 256  }
 0xb6d   : > { %6965 = dma.vmem_to_hbm [thread:$0]  (%p7269_p5), %s12493_s13, 512, %s12491_s16, %s12497_s28, %s7190_s15, %s7190_s15, %s7173_s17  }
 0xb6e PF: > { %p6977_p12 = scmp.ge.s32.totalorder %s7162_s27, 2  ;;  %s6843_s18 = sand.u32 1, %s7150_s24  }
 0xb6f   : > { %s6844_s19 = scalar_lea.sflag [#allocation4], %s6843_s18 }
 0xb70   : > { %p6972_p13 = pnand %p6977_p12, %p7273_p6 }
 0xb72   : > { %p6973_p0 = pneg %p6972_p13 }
 0xb74   : > { %7145 = dma.done.wait (%p6973_p0), %s6844_s19, 512  }
 0xb75   : > { %7147 = vsyncadd (%p6973_p0), %s6844_s19, 4294966784  ;;  %p18_p1 = scmp.ge.s32.totalorder %s7256_s30, 4   ;;  %s13593_s24 = smov %s7154_s25 }
 0xb76   : > { %s13594_s25 = smov %s7158_s26  ;;  %s13595_s26 = smov %s7267_s10 }
 0xb77   : > { %s13596_s27 = smov %s7256_s30  ;;  %20 = sbr.rel (!%p18_p1) target bundleno = 4 (0x4), region = 91 }
 0xb7c   :  { %6849 = vsyncpa [#allocation4], 1 }
 0xb7d   :  { %6851 = vsyncpa [#allocation4 + $0x1], 1 }
 0xb7e   :  { %6852 = vsyncpa [#allocation5], 1 }
 0xb7f   :  { %6854 = vsyncpa [#allocation5 + $0x1], 1 }

</bundles_post_ra>
